<compile_context>
chip_gen: v7x
topology: tpu7x:2x2x1
jax: 0.10.0
libtpu: 0.0.40
codegen_flags: <defaults>
</compile_context>

<pallas_src>
import jax
import jax.numpy as jnp
from jax.experimental import pallas as pl
from jax.experimental.pallas import tpu as pltpu


# --------------------------------------------------------------------------
# Pallas kernels: fused GEMM + bias (BN already folded into weights),
# optionally + residual add + ReLU.  Single full-array block per call.
# --------------------------------------------------------------------------
def _gemm_bias_kernel(p_ref, w_ref, b_ref, o_ref):
    acc = jnp.dot(p_ref[...], w_ref[...], preferred_element_type=jnp.float32)
    o_ref[...] = acc + b_ref[...]


def _gemm_bias_add_relu_kernel(p_ref, w_ref, b_ref, r_ref, o_ref):
    acc = jnp.dot(p_ref[...], w_ref[...], preferred_element_type=jnp.float32)
    o_ref[...] = jnp.maximum(acc + b_ref[...] + r_ref[...], 0.0)


def fused_gemm(patches, w, bias, res=None):
    """One pallas_call: out = patches @ w + bias [+ res, then ReLU].

    patches: (M, K), w: (K, N), bias: (N,), res: (M, N) or None.
    MXU operands are cast to bf16; accumulation/epilogue in f32.
    """
    M, K = patches.shape
    N = w.shape[1]
    p = patches.astype(jnp.bfloat16)
    wq = w.astype(jnp.bfloat16)
    b = bias.reshape(1, N).astype(jnp.float32)

    in_specs = [
        pl.BlockSpec((M, K), lambda i: (0, 0)),   # full patch matrix
        pl.BlockSpec((K, N), lambda i: (0, 0)),   # full (scale-folded) weight
        pl.BlockSpec((1, N), lambda i: (0, 0)),   # folded BN bias
    ]
    args = [p, wq, b]
    kernel = _gemm_bias_kernel
    if res is not None:
        in_specs.append(pl.BlockSpec((M, N), lambda i: (0, 0)))
        args.append(res.astype(jnp.float32))
        kernel = _gemm_bias_add_relu_kernel

    return pl.pallas_call(
        kernel,
        out_shape=jax.ShapeDtypeStruct((M, N), jnp.float32),
        grid=(1,),
        in_specs=in_specs,
        out_specs=pl.BlockSpec((M, N), lambda i: (0, 0)),
        compiler_params=pltpu.CompilerParams(
            dimension_semantics=("arbitrary",)),
    )(*args)


def fused_group_gemm(patch_list, w_list, b_list):
    """Batch several independent conv-GEMMs (same Cout) into ONE pallas_call.

    Patch matrices are stacked along M (K zero-padded to the max K); each
    conv's weight occupies its own Cout-wide output column block, so every
    (row-range, column-block) pair of the output holds one conv's result.
    """
    co = w_list[0].shape[1]
    kmax = max(pm.shape[1] for pm in patch_list)
    rows = [pm.shape[0] for pm in patch_list]
    big_p = jnp.concatenate(
        [jnp.pad(pm, ((0, 0), (0, kmax - pm.shape[1]))) for pm in patch_list],
        axis=0)
    big_w = jnp.concatenate(
        [jnp.pad(wm, ((0, kmax - wm.shape[0]), (0, 0))) for wm in w_list],
        axis=1)
    big_b = jnp.concatenate(b_list, axis=0)
    out = fused_gemm(big_p, big_w, big_b)
    results, r0 = [], 0
    for i, m in enumerate(rows):
        results.append(out[r0:r0 + m, i * co:(i + 1) * co])
        r0 += m
    return results


# --------------------------------------------------------------------------
# Glue: im2col (pad + shifted slices), stride = 1 for every conv in GCB.
# Pure XLA; patches are cast to bf16 inside fused_gemm.
# --------------------------------------------------------------------------
def im2col(x, kh, kw, dil, pad_h, pad_w):
    n, h, w, c = x.shape
    xp = jnp.pad(x, ((0, 0), (pad_h, pad_h), (pad_w, pad_w), (0, 0)))
    ho = h + 2 * pad_h - dil * (kh - 1)
    wo = w + 2 * pad_w - dil * (kw - 1)
    cols = [xp[:, i * dil:i * dil + ho, j * dil:j * dil + wo, :]
            for i in range(kh) for j in range(kw)]
    patches = jnp.concatenate(cols, axis=-1) if len(cols) > 1 else cols[0]
    return patches.reshape(n * ho * wo, kh * kw * c), (n, ho, wo)


# --------------------------------------------------------------------------
# Parameters (deterministic, synthetic).  BN folded in inference mode:
# the per-channel scale is folded INTO the weight matrix, only bias remains.
# --------------------------------------------------------------------------
def init_pconv_params(key, cin, cout, kh, kw):
    kwt, kg, kb, km, kv = jax.random.split(key, 5)
    fan_in = cin * kh * kw
    w = jax.random.normal(kwt, (kh, kw, cin, cout), jnp.float32) / jnp.sqrt(
        jnp.float32(fan_in))
    gamma = 1.0 + 0.1 * jax.random.normal(kg, (cout,), jnp.float32)
    beta = 0.1 * jax.random.normal(kb, (cout,), jnp.float32)
    rmean = 0.1 * jax.random.normal(km, (cout,), jnp.float32)
    rvar = 1.0 + 0.5 * jax.random.uniform(kv, (cout,), jnp.float32)
    eps = 1e-5
    scale = gamma / jnp.sqrt(rvar + eps)
    bias = beta - rmean * scale
    w2d = w.reshape(kh * kw * cin, cout) * scale[None, :]   # BN scale folded
    return {"w": w2d, "b": bias}


def init_gcb_params(key, cin, cout):
    k = jax.random.split(key, 16)
    p = {}
    p["b0"] = [init_pconv_params(k[0], cin, cout, 1, 1)]
    p["b1"] = [init_pconv_params(k[1], cin, cout, 1, 1),
               init_pconv_params(k[2], cout, cout, 1, 3),
               init_pconv_params(k[3], cout, cout, 3, 1),
               init_pconv_params(k[4], cout, cout, 3, 3)]
    p["b2"] = [init_pconv_params(k[5], cin, cout, 1, 1),
               init_pconv_params(k[6], cout, cout, 1, 3),
               init_pconv_params(k[7], cout, cout, 3, 1),
               init_pconv_params(k[8], cout, cout, 3, 3)]
    p["b3"] = [init_pconv_params(k[9], cin, cout, 1, 1)]
    p["b4"] = [init_pconv_params(k[10], cin, cout, 1, 1),
               init_pconv_params(k[11], cout, cout, 1, 5),
               init_pconv_params(k[12], cout, cout, 5, 1),
               init_pconv_params(k[13], cout, cout, 3, 3)]
    p["conv_cat"] = init_pconv_params(k[14], 5 * cout, cout, 3, 3)
    p["conv_res"] = init_pconv_params(k[15], cin, cout, 1, 1)
    return p


# --------------------------------------------------------------------------
# Forward: 5 Pallas kernel invocations for the whole GCB.
# --------------------------------------------------------------------------
def gcb_forward(x, p):
    # x: (N, H, W, Cin) -- NHWC
    n, h, w, cin = x.shape
    co = p["b0"][0]["w"].shape[1]

    # -- Stage A: all six 1x1 convs (five branch entries + conv_res) as ONE GEMM
    entry = [p["b0"][0], p["b1"][0], p["b2"][0], p["b3"][0], p["b4"][0],
             p["conv_res"]]
    wA = jnp.concatenate([q["w"] for q in entry], axis=1)        # (Cin, 6*Co)
    bA = jnp.concatenate([q["b"] for q in entry], axis=0)        # (6*Co,)
    a = fused_gemm(x.reshape(n * h * w, cin), wA, bA)            # (N*H*W, 6*Co)
    x0 = a[:, 0 * co:1 * co].reshape(n, h, w, co)
    t1 = a[:, 1 * co:2 * co].reshape(n, h, w, co)
    t2 = a[:, 2 * co:3 * co].reshape(n, h, w, co)
    x3 = a[:, 3 * co:4 * co].reshape(n, h, w, co)
    t4 = a[:, 4 * co:5 * co].reshape(n, h, w, co)
    res2d = a[:, 5 * co:6 * co]                                  # conv_res (M, Co)

    # -- Stage B: (1,3)p(0,1) / (1,3)p(0,2) / (1,5)p(0,4) batched into ONE GEMM
    p1, s1 = im2col(t1, 1, 3, 1, 0, 1)
    p2, s2 = im2col(t2, 1, 3, 1, 0, 2)   # width grows by +2 (as in reference)
    p4, s4 = im2col(t4, 1, 5, 1, 0, 4)   # width grows by +4 (as in reference)
    o1, o2, o4 = fused_group_gemm(
        [p1, p2, p4],
        [p["b1"][1]["w"], p["b2"][1]["w"], p["b4"][1]["w"]],
        [p["b1"][1]["b"], p["b2"][1]["b"], p["b4"][1]["b"]])
    t1, t2, t4 = o1.reshape(*s1, co), o2.reshape(*s2, co), o4.reshape(*s4, co)

    # -- Stage C: (3,1)p(1,0) / (3,1)p(2,0) / (5,1)p(4,0) batched into ONE GEMM
    p1, s1 = im2col(t1, 3, 1, 1, 1, 0)
    p2, s2 = im2col(t2, 3, 1, 1, 2, 0)   # height grows by +2 (as in reference)
    p4, s4 = im2col(t4, 5, 1, 1, 4, 0)   # height grows by +4 (as in reference)
    o1, o2, o4 = fused_group_gemm(
        [p1, p2, p4],
        [p["b1"][2]["w"], p["b2"][2]["w"], p["b4"][2]["w"]],
        [p["b1"][2]["b"], p["b2"][2]["b"], p["b4"][2]["b"]])
    t1, t2, t4 = o1.reshape(*s1, co), o2.reshape(*s2, co), o4.reshape(*s4, co)

    # -- Stage D: dilated 3x3 convs (dil 3/3/5, pad 3/3/5) batched into ONE GEMM
    p1, s1 = im2col(t1, 3, 3, 3, 3, 3)
    p2, s2 = im2col(t2, 3, 3, 3, 3, 3)
    p4, s4 = im2col(t4, 3, 3, 5, 5, 5)
    o1, o2, o4 = fused_group_gemm(
        [p1, p2, p4],
        [p["b1"][3]["w"], p["b2"][3]["w"], p["b4"][3]["w"]],
        [p["b1"][3]["b"], p["b2"][3]["b"], p["b4"][3]["b"]])
    x1 = o1.reshape(*s1, co)
    x2 = o2.reshape(*s2, co)
    x4 = o4.reshape(*s4, co)

    # TODO(synk): the reference module's torch.cat would raise a size-mismatch
    # error here (branch2/branch4 paddings enlarge H,W by +2/+4); we center-crop
    # those branches back to (H, W) so the concat is well-defined.
    x2 = x2[:, 1:-1, 1:-1, :]
    x4 = x4[:, 2:-2, 2:-2, :]

    # -- Stage E: conv_cat (3x3, pad 1) fused with conv_res residual add + ReLU
    xcat = jnp.concatenate([x0, x1, x2, x3, x4], axis=-1)        # (N,H,W,5*Co)
    pcat, scat = im2col(xcat, 3, 3, 1, 1, 1)                     # (N*H*W, 45*Co)
    out = fused_gemm(pcat, p["conv_cat"]["w"], p["conv_cat"]["b"], res=res2d)
    return out.reshape(*scat, co)


if __name__ == "__main__":
    key = jax.random.PRNGKey(0)
    kx, kp = jax.random.split(key)

    N, Cin, H, W = 2, 4, 16, 16
    Cout = 8

    x_nchw = jax.random.normal(kx, (N, Cin, H, W), jnp.float32)  # PyTorch NCHW
    x = jnp.transpose(x_nchw, (0, 2, 3, 1))                      # -> NHWC

    params = init_gcb_params(kp, Cin, Cout)
    fwd = jax.jit(gcb_forward)
    y = fwd(x, params)
    jax.block_until_ready(y)

    assert y.shape == (N, H, W, Cout), y.shape
    assert bool(jnp.all(y >= 0.0))   # final ReLU
    print("KERNEL_OK")
</pallas_src>

<mosaic_0001>
module attributes {stable_mosaic.version = 11 : i64} {
  func.func @_gemm_bias_kernel(%arg0: i32, %arg1: memref<512x4xbf16, #tpu.memory_space<vmem>>, %arg2: memref<4x48xbf16, #tpu.memory_space<vmem>>, %arg3: memref<1x48xf32, #tpu.memory_space<vmem>>, %arg4: memref<512x48xf32, #tpu.memory_space<vmem>>) attributes {dimension_semantics = [#tpu.dimension_semantics<arbitrary>], iteration_bounds = array<i64: 1>, scalar_prefetch = 0 : i64, scratch_operands = 0 : i64, tpu.core_type = #tpu.core_type<tc>, window_params = [{pipeline_mode = #tpu.pipeline_mode<synchronous>, transform_indices = @transform_0, window_bounds = array<i64: 512, 4>}, {pipeline_mode = #tpu.pipeline_mode<synchronous>, transform_indices = @transform_1, window_bounds = array<i64: 4, 48>}, {pipeline_mode = #tpu.pipeline_mode<synchronous>, transform_indices = @transform_2, window_bounds = array<i64: 1, 48>}, {pipeline_mode = #tpu.pipeline_mode<synchronous>, transform_indices = @transform_3, window_bounds = array<i64: 512, 48>}]} {
    %c0 = arith.constant 0 : index
    %c0_0 = arith.constant 0 : index
    %0 = vector.load %arg1[%c0, %c0_0] : memref<512x4xbf16, #tpu.memory_space<vmem>>, vector<512x4xbf16>
    %c0_1 = arith.constant 0 : index
    %c0_2 = arith.constant 0 : index
    %1 = vector.load %arg2[%c0_1, %c0_2] : memref<4x48xbf16, #tpu.memory_space<vmem>>, vector<4x48xbf16>
    %cst = arith.constant dense<0.000000e+00> : vector<512x48xf32>
    %2 = tpu.matmul %0, %1, %cst {dimension_numbers = #tpu.dot_dimension_numbers<[1], [0], [0], [1], [0, 0, 1, 1], [], []>} : vector<512x4xbf16>, vector<4x48xbf16>, vector<512x48xf32> -> vector<512x48xf32>
    %c0_3 = arith.constant 0 : index
    %c0_4 = arith.constant 0 : index
    %3 = vector.load %arg3[%c0_3, %c0_4] : memref<1x48xf32, #tpu.memory_space<vmem>>, vector<1x48xf32>
    %4 = vector.broadcast %3 : vector<1x48xf32> to vector<512x48xf32>
    %5 = arith.addf %2, %4 : vector<512x48xf32>
    %c0_5 = arith.constant 0 : index
    %c0_6 = arith.constant 0 : index
    %6 = vector.load %arg4[%c0_5, %c0_6] : memref<512x48xf32, #tpu.memory_space<vmem>>, vector<512x48xf32>
    tpu.vector_store %arg4[%c0_5, %c0_6], %5 {strides = array<i32>} : memref<512x48xf32, #tpu.memory_space<vmem>>, vector<512x48xf32>,
    return
  }
  func.func @transform_0(%arg0: i32) -> (i32, i32) {
    %c0_i32 = arith.constant 0 : i32
    %c0_i32_0 = arith.constant 0 : i32
    %c0_i32_1 = arith.constant 0 : i32
    return %c0_i32, %c0_i32_0 : i32, i32
  }
  func.func @transform_1(%arg0: i32) -> (i32, i32) {
    %c0_i32 = arith.constant 0 : i32
    %c0_i32_0 = arith.constant 0 : i32
    %c0_i32_1 = arith.constant 0 : i32
    return %c0_i32, %c0_i32_0 : i32, i32
  }
  func.func @transform_2(%arg0: i32) -> (i32, i32) {
    %c0_i32 = arith.constant 0 : i32
    %c0_i32_0 = arith.constant 0 : i32
    %c0_i32_1 = arith.constant 0 : i32
    return %c0_i32, %c0_i32_0 : i32, i32
  }
  func.func @transform_3(%arg0: i32) -> (i32, i32) {
    %c0_i32 = arith.constant 0 : i32
    %c0_i32_0 = arith.constant 0 : i32
    %c0_i32_1 = arith.constant 0 : i32
    return %c0_i32, %c0_i32_0 : i32, i32
  }
}

module attributes {stable_mosaic.version = 11 : i64} {
  func.func @_gemm_bias_kernel(%arg0: i32, %arg1: memref<1728x40xbf16, #tpu.memory_space<vmem>>, %arg2: memref<40x24xbf16, #tpu.memory_space<vmem>>, %arg3: memref<1x24xf32, #tpu.memory_space<vmem>>, %arg4: memref<1728x24xf32, #tpu.memory_space<vmem>>) attributes {dimension_semantics = [#tpu.dimension_semantics<arbitrary>], iteration_bounds = array<i64: 1>, scalar_prefetch = 0 : i64, scratch_operands = 0 : i64, tpu.core_type = #tpu.core_type<tc>, window_params = [{pipeline_mode = #tpu.pipeline_mode<synchronous>, transform_indices = @transform_0, window_bounds = array<i64: 1728, 40>}, {pipeline_mode = #tpu.pipeline_mode<synchronous>, transform_indices = @transform_1, window_bounds = array<i64: 40, 24>}, {pipeline_mode = #tpu.pipeline_mode<synchronous>, transform_indices = @transform_2, window_bounds = array<i64: 1, 24>}, {pipeline_mode = #tpu.pipeline_mode<synchronous>, transform_indices = @transform_3, window_bounds = array<i64: 1728, 24>}]} {
    %c0 = arith.constant 0 : index
    %c0_0 = arith.constant 0 : index
    %0 = vector.load %arg1[%c0, %c0_0] : memref<1728x40xbf16, #tpu.memory_space<vmem>>, vector<1728x40xbf16>
    %c0_1 = arith.constant 0 : index
    %c0_2 = arith.constant 0 : index
    %1 = vector.load %arg2[%c0_1, %c0_2] : memref<40x24xbf16, #tpu.memory_space<vmem>>, vector<40x24xbf16>
    %cst = arith.constant dense<0.000000e+00> : vector<1728x24xf32>
    %2 = tpu.matmul %0, %1, %cst {dimension_numbers = #tpu.dot_dimension_numbers<[1], [0], [0], [1], [0, 0, 1, 1], [], []>} : vector<1728x40xbf16>, vector<40x24xbf16>, vector<1728x24xf32> -> vector<1728x24xf32>
    %c0_3 = arith.constant 0 : index
    %c0_4 = arith.constant 0 : index
    %3 = vector.load %arg3[%c0_3, %c0_4] : memref<1x24xf32, #tpu.memory_space<vmem>>, vector<1x24xf32>
    %4 = vector.broadcast %3 : vector<1x24xf32> to vector<1728x24xf32>
    %5 = arith.addf %2, %4 : vector<1728x24xf32>
    %c0_5 = arith.constant 0 : index
    %c0_6 = arith.constant 0 : index
    %6 = vector.load %arg4[%c0_5, %c0_6] : memref<1728x24xf32, #tpu.memory_space<vmem>>, vector<1728x24xf32>
    tpu.vector_store %arg4[%c0_5, %c0_6], %5 {strides = array<i32>} : memref<1728x24xf32, #tpu.memory_space<vmem>>, vector<1728x24xf32>,
    return
  }
  func.func @transform_0(%arg0: i32) -> (i32, i32) {
    %c0_i32 = arith.constant 0 : i32
    %c0_i32_0 = arith.constant 0 : i32
    %c0_i32_1 = arith.constant 0 : i32
    return %c0_i32, %c0_i32_0 : i32, i32
  }
  func.func @transform_1(%arg0: i32) -> (i32, i32) {
    %c0_i32 = arith.constant 0 : i32
    %c0_i32_0 = arith.constant 0 : i32
    %c0_i32_1 = arith.constant 0 : i32
    return %c0_i32, %c0_i32_0 : i32, i32
  }
  func.func @transform_2(%arg0: i32) -> (i32, i32) {
    %c0_i32 = arith.constant 0 : i32
    %c0_i32_0 = arith.constant 0 : i32
    %c0_i32_1 = arith.constant 0 : i32
    return %c0_i32, %c0_i32_0 : i32, i32
  }
  func.func @transform_3(%arg0: i32) -> (i32, i32) {
    %c0_i32 = arith.constant 0 : i32
    %c0_i32_0 = arith.constant 0 : i32
    %c0_i32_1 = arith.constant 0 : i32
    return %c0_i32, %c0_i32_0 : i32, i32
  }
}

module attributes {stable_mosaic.version = 11 : i64} {
  func.func @_gemm_bias_kernel(%arg0: i32, %arg1: memref<1960x40xbf16, #tpu.memory_space<vmem>>, %arg2: memref<40x24xbf16, #tpu.memory_space<vmem>>, %arg3: memref<1x24xf32, #tpu.memory_space<vmem>>, %arg4: memref<1960x24xf32, #tpu.memory_space<vmem>>) attributes {dimension_semantics = [#tpu.dimension_semantics<arbitrary>], iteration_bounds = array<i64: 1>, scalar_prefetch = 0 : i64, scratch_operands = 0 : i64, tpu.core_type = #tpu.core_type<tc>, window_params = [{pipeline_mode = #tpu.pipeline_mode<synchronous>, transform_indices = @transform_0, window_bounds = array<i64: 1960, 40>}, {pipeline_mode = #tpu.pipeline_mode<synchronous>, transform_indices = @transform_1, window_bounds = array<i64: 40, 24>}, {pipeline_mode = #tpu.pipeline_mode<synchronous>, transform_indices = @transform_2, window_bounds = array<i64: 1, 24>}, {pipeline_mode = #tpu.pipeline_mode<synchronous>, transform_indices = @transform_3, window_bounds = array<i64: 1960, 24>}]} {
    %c0 = arith.constant 0 : index
    %c0_0 = arith.constant 0 : index
    %0 = vector.load %arg1[%c0, %c0_0] : memref<1960x40xbf16, #tpu.memory_space<vmem>>, vector<1960x40xbf16>
    %c0_1 = arith.constant 0 : index
    %c0_2 = arith.constant 0 : index
    %1 = vector.load %arg2[%c0_1, %c0_2] : memref<40x24xbf16, #tpu.memory_space<vmem>>, vector<40x24xbf16>
    %cst = arith.constant dense<0.000000e+00> : vector<1960x24xf32>
    %2 = tpu.matmul %0, %1, %cst {dimension_numbers = #tpu.dot_dimension_numbers<[1], [0], [0], [1], [0, 0, 1, 1], [], []>} : vector<1960x40xbf16>, vector<40x24xbf16>, vector<1960x24xf32> -> vector<1960x24xf32>
    %c0_3 = arith.constant 0 : index
    %c0_4 = arith.constant 0 : index
    %3 = vector.load %arg3[%c0_3, %c0_4] : memref<1x24xf32, #tpu.memory_space<vmem>>, vector<1x24xf32>
    %4 = vector.broadcast %3 : vector<1x24xf32> to vector<1960x24xf32>
    %5 = arith.addf %2, %4 : vector<1960x24xf32>
    %c0_5 = arith.constant 0 : index
    %c0_6 = arith.constant 0 : index
    %6 = vector.load %arg4[%c0_5, %c0_6] : memref<1960x24xf32, #tpu.memory_space<vmem>>, vector<1960x24xf32>
    tpu.vector_store %arg4[%c0_5, %c0_6], %5 {strides = array<i32>} : memref<1960x24xf32, #tpu.memory_space<vmem>>, vector<1960x24xf32>,
    return
  }
  func.func @transform_0(%arg0: i32) -> (i32, i32) {
    %c0_i32 = arith.constant 0 : i32
    %c0_i32_0 = arith.constant 0 : i32
    %c0_i32_1 = arith.constant 0 : i32
    return %c0_i32, %c0_i32_0 : i32, i32
  }
  func.func @transform_1(%arg0: i32) -> (i32, i32) {
    %c0_i32 = arith.constant 0 : i32
    %c0_i32_0 = arith.constant 0 : i32
    %c0_i32_1 = arith.constant 0 : i32
    return %c0_i32, %c0_i32_0 : i32, i32
  }
  func.func @transform_2(%arg0: i32) -> (i32, i32) {
    %c0_i32 = arith.constant 0 : i32
    %c0_i32_0 = arith.constant 0 : i32
    %c0_i32_1 = arith.constant 0 : i32
    return %c0_i32, %c0_i32_0 : i32, i32
  }
  func.func @transform_3(%arg0: i32) -> (i32, i32) {
    %c0_i32 = arith.constant 0 : i32
    %c0_i32_0 = arith.constant 0 : i32
    %c0_i32_1 = arith.constant 0 : i32
    return %c0_i32, %c0_i32_0 : i32, i32
  }
}

module attributes {stable_mosaic.version = 11 : i64} {
  func.func @_gemm_bias_kernel(%arg0: i32, %arg1: memref<1960x72xbf16, #tpu.memory_space<vmem>>, %arg2: memref<72x24xbf16, #tpu.memory_space<vmem>>, %arg3: memref<1x24xf32, #tpu.memory_space<vmem>>, %arg4: memref<1960x24xf32, #tpu.memory_space<vmem>>) attributes {dimension_semantics = [#tpu.dimension_semantics<arbitrary>], iteration_bounds = array<i64: 1>, scalar_prefetch = 0 : i64, scratch_operands = 0 : i64, tpu.core_type = #tpu.core_type<tc>, window_params = [{pipeline_mode = #tpu.pipeline_mode<synchronous>, transform_indices = @transform_0, window_bounds = array<i64: 1960, 72>}, {pipeline_mode = #tpu.pipeline_mode<synchronous>, transform_indices = @transform_1, window_bounds = array<i64: 72, 24>}, {pipeline_mode = #tpu.pipeline_mode<synchronous>, transform_indices = @transform_2, window_bounds = array<i64: 1, 24>}, {pipeline_mode = #tpu.pipeline_mode<synchronous>, transform_indices = @transform_3, window_bounds = array<i64: 1960, 24>}]} {
    %c0 = arith.constant 0 : index
    %c0_0 = arith.constant 0 : index
    %0 = vector.load %arg1[%c0, %c0_0] : memref<1960x72xbf16, #tpu.memory_space<vmem>>, vector<1960x72xbf16>
    %c0_1 = arith.constant 0 : index
    %c0_2 = arith.constant 0 : index
    %1 = vector.load %arg2[%c0_1, %c0_2] : memref<72x24xbf16, #tpu.memory_space<vmem>>, vector<72x24xbf16>
    %cst = arith.constant dense<0.000000e+00> : vector<1960x24xf32>
    %2 = tpu.matmul %0, %1, %cst {dimension_numbers = #tpu.dot_dimension_numbers<[1], [0], [0], [1], [0, 0, 1, 1], [], []>} : vector<1960x72xbf16>, vector<72x24xbf16>, vector<1960x24xf32> -> vector<1960x24xf32>
    %c0_3 = arith.constant 0 : index
    %c0_4 = arith.constant 0 : index
    %3 = vector.load %arg3[%c0_3, %c0_4] : memref<1x24xf32, #tpu.memory_space<vmem>>, vector<1x24xf32>
    %4 = vector.broadcast %3 : vector<1x24xf32> to vector<1960x24xf32>
    %5 = arith.addf %2, %4 : vector<1960x24xf32>
    %c0_5 = arith.constant 0 : index
    %c0_6 = arith.constant 0 : index
    %6 = vector.load %arg4[%c0_5, %c0_6] : memref<1960x24xf32, #tpu.memory_space<vmem>>, vector<1960x24xf32>
    tpu.vector_store %arg4[%c0_5, %c0_6], %5 {strides = array<i32>} : memref<1960x24xf32, #tpu.memory_space<vmem>>, vector<1960x24xf32>,
    return
  }
  func.func @transform_0(%arg0: i32) -> (i32, i32) {
    %c0_i32 = arith.constant 0 : i32
    %c0_i32_0 = arith.constant 0 : i32
    %c0_i32_1 = arith.constant 0 : i32
    return %c0_i32, %c0_i32_0 : i32, i32
  }
  func.func @transform_1(%arg0: i32) -> (i32, i32) {
    %c0_i32 = arith.constant 0 : i32
    %c0_i32_0 = arith.constant 0 : i32
    %c0_i32_1 = arith.constant 0 : i32
    return %c0_i32, %c0_i32_0 : i32, i32
  }
  func.func @transform_2(%arg0: i32) -> (i32, i32) {
    %c0_i32 = arith.constant 0 : i32
    %c0_i32_0 = arith.constant 0 : i32
    %c0_i32_1 = arith.constant 0 : i32
    return %c0_i32, %c0_i32_0 : i32, i32
  }
  func.func @transform_3(%arg0: i32) -> (i32, i32) {
    %c0_i32 = arith.constant 0 : i32
    %c0_i32_0 = arith.constant 0 : i32
    %c0_i32_1 = arith.constant 0 : i32
    return %c0_i32, %c0_i32_0 : i32, i32
  }
}

module attributes {stable_mosaic.version = 11 : i64} {
  func.func @_gemm_bias_add_relu_kernel(%arg0: i32, %arg1: memref<512x360xbf16, #tpu.memory_space<vmem>>, %arg2: memref<360x8xbf16, #tpu.memory_space<vmem>>, %arg3: memref<1x8xf32, #tpu.memory_space<vmem>>, %arg4: memref<512x8xf32, #tpu.memory_space<vmem>>, %arg5: memref<512x8xf32, #tpu.memory_space<vmem>>) attributes {dimension_semantics = [#tpu.dimension_semantics<arbitrary>], iteration_bounds = array<i64: 1>, scalar_prefetch = 0 : i64, scratch_operands = 0 : i64, tpu.core_type = #tpu.core_type<tc>, window_params = [{pipeline_mode = #tpu.pipeline_mode<synchronous>, transform_indices = @transform_0, window_bounds = array<i64: 512, 360>}, {pipeline_mode = #tpu.pipeline_mode<synchronous>, transform_indices = @transform_1, window_bounds = array<i64: 360, 8>}, {pipeline_mode = #tpu.pipeline_mode<synchronous>, transform_indices = @transform_2, window_bounds = array<i64: 1, 8>}, {pipeline_mode = #tpu.pipeline_mode<synchronous>, transform_indices = @transform_3, window_bounds = array<i64: 512, 8>}, {pipeline_mode = #tpu.pipeline_mode<synchronous>, transform_indices = @transform_4, window_bounds = array<i64: 512, 8>}]} {
    %c0 = arith.constant 0 : index
    %c0_0 = arith.constant 0 : index
    %0 = vector.load %arg1[%c0, %c0_0] : memref<512x360xbf16, #tpu.memory_space<vmem>>, vector<512x360xbf16>
    %c0_1 = arith.constant 0 : index
    %c0_2 = arith.constant 0 : index
    %1 = vector.load %arg2[%c0_1, %c0_2] : memref<360x8xbf16, #tpu.memory_space<vmem>>, vector<360x8xbf16>
    %cst = arith.constant dense<0.000000e+00> : vector<512x8xf32>
    %2 = tpu.matmul %0, %1, %cst {dimension_numbers = #tpu.dot_dimension_numbers<[1], [0], [0], [1], [0, 0, 1, 1], [], []>} : vector<512x360xbf16>, vector<360x8xbf16>, vector<512x8xf32> -> vector<512x8xf32>
    %c0_3 = arith.constant 0 : index
    %c0_4 = arith.constant 0 : index
    %3 = vector.load %arg3[%c0_3, %c0_4] : memref<1x8xf32, #tpu.memory_space<vmem>>, vector<1x8xf32>
    %4 = vector.broadcast %3 : vector<1x8xf32> to vector<512x8xf32>
    %5 = arith.addf %2, %4 : vector<512x8xf32>
    %c0_5 = arith.constant 0 : index
    %c0_6 = arith.constant 0 : index
    %6 = vector.load %arg4[%c0_5, %c0_6] : memref<512x8xf32, #tpu.memory_space<vmem>>, vector<512x8xf32>
    %7 = arith.addf %5, %6 : vector<512x8xf32>
    %cst_7 = arith.constant 0.000000e+00 : f32
    %8 = vector.broadcast %cst_7 : f32 to vector<512x8xf32>
    %9 = arith.maximumf %7, %8 : vector<512x8xf32>
    %c0_8 = arith.constant 0 : index
    %c0_9 = arith.constant 0 : index
    %10 = vector.load %arg5[%c0_8, %c0_9] : memref<512x8xf32, #tpu.memory_space<vmem>>, vector<512x8xf32>
    tpu.vector_store %arg5[%c0_8, %c0_9], %9 {strides = array<i32>} : memref<512x8xf32, #tpu.memory_space<vmem>>, vector<512x8xf32>,
    return
  }
  func.func @transform_0(%arg0: i32) -> (i32, i32) {
    %c0_i32 = arith.constant 0 : i32
    %c0_i32_0 = arith.constant 0 : i32
    %c0_i32_1 = arith.constant 0 : i32
    return %c0_i32, %c0_i32_0 : i32, i32
  }
  func.func @transform_1(%arg0: i32) -> (i32, i32) {
    %c0_i32 = arith.constant 0 : i32
    %c0_i32_0 = arith.constant 0 : i32
    %c0_i32_1 = arith.constant 0 : i32
    return %c0_i32, %c0_i32_0 : i32, i32
  }
  func.func @transform_2(%arg0: i32) -> (i32, i32) {
    %c0_i32 = arith.constant 0 : i32
    %c0_i32_0 = arith.constant 0 : i32
    %c0_i32_1 = arith.constant 0 : i32
    return %c0_i32, %c0_i32_0 : i32, i32
  }
  func.func @transform_3(%arg0: i32) -> (i32, i32) {
    %c0_i32 = arith.constant 0 : i32
    %c0_i32_0 = arith.constant 0 : i32
    %c0_i32_1 = arith.constant 0 : i32
    return %c0_i32, %c0_i32_0 : i32, i32
  }
  func.func @transform_4(%arg0: i32) -> (i32, i32) {
    %c0_i32 = arith.constant 0 : i32
    %c0_i32_0 = arith.constant 0 : i32
    %c0_i32_1 = arith.constant 0 : i32
    return %c0_i32, %c0_i32_0 : i32, i32
  }
}

</mosaic_0001>

<bundles_post_ra>
// kernel: gcb_forward.5
= control target key start
LH: loop header
LB: loop body
LE: loop exit
PB: predicated region body
PF: predicated region fallthrough
CT: control target
= control target key end

     0   :  { %vm344_vm0 = vcmask 1041408   ;;  %vm247_vm1 = vcmask 31744   ;;  %vm637_vm2 = vcmask 392192   ;;  %s1382_s1 = inlined_call_operand.vmem [shape: bf16[4,48], index: 1, kind: input, shape index: {}]   ;;  %s1383_s0 = inlined_call_operand.vmem [shape: bf16[512,4], index: 0, kind: input, shape index: {}]   ;;  %s1384_s2 = inlined_call_operand.vmem [shape: f32[1,48], index: 2, kind: input, shape index: {}]   ;;  %s1385_s3 = inlined_call_operand.vmem [shape: f32[512,48], index: 3, kind: output, shape index: {}]  }
   0x1   :  { %v79_v0 = vld [vmem:[%s1382_s1] sm:$0x3]  ;;  %v876_v4 = vld [vmem:[%s1383_s0 + $0x8] sm:$0xff]   ;;  %v878_v6 = vld [vmem:[%s1383_s0 + $0x10] sm:$0xff]  }
   0x2   :  { %872 = vmatprep.subr.msk.bf16.mxu0 %vm344_vm0, %v79_v0  ;;  %873 = vmatprep.subr.msk.bf16.mxu1 %vm344_vm0, %v79_v0  ;;  %v346_v1 = vsel %vm344_vm0, %v79_v0, 0  ;;  %v874_v2 = vld [vmem:[%s1383_s0] sm:$0xff]   ;;  %v877_v5 = vld [vmem:[%s1383_s0 + $0x88] sm:$0xff]   ;;  %v879_v7 = vld [vmem:[%s1383_s0 + $0x90] sm:$0xff]  }
   0x3   :  { %805 = vmatpush3.bf16.msra.mxu0 %v346_v1  ;;  %871 = vmatpush3.bf16.msra.mxu1 %v346_v1  ;;  %v875_v3 = vld [vmem:[%s1383_s0 + $0x80] sm:$0xff]   ;;  %v880_v8 = vld [vmem:[%s1383_s0 + $0x18] sm:$0xff]   ;;  %v884_v12 = vld [vmem:[%s1383_s0 + $0x28] sm:$0xff]  }
   0x4   :  { %806 = vmatprep.mubr.msk.bf16.mxu0 %vm247_vm1, %v874_v2  ;;  %838 = vmatprep.mubr.msk.bf16.mxu1 %vm247_vm1, %v875_v3  ;;  %v881_v9 = vld [vmem:[%s1383_s0 + $0x98] sm:$0xff]   ;;  %v882_v10 = vld [vmem:[%s1383_s0 + $0x20] sm:$0xff]   ;;  %v885_v13 = vld [vmem:[%s1383_s0 + $0xa8] sm:$0xff]  }
   0x5   :  { %v883_v11 = vld [vmem:[%s1383_s0 + $0xa0] sm:$0xff]   ;;  %v886_v14 = vld [vmem:[%s1383_s0 + $0x30] sm:$0xff]   ;;  %v888_v16 = vld [vmem:[%s1383_s0 + $0x38] sm:$0xff]  }
   0x6   :  { %807 = vmatmul.mubr.msk.bf16.vlgmr.msra.gmra.mrb[0].mxu0 %vm247_vm1, %v876_v4  ;;  %839 = vmatmul.mubr.msk.bf16.vlgmr.msra.gmra.mrb[0].mxu1 %vm247_vm1, %v877_v5  ;;  %v887_v15 = vld [vmem:[%s1383_s0 + $0xb0] sm:$0xff]   ;;  %v889_v17 = vld [vmem:[%s1383_s0 + $0xb8] sm:$0xff]   ;;  %v890_v18 = vld [vmem:[%s1383_s0 + $0x40] sm:$0xff]  }
   0x7   :  { %810 = vmatprep.mubr.msk.bf16.mxu0 %vm247_vm1, %v878_v6  ;;  %842 = vmatprep.mubr.msk.bf16.mxu1 %vm247_vm1, %v879_v7  ;;  %v891_v19 = vld [vmem:[%s1383_s0 + $0xc0] sm:$0xff]   ;;  %v892_v20 = vld [vmem:[%s1383_s0 + $0x48] sm:$0xff]   ;;  %v894_v22 = vld [vmem:[%s1383_s0 + $0x50] sm:$0xff]  }
   0x8   :  { %v893_v21 = vld [vmem:[%s1383_s0 + $0xc8] sm:$0xff]   ;;  %v895_v23 = vld [vmem:[%s1383_s0 + $0xd0] sm:$0xff]   ;;  %v896_v24 = vld [vmem:[%s1383_s0 + $0x58] sm:$0xff]  }
   0x9   :  { %v897_v25 = vld [vmem:[%s1383_s0 + $0xd8] sm:$0xff]   ;;  %v898_v26 = vld [vmem:[%s1383_s0 + $0x60] sm:$0xff]   ;;  %v900_v28 = vld [vmem:[%s1383_s0 + $0x68] sm:$0xff]  }
   0xa   :  { %v899_v27 = vld [vmem:[%s1383_s0 + $0xe0] sm:$0xff]   ;;  %v901_v29 = vld [vmem:[%s1383_s0 + $0xe8] sm:$0xff]   ;;  %v902_v30 = vld [vmem:[%s1383_s0 + $0x70] sm:$0xff]  }
   0xb   :  { %v903_v31 = vld [vmem:[%s1383_s0 + $0xf0] sm:$0xff]   ;;  %v904_v32 = vld [vmem:[%s1383_s0 + $0x78] sm:$0xff]   ;;  %v1060_v34 = vld [vmem:[%s1384_s2] ss:$0 sm:$0xff] }
   0xc   :  { %v905_v33 = vld [vmem:[%s1383_s0 + $0xf8] sm:$0xff]  }
   0xe   :  { %811 = vmatmul.mubr.msk.bf16.gmra.mrb[4].mxu0 %vm247_vm1, %v880_v8  ;;  %843 = vmatmul.mubr.msk.bf16.gmra.mrb[4].mxu1 %vm247_vm1, %v881_v9 }
   0xf   :  { %814 = vmatprep.mubr.msk.bf16.mxu0 %vm247_vm1, %v882_v10  ;;  %846 = vmatprep.mubr.msk.bf16.mxu1 %vm247_vm1, %v883_v11 }
  0x16   :  { %815 = vmatmul.mubr.msk.bf16.gmra.mrb[8].mxu0 %vm247_vm1, %v884_v12  ;;  %847 = vmatmul.mubr.msk.bf16.gmra.mrb[8].mxu1 %vm247_vm1, %v885_v13 }
  0x17   :  { %818 = vmatprep.mubr.msk.bf16.mxu0 %vm247_vm1, %v886_v14  ;;  %850 = vmatprep.mubr.msk.bf16.mxu1 %vm247_vm1, %v887_v15 }
  0x1e   :  { %819 = vmatmul.mubr.msk.bf16.gmra.mrb[12].mxu0 %vm247_vm1, %v888_v16  ;;  %851 = vmatmul.mubr.msk.bf16.gmra.mrb[12].mxu1 %vm247_vm1, %v889_v17 }
  0x1f   :  { %822 = vmatprep.mubr.msk.bf16.mxu0 %vm247_vm1, %v890_v18  ;;  %854 = vmatprep.mubr.msk.bf16.mxu1 %vm247_vm1, %v891_v19 }
  0x26   :  { %823 = vmatmul.mubr.msk.bf16.gmra.mrb[16].mxu0 %vm247_vm1, %v892_v20  ;;  %855 = vmatmul.mubr.msk.bf16.gmra.mrb[16].mxu1 %vm247_vm1, %v893_v21 }
  0x27   :  { %826 = vmatprep.mubr.msk.bf16.mxu0 %vm247_vm1, %v894_v22  ;;  %858 = vmatprep.mubr.msk.bf16.mxu1 %vm247_vm1, %v895_v23 }
  0x2e   :  { %827 = vmatmul.mubr.msk.bf16.gmra.mrb[20].mxu0 %vm247_vm1, %v896_v24  ;;  %859 = vmatmul.mubr.msk.bf16.gmra.mrb[20].mxu1 %vm247_vm1, %v897_v25 }
  0x2f   :  { %830 = vmatprep.mubr.msk.bf16.mxu0 %vm247_vm1, %v898_v26  ;;  %862 = vmatprep.mubr.msk.bf16.mxu1 %vm247_vm1, %v899_v27 }
  0x36   :  { %831 = vmatmul.mubr.msk.bf16.gmra.mrb[24].mxu0 %vm247_vm1, %v900_v28  ;;  %863 = vmatmul.mubr.msk.bf16.gmra.mrb[24].mxu1 %vm247_vm1, %v901_v29 }
  0x37   :  { %834 = vmatprep.mubr.msk.bf16.mxu0 %vm247_vm1, %v902_v30  ;;  %866 = vmatprep.mubr.msk.bf16.mxu1 %vm247_vm1, %v903_v31 }
  0x3e   :  { %835 = vmatmul.mubr.msk.bf16.gmra.mrb[28].mxu0 %vm247_vm1, %v904_v32  ;;  %867 = vmatmul.mubr.msk.bf16.gmra.mrb[28].mxu1 %vm247_vm1, %v905_v33 }
  0xd9   :  { %v808_v35 = vpop.f32.mrb[0].mxu0  ;;  %v840_v37 = vpop.f32.mrb[0].mxu1 }
  0xda   :  { %v391_v36 = vadd.f32 %v808_v35, %v1060_v34  ;;  %v382_v38 = vpop.f32.mrb[1].mxu0  ;;  %v519_v39 = vadd.f32 %v840_v37, %v1060_v34  ;;  %v510_v41 = vpop.f32.mrb[1].mxu1 }
  0xdb   :  { %v383_v40 = vadd.f32 %v1060_v34, %v382_v38  ;;  %v809_v42 = vpop.f32.mrb[2].mxu0  ;;  %v511_v43 = vadd.f32 %v1060_v34, %v510_v41  ;;  %v841_v45 = vpop.f32.mrb[2].mxu1 }
  0xdc   :  { %640 = vst.msk [vmem:[%s1385_s3 + $0x10] sm:$0xff] %vm637_vm2, %v391_v36  ;;  %v394_v44 = vadd.f32 %v809_v42, %v1060_v34  ;;  %v385_v46 = vpop.f32.mrb[3].mxu0  ;;  %672 = vst.msk [vmem:[%s1385_s3 + $0x110] sm:$0xff] %vm637_vm2, %v519_v39  ;;  %v522_v47 = vadd.f32 %v841_v45, %v1060_v34  ;;  %v513_v49 = vpop.f32.mrb[3].mxu1 }
  0xdd   :  { %638 = vst.msk [vmem:[%s1385_s3] sm:$0xff] %vm637_vm2, %v383_v40  ;;  %v386_v48 = vadd.f32 %v1060_v34, %v385_v46  ;;  %670 = vst.msk [vmem:[%s1385_s3 + $0x100] sm:$0xff] %vm637_vm2, %v511_v43  ;;  %v514_v50 = vadd.f32 %v1060_v34, %v513_v49 }
  0xde   :  { %641 = vst.msk [vmem:[%s1385_s3 + $0x18] sm:$0xff] %vm637_vm2, %v394_v44  ;;  %673 = vst.msk [vmem:[%s1385_s3 + $0x118] sm:$0xff] %vm637_vm2, %v522_v47 }
  0xdf   :  { %639 = vst.msk [vmem:[%s1385_s3 + $0x8] sm:$0xff] %vm637_vm2, %v386_v48  ;;  %671 = vst.msk [vmem:[%s1385_s3 + $0x108] sm:$0xff] %vm637_vm2, %v514_v50 }
  0xe1   :  { %v812_v51 = vpop.f32.mrb[4].mxu0  ;;  %v844_v53 = vpop.f32.mrb[4].mxu1 }
  0xe2   :  { %v407_v52 = vadd.f32 %v812_v51, %v1060_v34  ;;  %v398_v54 = vpop.f32.mrb[5].mxu0  ;;  %v535_v55 = vadd.f32 %v844_v53, %v1060_v34  ;;  %v526_v57 = vpop.f32.mrb[5].mxu1 }
  0xe3   :  { %v399_v56 = vadd.f32 %v1060_v34, %v398_v54  ;;  %v813_v58 = vpop.f32.mrb[6].mxu0  ;;  %v527_v59 = vadd.f32 %v1060_v34, %v526_v57  ;;  %v845_v61 = vpop.f32.mrb[6].mxu1 }
  0xe4   :  { %644 = vst.msk [vmem:[%s1385_s3 + $0x30] sm:$0xff] %vm637_vm2, %v407_v52  ;;  %v410_v60 = vadd.f32 %v813_v58, %v1060_v34  ;;  %v401_v62 = vpop.f32.mrb[7].mxu0  ;;  %676 = vst.msk [vmem:[%s1385_s3 + $0x130] sm:$0xff] %vm637_vm2, %v535_v55  ;;  %v538_v63 = vadd.f32 %v845_v61, %v1060_v34  ;;  %v529_v1 = vpop.f32.mrb[7].mxu1 }
  0xe5   :  { %642 = vst.msk [vmem:[%s1385_s3 + $0x20] sm:$0xff] %vm637_vm2, %v399_v56  ;;  %v402_v0 = vadd.f32 %v1060_v34, %v401_v62  ;;  %674 = vst.msk [vmem:[%s1385_s3 + $0x120] sm:$0xff] %vm637_vm2, %v527_v59  ;;  %v530_v2 = vadd.f32 %v1060_v34, %v529_v1 }
  0xe6   :  { %645 = vst.msk [vmem:[%s1385_s3 + $0x38] sm:$0xff] %vm637_vm2, %v410_v60  ;;  %677 = vst.msk [vmem:[%s1385_s3 + $0x138] sm:$0xff] %vm637_vm2, %v538_v63 }
  0xe7   :  { %643 = vst.msk [vmem:[%s1385_s3 + $0x28] sm:$0xff] %vm637_vm2, %v402_v0  ;;  %675 = vst.msk [vmem:[%s1385_s3 + $0x128] sm:$0xff] %vm637_vm2, %v530_v2 }
  0xe9   :  { %v816_v3 = vpop.f32.mrb[8].mxu0  ;;  %v848_v5 = vpop.f32.mrb[8].mxu1 }
  0xea   :  { %v423_v4 = vadd.f32 %v816_v3, %v1060_v34  ;;  %v414_v6 = vpop.f32.mrb[9].mxu0  ;;  %v551_v7 = vadd.f32 %v848_v5, %v1060_v34  ;;  %v542_v9 = vpop.f32.mrb[9].mxu1 }
  0xeb   :  { %v415_v8 = vadd.f32 %v1060_v34, %v414_v6  ;;  %v817_v10 = vpop.f32.mrb[10].mxu0  ;;  %v543_v11 = vadd.f32 %v1060_v34, %v542_v9  ;;  %v849_v13 = vpop.f32.mrb[10].mxu1 }
  0xec   :  { %648 = vst.msk [vmem:[%s1385_s3 + $0x50] sm:$0xff] %vm637_vm2, %v423_v4  ;;  %v426_v12 = vadd.f32 %v817_v10, %v1060_v34  ;;  %v417_v14 = vpop.f32.mrb[11].mxu0  ;;  %680 = vst.msk [vmem:[%s1385_s3 + $0x150] sm:$0xff] %vm637_vm2, %v551_v7  ;;  %v554_v15 = vadd.f32 %v849_v13, %v1060_v34  ;;  %v545_v17 = vpop.f32.mrb[11].mxu1 }
  0xed   :  { %646 = vst.msk [vmem:[%s1385_s3 + $0x40] sm:$0xff] %vm637_vm2, %v415_v8  ;;  %v418_v16 = vadd.f32 %v1060_v34, %v417_v14  ;;  %678 = vst.msk [vmem:[%s1385_s3 + $0x140] sm:$0xff] %vm637_vm2, %v543_v11  ;;  %v546_v18 = vadd.f32 %v1060_v34, %v545_v17 }
  0xee   :  { %649 = vst.msk [vmem:[%s1385_s3 + $0x58] sm:$0xff] %vm637_vm2, %v426_v12  ;;  %681 = vst.msk [vmem:[%s1385_s3 + $0x158] sm:$0xff] %vm637_vm2, %v554_v15 }
  0xef   :  { %647 = vst.msk [vmem:[%s1385_s3 + $0x48] sm:$0xff] %vm637_vm2, %v418_v16  ;;  %679 = vst.msk [vmem:[%s1385_s3 + $0x148] sm:$0xff] %vm637_vm2, %v546_v18 }
  0xf1   :  { %v820_v19 = vpop.f32.mrb[12].mxu0  ;;  %v852_v21 = vpop.f32.mrb[12].mxu1 }
  0xf2   :  { %v439_v20 = vadd.f32 %v820_v19, %v1060_v34  ;;  %v430_v22 = vpop.f32.mrb[13].mxu0  ;;  %v567_v23 = vadd.f32 %v852_v21, %v1060_v34  ;;  %v558_v25 = vpop.f32.mrb[13].mxu1 }
  0xf3   :  { %v431_v24 = vadd.f32 %v1060_v34, %v430_v22  ;;  %v821_v26 = vpop.f32.mrb[14].mxu0  ;;  %v559_v27 = vadd.f32 %v1060_v34, %v558_v25  ;;  %v853_v29 = vpop.f32.mrb[14].mxu1 }
  0xf4   :  { %652 = vst.msk [vmem:[%s1385_s3 + $0x70] sm:$0xff] %vm637_vm2, %v439_v20  ;;  %v442_v28 = vadd.f32 %v821_v26, %v1060_v34  ;;  %v433_v30 = vpop.f32.mrb[15].mxu0  ;;  %684 = vst.msk [vmem:[%s1385_s3 + $0x170] sm:$0xff] %vm637_vm2, %v567_v23  ;;  %v570_v31 = vadd.f32 %v853_v29, %v1060_v34  ;;  %v561_v33 = vpop.f32.mrb[15].mxu1 }
  0xf5   :  { %650 = vst.msk [vmem:[%s1385_s3 + $0x60] sm:$0xff] %vm637_vm2, %v431_v24  ;;  %v434_v32 = vadd.f32 %v1060_v34, %v433_v30  ;;  %682 = vst.msk [vmem:[%s1385_s3 + $0x160] sm:$0xff] %vm637_vm2, %v559_v27  ;;  %v562_v35 = vadd.f32 %v1060_v34, %v561_v33 }
  0xf6   :  { %653 = vst.msk [vmem:[%s1385_s3 + $0x78] sm:$0xff] %vm637_vm2, %v442_v28  ;;  %685 = vst.msk [vmem:[%s1385_s3 + $0x178] sm:$0xff] %vm637_vm2, %v570_v31 }
  0xf7   :  { %651 = vst.msk [vmem:[%s1385_s3 + $0x68] sm:$0xff] %vm637_vm2, %v434_v32  ;;  %683 = vst.msk [vmem:[%s1385_s3 + $0x168] sm:$0xff] %vm637_vm2, %v562_v35 }
  0xf9   :  { %v824_v36 = vpop.f32.mrb[16].mxu0  ;;  %v856_v38 = vpop.f32.mrb[16].mxu1 }
  0xfa   :  { %v455_v37 = vadd.f32 %v824_v36, %v1060_v34  ;;  %v446_v39 = vpop.f32.mrb[17].mxu0  ;;  %v583_v40 = vadd.f32 %v856_v38, %v1060_v34  ;;  %v574_v42 = vpop.f32.mrb[17].mxu1 }
  0xfb   :  { %v447_v41 = vadd.f32 %v1060_v34, %v446_v39  ;;  %v825_v43 = vpop.f32.mrb[18].mxu0  ;;  %v575_v44 = vadd.f32 %v1060_v34, %v574_v42  ;;  %v857_v46 = vpop.f32.mrb[18].mxu1 }
  0xfc   :  { %656 = vst.msk [vmem:[%s1385_s3 + $0x90] sm:$0xff] %vm637_vm2, %v455_v37  ;;  %v458_v45 = vadd.f32 %v825_v43, %v1060_v34  ;;  %v449_v47 = vpop.f32.mrb[19].mxu0  ;;  %688 = vst.msk [vmem:[%s1385_s3 + $0x190] sm:$0xff] %vm637_vm2, %v583_v40  ;;  %v586_v48 = vadd.f32 %v857_v46, %v1060_v34  ;;  %v577_v50 = vpop.f32.mrb[19].mxu1 }
  0xfd   :  { %654 = vst.msk [vmem:[%s1385_s3 + $0x80] sm:$0xff] %vm637_vm2, %v447_v41  ;;  %v450_v49 = vadd.f32 %v1060_v34, %v449_v47  ;;  %686 = vst.msk [vmem:[%s1385_s3 + $0x180] sm:$0xff] %vm637_vm2, %v575_v44  ;;  %v578_v51 = vadd.f32 %v1060_v34, %v577_v50 }
  0xfe   :  { %657 = vst.msk [vmem:[%s1385_s3 + $0x98] sm:$0xff] %vm637_vm2, %v458_v45  ;;  %689 = vst.msk [vmem:[%s1385_s3 + $0x198] sm:$0xff] %vm637_vm2, %v586_v48 }
  0xff   :  { %655 = vst.msk [vmem:[%s1385_s3 + $0x88] sm:$0xff] %vm637_vm2, %v450_v49  ;;  %687 = vst.msk [vmem:[%s1385_s3 + $0x188] sm:$0xff] %vm637_vm2, %v578_v51 }
 0x101   :  { %v828_v52 = vpop.f32.mrb[20].mxu0  ;;  %v860_v54 = vpop.f32.mrb[20].mxu1 }
 0x102   :  { %v471_v53 = vadd.f32 %v828_v52, %v1060_v34  ;;  %v462_v55 = vpop.f32.mrb[21].mxu0  ;;  %v599_v56 = vadd.f32 %v860_v54, %v1060_v34  ;;  %v590_v58 = vpop.f32.mrb[21].mxu1 }
 0x103   :  { %v463_v57 = vadd.f32 %v1060_v34, %v462_v55  ;;  %v829_v59 = vpop.f32.mrb[22].mxu0  ;;  %v591_v60 = vadd.f32 %v1060_v34, %v590_v58  ;;  %v861_v62 = vpop.f32.mrb[22].mxu1 }
 0x104   :  { %660 = vst.msk [vmem:[%s1385_s3 + $0xb0] sm:$0xff] %vm637_vm2, %v471_v53  ;;  %v474_v61 = vadd.f32 %v829_v59, %v1060_v34  ;;  %v465_v63 = vpop.f32.mrb[23].mxu0  ;;  %692 = vst.msk [vmem:[%s1385_s3 + $0x1b0] sm:$0xff] %vm637_vm2, %v599_v56  ;;  %v602_v0 = vadd.f32 %v861_v62, %v1060_v34  ;;  %v593_v2 = vpop.f32.mrb[23].mxu1 }
 0x105   :  { %658 = vst.msk [vmem:[%s1385_s3 + $0xa0] sm:$0xff] %vm637_vm2, %v463_v57  ;;  %v466_v1 = vadd.f32 %v1060_v34, %v465_v63  ;;  %690 = vst.msk [vmem:[%s1385_s3 + $0x1a0] sm:$0xff] %vm637_vm2, %v591_v60  ;;  %v594_v3 = vadd.f32 %v1060_v34, %v593_v2 }
 0x106   :  { %661 = vst.msk [vmem:[%s1385_s3 + $0xb8] sm:$0xff] %vm637_vm2, %v474_v61  ;;  %693 = vst.msk [vmem:[%s1385_s3 + $0x1b8] sm:$0xff] %vm637_vm2, %v602_v0 }
 0x107   :  { %659 = vst.msk [vmem:[%s1385_s3 + $0xa8] sm:$0xff] %vm637_vm2, %v466_v1  ;;  %691 = vst.msk [vmem:[%s1385_s3 + $0x1a8] sm:$0xff] %vm637_vm2, %v594_v3 }
 0x109   :  { %v832_v4 = vpop.f32.mrb[24].mxu0  ;;  %v864_v6 = vpop.f32.mrb[24].mxu1 }
 0x10a   :  { %v487_v5 = vadd.f32 %v832_v4, %v1060_v34  ;;  %v478_v7 = vpop.f32.mrb[25].mxu0  ;;  %v615_v8 = vadd.f32 %v864_v6, %v1060_v34  ;;  %v606_v10 = vpop.f32.mrb[25].mxu1 }
 0x10b   :  { %v479_v9 = vadd.f32 %v1060_v34, %v478_v7  ;;  %v833_v11 = vpop.f32.mrb[26].mxu0  ;;  %v607_v12 = vadd.f32 %v1060_v34, %v606_v10  ;;  %v865_v14 = vpop.f32.mrb[26].mxu1 }
 0x10c   :  { %664 = vst.msk [vmem:[%s1385_s3 + $0xd0] sm:$0xff] %vm637_vm2, %v487_v5  ;;  %v490_v13 = vadd.f32 %v833_v11, %v1060_v34  ;;  %v481_v15 = vpop.f32.mrb[27].mxu0  ;;  %696 = vst.msk [vmem:[%s1385_s3 + $0x1d0] sm:$0xff] %vm637_vm2, %v615_v8  ;;  %v618_v16 = vadd.f32 %v865_v14, %v1060_v34  ;;  %v609_v18 = vpop.f32.mrb[27].mxu1 }
 0x10d   :  { %662 = vst.msk [vmem:[%s1385_s3 + $0xc0] sm:$0xff] %vm637_vm2, %v479_v9  ;;  %v482_v17 = vadd.f32 %v1060_v34, %v481_v15  ;;  %694 = vst.msk [vmem:[%s1385_s3 + $0x1c0] sm:$0xff] %vm637_vm2, %v607_v12  ;;  %v610_v19 = vadd.f32 %v1060_v34, %v609_v18 }
 0x10e   :  { %665 = vst.msk [vmem:[%s1385_s3 + $0xd8] sm:$0xff] %vm637_vm2, %v490_v13  ;;  %697 = vst.msk [vmem:[%s1385_s3 + $0x1d8] sm:$0xff] %vm637_vm2, %v618_v16 }
 0x10f   :  { %663 = vst.msk [vmem:[%s1385_s3 + $0xc8] sm:$0xff] %vm637_vm2, %v482_v17  ;;  %695 = vst.msk [vmem:[%s1385_s3 + $0x1c8] sm:$0xff] %vm637_vm2, %v610_v19 }
 0x111   :  { %v836_v20 = vpop.f32.mrb[28].mxu0  ;;  %v868_v22 = vpop.f32.mrb[28].mxu1 }
 0x112   :  { %v503_v21 = vadd.f32 %v836_v20, %v1060_v34  ;;  %v494_v23 = vpop.f32.mrb[29].mxu0  ;;  %v631_v24 = vadd.f32 %v868_v22, %v1060_v34  ;;  %v622_v26 = vpop.f32.mrb[29].mxu1 }
 0x113   :  { %v495_v25 = vadd.f32 %v1060_v34, %v494_v23  ;;  %v837_v27 = vpop.f32.mrb[30].mxu0  ;;  %v623_v28 = vadd.f32 %v1060_v34, %v622_v26  ;;  %v869_v30 = vpop.f32.mrb[30].mxu1 }
 0x114   :  { %668 = vst.msk [vmem:[%s1385_s3 + $0xf0] sm:$0xff] %vm637_vm2, %v503_v21  ;;  %v506_v29 = vadd.f32 %v837_v27, %v1060_v34  ;;  %v497_v31 = vpop.f32.mrb[31].mxu0  ;;  %700 = vst.msk [vmem:[%s1385_s3 + $0x1f0] sm:$0xff] %vm637_vm2, %v631_v24  ;;  %v634_v32 = vadd.f32 %v869_v30, %v1060_v34  ;;  %v625_v35 = vpop.f32.mrb[31].mxu1 }
 0x115   :  { %666 = vst.msk [vmem:[%s1385_s3 + $0xe0] sm:$0xff] %vm637_vm2, %v495_v25  ;;  %v498_v33 = vadd.f32 %v1060_v34, %v497_v31  ;;  %698 = vst.msk [vmem:[%s1385_s3 + $0x1e0] sm:$0xff] %vm637_vm2, %v623_v28  ;;  %v626_v36 = vadd.f32 %v1060_v34, %v625_v35 }
 0x116   :  { %669 = vst.msk [vmem:[%s1385_s3 + $0xf8] sm:$0xff] %vm637_vm2, %v506_v29  ;;  %701 = vst.msk [vmem:[%s1385_s3 + $0x1f8] sm:$0xff] %vm637_vm2, %v634_v32 }
 0x117   :  { %667 = vst.msk [vmem:[%s1385_s3 + $0xe8] sm:$0xff] %vm637_vm2, %v498_v33  ;;  %699 = vst.msk [vmem:[%s1385_s3 + $0x1e8] sm:$0xff] %vm637_vm2, %v626_v36 }

// kernel: gcb_forward.6
= control target key start
LH: loop header
LB: loop body
LE: loop exit
PB: predicated region body
PF: predicated region fallthrough
CT: control target
= control target key end

     0   :  { %vm798_vm0 = vcmask 326656   ;;  %vm1123_vm1 = vcmask 1043456   ;;  %vm2024_vm2 = vcmask 195584   ;;  %s4469_s1 = inlined_call_operand.vmem [shape: bf16[40,24], index: 1, kind: input, shape index: {}]   ;;  %s4470_s0 = inlined_call_operand.vmem [shape: bf16[1728,40], index: 0, kind: input, shape index: {}]   ;;  %s4471_s2 = inlined_call_operand.vmem [shape: f32[1,24], index: 2, kind: input, shape index: {}]   ;;  %s4472_s3 = inlined_call_operand.vmem [shape: f32[1728,24], index: 3, kind: output, shape index: {}]  }
   0x1   :  { %v2806_v0 = vld [vmem:[%s4469_s1] sm:$0xff]   ;;  %v2807_v1 = vld [vmem:[%s4469_s1 + $0x8] sm:$0xff]   ;;  %v2808_v2 = vld [vmem:[%s4469_s1 + $0x10] ss:$0 sps:$4 sm:$0xff]  }
   0x2   :  { %2576 = vmatprep.subr.bf16.mxu0 %v2806_v0  ;;  %2798 = vmatprep.subr.bf16.mxu1 %v2806_v0  ;;  %v2809_v3 = vld [vmem:[%s4470_s0] sm:$0xff]   ;;  %v2810_v4 = vld [vmem:[%s4470_s0 + $0x1b0] sm:$0xff]   ;;  %v1125_v5 = vsel %vm1123_vm1, %v2808_v2, 0  ;;  %v2811_v6 = vld [vmem:[%s4470_s0 + $0x8] sm:$0xff]  }
   0x3   :  { %2577 = vmatpush3.bf16.msra.mxu0 %v2806_v0  ;;  %2801 = vmatpush3.bf16.msra.mxu1 %v2806_v0  ;;  %v2812_v7 = vld [vmem:[%s4470_s0 + $0x1b8] sm:$0xff]   ;;  %v2813_v8 = vld [vmem:[%s4470_s0 + $0x10] sm:$0xff]   ;;  %v2814_v9 = vld [vmem:[%s4470_s0 + $0x1c0] sm:$0xff]  }
   0x4   :  { %2578 = vmatprep.subr.bf16.mxu0 %v2807_v1  ;;  %2799 = vmatprep.subr.bf16.mxu1 %v2807_v1  ;;  %v2815_v10 = vld [vmem:[%s4470_s0 + $0x18] sm:$0xff]   ;;  %v2816_v11 = vld [vmem:[%s4470_s0 + $0x1c8] sm:$0xff]   ;;  %v2817_v12 = vld [vmem:[%s4470_s0 + $0x20] sm:$0xff]  }
   0x5   :  { %2582 = vmatprep.mubr.msk.bf16.mxu0 %vm798_vm0, %v2809_v3  ;;  %2690 = vmatprep.mubr.msk.bf16.mxu1 %vm798_vm0, %v2810_v4  ;;  %v2818_v13 = vld [vmem:[%s4470_s0 + $0x1d0] sm:$0xff]   ;;  %v2819_v14 = vld [vmem:[%s4470_s0 + $0x28] sm:$0xff]   ;;  %v2820_v15 = vld [vmem:[%s4470_s0 + $0x1d8] sm:$0xff]  }
   0x6   :  { %v2821_v16 = vld [vmem:[%s4470_s0 + $0x30] sm:$0xff]   ;;  %v2822_v17 = vld [vmem:[%s4470_s0 + $0x1e0] sm:$0xff]   ;;  %v2823_v18 = vld [vmem:[%s4470_s0 + $0x38] sm:$0xff]  }
   0x7   :  { %2579 = vmatpush3.bf16.msra.mxu0 %v2807_v1  ;;  %2802 = vmatpush3.bf16.msra.mxu1 %v2807_v1  ;;  %v2824_v19 = vld [vmem:[%s4470_s0 + $0x1e8] sm:$0xff]   ;;  %v2825_v20 = vld [vmem:[%s4470_s0 + $0x40] sm:$0xff]   ;;  %v2826_v21 = vld [vmem:[%s4470_s0 + $0x1f0] sm:$0xff]  }
   0x8   :  { %2804 = vmatprep.subr.msk.bf16.mxu0 %vm1123_vm1, %v2808_v2  ;;  %2805 = vmatprep.subr.msk.bf16.mxu1 %vm1123_vm1, %v2808_v2  ;;  %v2827_v22 = vld [vmem:[%s4470_s0 + $0x48] sm:$0xff]   ;;  %v2828_v23 = vld [vmem:[%s4470_s0 + $0x1f8] sm:$0xff]   ;;  %v2829_v24 = vld [vmem:[%s4470_s0 + $0x50] sm:$0xff]  }
   0x9   :  { %v2830_v25 = vld [vmem:[%s4470_s0 + $0x200] sm:$0xff]   ;;  %v2831_v26 = vld [vmem:[%s4470_s0 + $0x58] sm:$0xff]   ;;  %v2832_v27 = vld [vmem:[%s4470_s0 + $0x208] sm:$0xff]  }
   0xa   :  { %v2833_v28 = vld [vmem:[%s4470_s0 + $0x60] sm:$0xff]   ;;  %v2834_v29 = vld [vmem:[%s4470_s0 + $0x210] sm:$0xff]   ;;  %v2835_v30 = vld [vmem:[%s4470_s0 + $0x68] sm:$0xff]  }
   0xb   :  { %2581 = vmatpush3.bf16.msra.mxu0 %v1125_v5  ;;  %2803 = vmatpush3.bf16.msra.mxu1 %v1125_v5  ;;  %v2836_v31 = vld [vmem:[%s4470_s0 + $0x218] sm:$0xff]   ;;  %v2837_v32 = vld [vmem:[%s4470_s0 + $0x70] sm:$0xff]   ;;  %v2838_v33 = vld [vmem:[%s4470_s0 + $0x220] sm:$0xff]  }
   0xc   :  { %v2839_v34 = vld [vmem:[%s4470_s0 + $0x78] sm:$0xff]   ;;  %v2840_v35 = vld [vmem:[%s4470_s0 + $0x228] sm:$0xff]   ;;  %v2841_v36 = vld [vmem:[%s4470_s0 + $0x80] sm:$0xff]  }
   0xd   :  { %v2842_v37 = vld [vmem:[%s4470_s0 + $0x230] sm:$0xff]   ;;  %v2843_v38 = vld [vmem:[%s4470_s0 + $0x88] sm:$0xff]   ;;  %v2844_v39 = vld [vmem:[%s4470_s0 + $0x238] sm:$0xff]  }
   0xe   :  { %2583 = vmatmul.mubr.msk.bf16.vlgmr.msra.gmra.mrb[0].mxu0 %vm798_vm0, %v2811_v6  ;;  %2691 = vmatmul.mubr.msk.bf16.vlgmr.msra.gmra.mrb[0].mxu1 %vm798_vm0, %v2812_v7  ;;  %v2845_v40 = vld [vmem:[%s4470_s0 + $0x90] sm:$0xff]   ;;  %v2846_v41 = vld [vmem:[%s4470_s0 + $0x240] sm:$0xff]   ;;  %v2847_v42 = vld [vmem:[%s4470_s0 + $0x98] sm:$0xff]  }
   0xf   :  { %2586 = vmatprep.mubr.msk.bf16.mxu0 %vm798_vm0, %v2813_v8  ;;  %2694 = vmatprep.mubr.msk.bf16.mxu1 %vm798_vm0, %v2814_v9  ;;  %v2848_v43 = vld [vmem:[%s4470_s0 + $0x248] sm:$0xff]   ;;  %v2849_v44 = vld [vmem:[%s4470_s0 + $0xa0] sm:$0xff]   ;;  %v2850_v45 = vld [vmem:[%s4470_s0 + $0x250] sm:$0xff]  }
  0x10   :  { %v2851_v46 = vld [vmem:[%s4470_s0 + $0xa8] sm:$0xff]   ;;  %v2852_v47 = vld [vmem:[%s4470_s0 + $0x258] sm:$0xff]   ;;  %v2853_v48 = vld [vmem:[%s4470_s0 + $0xb0] sm:$0xff]  }
  0x11   :  { %v2854_v49 = vld [vmem:[%s4470_s0 + $0x260] sm:$0xff]   ;;  %v2855_v50 = vld [vmem:[%s4470_s0 + $0xb8] sm:$0xff]   ;;  %v2856_v51 = vld [vmem:[%s4470_s0 + $0x268] sm:$0xff]  }
  0x12   :  { %v2857_v52 = vld [vmem:[%s4470_s0 + $0xc0] sm:$0xff]   ;;  %v2858_v53 = vld [vmem:[%s4470_s0 + $0x270] sm:$0xff]   ;;  %v2859_v54 = vld [vmem:[%s4470_s0 + $0xc8] sm:$0xff]  }
  0x13   :  { %v2860_v55 = vld [vmem:[%s4470_s0 + $0x278] sm:$0xff]   ;;  %v2861_v56 = vld [vmem:[%s4470_s0 + $0xd0] sm:$0xff]   ;;  %v2862_v57 = vld [vmem:[%s4470_s0 + $0x280] sm:$0xff]  }
  0x14   :  { %v2863_v58 = vld [vmem:[%s4470_s0 + $0xd8] sm:$0xff]   ;;  %v2864_v59 = vld [vmem:[%s4470_s0 + $0x288] sm:$0xff]   ;;  %v2865_v60 = vld [vmem:[%s4470_s0 + $0xe0] sm:$0xff]  }
  0x15   :  { %v2866_v61 = vld [vmem:[%s4470_s0 + $0x290] sm:$0xff]   ;;  %v2867_v62 = vld [vmem:[%s4470_s0 + $0xe8] sm:$0xff]   ;;  %v2868_v63 = vld [vmem:[%s4470_s0 + $0x298] sm:$0xff]  }
  0x16   :  { %2587 = vmatmul.mubr.msk.bf16.gmra.mrb[4].mxu0 %vm798_vm0, %v2815_v10  ;;  %2695 = vmatmul.mubr.msk.bf16.gmra.mrb[4].mxu1 %vm798_vm0, %v2816_v11  ;;  %v2869_v0 = vld [vmem:[%s4470_s0 + $0xf0] sm:$0xff]   ;;  %v2870_v1 = vld [vmem:[%s4470_s0 + $0x2a0] sm:$0xff]   ;;  %v2871_v2 = vld [vmem:[%s4470_s0 + $0xf8] sm:$0xff]  }
  0x17   :  { %2590 = vmatprep.mubr.msk.bf16.mxu0 %vm798_vm0, %v2817_v12  ;;  %2698 = vmatprep.mubr.msk.bf16.mxu1 %vm798_vm0, %v2818_v13  ;;  %v2872_v3 = vld [vmem:[%s4470_s0 + $0x2a8] sm:$0xff]   ;;  %v2873_v4 = vld [vmem:[%s4470_s0 + $0x100] sm:$0xff]   ;;  %v2874_v5 = vld [vmem:[%s4470_s0 + $0x2b0] sm:$0xff]  }
  0x18   :  { %v2875_v6 = vld [vmem:[%s4470_s0 + $0x108] sm:$0xff]   ;;  %v2876_v7 = vld [vmem:[%s4470_s0 + $0x2b8] sm:$0xff]   ;;  %v2877_v8 = vld [vmem:[%s4470_s0 + $0x110] sm:$0xff]  }
  0x19   :  { %v2878_v9 = vld [vmem:[%s4470_s0 + $0x2c0] sm:$0xff]   ;;  %v2879_v10 = vld [vmem:[%s4470_s0 + $0x118] sm:$0xff]   ;;  %v2880_v11 = vld [vmem:[%s4470_s0 + $0x2c8] sm:$0xff]  }
  0x1a   :  { %v2881_v12 = vld [vmem:[%s4470_s0 + $0x120] sm:$0xff]   ;;  %v2882_v13 = vld [vmem:[%s4470_s0 + $0x2d0] sm:$0xff]  }
  0x1e   :  { %2591 = vmatmul.mubr.msk.bf16.gmra.mrb[8].mxu0 %vm798_vm0, %v2819_v14  ;;  %2699 = vmatmul.mubr.msk.bf16.gmra.mrb[8].mxu1 %vm798_vm0, %v2820_v15  ;;  %v2883_v14 = vld [vmem:[%s4470_s0 + $0x128] sm:$0xff]   ;;  %v2884_v15 = vld [vmem:[%s4470_s0 + $0x2d8] sm:$0xff]  }
  0x1f   :  { %2594 = vmatprep.mubr.msk.bf16.mxu0 %vm798_vm0, %v2821_v16  ;;  %2702 = vmatprep.mubr.msk.bf16.mxu1 %vm798_vm0, %v2822_v17  ;;  %v2885_v16 = vld [vmem:[%s4470_s0 + $0x130] sm:$0xff]   ;;  %v2886_v17 = vld [vmem:[%s4470_s0 + $0x2e0] sm:$0xff]  }
  0x26   :  { %2595 = vmatmul.mubr.msk.bf16.gmra.mrb[12].mxu0 %vm798_vm0, %v2823_v18  ;;  %2703 = vmatmul.mubr.msk.bf16.gmra.mrb[12].mxu1 %vm798_vm0, %v2824_v19  ;;  %v2887_v18 = vld [vmem:[%s4470_s0 + $0x138] sm:$0xff]   ;;  %v2888_v19 = vld [vmem:[%s4470_s0 + $0x2e8] sm:$0xff]  }
  0x27   :  { %2598 = vmatprep.mubr.msk.bf16.mxu0 %vm798_vm0, %v2825_v20  ;;  %2706 = vmatprep.mubr.msk.bf16.mxu1 %vm798_vm0, %v2826_v21  ;;  %v2889_v20 = vld [vmem:[%s4470_s0 + $0x140] sm:$0xff]   ;;  %v2890_v21 = vld [vmem:[%s4470_s0 + $0x2f0] sm:$0xff]  }
  0x2e   :  { %2599 = vmatmul.mubr.msk.bf16.gmra.mrb[16].mxu0 %vm798_vm0, %v2827_v22  ;;  %2707 = vmatmul.mubr.msk.bf16.gmra.mrb[16].mxu1 %vm798_vm0, %v2828_v23  ;;  %v2891_v22 = vld [vmem:[%s4470_s0 + $0x148] sm:$0xff]   ;;  %v2892_v23 = vld [vmem:[%s4470_s0 + $0x2f8] sm:$0xff]  }
  0x2f   :  { %2602 = vmatprep.mubr.msk.bf16.mxu0 %vm798_vm0, %v2829_v24  ;;  %2710 = vmatprep.mubr.msk.bf16.mxu1 %vm798_vm0, %v2830_v25  ;;  %v2893_v24 = vld [vmem:[%s4470_s0 + $0x150] sm:$0xff]   ;;  %v2894_v25 = vld [vmem:[%s4470_s0 + $0x300] sm:$0xff]  }
  0x36   :  { %2603 = vmatmul.mubr.msk.bf16.gmra.mrb[20].mxu0 %vm798_vm0, %v2831_v26  ;;  %2711 = vmatmul.mubr.msk.bf16.gmra.mrb[20].mxu1 %vm798_vm0, %v2832_v27  ;;  %v2895_v26 = vld [vmem:[%s4470_s0 + $0x158] sm:$0xff]   ;;  %v2896_v27 = vld [vmem:[%s4470_s0 + $0x308] sm:$0xff]  }
  0x37   :  { %2606 = vmatprep.mubr.msk.bf16.mxu0 %vm798_vm0, %v2833_v28  ;;  %2714 = vmatprep.mubr.msk.bf16.mxu1 %vm798_vm0, %v2834_v29  ;;  %v2897_v28 = vld [vmem:[%s4470_s0 + $0x160] sm:$0xff]   ;;  %v2898_v29 = vld [vmem:[%s4470_s0 + $0x310] sm:$0xff]  }
  0x3e   :  { %2607 = vmatmul.mubr.msk.bf16.gmra.mrb[24].mxu0 %vm798_vm0, %v2835_v30  ;;  %2715 = vmatmul.mubr.msk.bf16.gmra.mrb[24].mxu1 %vm798_vm0, %v2836_v31  ;;  %v2899_v30 = vld [vmem:[%s4470_s0 + $0x168] sm:$0xff]   ;;  %v2900_v31 = vld [vmem:[%s4470_s0 + $0x318] sm:$0xff]  }
  0x3f   :  { %2610 = vmatprep.mubr.msk.bf16.mxu0 %vm798_vm0, %v2837_v32  ;;  %2718 = vmatprep.mubr.msk.bf16.mxu1 %vm798_vm0, %v2838_v33  ;;  %v2901_v32 = vld [vmem:[%s4470_s0 + $0x170] sm:$0xff]   ;;  %v2902_v33 = vld [vmem:[%s4470_s0 + $0x320] sm:$0xff]  }
  0x46   :  { %2611 = vmatmul.mubr.msk.bf16.gmra.mrb[28].mxu0 %vm798_vm0, %v2839_v34  ;;  %2719 = vmatmul.mubr.msk.bf16.gmra.mrb[28].mxu1 %vm798_vm0, %v2840_v35  ;;  %v2903_v34 = vld [vmem:[%s4470_s0 + $0x178] sm:$0xff]   ;;  %v2904_v35 = vld [vmem:[%s4470_s0 + $0x328] sm:$0xff]  }
  0x47   :  { %2614 = vmatprep.mubr.msk.bf16.mxu0 %vm798_vm0, %v2841_v36  ;;  %2722 = vmatprep.mubr.msk.bf16.mxu1 %vm798_vm0, %v2842_v37  ;;  %v2905_v36 = vld [vmem:[%s4470_s0 + $0x180] sm:$0xff]   ;;  %v2906_v37 = vld [vmem:[%s4470_s0 + $0x330] sm:$0xff]  }
  0x4e   :  { %2615 = vmatmul.mubr.msk.bf16.gmra.mrb[32].mxu0 %vm798_vm0, %v2843_v38  ;;  %2723 = vmatmul.mubr.msk.bf16.gmra.mrb[32].mxu1 %vm798_vm0, %v2844_v39  ;;  %v2907_v38 = vld [vmem:[%s4470_s0 + $0x188] sm:$0xff]   ;;  %v2908_v39 = vld [vmem:[%s4470_s0 + $0x338] sm:$0xff]  }
  0x4f   :  { %2618 = vmatprep.mubr.msk.bf16.mxu0 %vm798_vm0, %v2845_v40  ;;  %2726 = vmatprep.mubr.msk.bf16.mxu1 %vm798_vm0, %v2846_v41  ;;  %v2909_v40 = vld [vmem:[%s4470_s0 + $0x190] sm:$0xff]   ;;  %v2910_v41 = vld [vmem:[%s4470_s0 + $0x340] sm:$0xff]  }
  0x56   :  { %2619 = vmatmul.mubr.msk.bf16.gmra.mrb[36].mxu0 %vm798_vm0, %v2847_v42  ;;  %2727 = vmatmul.mubr.msk.bf16.gmra.mrb[36].mxu1 %vm798_vm0, %v2848_v43  ;;  %v2911_v42 = vld [vmem:[%s4470_s0 + $0x198] sm:$0xff]   ;;  %v2912_v43 = vld [vmem:[%s4470_s0 + $0x348] sm:$0xff]  }
  0x57   :  { %2622 = vmatprep.mubr.msk.bf16.mxu0 %vm798_vm0, %v2849_v44  ;;  %2730 = vmatprep.mubr.msk.bf16.mxu1 %vm798_vm0, %v2850_v45  ;;  %v2913_v44 = vld [vmem:[%s4470_s0 + $0x1a0] sm:$0xff]   ;;  %v2914_v45 = vld [vmem:[%s4470_s0 + $0x350] sm:$0xff]  }
  0x5e   :  { %2623 = vmatmul.mubr.msk.bf16.gmra.mrb[40].mxu0 %vm798_vm0, %v2851_v46  ;;  %2731 = vmatmul.mubr.msk.bf16.gmra.mrb[40].mxu1 %vm798_vm0, %v2852_v47  ;;  %v2915_v46 = vld [vmem:[%s4470_s0 + $0x1a8] sm:$0xff]   ;;  %v2916_v47 = vld [vmem:[%s4470_s0 + $0x358] sm:$0xff]  }
  0x5f   :  { %2626 = vmatprep.mubr.msk.bf16.mxu0 %vm798_vm0, %v2853_v48  ;;  %2734 = vmatprep.mubr.msk.bf16.mxu1 %vm798_vm0, %v2854_v49  ;;  %v3382_v48 = vld [vmem:[%s4471_s2] ss:$0 sm:$0xff] }
  0x66   :  { %2627 = vmatmul.mubr.msk.bf16.gmra.mrb[44].mxu0 %vm798_vm0, %v2855_v50  ;;  %2735 = vmatmul.mubr.msk.bf16.gmra.mrb[44].mxu1 %vm798_vm0, %v2856_v51 }
  0x67   :  { %2630 = vmatprep.mubr.msk.bf16.mxu0 %vm798_vm0, %v2857_v52  ;;  %2738 = vmatprep.mubr.msk.bf16.mxu1 %vm798_vm0, %v2858_v53 }
  0x6e   :  { %2631 = vmatmul.mubr.msk.bf16.gmra.mrb[48].mxu0 %vm798_vm0, %v2859_v54  ;;  %2739 = vmatmul.mubr.msk.bf16.gmra.mrb[48].mxu1 %vm798_vm0, %v2860_v55 }
  0x6f   :  { %2634 = vmatprep.mubr.msk.bf16.mxu0 %vm798_vm0, %v2861_v56  ;;  %2742 = vmatprep.mubr.msk.bf16.mxu1 %vm798_vm0, %v2862_v57 }
  0x76   :  { %2635 = vmatmul.mubr.msk.bf16.gmra.mrb[52].mxu0 %vm798_vm0, %v2863_v58  ;;  %2743 = vmatmul.mubr.msk.bf16.gmra.mrb[52].mxu1 %vm798_vm0, %v2864_v59 }
  0x77   :  { %2638 = vmatprep.mubr.msk.bf16.mxu0 %vm798_vm0, %v2865_v60  ;;  %2746 = vmatprep.mubr.msk.bf16.mxu1 %vm798_vm0, %v2866_v61 }
  0x7e   :  { %2639 = vmatmul.mubr.msk.bf16.gmra.mrb[56].mxu0 %vm798_vm0, %v2867_v62  ;;  %2747 = vmatmul.mubr.msk.bf16.gmra.mrb[56].mxu1 %vm798_vm0, %v2868_v63 }
  0x7f   :  { %2642 = vmatprep.mubr.msk.bf16.mxu0 %vm798_vm0, %v2869_v0  ;;  %2750 = vmatprep.mubr.msk.bf16.mxu1 %vm798_vm0, %v2870_v1 }
  0x86   :  { %2643 = vmatmul.mubr.msk.bf16.gmra.mrb[60].mxu0 %vm798_vm0, %v2871_v2  ;;  %2751 = vmatmul.mubr.msk.bf16.gmra.mrb[60].mxu1 %vm798_vm0, %v2872_v3 }
  0x87   :  { %2646 = vmatprep.mubr.msk.bf16.mxu0 %vm798_vm0, %v2873_v4  ;;  %2754 = vmatprep.mubr.msk.bf16.mxu1 %vm798_vm0, %v2874_v5 }
  0x8e   :  { %2647 = vmatmul.mubr.msk.bf16.gmra.mrb[64].mxu0 %vm798_vm0, %v2875_v6  ;;  %2755 = vmatmul.mubr.msk.bf16.gmra.mrb[64].mxu1 %vm798_vm0, %v2876_v7 }
  0x8f   :  { %2650 = vmatprep.mubr.msk.bf16.mxu0 %vm798_vm0, %v2877_v8  ;;  %2758 = vmatprep.mubr.msk.bf16.mxu1 %vm798_vm0, %v2878_v9 }
  0x96   :  { %2651 = vmatmul.mubr.msk.bf16.gmra.mrb[68].mxu0 %vm798_vm0, %v2879_v10  ;;  %2759 = vmatmul.mubr.msk.bf16.gmra.mrb[68].mxu1 %vm798_vm0, %v2880_v11 }
  0x97   :  { %2654 = vmatprep.mubr.msk.bf16.mxu0 %vm798_vm0, %v2881_v12  ;;  %2762 = vmatprep.mubr.msk.bf16.mxu1 %vm798_vm0, %v2882_v13 }
  0x9e   :  { %2655 = vmatmul.mubr.msk.bf16.gmra.mrb[72].mxu0 %vm798_vm0, %v2883_v14  ;;  %2763 = vmatmul.mubr.msk.bf16.gmra.mrb[72].mxu1 %vm798_vm0, %v2884_v15 }
  0x9f   :  { %2658 = vmatprep.mubr.msk.bf16.mxu0 %vm798_vm0, %v2885_v16  ;;  %2766 = vmatprep.mubr.msk.bf16.mxu1 %vm798_vm0, %v2886_v17 }
  0xa6   :  { %2659 = vmatmul.mubr.msk.bf16.gmra.mrb[76].mxu0 %vm798_vm0, %v2887_v18  ;;  %2767 = vmatmul.mubr.msk.bf16.gmra.mrb[76].mxu1 %vm798_vm0, %v2888_v19 }
  0xa7   :  { %2662 = vmatprep.mubr.msk.bf16.mxu0 %vm798_vm0, %v2889_v20  ;;  %2770 = vmatprep.mubr.msk.bf16.mxu1 %vm798_vm0, %v2890_v21 }
  0xae   :  { %2663 = vmatmul.mubr.msk.bf16.gmra.mrb[80].mxu0 %vm798_vm0, %v2891_v22  ;;  %2771 = vmatmul.mubr.msk.bf16.gmra.mrb[80].mxu1 %vm798_vm0, %v2892_v23 }
  0xaf   :  { %2666 = vmatprep.mubr.msk.bf16.mxu0 %vm798_vm0, %v2893_v24  ;;  %2774 = vmatprep.mubr.msk.bf16.mxu1 %vm798_vm0, %v2894_v25 }
  0xb6   :  { %2667 = vmatmul.mubr.msk.bf16.gmra.mrb[84].mxu0 %vm798_vm0, %v2895_v26  ;;  %2775 = vmatmul.mubr.msk.bf16.gmra.mrb[84].mxu1 %vm798_vm0, %v2896_v27 }
  0xb7   :  { %2670 = vmatprep.mubr.msk.bf16.mxu0 %vm798_vm0, %v2897_v28  ;;  %2778 = vmatprep.mubr.msk.bf16.mxu1 %vm798_vm0, %v2898_v29 }
  0xbe   :  { %2671 = vmatmul.mubr.msk.bf16.gmra.mrb[88].mxu0 %vm798_vm0, %v2899_v30  ;;  %2779 = vmatmul.mubr.msk.bf16.gmra.mrb[88].mxu1 %vm798_vm0, %v2900_v31 }
  0xbf   :  { %2674 = vmatprep.mubr.msk.bf16.mxu0 %vm798_vm0, %v2901_v32  ;;  %2782 = vmatprep.mubr.msk.bf16.mxu1 %vm798_vm0, %v2902_v33 }
  0xc6   :  { %2675 = vmatmul.mubr.msk.bf16.gmra.mrb[92].mxu0 %vm798_vm0, %v2903_v34  ;;  %2783 = vmatmul.mubr.msk.bf16.gmra.mrb[92].mxu1 %vm798_vm0, %v2904_v35 }
  0xc7   :  { %2678 = vmatprep.mubr.msk.bf16.mxu0 %vm798_vm0, %v2905_v36  ;;  %2786 = vmatprep.mubr.msk.bf16.mxu1 %vm798_vm0, %v2906_v37 }
  0xce   :  { %2679 = vmatmul.mubr.msk.bf16.gmra.mrb[96].mxu0 %vm798_vm0, %v2907_v38  ;;  %2787 = vmatmul.mubr.msk.bf16.gmra.mrb[96].mxu1 %vm798_vm0, %v2908_v39 }
  0xcf   :  { %2682 = vmatprep.mubr.msk.bf16.mxu0 %vm798_vm0, %v2909_v40  ;;  %2790 = vmatprep.mubr.msk.bf16.mxu1 %vm798_vm0, %v2910_v41 }
  0xd6   :  { %2683 = vmatmul.mubr.msk.bf16.gmra.mrb[100].mxu0 %vm798_vm0, %v2911_v42  ;;  %2791 = vmatmul.mubr.msk.bf16.gmra.mrb[100].mxu1 %vm798_vm0, %v2912_v43 }
  0xd7   :  { %2686 = vmatprep.mubr.msk.bf16.mxu0 %vm798_vm0, %v2913_v44  ;;  %2794 = vmatprep.mubr.msk.bf16.mxu1 %vm798_vm0, %v2914_v45 }
  0xde   :  { %2687 = vmatmul.mubr.msk.bf16.gmra.mrb[104].mxu0 %vm798_vm0, %v2915_v46  ;;  %2795 = vmatmul.mubr.msk.bf16.gmra.mrb[104].mxu1 %vm798_vm0, %v2916_v47 }
  0xe1   :  { %v2584_v49 = vpop.f32.mrb[0].mxu0  ;;  %v2692_v50 = vpop.f32.mrb[0].mxu1 }
  0xe2   :  { %v1170_v51 = vadd.f32 %v2584_v49, %v3382_v48  ;;  %v1602_v52 = vadd.f32 %v2692_v50, %v3382_v48  ;;  %v1161_v53 = vpop.f32.mrb[1].mxu0  ;;  %v1593_v54 = vpop.f32.mrb[1].mxu1 }
  0xe3   :  { %v1162_v55 = vadd.f32 %v3382_v48, %v1161_v53  ;;  %v1594_v56 = vadd.f32 %v3382_v48, %v1593_v54  ;;  %v2585_v57 = vpop.f32.mrb[2].mxu0  ;;  %v2693_v58 = vpop.f32.mrb[2].mxu1 }
  0xe4   :  { %2027 = vst.msk [vmem:[%s4472_s3 + $0x10] sm:$0xff] %vm2024_vm2, %v1170_v51  ;;  %2135 = vst.msk [vmem:[%s4472_s3 + $0x370] sm:$0xff] %vm2024_vm2, %v1602_v52  ;;  %v1173_v59 = vadd.f32 %v2585_v57, %v3382_v48  ;;  %v1605_v60 = vadd.f32 %v2693_v58, %v3382_v48  ;;  %v1164_v61 = vpop.f32.mrb[3].mxu0  ;;  %v1596_v62 = vpop.f32.mrb[3].mxu1 }
  0xe5   :  { %2025 = vst.msk [vmem:[%s4472_s3] sm:$0xff] %vm2024_vm2, %v1162_v55  ;;  %2133 = vst.msk [vmem:[%s4472_s3 + $0x360] sm:$0xff] %vm2024_vm2, %v1594_v56  ;;  %v1165_v63 = vadd.f32 %v3382_v48, %v1164_v61  ;;  %v1597_v0 = vadd.f32 %v3382_v48, %v1596_v62 }
  0xe6   :  { %2028 = vst.msk [vmem:[%s4472_s3 + $0x18] sm:$0xff] %vm2024_vm2, %v1173_v59  ;;  %2136 = vst.msk [vmem:[%s4472_s3 + $0x378] sm:$0xff] %vm2024_vm2, %v1605_v60 }
  0xe7   :  { %2026 = vst.msk [vmem:[%s4472_s3 + $0x8] sm:$0xff] %vm2024_vm2, %v1165_v63  ;;  %2134 = vst.msk [vmem:[%s4472_s3 + $0x368] sm:$0xff] %vm2024_vm2, %v1597_v0 }
  0xe9   :  { %v2588_v1 = vpop.f32.mrb[4].mxu0  ;;  %v2696_v2 = vpop.f32.mrb[4].mxu1 }
  0xea   :  { %v1186_v3 = vadd.f32 %v2588_v1, %v3382_v48  ;;  %v1618_v4 = vadd.f32 %v2696_v2, %v3382_v48  ;;  %v1177_v5 = vpop.f32.mrb[5].mxu0  ;;  %v1609_v6 = vpop.f32.mrb[5].mxu1 }
  0xeb   :  { %v1178_v7 = vadd.f32 %v3382_v48, %v1177_v5  ;;  %v1610_v8 = vadd.f32 %v3382_v48, %v1609_v6  ;;  %v2589_v9 = vpop.f32.mrb[6].mxu0  ;;  %v2697_v10 = vpop.f32.mrb[6].mxu1 }
  0xec   :  { %2031 = vst.msk [vmem:[%s4472_s3 + $0x30] sm:$0xff] %vm2024_vm2, %v1186_v3  ;;  %2139 = vst.msk [vmem:[%s4472_s3 + $0x390] sm:$0xff] %vm2024_vm2, %v1618_v4  ;;  %v1189_v11 = vadd.f32 %v2589_v9, %v3382_v48  ;;  %v1621_v12 = vadd.f32 %v2697_v10, %v3382_v48  ;;  %v1180_v13 = vpop.f32.mrb[7].mxu0  ;;  %v1612_v14 = vpop.f32.mrb[7].mxu1 }
  0xed   :  { %2029 = vst.msk [vmem:[%s4472_s3 + $0x20] sm:$0xff] %vm2024_vm2, %v1178_v7  ;;  %2137 = vst.msk [vmem:[%s4472_s3 + $0x380] sm:$0xff] %vm2024_vm2, %v1610_v8  ;;  %v1181_v15 = vadd.f32 %v3382_v48, %v1180_v13  ;;  %v1613_v16 = vadd.f32 %v3382_v48, %v1612_v14 }
  0xee   :  { %2032 = vst.msk [vmem:[%s4472_s3 + $0x38] sm:$0xff] %vm2024_vm2, %v1189_v11  ;;  %2140 = vst.msk [vmem:[%s4472_s3 + $0x398] sm:$0xff] %vm2024_vm2, %v1621_v12 }
  0xef   :  { %2030 = vst.msk [vmem:[%s4472_s3 + $0x28] sm:$0xff] %vm2024_vm2, %v1181_v15  ;;  %2138 = vst.msk [vmem:[%s4472_s3 + $0x388] sm:$0xff] %vm2024_vm2, %v1613_v16 }
  0xf1   :  { %v2592_v17 = vpop.f32.mrb[8].mxu0  ;;  %v2700_v18 = vpop.f32.mrb[8].mxu1 }
  0xf2   :  { %v1202_v19 = vadd.f32 %v2592_v17, %v3382_v48  ;;  %v1634_v20 = vadd.f32 %v2700_v18, %v3382_v48  ;;  %v1193_v21 = vpop.f32.mrb[9].mxu0  ;;  %v1625_v22 = vpop.f32.mrb[9].mxu1 }
  0xf3   :  { %v1194_v23 = vadd.f32 %v3382_v48, %v1193_v21  ;;  %v1626_v24 = vadd.f32 %v3382_v48, %v1625_v22  ;;  %v2593_v25 = vpop.f32.mrb[10].mxu0  ;;  %v2701_v26 = vpop.f32.mrb[10].mxu1 }
  0xf4   :  { %2035 = vst.msk [vmem:[%s4472_s3 + $0x50] sm:$0xff] %vm2024_vm2, %v1202_v19  ;;  %2143 = vst.msk [vmem:[%s4472_s3 + $0x3b0] sm:$0xff] %vm2024_vm2, %v1634_v20  ;;  %v1205_v27 = vadd.f32 %v2593_v25, %v3382_v48  ;;  %v1637_v28 = vadd.f32 %v2701_v26, %v3382_v48  ;;  %v1196_v29 = vpop.f32.mrb[11].mxu0  ;;  %v1628_v30 = vpop.f32.mrb[11].mxu1 }
  0xf5   :  { %2033 = vst.msk [vmem:[%s4472_s3 + $0x40] sm:$0xff] %vm2024_vm2, %v1194_v23  ;;  %2141 = vst.msk [vmem:[%s4472_s3 + $0x3a0] sm:$0xff] %vm2024_vm2, %v1626_v24  ;;  %v1197_v31 = vadd.f32 %v3382_v48, %v1196_v29  ;;  %v1629_v32 = vadd.f32 %v3382_v48, %v1628_v30 }
  0xf6   :  { %2036 = vst.msk [vmem:[%s4472_s3 + $0x58] sm:$0xff] %vm2024_vm2, %v1205_v27  ;;  %2144 = vst.msk [vmem:[%s4472_s3 + $0x3b8] sm:$0xff] %vm2024_vm2, %v1637_v28 }
  0xf7   :  { %2034 = vst.msk [vmem:[%s4472_s3 + $0x48] sm:$0xff] %vm2024_vm2, %v1197_v31  ;;  %2142 = vst.msk [vmem:[%s4472_s3 + $0x3a8] sm:$0xff] %vm2024_vm2, %v1629_v32 }
  0xf9   :  { %v2596_v33 = vpop.f32.mrb[12].mxu0  ;;  %v2704_v34 = vpop.f32.mrb[12].mxu1 }
  0xfa   :  { %v1218_v35 = vadd.f32 %v2596_v33, %v3382_v48  ;;  %v1650_v36 = vadd.f32 %v2704_v34, %v3382_v48  ;;  %v1209_v37 = vpop.f32.mrb[13].mxu0  ;;  %v1641_v38 = vpop.f32.mrb[13].mxu1 }
  0xfb   :  { %v1210_v39 = vadd.f32 %v3382_v48, %v1209_v37  ;;  %v1642_v40 = vadd.f32 %v3382_v48, %v1641_v38  ;;  %v2597_v41 = vpop.f32.mrb[14].mxu0  ;;  %v2705_v42 = vpop.f32.mrb[14].mxu1 }
  0xfc   :  { %2039 = vst.msk [vmem:[%s4472_s3 + $0x70] sm:$0xff] %vm2024_vm2, %v1218_v35  ;;  %2147 = vst.msk [vmem:[%s4472_s3 + $0x3d0] sm:$0xff] %vm2024_vm2, %v1650_v36  ;;  %v1221_v43 = vadd.f32 %v2597_v41, %v3382_v48  ;;  %v1653_v44 = vadd.f32 %v2705_v42, %v3382_v48  ;;  %v1212_v45 = vpop.f32.mrb[15].mxu0  ;;  %v1644_v46 = vpop.f32.mrb[15].mxu1 }
  0xfd   :  { %2037 = vst.msk [vmem:[%s4472_s3 + $0x60] sm:$0xff] %vm2024_vm2, %v1210_v39  ;;  %2145 = vst.msk [vmem:[%s4472_s3 + $0x3c0] sm:$0xff] %vm2024_vm2, %v1642_v40  ;;  %v1213_v47 = vadd.f32 %v3382_v48, %v1212_v45  ;;  %v1645_v49 = vadd.f32 %v3382_v48, %v1644_v46 }
  0xfe   :  { %2040 = vst.msk [vmem:[%s4472_s3 + $0x78] sm:$0xff] %vm2024_vm2, %v1221_v43  ;;  %2148 = vst.msk [vmem:[%s4472_s3 + $0x3d8] sm:$0xff] %vm2024_vm2, %v1653_v44 }
  0xff   :  { %2038 = vst.msk [vmem:[%s4472_s3 + $0x68] sm:$0xff] %vm2024_vm2, %v1213_v47  ;;  %2146 = vst.msk [vmem:[%s4472_s3 + $0x3c8] sm:$0xff] %vm2024_vm2, %v1645_v49 }
 0x101   :  { %v2600_v50 = vpop.f32.mrb[16].mxu0  ;;  %v2708_v51 = vpop.f32.mrb[16].mxu1 }
 0x102   :  { %v1234_v52 = vadd.f32 %v2600_v50, %v3382_v48  ;;  %v1666_v53 = vadd.f32 %v2708_v51, %v3382_v48  ;;  %v1225_v54 = vpop.f32.mrb[17].mxu0  ;;  %v1657_v55 = vpop.f32.mrb[17].mxu1 }
 0x103   :  { %v1226_v56 = vadd.f32 %v3382_v48, %v1225_v54  ;;  %v1658_v57 = vadd.f32 %v3382_v48, %v1657_v55  ;;  %v2601_v58 = vpop.f32.mrb[18].mxu0  ;;  %v2709_v59 = vpop.f32.mrb[18].mxu1 }
 0x104   :  { %2043 = vst.msk [vmem:[%s4472_s3 + $0x90] sm:$0xff] %vm2024_vm2, %v1234_v52  ;;  %2151 = vst.msk [vmem:[%s4472_s3 + $0x3f0] sm:$0xff] %vm2024_vm2, %v1666_v53  ;;  %v1237_v60 = vadd.f32 %v2601_v58, %v3382_v48  ;;  %v1669_v61 = vadd.f32 %v2709_v59, %v3382_v48  ;;  %v1228_v62 = vpop.f32.mrb[19].mxu0  ;;  %v1660_v63 = vpop.f32.mrb[19].mxu1 }
 0x105   :  { %2041 = vst.msk [vmem:[%s4472_s3 + $0x80] sm:$0xff] %vm2024_vm2, %v1226_v56  ;;  %2149 = vst.msk [vmem:[%s4472_s3 + $0x3e0] sm:$0xff] %vm2024_vm2, %v1658_v57  ;;  %v1229_v0 = vadd.f32 %v3382_v48, %v1228_v62  ;;  %v1661_v1 = vadd.f32 %v3382_v48, %v1660_v63 }
 0x106   :  { %2044 = vst.msk [vmem:[%s4472_s3 + $0x98] sm:$0xff] %vm2024_vm2, %v1237_v60  ;;  %2152 = vst.msk [vmem:[%s4472_s3 + $0x3f8] sm:$0xff] %vm2024_vm2, %v1669_v61 }
 0x107   :  { %2042 = vst.msk [vmem:[%s4472_s3 + $0x88] sm:$0xff] %vm2024_vm2, %v1229_v0  ;;  %2150 = vst.msk [vmem:[%s4472_s3 + $0x3e8] sm:$0xff] %vm2024_vm2, %v1661_v1 }
 0x109   :  { %v2604_v2 = vpop.f32.mrb[20].mxu0  ;;  %v2712_v3 = vpop.f32.mrb[20].mxu1 }
 0x10a   :  { %v1250_v4 = vadd.f32 %v2604_v2, %v3382_v48  ;;  %v1682_v5 = vadd.f32 %v2712_v3, %v3382_v48  ;;  %v1241_v6 = vpop.f32.mrb[21].mxu0  ;;  %v1673_v7 = vpop.f32.mrb[21].mxu1 }
 0x10b   :  { %v1242_v8 = vadd.f32 %v3382_v48, %v1241_v6  ;;  %v1674_v9 = vadd.f32 %v3382_v48, %v1673_v7  ;;  %v2605_v10 = vpop.f32.mrb[22].mxu0  ;;  %v2713_v11 = vpop.f32.mrb[22].mxu1 }
 0x10c   :  { %2047 = vst.msk [vmem:[%s4472_s3 + $0xb0] sm:$0xff] %vm2024_vm2, %v1250_v4  ;;  %2155 = vst.msk [vmem:[%s4472_s3 + $0x410] sm:$0xff] %vm2024_vm2, %v1682_v5  ;;  %v1253_v12 = vadd.f32 %v2605_v10, %v3382_v48  ;;  %v1685_v13 = vadd.f32 %v2713_v11, %v3382_v48  ;;  %v1244_v14 = vpop.f32.mrb[23].mxu0  ;;  %v1676_v15 = vpop.f32.mrb[23].mxu1 }
 0x10d   :  { %2045 = vst.msk [vmem:[%s4472_s3 + $0xa0] sm:$0xff] %vm2024_vm2, %v1242_v8  ;;  %2153 = vst.msk [vmem:[%s4472_s3 + $0x400] sm:$0xff] %vm2024_vm2, %v1674_v9  ;;  %v1245_v16 = vadd.f32 %v3382_v48, %v1244_v14  ;;  %v1677_v17 = vadd.f32 %v3382_v48, %v1676_v15 }
 0x10e   :  { %2048 = vst.msk [vmem:[%s4472_s3 + $0xb8] sm:$0xff] %vm2024_vm2, %v1253_v12  ;;  %2156 = vst.msk [vmem:[%s4472_s3 + $0x418] sm:$0xff] %vm2024_vm2, %v1685_v13 }
 0x10f   :  { %2046 = vst.msk [vmem:[%s4472_s3 + $0xa8] sm:$0xff] %vm2024_vm2, %v1245_v16  ;;  %2154 = vst.msk [vmem:[%s4472_s3 + $0x408] sm:$0xff] %vm2024_vm2, %v1677_v17 }
 0x111   :  { %v2608_v18 = vpop.f32.mrb[24].mxu0  ;;  %v2716_v19 = vpop.f32.mrb[24].mxu1 }
 0x112   :  { %v1266_v20 = vadd.f32 %v2608_v18, %v3382_v48  ;;  %v1698_v21 = vadd.f32 %v2716_v19, %v3382_v48  ;;  %v1257_v22 = vpop.f32.mrb[25].mxu0  ;;  %v1689_v23 = vpop.f32.mrb[25].mxu1 }
 0x113   :  { %v1258_v24 = vadd.f32 %v3382_v48, %v1257_v22  ;;  %v1690_v25 = vadd.f32 %v3382_v48, %v1689_v23  ;;  %v2609_v26 = vpop.f32.mrb[26].mxu0  ;;  %v2717_v27 = vpop.f32.mrb[26].mxu1 }
 0x114   :  { %2051 = vst.msk [vmem:[%s4472_s3 + $0xd0] sm:$0xff] %vm2024_vm2, %v1266_v20  ;;  %2159 = vst.msk [vmem:[%s4472_s3 + $0x430] sm:$0xff] %vm2024_vm2, %v1698_v21  ;;  %v1269_v28 = vadd.f32 %v2609_v26, %v3382_v48  ;;  %v1701_v29 = vadd.f32 %v2717_v27, %v3382_v48  ;;  %v1260_v30 = vpop.f32.mrb[27].mxu0  ;;  %v1692_v31 = vpop.f32.mrb[27].mxu1 }
 0x115   :  { %2049 = vst.msk [vmem:[%s4472_s3 + $0xc0] sm:$0xff] %vm2024_vm2, %v1258_v24  ;;  %2157 = vst.msk [vmem:[%s4472_s3 + $0x420] sm:$0xff] %vm2024_vm2, %v1690_v25  ;;  %v1261_v32 = vadd.f32 %v3382_v48, %v1260_v30  ;;  %v1693_v33 = vadd.f32 %v3382_v48, %v1692_v31 }
 0x116   :  { %2052 = vst.msk [vmem:[%s4472_s3 + $0xd8] sm:$0xff] %vm2024_vm2, %v1269_v28  ;;  %2160 = vst.msk [vmem:[%s4472_s3 + $0x438] sm:$0xff] %vm2024_vm2, %v1701_v29 }
 0x117   :  { %2050 = vst.msk [vmem:[%s4472_s3 + $0xc8] sm:$0xff] %vm2024_vm2, %v1261_v32  ;;  %2158 = vst.msk [vmem:[%s4472_s3 + $0x428] sm:$0xff] %vm2024_vm2, %v1693_v33 }
 0x119   :  { %v2612_v34 = vpop.f32.mrb[28].mxu0  ;;  %v2720_v35 = vpop.f32.mrb[28].mxu1 }
 0x11a   :  { %v1282_v36 = vadd.f32 %v2612_v34, %v3382_v48  ;;  %v1714_v37 = vadd.f32 %v2720_v35, %v3382_v48  ;;  %v1273_v38 = vpop.f32.mrb[29].mxu0  ;;  %v1705_v39 = vpop.f32.mrb[29].mxu1 }
 0x11b   :  { %v1274_v40 = vadd.f32 %v3382_v48, %v1273_v38  ;;  %v1706_v41 = vadd.f32 %v3382_v48, %v1705_v39  ;;  %v2613_v42 = vpop.f32.mrb[30].mxu0  ;;  %v2721_v43 = vpop.f32.mrb[30].mxu1 }
 0x11c   :  { %2055 = vst.msk [vmem:[%s4472_s3 + $0xf0] sm:$0xff] %vm2024_vm2, %v1282_v36  ;;  %2163 = vst.msk [vmem:[%s4472_s3 + $0x450] sm:$0xff] %vm2024_vm2, %v1714_v37  ;;  %v1285_v44 = vadd.f32 %v2613_v42, %v3382_v48  ;;  %v1717_v45 = vadd.f32 %v2721_v43, %v3382_v48  ;;  %v1276_v46 = vpop.f32.mrb[31].mxu0  ;;  %v1708_v47 = vpop.f32.mrb[31].mxu1 }
 0x11d   :  { %2053 = vst.msk [vmem:[%s4472_s3 + $0xe0] sm:$0xff] %vm2024_vm2, %v1274_v40  ;;  %2161 = vst.msk [vmem:[%s4472_s3 + $0x440] sm:$0xff] %vm2024_vm2, %v1706_v41  ;;  %v1277_v49 = vadd.f32 %v3382_v48, %v1276_v46  ;;  %v1709_v50 = vadd.f32 %v3382_v48, %v1708_v47 }
 0x11e   :  { %2056 = vst.msk [vmem:[%s4472_s3 + $0xf8] sm:$0xff] %vm2024_vm2, %v1285_v44  ;;  %2164 = vst.msk [vmem:[%s4472_s3 + $0x458] sm:$0xff] %vm2024_vm2, %v1717_v45 }
 0x11f   :  { %2054 = vst.msk [vmem:[%s4472_s3 + $0xe8] sm:$0xff] %vm2024_vm2, %v1277_v49  ;;  %2162 = vst.msk [vmem:[%s4472_s3 + $0x448] sm:$0xff] %vm2024_vm2, %v1709_v50 }
 0x121   :  { %v2616_v51 = vpop.f32.mrb[32].mxu0  ;;  %v2724_v52 = vpop.f32.mrb[32].mxu1 }
 0x122   :  { %v1298_v53 = vadd.f32 %v2616_v51, %v3382_v48  ;;  %v1730_v54 = vadd.f32 %v2724_v52, %v3382_v48  ;;  %v1289_v55 = vpop.f32.mrb[33].mxu0  ;;  %v1721_v56 = vpop.f32.mrb[33].mxu1 }
 0x123   :  { %v1290_v57 = vadd.f32 %v3382_v48, %v1289_v55  ;;  %v1722_v58 = vadd.f32 %v3382_v48, %v1721_v56  ;;  %v2617_v59 = vpop.f32.mrb[34].mxu0  ;;  %v2725_v60 = vpop.f32.mrb[34].mxu1 }
 0x124   :  { %2059 = vst.msk [vmem:[%s4472_s3 + $0x110] sm:$0xff] %vm2024_vm2, %v1298_v53  ;;  %2167 = vst.msk [vmem:[%s4472_s3 + $0x470] sm:$0xff] %vm2024_vm2, %v1730_v54  ;;  %v1301_v61 = vadd.f32 %v2617_v59, %v3382_v48  ;;  %v1733_v62 = vadd.f32 %v2725_v60, %v3382_v48  ;;  %v1292_v63 = vpop.f32.mrb[35].mxu0  ;;  %v1724_v0 = vpop.f32.mrb[35].mxu1 }
 0x125   :  { %2057 = vst.msk [vmem:[%s4472_s3 + $0x100] sm:$0xff] %vm2024_vm2, %v1290_v57  ;;  %2165 = vst.msk [vmem:[%s4472_s3 + $0x460] sm:$0xff] %vm2024_vm2, %v1722_v58  ;;  %v1293_v1 = vadd.f32 %v3382_v48, %v1292_v63  ;;  %v1725_v2 = vadd.f32 %v3382_v48, %v1724_v0 }
 0x126   :  { %2060 = vst.msk [vmem:[%s4472_s3 + $0x118] sm:$0xff] %vm2024_vm2, %v1301_v61  ;;  %2168 = vst.msk [vmem:[%s4472_s3 + $0x478] sm:$0xff] %vm2024_vm2, %v1733_v62 }
 0x127   :  { %2058 = vst.msk [vmem:[%s4472_s3 + $0x108] sm:$0xff] %vm2024_vm2, %v1293_v1  ;;  %2166 = vst.msk [vmem:[%s4472_s3 + $0x468] sm:$0xff] %vm2024_vm2, %v1725_v2 }
 0x129   :  { %v2620_v3 = vpop.f32.mrb[36].mxu0  ;;  %v2728_v4 = vpop.f32.mrb[36].mxu1 }
 0x12a   :  { %v1314_v5 = vadd.f32 %v2620_v3, %v3382_v48  ;;  %v1746_v6 = vadd.f32 %v2728_v4, %v3382_v48  ;;  %v1305_v7 = vpop.f32.mrb[37].mxu0  ;;  %v1737_v8 = vpop.f32.mrb[37].mxu1 }
 0x12b   :  { %v1306_v9 = vadd.f32 %v3382_v48, %v1305_v7  ;;  %v1738_v10 = vadd.f32 %v3382_v48, %v1737_v8  ;;  %v2621_v11 = vpop.f32.mrb[38].mxu0  ;;  %v2729_v12 = vpop.f32.mrb[38].mxu1 }
 0x12c   :  { %2063 = vst.msk [vmem:[%s4472_s3 + $0x130] sm:$0xff] %vm2024_vm2, %v1314_v5  ;;  %2171 = vst.msk [vmem:[%s4472_s3 + $0x490] sm:$0xff] %vm2024_vm2, %v1746_v6  ;;  %v1317_v13 = vadd.f32 %v2621_v11, %v3382_v48  ;;  %v1749_v14 = vadd.f32 %v2729_v12, %v3382_v48  ;;  %v1308_v15 = vpop.f32.mrb[39].mxu0  ;;  %v1740_v16 = vpop.f32.mrb[39].mxu1 }
 0x12d   :  { %2061 = vst.msk [vmem:[%s4472_s3 + $0x120] sm:$0xff] %vm2024_vm2, %v1306_v9  ;;  %2169 = vst.msk [vmem:[%s4472_s3 + $0x480] sm:$0xff] %vm2024_vm2, %v1738_v10  ;;  %v1309_v17 = vadd.f32 %v3382_v48, %v1308_v15  ;;  %v1741_v18 = vadd.f32 %v3382_v48, %v1740_v16 }
 0x12e   :  { %2064 = vst.msk [vmem:[%s4472_s3 + $0x138] sm:$0xff] %vm2024_vm2, %v1317_v13  ;;  %2172 = vst.msk [vmem:[%s4472_s3 + $0x498] sm:$0xff] %vm2024_vm2, %v1749_v14 }
 0x12f   :  { %2062 = vst.msk [vmem:[%s4472_s3 + $0x128] sm:$0xff] %vm2024_vm2, %v1309_v17  ;;  %2170 = vst.msk [vmem:[%s4472_s3 + $0x488] sm:$0xff] %vm2024_vm2, %v1741_v18 }
 0x131   :  { %v2624_v19 = vpop.f32.mrb[40].mxu0  ;;  %v2732_v20 = vpop.f32.mrb[40].mxu1 }
 0x132   :  { %v1330_v21 = vadd.f32 %v2624_v19, %v3382_v48  ;;  %v1762_v22 = vadd.f32 %v2732_v20, %v3382_v48  ;;  %v1321_v23 = vpop.f32.mrb[41].mxu0  ;;  %v1753_v24 = vpop.f32.mrb[41].mxu1 }
 0x133   :  { %v1322_v25 = vadd.f32 %v3382_v48, %v1321_v23  ;;  %v1754_v26 = vadd.f32 %v3382_v48, %v1753_v24  ;;  %v2625_v27 = vpop.f32.mrb[42].mxu0  ;;  %v2733_v28 = vpop.f32.mrb[42].mxu1 }
 0x134   :  { %2067 = vst.msk [vmem:[%s4472_s3 + $0x150] sm:$0xff] %vm2024_vm2, %v1330_v21  ;;  %2175 = vst.msk [vmem:[%s4472_s3 + $0x4b0] sm:$0xff] %vm2024_vm2, %v1762_v22  ;;  %v1333_v29 = vadd.f32 %v2625_v27, %v3382_v48  ;;  %v1765_v30 = vadd.f32 %v2733_v28, %v3382_v48  ;;  %v1324_v31 = vpop.f32.mrb[43].mxu0  ;;  %v1756_v32 = vpop.f32.mrb[43].mxu1 }
 0x135   :  { %2065 = vst.msk [vmem:[%s4472_s3 + $0x140] sm:$0xff] %vm2024_vm2, %v1322_v25  ;;  %2173 = vst.msk [vmem:[%s4472_s3 + $0x4a0] sm:$0xff] %vm2024_vm2, %v1754_v26  ;;  %v1325_v33 = vadd.f32 %v3382_v48, %v1324_v31  ;;  %v1757_v34 = vadd.f32 %v3382_v48, %v1756_v32 }
 0x136   :  { %2068 = vst.msk [vmem:[%s4472_s3 + $0x158] sm:$0xff] %vm2024_vm2, %v1333_v29  ;;  %2176 = vst.msk [vmem:[%s4472_s3 + $0x4b8] sm:$0xff] %vm2024_vm2, %v1765_v30 }
 0x137   :  { %2066 = vst.msk [vmem:[%s4472_s3 + $0x148] sm:$0xff] %vm2024_vm2, %v1325_v33  ;;  %2174 = vst.msk [vmem:[%s4472_s3 + $0x4a8] sm:$0xff] %vm2024_vm2, %v1757_v34 }
 0x139   :  { %v2628_v35 = vpop.f32.mrb[44].mxu0  ;;  %v2736_v36 = vpop.f32.mrb[44].mxu1 }
 0x13a   :  { %v1346_v37 = vadd.f32 %v2628_v35, %v3382_v48  ;;  %v1778_v38 = vadd.f32 %v2736_v36, %v3382_v48  ;;  %v1337_v39 = vpop.f32.mrb[45].mxu0  ;;  %v1769_v40 = vpop.f32.mrb[45].mxu1 }
 0x13b   :  { %v1338_v41 = vadd.f32 %v3382_v48, %v1337_v39  ;;  %v1770_v42 = vadd.f32 %v3382_v48, %v1769_v40  ;;  %v2629_v43 = vpop.f32.mrb[46].mxu0  ;;  %v2737_v44 = vpop.f32.mrb[46].mxu1 }
 0x13c   :  { %2071 = vst.msk [vmem:[%s4472_s3 + $0x170] sm:$0xff] %vm2024_vm2, %v1346_v37  ;;  %2179 = vst.msk [vmem:[%s4472_s3 + $0x4d0] sm:$0xff] %vm2024_vm2, %v1778_v38  ;;  %v1349_v45 = vadd.f32 %v2629_v43, %v3382_v48  ;;  %v1781_v46 = vadd.f32 %v2737_v44, %v3382_v48  ;;  %v1340_v47 = vpop.f32.mrb[47].mxu0  ;;  %v1772_v49 = vpop.f32.mrb[47].mxu1 }
 0x13d   :  { %2069 = vst.msk [vmem:[%s4472_s3 + $0x160] sm:$0xff] %vm2024_vm2, %v1338_v41  ;;  %2177 = vst.msk [vmem:[%s4472_s3 + $0x4c0] sm:$0xff] %vm2024_vm2, %v1770_v42  ;;  %v1341_v50 = vadd.f32 %v3382_v48, %v1340_v47  ;;  %v1773_v51 = vadd.f32 %v3382_v48, %v1772_v49 }
 0x13e   :  { %2072 = vst.msk [vmem:[%s4472_s3 + $0x178] sm:$0xff] %vm2024_vm2, %v1349_v45  ;;  %2180 = vst.msk [vmem:[%s4472_s3 + $0x4d8] sm:$0xff] %vm2024_vm2, %v1781_v46 }
 0x13f   :  { %2070 = vst.msk [vmem:[%s4472_s3 + $0x168] sm:$0xff] %vm2024_vm2, %v1341_v50  ;;  %2178 = vst.msk [vmem:[%s4472_s3 + $0x4c8] sm:$0xff] %vm2024_vm2, %v1773_v51 }
 0x141   :  { %v2632_v52 = vpop.f32.mrb[48].mxu0  ;;  %v2740_v53 = vpop.f32.mrb[48].mxu1 }
 0x142   :  { %v1362_v54 = vadd.f32 %v2632_v52, %v3382_v48  ;;  %v1794_v55 = vadd.f32 %v2740_v53, %v3382_v48  ;;  %v1353_v56 = vpop.f32.mrb[49].mxu0  ;;  %v1785_v57 = vpop.f32.mrb[49].mxu1 }
 0x143   :  { %v1354_v58 = vadd.f32 %v3382_v48, %v1353_v56  ;;  %v1786_v59 = vadd.f32 %v3382_v48, %v1785_v57  ;;  %v2633_v60 = vpop.f32.mrb[50].mxu0  ;;  %v2741_v61 = vpop.f32.mrb[50].mxu1 }
 0x144   :  { %2075 = vst.msk [vmem:[%s4472_s3 + $0x190] sm:$0xff] %vm2024_vm2, %v1362_v54  ;;  %2183 = vst.msk [vmem:[%s4472_s3 + $0x4f0] sm:$0xff] %vm2024_vm2, %v1794_v55  ;;  %v1365_v62 = vadd.f32 %v2633_v60, %v3382_v48  ;;  %v1797_v63 = vadd.f32 %v2741_v61, %v3382_v48  ;;  %v1356_v0 = vpop.f32.mrb[51].mxu0  ;;  %v1788_v1 = vpop.f32.mrb[51].mxu1 }
 0x145   :  { %2073 = vst.msk [vmem:[%s4472_s3 + $0x180] sm:$0xff] %vm2024_vm2, %v1354_v58  ;;  %2181 = vst.msk [vmem:[%s4472_s3 + $0x4e0] sm:$0xff] %vm2024_vm2, %v1786_v59  ;;  %v1357_v2 = vadd.f32 %v3382_v48, %v1356_v0  ;;  %v1789_v3 = vadd.f32 %v3382_v48, %v1788_v1 }
 0x146   :  { %2076 = vst.msk [vmem:[%s4472_s3 + $0x198] sm:$0xff] %vm2024_vm2, %v1365_v62  ;;  %2184 = vst.msk [vmem:[%s4472_s3 + $0x4f8] sm:$0xff] %vm2024_vm2, %v1797_v63 }
 0x147   :  { %2074 = vst.msk [vmem:[%s4472_s3 + $0x188] sm:$0xff] %vm2024_vm2, %v1357_v2  ;;  %2182 = vst.msk [vmem:[%s4472_s3 + $0x4e8] sm:$0xff] %vm2024_vm2, %v1789_v3 }
 0x149   :  { %v2636_v4 = vpop.f32.mrb[52].mxu0  ;;  %v2744_v5 = vpop.f32.mrb[52].mxu1 }
 0x14a   :  { %v1378_v6 = vadd.f32 %v2636_v4, %v3382_v48  ;;  %v1810_v7 = vadd.f32 %v2744_v5, %v3382_v48  ;;  %v1369_v8 = vpop.f32.mrb[53].mxu0  ;;  %v1801_v9 = vpop.f32.mrb[53].mxu1 }
 0x14b   :  { %v1370_v10 = vadd.f32 %v3382_v48, %v1369_v8  ;;  %v1802_v11 = vadd.f32 %v3382_v48, %v1801_v9  ;;  %v2637_v12 = vpop.f32.mrb[54].mxu0  ;;  %v2745_v13 = vpop.f32.mrb[54].mxu1 }
 0x14c   :  { %2079 = vst.msk [vmem:[%s4472_s3 + $0x1b0] sm:$0xff] %vm2024_vm2, %v1378_v6  ;;  %2187 = vst.msk [vmem:[%s4472_s3 + $0x510] sm:$0xff] %vm2024_vm2, %v1810_v7  ;;  %v1381_v14 = vadd.f32 %v2637_v12, %v3382_v48  ;;  %v1813_v15 = vadd.f32 %v2745_v13, %v3382_v48  ;;  %v1372_v16 = vpop.f32.mrb[55].mxu0  ;;  %v1804_v17 = vpop.f32.mrb[55].mxu1 }
 0x14d   :  { %2077 = vst.msk [vmem:[%s4472_s3 + $0x1a0] sm:$0xff] %vm2024_vm2, %v1370_v10  ;;  %2185 = vst.msk [vmem:[%s4472_s3 + $0x500] sm:$0xff] %vm2024_vm2, %v1802_v11  ;;  %v1373_v18 = vadd.f32 %v3382_v48, %v1372_v16  ;;  %v1805_v19 = vadd.f32 %v3382_v48, %v1804_v17 }
 0x14e   :  { %2080 = vst.msk [vmem:[%s4472_s3 + $0x1b8] sm:$0xff] %vm2024_vm2, %v1381_v14  ;;  %2188 = vst.msk [vmem:[%s4472_s3 + $0x518] sm:$0xff] %vm2024_vm2, %v1813_v15 }
 0x14f   :  { %2078 = vst.msk [vmem:[%s4472_s3 + $0x1a8] sm:$0xff] %vm2024_vm2, %v1373_v18  ;;  %2186 = vst.msk [vmem:[%s4472_s3 + $0x508] sm:$0xff] %vm2024_vm2, %v1805_v19 }
 0x151   :  { %v2640_v20 = vpop.f32.mrb[56].mxu0  ;;  %v2748_v21 = vpop.f32.mrb[56].mxu1 }
 0x152   :  { %v1394_v22 = vadd.f32 %v2640_v20, %v3382_v48  ;;  %v1826_v23 = vadd.f32 %v2748_v21, %v3382_v48  ;;  %v1385_v24 = vpop.f32.mrb[57].mxu0  ;;  %v1817_v25 = vpop.f32.mrb[57].mxu1 }
 0x153   :  { %v1386_v26 = vadd.f32 %v3382_v48, %v1385_v24  ;;  %v1818_v27 = vadd.f32 %v3382_v48, %v1817_v25  ;;  %v2641_v28 = vpop.f32.mrb[58].mxu0  ;;  %v2749_v29 = vpop.f32.mrb[58].mxu1 }
 0x154   :  { %2083 = vst.msk [vmem:[%s4472_s3 + $0x1d0] sm:$0xff] %vm2024_vm2, %v1394_v22  ;;  %2191 = vst.msk [vmem:[%s4472_s3 + $0x530] sm:$0xff] %vm2024_vm2, %v1826_v23  ;;  %v1397_v30 = vadd.f32 %v2641_v28, %v3382_v48  ;;  %v1829_v31 = vadd.f32 %v2749_v29, %v3382_v48  ;;  %v1388_v32 = vpop.f32.mrb[59].mxu0  ;;  %v1820_v33 = vpop.f32.mrb[59].mxu1 }
 0x155   :  { %2081 = vst.msk [vmem:[%s4472_s3 + $0x1c0] sm:$0xff] %vm2024_vm2, %v1386_v26  ;;  %2189 = vst.msk [vmem:[%s4472_s3 + $0x520] sm:$0xff] %vm2024_vm2, %v1818_v27  ;;  %v1389_v34 = vadd.f32 %v3382_v48, %v1388_v32  ;;  %v1821_v35 = vadd.f32 %v3382_v48, %v1820_v33 }
 0x156   :  { %2084 = vst.msk [vmem:[%s4472_s3 + $0x1d8] sm:$0xff] %vm2024_vm2, %v1397_v30  ;;  %2192 = vst.msk [vmem:[%s4472_s3 + $0x538] sm:$0xff] %vm2024_vm2, %v1829_v31 }
 0x157   :  { %2082 = vst.msk [vmem:[%s4472_s3 + $0x1c8] sm:$0xff] %vm2024_vm2, %v1389_v34  ;;  %2190 = vst.msk [vmem:[%s4472_s3 + $0x528] sm:$0xff] %vm2024_vm2, %v1821_v35 }
 0x159   :  { %v2644_v36 = vpop.f32.mrb[60].mxu0  ;;  %v2752_v37 = vpop.f32.mrb[60].mxu1 }
 0x15a   :  { %v1410_v38 = vadd.f32 %v2644_v36, %v3382_v48  ;;  %v1842_v39 = vadd.f32 %v2752_v37, %v3382_v48  ;;  %v1401_v40 = vpop.f32.mrb[61].mxu0  ;;  %v1833_v41 = vpop.f32.mrb[61].mxu1 }
 0x15b   :  { %v1402_v42 = vadd.f32 %v3382_v48, %v1401_v40  ;;  %v1834_v43 = vadd.f32 %v3382_v48, %v1833_v41  ;;  %v2645_v44 = vpop.f32.mrb[62].mxu0  ;;  %v2753_v45 = vpop.f32.mrb[62].mxu1 }
 0x15c   :  { %2087 = vst.msk [vmem:[%s4472_s3 + $0x1f0] sm:$0xff] %vm2024_vm2, %v1410_v38  ;;  %2195 = vst.msk [vmem:[%s4472_s3 + $0x550] sm:$0xff] %vm2024_vm2, %v1842_v39  ;;  %v1413_v46 = vadd.f32 %v2645_v44, %v3382_v48  ;;  %v1845_v47 = vadd.f32 %v2753_v45, %v3382_v48  ;;  %v1404_v49 = vpop.f32.mrb[63].mxu0  ;;  %v1836_v50 = vpop.f32.mrb[63].mxu1 }
 0x15d   :  { %2085 = vst.msk [vmem:[%s4472_s3 + $0x1e0] sm:$0xff] %vm2024_vm2, %v1402_v42  ;;  %2193 = vst.msk [vmem:[%s4472_s3 + $0x540] sm:$0xff] %vm2024_vm2, %v1834_v43  ;;  %v1405_v51 = vadd.f32 %v3382_v48, %v1404_v49  ;;  %v1837_v52 = vadd.f32 %v3382_v48, %v1836_v50 }
 0x15e   :  { %2088 = vst.msk [vmem:[%s4472_s3 + $0x1f8] sm:$0xff] %vm2024_vm2, %v1413_v46  ;;  %2196 = vst.msk [vmem:[%s4472_s3 + $0x558] sm:$0xff] %vm2024_vm2, %v1845_v47 }
 0x15f   :  { %2086 = vst.msk [vmem:[%s4472_s3 + $0x1e8] sm:$0xff] %vm2024_vm2, %v1405_v51  ;;  %2194 = vst.msk [vmem:[%s4472_s3 + $0x548] sm:$0xff] %vm2024_vm2, %v1837_v52 }
 0x161   :  { %v2648_v53 = vpop.f32.mrb[64].mxu0  ;;  %v2756_v54 = vpop.f32.mrb[64].mxu1 }
 0x162   :  { %v1426_v55 = vadd.f32 %v2648_v53, %v3382_v48  ;;  %v1858_v56 = vadd.f32 %v2756_v54, %v3382_v48  ;;  %v1417_v57 = vpop.f32.mrb[65].mxu0  ;;  %v1849_v58 = vpop.f32.mrb[65].mxu1 }
 0x163   :  { %v1418_v59 = vadd.f32 %v3382_v48, %v1417_v57  ;;  %v1850_v60 = vadd.f32 %v3382_v48, %v1849_v58  ;;  %v2649_v61 = vpop.f32.mrb[66].mxu0  ;;  %v2757_v62 = vpop.f32.mrb[66].mxu1 }
 0x164   :  { %2091 = vst.msk [vmem:[%s4472_s3 + $0x210] sm:$0xff] %vm2024_vm2, %v1426_v55  ;;  %2199 = vst.msk [vmem:[%s4472_s3 + $0x570] sm:$0xff] %vm2024_vm2, %v1858_v56  ;;  %v1429_v63 = vadd.f32 %v2649_v61, %v3382_v48  ;;  %v1861_v0 = vadd.f32 %v2757_v62, %v3382_v48  ;;  %v1420_v1 = vpop.f32.mrb[67].mxu0  ;;  %v1852_v2 = vpop.f32.mrb[67].mxu1 }
 0x165   :  { %2089 = vst.msk [vmem:[%s4472_s3 + $0x200] sm:$0xff] %vm2024_vm2, %v1418_v59  ;;  %2197 = vst.msk [vmem:[%s4472_s3 + $0x560] sm:$0xff] %vm2024_vm2, %v1850_v60  ;;  %v1421_v3 = vadd.f32 %v3382_v48, %v1420_v1  ;;  %v1853_v4 = vadd.f32 %v3382_v48, %v1852_v2 }
 0x166   :  { %2092 = vst.msk [vmem:[%s4472_s3 + $0x218] sm:$0xff] %vm2024_vm2, %v1429_v63  ;;  %2200 = vst.msk [vmem:[%s4472_s3 + $0x578] sm:$0xff] %vm2024_vm2, %v1861_v0 }
 0x167   :  { %2090 = vst.msk [vmem:[%s4472_s3 + $0x208] sm:$0xff] %vm2024_vm2, %v1421_v3  ;;  %2198 = vst.msk [vmem:[%s4472_s3 + $0x568] sm:$0xff] %vm2024_vm2, %v1853_v4 }
 0x169   :  { %v2652_v5 = vpop.f32.mrb[68].mxu0  ;;  %v2760_v6 = vpop.f32.mrb[68].mxu1 }
 0x16a   :  { %v1442_v7 = vadd.f32 %v2652_v5, %v3382_v48  ;;  %v1874_v8 = vadd.f32 %v2760_v6, %v3382_v48  ;;  %v1433_v9 = vpop.f32.mrb[69].mxu0  ;;  %v1865_v10 = vpop.f32.mrb[69].mxu1 }
 0x16b   :  { %v1434_v11 = vadd.f32 %v3382_v48, %v1433_v9  ;;  %v1866_v12 = vadd.f32 %v3382_v48, %v1865_v10  ;;  %v2653_v13 = vpop.f32.mrb[70].mxu0  ;;  %v2761_v14 = vpop.f32.mrb[70].mxu1 }
 0x16c   :  { %2095 = vst.msk [vmem:[%s4472_s3 + $0x230] sm:$0xff] %vm2024_vm2, %v1442_v7  ;;  %2203 = vst.msk [vmem:[%s4472_s3 + $0x590] sm:$0xff] %vm2024_vm2, %v1874_v8  ;;  %v1445_v15 = vadd.f32 %v2653_v13, %v3382_v48  ;;  %v1877_v16 = vadd.f32 %v2761_v14, %v3382_v48  ;;  %v1436_v17 = vpop.f32.mrb[71].mxu0  ;;  %v1868_v18 = vpop.f32.mrb[71].mxu1 }
 0x16d   :  { %2093 = vst.msk [vmem:[%s4472_s3 + $0x220] sm:$0xff] %vm2024_vm2, %v1434_v11  ;;  %2201 = vst.msk [vmem:[%s4472_s3 + $0x580] sm:$0xff] %vm2024_vm2, %v1866_v12  ;;  %v1437_v19 = vadd.f32 %v3382_v48, %v1436_v17  ;;  %v1869_v20 = vadd.f32 %v3382_v48, %v1868_v18  ;;  %v4229_v12 = vld [vmem:[%s4471_s2] ss:$0 sm:$0xff] }
 0x16e   :  { %2096 = vst.msk [vmem:[%s4472_s3 + $0x238] sm:$0xff] %vm2024_vm2, %v1445_v15  ;;  %2204 = vst.msk [vmem:[%s4472_s3 + $0x598] sm:$0xff] %vm2024_vm2, %v1877_v16 }
 0x16f   :  { %2094 = vst.msk [vmem:[%s4472_s3 + $0x228] sm:$0xff] %vm2024_vm2, %v1437_v19  ;;  %2202 = vst.msk [vmem:[%s4472_s3 + $0x588] sm:$0xff] %vm2024_vm2, %v1869_v20 }
 0x171   :  { %v2656_v21 = vpop.f32.mrb[72].mxu0  ;;  %v2764_v22 = vpop.f32.mrb[72].mxu1 }
 0x172   :  { %v1458_v23 = vadd.f32 %v2656_v21, %v3382_v48  ;;  %v1890_v24 = vadd.f32 %v2764_v22, %v3382_v48  ;;  %v1449_v25 = vpop.f32.mrb[73].mxu0  ;;  %v1881_v26 = vpop.f32.mrb[73].mxu1 }
 0x173   :  { %v1450_v27 = vadd.f32 %v3382_v48, %v1449_v25  ;;  %v1882_v28 = vadd.f32 %v3382_v48, %v1881_v26  ;;  %v2657_v29 = vpop.f32.mrb[74].mxu0  ;;  %v2765_v30 = vpop.f32.mrb[74].mxu1 }
 0x174   :  { %2099 = vst.msk [vmem:[%s4472_s3 + $0x250] sm:$0xff] %vm2024_vm2, %v1458_v23  ;;  %2207 = vst.msk [vmem:[%s4472_s3 + $0x5b0] sm:$0xff] %vm2024_vm2, %v1890_v24  ;;  %v1461_v31 = vadd.f32 %v2657_v29, %v3382_v48  ;;  %v1893_v32 = vadd.f32 %v2765_v30, %v3382_v48  ;;  %v1452_v33 = vpop.f32.mrb[75].mxu0  ;;  %v1884_v34 = vpop.f32.mrb[75].mxu1 }
 0x175   :  { %2097 = vst.msk [vmem:[%s4472_s3 + $0x240] sm:$0xff] %vm2024_vm2, %v1450_v27  ;;  %2205 = vst.msk [vmem:[%s4472_s3 + $0x5a0] sm:$0xff] %vm2024_vm2, %v1882_v28  ;;  %v1453_v35 = vadd.f32 %v3382_v48, %v1452_v33  ;;  %v1885_v36 = vadd.f32 %v3382_v48, %v1884_v34 }
 0x176   :  { %2100 = vst.msk [vmem:[%s4472_s3 + $0x258] sm:$0xff] %vm2024_vm2, %v1461_v31  ;;  %2208 = vst.msk [vmem:[%s4472_s3 + $0x5b8] sm:$0xff] %vm2024_vm2, %v1893_v32 }
 0x177   :  { %2098 = vst.msk [vmem:[%s4472_s3 + $0x248] sm:$0xff] %vm2024_vm2, %v1453_v35  ;;  %2206 = vst.msk [vmem:[%s4472_s3 + $0x5a8] sm:$0xff] %vm2024_vm2, %v1885_v36 }
 0x179   :  { %v2660_v37 = vpop.f32.mrb[76].mxu0  ;;  %v2768_v38 = vpop.f32.mrb[76].mxu1 }
 0x17a   :  { %v1474_v39 = vadd.f32 %v2660_v37, %v3382_v48  ;;  %v1906_v40 = vadd.f32 %v2768_v38, %v3382_v48  ;;  %v1465_v41 = vpop.f32.mrb[77].mxu0  ;;  %v1897_v42 = vpop.f32.mrb[77].mxu1 }
 0x17b   :  { %v1466_v43 = vadd.f32 %v3382_v48, %v1465_v41  ;;  %v1898_v44 = vadd.f32 %v3382_v48, %v1897_v42  ;;  %v2661_v45 = vpop.f32.mrb[78].mxu0  ;;  %v2769_v46 = vpop.f32.mrb[78].mxu1 }
 0x17c   :  { %2103 = vst.msk [vmem:[%s4472_s3 + $0x270] sm:$0xff] %vm2024_vm2, %v1474_v39  ;;  %2211 = vst.msk [vmem:[%s4472_s3 + $0x5d0] sm:$0xff] %vm2024_vm2, %v1906_v40  ;;  %v1477_v47 = vadd.f32 %v2661_v45, %v3382_v48  ;;  %v1909_v49 = vadd.f32 %v2769_v46, %v3382_v48  ;;  %v1468_v50 = vpop.f32.mrb[79].mxu0  ;;  %v1900_v51 = vpop.f32.mrb[79].mxu1 }
 0x17d   :  { %2101 = vst.msk [vmem:[%s4472_s3 + $0x260] sm:$0xff] %vm2024_vm2, %v1466_v43  ;;  %2209 = vst.msk [vmem:[%s4472_s3 + $0x5c0] sm:$0xff] %vm2024_vm2, %v1898_v44  ;;  %v1469_v52 = vadd.f32 %v3382_v48, %v1468_v50  ;;  %v1901_v53 = vadd.f32 %v3382_v48, %v1900_v51 }
 0x17e   :  { %2104 = vst.msk [vmem:[%s4472_s3 + $0x278] sm:$0xff] %vm2024_vm2, %v1477_v47  ;;  %2212 = vst.msk [vmem:[%s4472_s3 + $0x5d8] sm:$0xff] %vm2024_vm2, %v1909_v49 }
 0x17f   :  { %2102 = vst.msk [vmem:[%s4472_s3 + $0x268] sm:$0xff] %vm2024_vm2, %v1469_v52  ;;  %2210 = vst.msk [vmem:[%s4472_s3 + $0x5c8] sm:$0xff] %vm2024_vm2, %v1901_v53 }
 0x181   :  { %v2664_v54 = vpop.f32.mrb[80].mxu0  ;;  %v2772_v55 = vpop.f32.mrb[80].mxu1 }
 0x182   :  { %v1490_v56 = vadd.f32 %v2664_v54, %v3382_v48  ;;  %v1922_v57 = vadd.f32 %v2772_v55, %v3382_v48  ;;  %v1481_v58 = vpop.f32.mrb[81].mxu0  ;;  %v1913_v59 = vpop.f32.mrb[81].mxu1 }
 0x183   :  { %v1482_v60 = vadd.f32 %v3382_v48, %v1481_v58  ;;  %v1914_v61 = vadd.f32 %v3382_v48, %v1913_v59  ;;  %v2665_v62 = vpop.f32.mrb[82].mxu0  ;;  %v2773_v63 = vpop.f32.mrb[82].mxu1 }
 0x184   :  { %2107 = vst.msk [vmem:[%s4472_s3 + $0x290] sm:$0xff] %vm2024_vm2, %v1490_v56  ;;  %2215 = vst.msk [vmem:[%s4472_s3 + $0x5f0] sm:$0xff] %vm2024_vm2, %v1922_v57  ;;  %v1493_v0 = vadd.f32 %v2665_v62, %v3382_v48  ;;  %v1925_v1 = vadd.f32 %v2773_v63, %v3382_v48  ;;  %v1484_v2 = vpop.f32.mrb[83].mxu0  ;;  %v1916_v3 = vpop.f32.mrb[83].mxu1 }
 0x185   :  { %2105 = vst.msk [vmem:[%s4472_s3 + $0x280] sm:$0xff] %vm2024_vm2, %v1482_v60  ;;  %2213 = vst.msk [vmem:[%s4472_s3 + $0x5e0] sm:$0xff] %vm2024_vm2, %v1914_v61  ;;  %v1485_v4 = vadd.f32 %v3382_v48, %v1484_v2  ;;  %v1917_v5 = vadd.f32 %v3382_v48, %v1916_v3 }
 0x186   :  { %2108 = vst.msk [vmem:[%s4472_s3 + $0x298] sm:$0xff] %vm2024_vm2, %v1493_v0  ;;  %2216 = vst.msk [vmem:[%s4472_s3 + $0x5f8] sm:$0xff] %vm2024_vm2, %v1925_v1 }
 0x187   :  { %2106 = vst.msk [vmem:[%s4472_s3 + $0x288] sm:$0xff] %vm2024_vm2, %v1485_v4  ;;  %2214 = vst.msk [vmem:[%s4472_s3 + $0x5e8] sm:$0xff] %vm2024_vm2, %v1917_v5 }
 0x189   :  { %v2668_v6 = vpop.f32.mrb[84].mxu0  ;;  %v2776_v7 = vpop.f32.mrb[84].mxu1 }
 0x18a   :  { %v1506_v8 = vadd.f32 %v2668_v6, %v3382_v48  ;;  %v1938_v9 = vadd.f32 %v2776_v7, %v3382_v48  ;;  %v1497_v10 = vpop.f32.mrb[85].mxu0  ;;  %v1929_v11 = vpop.f32.mrb[85].mxu1 }
 0x18b   :  { %v1498_v13 = vadd.f32 %v4229_v12, %v1497_v10  ;;  %v1930_v14 = vadd.f32 %v4229_v12, %v1929_v11  ;;  %v2669_v15 = vpop.f32.mrb[86].mxu0  ;;  %v2777_v16 = vpop.f32.mrb[86].mxu1 }
 0x18c   :  { %2111 = vst.msk [vmem:[%s4472_s3 + $0x2b0] sm:$0xff] %vm2024_vm2, %v1506_v8  ;;  %2219 = vst.msk [vmem:[%s4472_s3 + $0x610] sm:$0xff] %vm2024_vm2, %v1938_v9  ;;  %v1509_v48 = vadd.f32 %v4229_v12, %v2669_v15  ;;  %v1941_v17 = vadd.f32 %v4229_v12, %v2777_v16  ;;  %v1500_v18 = vpop.f32.mrb[87].mxu0  ;;  %v1932_v19 = vpop.f32.mrb[87].mxu1 }
 0x18d   :  { %2109 = vst.msk [vmem:[%s4472_s3 + $0x2a0] sm:$0xff] %vm2024_vm2, %v1498_v13  ;;  %2217 = vst.msk [vmem:[%s4472_s3 + $0x600] sm:$0xff] %vm2024_vm2, %v1930_v14  ;;  %v1501_v20 = vadd.f32 %v4229_v12, %v1500_v18  ;;  %v1933_v21 = vadd.f32 %v4229_v12, %v1932_v19 }
 0x18e   :  { %2112 = vst.msk [vmem:[%s4472_s3 + $0x2b8] sm:$0xff] %vm2024_vm2, %v1509_v48  ;;  %2220 = vst.msk [vmem:[%s4472_s3 + $0x618] sm:$0xff] %vm2024_vm2, %v1941_v17 }
 0x18f   :  { %2110 = vst.msk [vmem:[%s4472_s3 + $0x2a8] sm:$0xff] %vm2024_vm2, %v1501_v20  ;;  %2218 = vst.msk [vmem:[%s4472_s3 + $0x608] sm:$0xff] %vm2024_vm2, %v1933_v21 }
 0x191   :  { %v2672_v22 = vpop.f32.mrb[88].mxu0  ;;  %v2780_v23 = vpop.f32.mrb[88].mxu1 }
 0x192   :  { %v1522_v24 = vadd.f32 %v4229_v12, %v2672_v22  ;;  %v1954_v25 = vadd.f32 %v4229_v12, %v2780_v23  ;;  %v1513_v26 = vpop.f32.mrb[89].mxu0  ;;  %v1945_v27 = vpop.f32.mrb[89].mxu1 }
 0x193   :  { %v1514_v28 = vadd.f32 %v4229_v12, %v1513_v26  ;;  %v1946_v29 = vadd.f32 %v4229_v12, %v1945_v27  ;;  %v2673_v30 = vpop.f32.mrb[90].mxu0  ;;  %v2781_v31 = vpop.f32.mrb[90].mxu1 }
 0x194   :  { %2115 = vst.msk [vmem:[%s4472_s3 + $0x2d0] sm:$0xff] %vm2024_vm2, %v1522_v24  ;;  %2223 = vst.msk [vmem:[%s4472_s3 + $0x630] sm:$0xff] %vm2024_vm2, %v1954_v25  ;;  %v1525_v32 = vadd.f32 %v4229_v12, %v2673_v30  ;;  %v1957_v33 = vadd.f32 %v4229_v12, %v2781_v31  ;;  %v1516_v34 = vpop.f32.mrb[91].mxu0  ;;  %v1948_v35 = vpop.f32.mrb[91].mxu1 }
 0x195   :  { %2113 = vst.msk [vmem:[%s4472_s3 + $0x2c0] sm:$0xff] %vm2024_vm2, %v1514_v28  ;;  %2221 = vst.msk [vmem:[%s4472_s3 + $0x620] sm:$0xff] %vm2024_vm2, %v1946_v29  ;;  %v1517_v36 = vadd.f32 %v4229_v12, %v1516_v34  ;;  %v1949_v37 = vadd.f32 %v4229_v12, %v1948_v35 }
 0x196   :  { %2116 = vst.msk [vmem:[%s4472_s3 + $0x2d8] sm:$0xff] %vm2024_vm2, %v1525_v32  ;;  %2224 = vst.msk [vmem:[%s4472_s3 + $0x638] sm:$0xff] %vm2024_vm2, %v1957_v33 }
 0x197   :  { %2114 = vst.msk [vmem:[%s4472_s3 + $0x2c8] sm:$0xff] %vm2024_vm2, %v1517_v36  ;;  %2222 = vst.msk [vmem:[%s4472_s3 + $0x628] sm:$0xff] %vm2024_vm2, %v1949_v37 }
 0x199   :  { %v2676_v38 = vpop.f32.mrb[92].mxu0  ;;  %v2784_v39 = vpop.f32.mrb[92].mxu1 }
 0x19a   :  { %v1538_v40 = vadd.f32 %v4229_v12, %v2676_v38  ;;  %v1970_v41 = vadd.f32 %v4229_v12, %v2784_v39  ;;  %v1529_v42 = vpop.f32.mrb[93].mxu0  ;;  %v1961_v43 = vpop.f32.mrb[93].mxu1 }
 0x19b   :  { %v1530_v44 = vadd.f32 %v4229_v12, %v1529_v42  ;;  %v1962_v45 = vadd.f32 %v4229_v12, %v1961_v43  ;;  %v2677_v46 = vpop.f32.mrb[94].mxu0  ;;  %v2785_v47 = vpop.f32.mrb[94].mxu1 }
 0x19c   :  { %2119 = vst.msk [vmem:[%s4472_s3 + $0x2f0] sm:$0xff] %vm2024_vm2, %v1538_v40  ;;  %2227 = vst.msk [vmem:[%s4472_s3 + $0x650] sm:$0xff] %vm2024_vm2, %v1970_v41  ;;  %v1541_v49 = vadd.f32 %v4229_v12, %v2677_v46  ;;  %v1973_v50 = vadd.f32 %v4229_v12, %v2785_v47  ;;  %v1532_v51 = vpop.f32.mrb[95].mxu0  ;;  %v1964_v52 = vpop.f32.mrb[95].mxu1 }
 0x19d   :  { %2117 = vst.msk [vmem:[%s4472_s3 + $0x2e0] sm:$0xff] %vm2024_vm2, %v1530_v44  ;;  %2225 = vst.msk [vmem:[%s4472_s3 + $0x640] sm:$0xff] %vm2024_vm2, %v1962_v45  ;;  %v1533_v53 = vadd.f32 %v4229_v12, %v1532_v51  ;;  %v1965_v54 = vadd.f32 %v4229_v12, %v1964_v52 }
 0x19e   :  { %2120 = vst.msk [vmem:[%s4472_s3 + $0x2f8] sm:$0xff] %vm2024_vm2, %v1541_v49  ;;  %2228 = vst.msk [vmem:[%s4472_s3 + $0x658] sm:$0xff] %vm2024_vm2, %v1973_v50 }
 0x19f   :  { %2118 = vst.msk [vmem:[%s4472_s3 + $0x2e8] sm:$0xff] %vm2024_vm2, %v1533_v53  ;;  %2226 = vst.msk [vmem:[%s4472_s3 + $0x648] sm:$0xff] %vm2024_vm2, %v1965_v54 }
 0x1a1   :  { %v2680_v55 = vpop.f32.mrb[96].mxu0  ;;  %v2788_v56 = vpop.f32.mrb[96].mxu1 }
 0x1a2   :  { %v1554_v57 = vadd.f32 %v4229_v12, %v2680_v55  ;;  %v1986_v58 = vadd.f32 %v4229_v12, %v2788_v56  ;;  %v1545_v59 = vpop.f32.mrb[97].mxu0  ;;  %v1977_v60 = vpop.f32.mrb[97].mxu1 }
 0x1a3   :  { %v1546_v61 = vadd.f32 %v4229_v12, %v1545_v59  ;;  %v1978_v62 = vadd.f32 %v4229_v12, %v1977_v60  ;;  %v2681_v63 = vpop.f32.mrb[98].mxu0  ;;  %v2789_v0 = vpop.f32.mrb[98].mxu1 }
 0x1a4   :  { %2123 = vst.msk [vmem:[%s4472_s3 + $0x310] sm:$0xff] %vm2024_vm2, %v1554_v57  ;;  %2231 = vst.msk [vmem:[%s4472_s3 + $0x670] sm:$0xff] %vm2024_vm2, %v1986_v58  ;;  %v1557_v1 = vadd.f32 %v4229_v12, %v2681_v63  ;;  %v1989_v2 = vadd.f32 %v4229_v12, %v2789_v0  ;;  %v1548_v3 = vpop.f32.mrb[99].mxu0  ;;  %v1980_v4 = vpop.f32.mrb[99].mxu1 }
 0x1a5   :  { %2121 = vst.msk [vmem:[%s4472_s3 + $0x300] sm:$0xff] %vm2024_vm2, %v1546_v61  ;;  %2229 = vst.msk [vmem:[%s4472_s3 + $0x660] sm:$0xff] %vm2024_vm2, %v1978_v62  ;;  %v1549_v5 = vadd.f32 %v4229_v12, %v1548_v3  ;;  %v1981_v6 = vadd.f32 %v4229_v12, %v1980_v4 }
 0x1a6   :  { %2124 = vst.msk [vmem:[%s4472_s3 + $0x318] sm:$0xff] %vm2024_vm2, %v1557_v1  ;;  %2232 = vst.msk [vmem:[%s4472_s3 + $0x678] sm:$0xff] %vm2024_vm2, %v1989_v2 }
 0x1a7   :  { %2122 = vst.msk [vmem:[%s4472_s3 + $0x308] sm:$0xff] %vm2024_vm2, %v1549_v5  ;;  %2230 = vst.msk [vmem:[%s4472_s3 + $0x668] sm:$0xff] %vm2024_vm2, %v1981_v6 }
 0x1a9   :  { %v2684_v7 = vpop.f32.mrb[100].mxu0  ;;  %v2792_v8 = vpop.f32.mrb[100].mxu1 }
 0x1aa   :  { %v1570_v9 = vadd.f32 %v4229_v12, %v2684_v7  ;;  %v2002_v10 = vadd.f32 %v4229_v12, %v2792_v8  ;;  %v1561_v11 = vpop.f32.mrb[101].mxu0  ;;  %v1993_v13 = vpop.f32.mrb[101].mxu1 }
 0x1ab   :  { %v1562_v14 = vadd.f32 %v4229_v12, %v1561_v11  ;;  %v1994_v15 = vadd.f32 %v4229_v12, %v1993_v13  ;;  %v2685_v16 = vpop.f32.mrb[102].mxu0  ;;  %v2793_v48 = vpop.f32.mrb[102].mxu1 }
 0x1ac   :  { %2127 = vst.msk [vmem:[%s4472_s3 + $0x330] sm:$0xff] %vm2024_vm2, %v1570_v9  ;;  %2235 = vst.msk [vmem:[%s4472_s3 + $0x690] sm:$0xff] %vm2024_vm2, %v2002_v10  ;;  %v1573_v17 = vadd.f32 %v4229_v12, %v2685_v16  ;;  %v2005_v18 = vadd.f32 %v4229_v12, %v2793_v48  ;;  %v1564_v19 = vpop.f32.mrb[103].mxu0  ;;  %v1996_v20 = vpop.f32.mrb[103].mxu1 }
 0x1ad   :  { %2125 = vst.msk [vmem:[%s4472_s3 + $0x320] sm:$0xff] %vm2024_vm2, %v1562_v14  ;;  %2233 = vst.msk [vmem:[%s4472_s3 + $0x680] sm:$0xff] %vm2024_vm2, %v1994_v15  ;;  %v1565_v21 = vadd.f32 %v4229_v12, %v1564_v19  ;;  %v1997_v22 = vadd.f32 %v4229_v12, %v1996_v20 }
 0x1ae   :  { %2128 = vst.msk [vmem:[%s4472_s3 + $0x338] sm:$0xff] %vm2024_vm2, %v1573_v17  ;;  %2236 = vst.msk [vmem:[%s4472_s3 + $0x698] sm:$0xff] %vm2024_vm2, %v2005_v18 }
 0x1af   :  { %2126 = vst.msk [vmem:[%s4472_s3 + $0x328] sm:$0xff] %vm2024_vm2, %v1565_v21  ;;  %2234 = vst.msk [vmem:[%s4472_s3 + $0x688] sm:$0xff] %vm2024_vm2, %v1997_v22 }
 0x1b1   :  { %v2688_v23 = vpop.f32.mrb[104].mxu0  ;;  %v2796_v24 = vpop.f32.mrb[104].mxu1 }
 0x1b2   :  { %v1586_v25 = vadd.f32 %v4229_v12, %v2688_v23  ;;  %v2018_v26 = vadd.f32 %v4229_v12, %v2796_v24  ;;  %v1577_v27 = vpop.f32.mrb[105].mxu0  ;;  %v2009_v28 = vpop.f32.mrb[105].mxu1 }
 0x1b3   :  { %v1578_v29 = vadd.f32 %v4229_v12, %v1577_v27  ;;  %v2010_v30 = vadd.f32 %v4229_v12, %v2009_v28  ;;  %v2689_v31 = vpop.f32.mrb[106].mxu0  ;;  %v2797_v32 = vpop.f32.mrb[106].mxu1 }
 0x1b4   :  { %2131 = vst.msk [vmem:[%s4472_s3 + $0x350] sm:$0xff] %vm2024_vm2, %v1586_v25  ;;  %2239 = vst.msk [vmem:[%s4472_s3 + $0x6b0] sm:$0xff] %vm2024_vm2, %v2018_v26  ;;  %v1589_v33 = vadd.f32 %v4229_v12, %v2689_v31  ;;  %v2021_v34 = vadd.f32 %v4229_v12, %v2797_v32  ;;  %v1580_v35 = vpop.f32.mrb[107].mxu0  ;;  %v2012_v36 = vpop.f32.mrb[107].mxu1 }
 0x1b5   :  { %2129 = vst.msk [vmem:[%s4472_s3 + $0x340] sm:$0xff] %vm2024_vm2, %v1578_v29  ;;  %2237 = vst.msk [vmem:[%s4472_s3 + $0x6a0] sm:$0xff] %vm2024_vm2, %v2010_v30  ;;  %v1581_v37 = vadd.f32 %v4229_v12, %v1580_v35  ;;  %v2013_v38 = vadd.f32 %v4229_v12, %v2012_v36 }
 0x1b6   :  { %2132 = vst.msk [vmem:[%s4472_s3 + $0x358] sm:$0xff] %vm2024_vm2, %v1589_v33  ;;  %2240 = vst.msk [vmem:[%s4472_s3 + $0x6b8] sm:$0xff] %vm2024_vm2, %v2021_v34 }
 0x1b7   :  { %2130 = vst.msk [vmem:[%s4472_s3 + $0x348] sm:$0xff] %vm2024_vm2, %v1581_v37  ;;  %2238 = vst.msk [vmem:[%s4472_s3 + $0x6a8] sm:$0xff] %vm2024_vm2, %v2013_v38 }

// kernel: gcb_forward.7
= control target key start
LH: loop header
LB: loop body
LE: loop exit
PB: predicated region body
PF: predicated region fallthrough
CT: control target
= control target key end

     0   :  { %v3550_v0 = vmov 0.0   ;;  %vm3551_vm0 = vmmov 0   ;;  %vm1270_vm1 = vcmask 1043456   ;;  %vm900_vm2 = vcmask 326656   ;;  %s5565_s1 = inlined_call_operand.vmem [shape: bf16[40,24], index: 1, kind: input, shape index: {}]   ;;  %s5566_s0 = inlined_call_operand.vmem [shape: bf16[1960,40], index: 0, kind: input, shape index: {}]   ;;  %s5567_s2 = inlined_call_operand.vmem [shape: f32[1,24], index: 2, kind: input, shape index: {}]   ;;  %s5568_s3 = inlined_call_operand.vmem [shape: f32[1960,24], index: 3, kind: output, shape index: {}]  }
   0x1   :  { %2916 = vmatprep.subr.bf16.mxu0 %v3550_v0  ;;  %v3422_v1 = vld [vmem:[%s5565_s1] sm:$0xff]   ;;  %3414 = vmatprep.subr.bf16.mxu1 %v3550_v0  ;;  %v3423_v2 = vld [vmem:[%s5565_s1 + $0x8] sm:$0xff]   ;;  %v3424_v3 = vld [vmem:[%s5565_s1 + $0x10] ss:$0 sps:$4 sm:$0xff]   ;;  %vm2290_vm3 = vcmask 195584  }
   0x2   :  { %2922 = vmatprep.mubr.msk.bf16.mxu0 %vm3551_vm0, %v3550_v0  ;;  %3170 = vmatprep.mubr.msk.bf16.mxu1 %vm3551_vm0, %v3550_v0  ;;  %v1272_v4 = vsel %vm1270_vm1, %v3424_v3, 0  ;;  %v3425_v5 = vld [vmem:[%s5566_s0] sm:$0xff]   ;;  %v3426_v6 = vld [vmem:[%s5566_s0 + $0x1f0] sm:$0xff]   ;;  %v3427_v7 = vld [vmem:[%s5566_s0 + $0x8] sm:$0xff]  }
   0x3   :  { %2917 = vmatpush3.bf16.msra.mxu0 %v3422_v1  ;;  %3417 = vmatpush3.bf16.msra.mxu1 %v3422_v1  ;;  %v3428_v8 = vld [vmem:[%s5566_s0 + $0x1f8] sm:$0xff]   ;;  %v3429_v9 = vld [vmem:[%s5566_s0 + $0x10] sm:$0xff]   ;;  %v3430_v10 = vld [vmem:[%s5566_s0 + $0x200] sm:$0xff]  }
   0x4   :  { %2918 = vmatprep.subr.bf16.mxu0 %v3550_v0  ;;  %3415 = vmatprep.subr.bf16.mxu1 %v3550_v0  ;;  %v3431_v11 = vld [vmem:[%s5566_s0 + $0x18] sm:$0xff]   ;;  %v3432_v12 = vld [vmem:[%s5566_s0 + $0x208] sm:$0xff]   ;;  %v3433_v13 = vld [vmem:[%s5566_s0 + $0x20] sm:$0xff]  }
   0x5   :  { %v3434_v14 = vld [vmem:[%s5566_s0 + $0x210] sm:$0xff]   ;;  %v3435_v15 = vld [vmem:[%s5566_s0 + $0x28] sm:$0xff]   ;;  %v3436_v16 = vld [vmem:[%s5566_s0 + $0x218] sm:$0xff]  }
   0x6   :  { %v3437_v17 = vld [vmem:[%s5566_s0 + $0x30] sm:$0xff]   ;;  %v3438_v18 = vld [vmem:[%s5566_s0 + $0x220] sm:$0xff]   ;;  %v3439_v19 = vld [vmem:[%s5566_s0 + $0x38] sm:$0xff]  }
   0x7   :  { %2919 = vmatpush3.bf16.msra.mxu0 %v3423_v2  ;;  %3418 = vmatpush3.bf16.msra.mxu1 %v3423_v2  ;;  %v3440_v20 = vld [vmem:[%s5566_s0 + $0x228] sm:$0xff]   ;;  %v3441_v21 = vld [vmem:[%s5566_s0 + $0x40] sm:$0xff]   ;;  %v3442_v22 = vld [vmem:[%s5566_s0 + $0x230] sm:$0xff]  }
   0x8   :  { %2920 = vmatprep.subr.bf16.mxu0 %v3550_v0  ;;  %3416 = vmatprep.subr.bf16.mxu1 %v3550_v0  ;;  %v3443_v23 = vld [vmem:[%s5566_s0 + $0x48] sm:$0xff]   ;;  %v3444_v24 = vld [vmem:[%s5566_s0 + $0x238] sm:$0xff]   ;;  %v3445_v25 = vld [vmem:[%s5566_s0 + $0x50] sm:$0xff]  }
   0x9   :  { %v3446_v26 = vld [vmem:[%s5566_s0 + $0x240] sm:$0xff]   ;;  %v3447_v27 = vld [vmem:[%s5566_s0 + $0x58] sm:$0xff]   ;;  %v3448_v28 = vld [vmem:[%s5566_s0 + $0x248] sm:$0xff]  }
   0xa   :  { %v3449_v29 = vld [vmem:[%s5566_s0 + $0x60] sm:$0xff]   ;;  %v3450_v30 = vld [vmem:[%s5566_s0 + $0x250] sm:$0xff]   ;;  %v3451_v31 = vld [vmem:[%s5566_s0 + $0x68] sm:$0xff]  }
   0xb   :  { %2921 = vmatpush3.bf16.msra.mxu0 %v1272_v4  ;;  %3419 = vmatpush3.bf16.msra.mxu1 %v1272_v4  ;;  %v3452_v32 = vld [vmem:[%s5566_s0 + $0x258] sm:$0xff]   ;;  %v3453_v33 = vld [vmem:[%s5566_s0 + $0x70] sm:$0xff]   ;;  %v3454_v34 = vld [vmem:[%s5566_s0 + $0x260] sm:$0xff]  }
   0xc   :  { %v3455_v35 = vld [vmem:[%s5566_s0 + $0x78] sm:$0xff]   ;;  %v3456_v36 = vld [vmem:[%s5566_s0 + $0x268] sm:$0xff]   ;;  %v3457_v37 = vld [vmem:[%s5566_s0 + $0x80] sm:$0xff]  }
   0xd   :  { %v3458_v38 = vld [vmem:[%s5566_s0 + $0x270] sm:$0xff]   ;;  %v3459_v39 = vld [vmem:[%s5566_s0 + $0x88] sm:$0xff]   ;;  %v3460_v40 = vld [vmem:[%s5566_s0 + $0x278] sm:$0xff]  }
   0xe   :  { %2923 = vmatmul.mubr.msk.bf16.vlgmr.msra.gmra.mrb[0].mxu0 %vm900_vm2, %v3425_v5  ;;  %3171 = vmatmul.mubr.msk.bf16.vlgmr.msra.gmra.mrb[0].mxu1 %vm900_vm2, %v3426_v6  ;;  %v3461_v41 = vld [vmem:[%s5566_s0 + $0x90] sm:$0xff]   ;;  %v3462_v42 = vld [vmem:[%s5566_s0 + $0x280] sm:$0xff]   ;;  %v3463_v43 = vld [vmem:[%s5566_s0 + $0x98] sm:$0xff]  }
   0xf   :  { %2926 = vmatprep.mubr.msk.bf16.mxu0 %vm3551_vm0, %v3550_v0  ;;  %3174 = vmatprep.mubr.msk.bf16.mxu1 %vm3551_vm0, %v3550_v0  ;;  %v3464_v44 = vld [vmem:[%s5566_s0 + $0x288] sm:$0xff]   ;;  %v3465_v45 = vld [vmem:[%s5566_s0 + $0xa0] sm:$0xff]   ;;  %v3466_v46 = vld [vmem:[%s5566_s0 + $0x290] sm:$0xff]  }
  0x10   :  { %v3467_v47 = vld [vmem:[%s5566_s0 + $0xa8] sm:$0xff]   ;;  %v3468_v48 = vld [vmem:[%s5566_s0 + $0x298] sm:$0xff]   ;;  %v3469_v49 = vld [vmem:[%s5566_s0 + $0xb0] sm:$0xff]  }
  0x11   :  { %v3470_v50 = vld [vmem:[%s5566_s0 + $0x2a0] sm:$0xff]   ;;  %v3471_v51 = vld [vmem:[%s5566_s0 + $0xb8] sm:$0xff]   ;;  %v3472_v52 = vld [vmem:[%s5566_s0 + $0x2a8] sm:$0xff]  }
  0x12   :  { %v3473_v53 = vld [vmem:[%s5566_s0 + $0xc0] sm:$0xff]   ;;  %v3474_v54 = vld [vmem:[%s5566_s0 + $0x2b0] sm:$0xff]   ;;  %v3475_v55 = vld [vmem:[%s5566_s0 + $0xc8] sm:$0xff]  }
  0x13   :  { %v3476_v56 = vld [vmem:[%s5566_s0 + $0x2b8] sm:$0xff]   ;;  %v3477_v57 = vld [vmem:[%s5566_s0 + $0xd0] sm:$0xff]   ;;  %v3478_v58 = vld [vmem:[%s5566_s0 + $0x2c0] sm:$0xff]  }
  0x14   :  { %v3914_v59 = vld [vmem:[%s5567_s2] ss:$0 sm:$0xff]  ;;  %v3479_v1 = vld [vmem:[%s5566_s0 + $0xd8] sm:$0xff]   ;;  %v3480_v4 = vld [vmem:[%s5566_s0 + $0x2c8] sm:$0xff]  }
  0x16   :  { %2927 = vmatmul.mubr.msk.bf16.gmra.mrb[4].mxu0 %vm900_vm2, %v3427_v7  ;;  %3175 = vmatmul.mubr.msk.bf16.gmra.mrb[4].mxu1 %vm900_vm2, %v3428_v8 }
  0x17   :  { %2930 = vmatprep.mubr.msk.bf16.mxu0 %vm3551_vm0, %v3550_v0  ;;  %3178 = vmatprep.mubr.msk.bf16.mxu1 %vm3551_vm0, %v3550_v0 }
  0x1e   :  { %2931 = vmatmul.mubr.msk.bf16.gmra.mrb[8].mxu0 %vm900_vm2, %v3429_v9  ;;  %3179 = vmatmul.mubr.msk.bf16.gmra.mrb[8].mxu1 %vm900_vm2, %v3430_v10 }
  0x1f   :  { %2934 = vmatprep.mubr.msk.bf16.mxu0 %vm3551_vm0, %v3550_v0  ;;  %3182 = vmatprep.mubr.msk.bf16.mxu1 %vm3551_vm0, %v3550_v0 }
  0x26   :  { %2935 = vmatmul.mubr.msk.bf16.gmra.mrb[12].mxu0 %vm900_vm2, %v3431_v11  ;;  %3183 = vmatmul.mubr.msk.bf16.gmra.mrb[12].mxu1 %vm900_vm2, %v3432_v12 }
  0x27   :  { %2938 = vmatprep.mubr.msk.bf16.mxu0 %vm3551_vm0, %v3550_v0  ;;  %3186 = vmatprep.mubr.msk.bf16.mxu1 %vm3551_vm0, %v3550_v0 }
  0x2e   :  { %2939 = vmatmul.mubr.msk.bf16.gmra.mrb[16].mxu0 %vm900_vm2, %v3433_v13  ;;  %3187 = vmatmul.mubr.msk.bf16.gmra.mrb[16].mxu1 %vm900_vm2, %v3434_v14 }
  0x2f   :  { %2942 = vmatprep.mubr.msk.bf16.mxu0 %vm3551_vm0, %v3550_v0  ;;  %3190 = vmatprep.mubr.msk.bf16.mxu1 %vm3551_vm0, %v3550_v0 }
  0x36   :  { %2943 = vmatmul.mubr.msk.bf16.gmra.mrb[20].mxu0 %vm900_vm2, %v3435_v15  ;;  %3191 = vmatmul.mubr.msk.bf16.gmra.mrb[20].mxu1 %vm900_vm2, %v3436_v16  ;;  %v3481_v15 = vld [vmem:[%s5566_s0 + $0xe0] sm:$0xff]  }
  0x37   :  { %2946 = vmatprep.mubr.msk.bf16.mxu0 %vm3551_vm0, %v3550_v0  ;;  %3194 = vmatprep.mubr.msk.bf16.mxu1 %vm3551_vm0, %v3550_v0 }
  0x3e   :  { %2947 = vmatmul.mubr.msk.bf16.gmra.mrb[24].mxu0 %vm900_vm2, %v3437_v17  ;;  %3195 = vmatmul.mubr.msk.bf16.gmra.mrb[24].mxu1 %vm900_vm2, %v3438_v18  ;;  %v3482_v18 = vld [vmem:[%s5566_s0 + $0x2d0] sm:$0xff]  }
  0x3f   :  { %2950 = vmatprep.mubr.msk.bf16.mxu0 %vm3551_vm0, %v3550_v0  ;;  %3198 = vmatprep.mubr.msk.bf16.mxu1 %vm3551_vm0, %v3550_v0 }
  0x46   :  { %2951 = vmatmul.mubr.msk.bf16.gmra.mrb[28].mxu0 %vm900_vm2, %v3439_v19  ;;  %3199 = vmatmul.mubr.msk.bf16.gmra.mrb[28].mxu1 %vm900_vm2, %v3440_v20 }
  0x47   :  { %2954 = vmatprep.mubr.msk.bf16.mxu0 %vm3551_vm0, %v3550_v0  ;;  %3202 = vmatprep.mubr.msk.bf16.mxu1 %vm3551_vm0, %v3550_v0 }
  0x4e   :  { %2955 = vmatmul.mubr.msk.bf16.gmra.mrb[32].mxu0 %vm900_vm2, %v3441_v21  ;;  %3203 = vmatmul.mubr.msk.bf16.gmra.mrb[32].mxu1 %vm900_vm2, %v3442_v22 }
  0x4f   :  { %2958 = vmatprep.mubr.msk.bf16.mxu0 %vm3551_vm0, %v3550_v0  ;;  %3206 = vmatprep.mubr.msk.bf16.mxu1 %vm3551_vm0, %v3550_v0 }
  0x56   :  { %2959 = vmatmul.mubr.msk.bf16.gmra.mrb[36].mxu0 %vm900_vm2, %v3443_v23  ;;  %3207 = vmatmul.mubr.msk.bf16.gmra.mrb[36].mxu1 %vm900_vm2, %v3444_v24 }
  0x57   :  { %2962 = vmatprep.mubr.msk.bf16.mxu0 %vm3551_vm0, %v3550_v0  ;;  %3210 = vmatprep.mubr.msk.bf16.mxu1 %vm3551_vm0, %v3550_v0 }
  0x5e   :  { %2963 = vmatmul.mubr.msk.bf16.gmra.mrb[40].mxu0 %vm900_vm2, %v3445_v25  ;;  %3211 = vmatmul.mubr.msk.bf16.gmra.mrb[40].mxu1 %vm900_vm2, %v3446_v26 }
  0x5f   :  { %2966 = vmatprep.mubr.msk.bf16.mxu0 %vm3551_vm0, %v3550_v0  ;;  %3214 = vmatprep.mubr.msk.bf16.mxu1 %vm3551_vm0, %v3550_v0 }
  0x66   :  { %2967 = vmatmul.mubr.msk.bf16.gmra.mrb[44].mxu0 %vm900_vm2, %v3447_v27  ;;  %3215 = vmatmul.mubr.msk.bf16.gmra.mrb[44].mxu1 %vm900_vm2, %v3448_v28 }
  0x67   :  { %2970 = vmatprep.mubr.msk.bf16.mxu0 %vm3551_vm0, %v3550_v0  ;;  %3218 = vmatprep.mubr.msk.bf16.mxu1 %vm3551_vm0, %v3550_v0 }
  0x6e   :  { %2971 = vmatmul.mubr.msk.bf16.gmra.mrb[48].mxu0 %vm900_vm2, %v3449_v29  ;;  %3219 = vmatmul.mubr.msk.bf16.gmra.mrb[48].mxu1 %vm900_vm2, %v3450_v30  ;;  %v3483_v29 = vld [vmem:[%s5566_s0 + $0xe8] sm:$0xff]  }
  0x6f   :  { %2974 = vmatprep.mubr.msk.bf16.mxu0 %vm3551_vm0, %v3550_v0  ;;  %3222 = vmatprep.mubr.msk.bf16.mxu1 %vm3551_vm0, %v3550_v0 }
  0x76   :  { %2975 = vmatmul.mubr.msk.bf16.gmra.mrb[52].mxu0 %vm900_vm2, %v3451_v31  ;;  %3223 = vmatmul.mubr.msk.bf16.gmra.mrb[52].mxu1 %vm900_vm2, %v3452_v32  ;;  %v3484_v32 = vld [vmem:[%s5566_s0 + $0x2d8] sm:$0xff]  }
  0x77   :  { %2978 = vmatprep.mubr.msk.bf16.mxu0 %vm3551_vm0, %v3550_v0  ;;  %3226 = vmatprep.mubr.msk.bf16.mxu1 %vm3551_vm0, %v3550_v0 }
  0x7e   :  { %2979 = vmatmul.mubr.msk.bf16.gmra.mrb[56].mxu0 %vm900_vm2, %v3453_v33  ;;  %3227 = vmatmul.mubr.msk.bf16.gmra.mrb[56].mxu1 %vm900_vm2, %v3454_v34 }
  0x7f   :  { %2982 = vmatprep.mubr.msk.bf16.mxu0 %vm3551_vm0, %v3550_v0  ;;  %3230 = vmatprep.mubr.msk.bf16.mxu1 %vm3551_vm0, %v3550_v0 }
  0x86   :  { %2983 = vmatmul.mubr.msk.bf16.gmra.mrb[60].mxu0 %vm900_vm2, %v3455_v35  ;;  %3231 = vmatmul.mubr.msk.bf16.gmra.mrb[60].mxu1 %vm900_vm2, %v3456_v36 }
  0x87   :  { %2986 = vmatprep.mubr.msk.bf16.mxu0 %vm3551_vm0, %v3550_v0  ;;  %3234 = vmatprep.mubr.msk.bf16.mxu1 %vm3551_vm0, %v3550_v0 }
  0x8e   :  { %2987 = vmatmul.mubr.msk.bf16.gmra.mrb[64].mxu0 %vm900_vm2, %v3457_v37  ;;  %3235 = vmatmul.mubr.msk.bf16.gmra.mrb[64].mxu1 %vm900_vm2, %v3458_v38 }
  0x8f   :  { %2990 = vmatprep.mubr.msk.bf16.mxu0 %vm3551_vm0, %v3550_v0  ;;  %3238 = vmatprep.mubr.msk.bf16.mxu1 %vm3551_vm0, %v3550_v0 }
  0x96   :  { %2991 = vmatmul.mubr.msk.bf16.gmra.mrb[68].mxu0 %vm900_vm2, %v3459_v39  ;;  %3239 = vmatmul.mubr.msk.bf16.gmra.mrb[68].mxu1 %vm900_vm2, %v3460_v40 }
  0x97   :  { %2994 = vmatprep.mubr.msk.bf16.mxu0 %vm3551_vm0, %v3550_v0  ;;  %3242 = vmatprep.mubr.msk.bf16.mxu1 %vm3551_vm0, %v3550_v0 }
  0x9e   :  { %2995 = vmatmul.mubr.msk.bf16.gmra.mrb[72].mxu0 %vm900_vm2, %v3461_v41  ;;  %3243 = vmatmul.mubr.msk.bf16.gmra.mrb[72].mxu1 %vm900_vm2, %v3462_v42 }
  0x9f   :  { %2998 = vmatprep.mubr.msk.bf16.mxu0 %vm3551_vm0, %v3550_v0  ;;  %3246 = vmatprep.mubr.msk.bf16.mxu1 %vm3551_vm0, %v3550_v0 }
  0xa6   :  { %2999 = vmatmul.mubr.msk.bf16.gmra.mrb[76].mxu0 %vm900_vm2, %v3463_v43  ;;  %3247 = vmatmul.mubr.msk.bf16.gmra.mrb[76].mxu1 %vm900_vm2, %v3464_v44  ;;  %v3485_v43 = vld [vmem:[%s5566_s0 + $0xf0] sm:$0xff]  }
  0xa7   :  { %3002 = vmatprep.mubr.msk.bf16.mxu0 %vm3551_vm0, %v3550_v0  ;;  %3250 = vmatprep.mubr.msk.bf16.mxu1 %vm3551_vm0, %v3550_v0 }
  0xae   :  { %3003 = vmatmul.mubr.msk.bf16.gmra.mrb[80].mxu0 %vm900_vm2, %v3465_v45  ;;  %3251 = vmatmul.mubr.msk.bf16.gmra.mrb[80].mxu1 %vm900_vm2, %v3466_v46  ;;  %v3486_v46 = vld [vmem:[%s5566_s0 + $0x2e0] sm:$0xff]  }
  0xaf   :  { %3006 = vmatprep.mubr.msk.bf16.mxu0 %vm3551_vm0, %v3550_v0  ;;  %3254 = vmatprep.mubr.msk.bf16.mxu1 %vm3551_vm0, %v3550_v0 }
  0xb6   :  { %3007 = vmatmul.mubr.msk.bf16.gmra.mrb[84].mxu0 %vm900_vm2, %v3467_v47  ;;  %3255 = vmatmul.mubr.msk.bf16.gmra.mrb[84].mxu1 %vm900_vm2, %v3468_v48 }
  0xb7   :  { %3010 = vmatprep.mubr.msk.bf16.mxu0 %vm3551_vm0, %v3550_v0  ;;  %3258 = vmatprep.mubr.msk.bf16.mxu1 %vm3551_vm0, %v3550_v0 }
  0xbe   :  { %3011 = vmatmul.mubr.msk.bf16.gmra.mrb[88].mxu0 %vm900_vm2, %v3469_v49  ;;  %3259 = vmatmul.mubr.msk.bf16.gmra.mrb[88].mxu1 %vm900_vm2, %v3470_v50 }
  0xbf   :  { %3014 = vmatprep.mubr.msk.bf16.mxu0 %vm3551_vm0, %v3550_v0  ;;  %3262 = vmatprep.mubr.msk.bf16.mxu1 %vm3551_vm0, %v3550_v0 }
  0xc6   :  { %3015 = vmatmul.mubr.msk.bf16.gmra.mrb[92].mxu0 %vm900_vm2, %v3471_v51  ;;  %3263 = vmatmul.mubr.msk.bf16.gmra.mrb[92].mxu1 %vm900_vm2, %v3472_v52 }
  0xc7   :  { %3018 = vmatprep.mubr.msk.bf16.mxu0 %vm3551_vm0, %v3550_v0  ;;  %3266 = vmatprep.mubr.msk.bf16.mxu1 %vm3551_vm0, %v3550_v0 }
  0xce   :  { %3019 = vmatmul.mubr.msk.bf16.gmra.mrb[96].mxu0 %vm900_vm2, %v3473_v53  ;;  %3267 = vmatmul.mubr.msk.bf16.gmra.mrb[96].mxu1 %vm900_vm2, %v3474_v54 }
  0xcf   :  { %3022 = vmatprep.mubr.msk.bf16.mxu0 %vm3551_vm0, %v3550_v0  ;;  %3270 = vmatprep.mubr.msk.bf16.mxu1 %vm3551_vm0, %v3550_v0 }
  0xd6   :  { %3023 = vmatmul.mubr.msk.bf16.gmra.mrb[100].mxu0 %vm900_vm2, %v3475_v55  ;;  %3271 = vmatmul.mubr.msk.bf16.gmra.mrb[100].mxu1 %vm900_vm2, %v3476_v56 }
  0xd7   :  { %3026 = vmatprep.mubr.msk.bf16.mxu0 %vm3551_vm0, %v3550_v0  ;;  %3274 = vmatprep.mubr.msk.bf16.mxu1 %vm3551_vm0, %v3550_v0 }
  0xde   :  { %3027 = vmatmul.mubr.msk.bf16.gmra.mrb[104].mxu0 %vm900_vm2, %v3477_v57  ;;  %3275 = vmatmul.mubr.msk.bf16.gmra.mrb[104].mxu1 %vm900_vm2, %v3478_v58  ;;  %v3487_v57 = vld [vmem:[%s5566_s0 + $0xf8] sm:$0xff]  }
  0xdf   :  { %3030 = vmatprep.mubr.msk.bf16.mxu0 %vm3551_vm0, %v3550_v0  ;;  %3278 = vmatprep.mubr.msk.bf16.mxu1 %vm3551_vm0, %v3550_v0 }
  0xe1   :  { %v1308_v60 = vpop.f32.mrb[0].mxu0  ;;  %v1804_v61 = vpop.f32.mrb[0].mxu1 }
  0xe2   :  { %v1309_v62 = vadd.f32 %v3914_v59, %v1308_v60  ;;  %v2924_v63 = vpop.f32.mrb[1].mxu0  ;;  %v1805_v2 = vadd.f32 %v3914_v59, %v1804_v61  ;;  %v3172_v3 = vpop.f32.mrb[1].mxu1  ;;  %v3488_v61 = vld [vmem:[%s5566_s0 + $0x2e8] sm:$0xff]  }
  0xe3   :  { %v1311_v5 = vpop.f32.mrb[2].mxu0  ;;  %v1807_v6 = vpop.f32.mrb[2].mxu1 }
  0xe4   :  { %2291 = vst.msk [vmem:[%s5568_s3] sm:$0xff] %vm2290_vm3, %v1309_v62  ;;  %v1312_v7 = vadd.f32 %v3914_v59, %v1311_v5  ;;  %v2925_v8 = vpop.f32.mrb[3].mxu0  ;;  %2415 = vst.msk [vmem:[%s5568_s3 + $0x3e0] sm:$0xff] %vm2290_vm3, %v1805_v2  ;;  %v1808_v9 = vadd.f32 %v3914_v59, %v1807_v6  ;;  %v3173_v10 = vpop.f32.mrb[3].mxu1 }
  0xe6   :  { %2292 = vst.msk [vmem:[%s5568_s3 + $0x8] sm:$0xff] %vm2290_vm3, %v1312_v7  ;;  %3031 = vmatmul.mubr.msk.bf16.gmra.mrb[108].mxu0 %vm900_vm2, %v3479_v1  ;;  %2416 = vst.msk [vmem:[%s5568_s3 + $0x3e8] sm:$0xff] %vm2290_vm3, %v1808_v9  ;;  %3279 = vmatmul.mubr.msk.bf16.gmra.mrb[108].mxu1 %vm900_vm2, %v3480_v4  ;;  %v3489_v9 = vld [vmem:[%s5566_s0 + $0x100] sm:$0xff]  }
  0xe7   :  { %3034 = vmatprep.mubr.msk.bf16.mxu0 %vm3551_vm0, %v3550_v0  ;;  %3282 = vmatprep.mubr.msk.bf16.mxu1 %vm3551_vm0, %v3550_v0 }
  0xe9   :  { %v1316_v11 = vpop.f32.mrb[4].mxu0  ;;  %v1812_v12 = vpop.f32.mrb[4].mxu1 }
  0xea   :  { %v1317_v13 = vadd.f32 %v3914_v59, %v1316_v11  ;;  %v2928_v14 = vpop.f32.mrb[5].mxu0  ;;  %v1813_v16 = vadd.f32 %v3914_v59, %v1812_v12  ;;  %v3176_v17 = vpop.f32.mrb[5].mxu1  ;;  %v3490_v12 = vld [vmem:[%s5566_s0 + $0x2f0] sm:$0xff]  }
  0xeb   :  { %v1319_v19 = vpop.f32.mrb[6].mxu0  ;;  %v1815_v20 = vpop.f32.mrb[6].mxu1 }
  0xec   :  { %2293 = vst.msk [vmem:[%s5568_s3 + $0x10] sm:$0xff] %vm2290_vm3, %v1317_v13  ;;  %v1320_v21 = vadd.f32 %v3914_v59, %v1319_v19  ;;  %v2929_v22 = vpop.f32.mrb[7].mxu0  ;;  %2417 = vst.msk [vmem:[%s5568_s3 + $0x3f0] sm:$0xff] %vm2290_vm3, %v1813_v16  ;;  %v1816_v23 = vadd.f32 %v3914_v59, %v1815_v20  ;;  %v3177_v24 = vpop.f32.mrb[7].mxu1 }
  0xee   :  { %2294 = vst.msk [vmem:[%s5568_s3 + $0x18] sm:$0xff] %vm2290_vm3, %v1320_v21  ;;  %3035 = vmatmul.mubr.msk.bf16.gmra.mrb[112].mxu0 %vm900_vm2, %v3481_v15  ;;  %2418 = vst.msk [vmem:[%s5568_s3 + $0x3f8] sm:$0xff] %vm2290_vm3, %v1816_v23  ;;  %3283 = vmatmul.mubr.msk.bf16.gmra.mrb[112].mxu1 %vm900_vm2, %v3482_v18  ;;  %v3491_v23 = vld [vmem:[%s5566_s0 + $0x108] sm:$0xff]  }
  0xef   :  { %3038 = vmatprep.mubr.msk.bf16.mxu0 %vm3551_vm0, %v3550_v0  ;;  %3286 = vmatprep.mubr.msk.bf16.mxu1 %vm3551_vm0, %v3550_v0 }
  0xf1   :  { %v1324_v25 = vpop.f32.mrb[8].mxu0  ;;  %v1820_v26 = vpop.f32.mrb[8].mxu1 }
  0xf2   :  { %v1325_v27 = vadd.f32 %v3914_v59, %v1324_v25  ;;  %v2932_v28 = vpop.f32.mrb[9].mxu0  ;;  %v1821_v30 = vadd.f32 %v3914_v59, %v1820_v26  ;;  %v3180_v31 = vpop.f32.mrb[9].mxu1  ;;  %v3492_v26 = vld [vmem:[%s5566_s0 + $0x2f8] sm:$0xff]  }
  0xf3   :  { %v1327_v33 = vpop.f32.mrb[10].mxu0  ;;  %v1823_v34 = vpop.f32.mrb[10].mxu1 }
  0xf4   :  { %2295 = vst.msk [vmem:[%s5568_s3 + $0x20] sm:$0xff] %vm2290_vm3, %v1325_v27  ;;  %v1328_v35 = vadd.f32 %v3914_v59, %v1327_v33  ;;  %v2933_v36 = vpop.f32.mrb[11].mxu0  ;;  %2419 = vst.msk [vmem:[%s5568_s3 + $0x400] sm:$0xff] %vm2290_vm3, %v1821_v30  ;;  %v1824_v37 = vadd.f32 %v3914_v59, %v1823_v34  ;;  %v3181_v38 = vpop.f32.mrb[11].mxu1 }
  0xf6   :  { %2296 = vst.msk [vmem:[%s5568_s3 + $0x28] sm:$0xff] %vm2290_vm3, %v1328_v35  ;;  %3039 = vmatmul.mubr.msk.bf16.gmra.mrb[116].mxu0 %vm900_vm2, %v3483_v29  ;;  %2420 = vst.msk [vmem:[%s5568_s3 + $0x408] sm:$0xff] %vm2290_vm3, %v1824_v37  ;;  %3287 = vmatmul.mubr.msk.bf16.gmra.mrb[116].mxu1 %vm900_vm2, %v3484_v32  ;;  %v3493_v37 = vld [vmem:[%s5566_s0 + $0x110] sm:$0xff]  }
  0xf7   :  { %3042 = vmatprep.mubr.msk.bf16.mxu0 %vm3551_vm0, %v3550_v0  ;;  %3290 = vmatprep.mubr.msk.bf16.mxu1 %vm3551_vm0, %v3550_v0 }
  0xf9   :  { %v1332_v39 = vpop.f32.mrb[12].mxu0  ;;  %v1828_v40 = vpop.f32.mrb[12].mxu1 }
  0xfa   :  { %v1333_v41 = vadd.f32 %v3914_v59, %v1332_v39  ;;  %v2936_v42 = vpop.f32.mrb[13].mxu0  ;;  %v1829_v44 = vadd.f32 %v3914_v59, %v1828_v40  ;;  %v3184_v45 = vpop.f32.mrb[13].mxu1  ;;  %v3494_v40 = vld [vmem:[%s5566_s0 + $0x300] sm:$0xff]  }
  0xfb   :  { %v1335_v47 = vpop.f32.mrb[14].mxu0  ;;  %v1831_v48 = vpop.f32.mrb[14].mxu1 }
  0xfc   :  { %2297 = vst.msk [vmem:[%s5568_s3 + $0x30] sm:$0xff] %vm2290_vm3, %v1333_v41  ;;  %v1336_v49 = vadd.f32 %v3914_v59, %v1335_v47  ;;  %v2937_v50 = vpop.f32.mrb[15].mxu0  ;;  %2421 = vst.msk [vmem:[%s5568_s3 + $0x410] sm:$0xff] %vm2290_vm3, %v1829_v44  ;;  %v1832_v51 = vadd.f32 %v3914_v59, %v1831_v48  ;;  %v3185_v52 = vpop.f32.mrb[15].mxu1 }
  0xfe   :  { %2298 = vst.msk [vmem:[%s5568_s3 + $0x38] sm:$0xff] %vm2290_vm3, %v1336_v49  ;;  %3043 = vmatmul.mubr.msk.bf16.gmra.mrb[120].mxu0 %vm900_vm2, %v3485_v43  ;;  %2422 = vst.msk [vmem:[%s5568_s3 + $0x418] sm:$0xff] %vm2290_vm3, %v1832_v51  ;;  %3291 = vmatmul.mubr.msk.bf16.gmra.mrb[120].mxu1 %vm900_vm2, %v3486_v46  ;;  %v3495_v51 = vld [vmem:[%s5566_s0 + $0x118] sm:$0xff]  }
  0xff   :  { %3046 = vmatprep.mubr.msk.bf16.mxu0 %vm3551_vm0, %v3550_v0  ;;  %3294 = vmatprep.mubr.msk.bf16.mxu1 %vm3551_vm0, %v3550_v0 }
 0x101   :  { %v1340_v53 = vpop.f32.mrb[16].mxu0  ;;  %v1836_v54 = vpop.f32.mrb[16].mxu1 }
 0x102   :  { %v1341_v55 = vadd.f32 %v3914_v59, %v1340_v53  ;;  %v2940_v56 = vpop.f32.mrb[17].mxu0  ;;  %v1837_v58 = vadd.f32 %v3914_v59, %v1836_v54  ;;  %v3188_v60 = vpop.f32.mrb[17].mxu1  ;;  %v3496_v54 = vld [vmem:[%s5566_s0 + $0x308] sm:$0xff]  }
 0x103   :  { %v1343_v62 = vpop.f32.mrb[18].mxu0  ;;  %v1839_v63 = vpop.f32.mrb[18].mxu1 }
 0x104   :  { %2299 = vst.msk [vmem:[%s5568_s3 + $0x40] sm:$0xff] %vm2290_vm3, %v1341_v55  ;;  %v1344_v1 = vadd.f32 %v3914_v59, %v1343_v62  ;;  %v2941_v2 = vpop.f32.mrb[19].mxu0  ;;  %2423 = vst.msk [vmem:[%s5568_s3 + $0x420] sm:$0xff] %vm2290_vm3, %v1837_v58  ;;  %v1840_v3 = vadd.f32 %v3914_v59, %v1839_v63  ;;  %v3189_v4 = vpop.f32.mrb[19].mxu1 }
 0x106   :  { %2300 = vst.msk [vmem:[%s5568_s3 + $0x48] sm:$0xff] %vm2290_vm3, %v1344_v1  ;;  %3047 = vmatmul.mubr.msk.bf16.gmra.mrb[124].mxu0 %vm900_vm2, %v3487_v57  ;;  %2424 = vst.msk [vmem:[%s5568_s3 + $0x428] sm:$0xff] %vm2290_vm3, %v1840_v3  ;;  %3295 = vmatmul.mubr.msk.bf16.gmra.mrb[124].mxu1 %vm900_vm2, %v3488_v61  ;;  %v3497_v3 = vld [vmem:[%s5566_s0 + $0x120] sm:$0xff]  }
 0x107   :  { %3050 = vmatprep.mubr.msk.bf16.mxu0 %vm3551_vm0, %v3550_v0  ;;  %3298 = vmatprep.mubr.msk.bf16.mxu1 %vm3551_vm0, %v3550_v0 }
 0x109   :  { %v1348_v5 = vpop.f32.mrb[20].mxu0  ;;  %v1844_v6 = vpop.f32.mrb[20].mxu1 }
 0x10a   :  { %v1349_v7 = vadd.f32 %v3914_v59, %v1348_v5  ;;  %v2944_v8 = vpop.f32.mrb[21].mxu0  ;;  %v1845_v10 = vadd.f32 %v3914_v59, %v1844_v6  ;;  %v3192_v11 = vpop.f32.mrb[21].mxu1  ;;  %v3498_v6 = vld [vmem:[%s5566_s0 + $0x310] sm:$0xff]  }
 0x10b   :  { %v1351_v13 = vpop.f32.mrb[22].mxu0  ;;  %v1847_v14 = vpop.f32.mrb[22].mxu1 }
 0x10c   :  { %2301 = vst.msk [vmem:[%s5568_s3 + $0x50] sm:$0xff] %vm2290_vm3, %v1349_v7  ;;  %v1352_v15 = vadd.f32 %v3914_v59, %v1351_v13  ;;  %v2945_v16 = vpop.f32.mrb[23].mxu0  ;;  %2425 = vst.msk [vmem:[%s5568_s3 + $0x430] sm:$0xff] %vm2290_vm3, %v1845_v10  ;;  %v1848_v17 = vadd.f32 %v3914_v59, %v1847_v14  ;;  %v3193_v18 = vpop.f32.mrb[23].mxu1 }
 0x10e   :  { %2302 = vst.msk [vmem:[%s5568_s3 + $0x58] sm:$0xff] %vm2290_vm3, %v1352_v15  ;;  %3051 = vmatmul.mubr.msk.bf16.gmra.mrb[128].mxu0 %vm900_vm2, %v3489_v9  ;;  %2426 = vst.msk [vmem:[%s5568_s3 + $0x438] sm:$0xff] %vm2290_vm3, %v1848_v17  ;;  %3299 = vmatmul.mubr.msk.bf16.gmra.mrb[128].mxu1 %vm900_vm2, %v3490_v12  ;;  %v3499_v17 = vld [vmem:[%s5566_s0 + $0x128] sm:$0xff]  }
 0x10f   :  { %3054 = vmatprep.mubr.msk.bf16.mxu0 %vm3551_vm0, %v3550_v0  ;;  %3302 = vmatprep.mubr.msk.bf16.mxu1 %vm3551_vm0, %v3550_v0 }
 0x111   :  { %v1356_v19 = vpop.f32.mrb[24].mxu0  ;;  %v1852_v20 = vpop.f32.mrb[24].mxu1 }
 0x112   :  { %v1357_v21 = vadd.f32 %v3914_v59, %v1356_v19  ;;  %v2948_v22 = vpop.f32.mrb[25].mxu0  ;;  %v1853_v24 = vadd.f32 %v3914_v59, %v1852_v20  ;;  %v3196_v25 = vpop.f32.mrb[25].mxu1  ;;  %v3500_v20 = vld [vmem:[%s5566_s0 + $0x318] sm:$0xff]  }
 0x113   :  { %v1359_v27 = vpop.f32.mrb[26].mxu0  ;;  %v1855_v28 = vpop.f32.mrb[26].mxu1 }
 0x114   :  { %2303 = vst.msk [vmem:[%s5568_s3 + $0x60] sm:$0xff] %vm2290_vm3, %v1357_v21  ;;  %v1360_v29 = vadd.f32 %v3914_v59, %v1359_v27  ;;  %v2949_v30 = vpop.f32.mrb[27].mxu0  ;;  %2427 = vst.msk [vmem:[%s5568_s3 + $0x440] sm:$0xff] %vm2290_vm3, %v1853_v24  ;;  %v1856_v31 = vadd.f32 %v3914_v59, %v1855_v28  ;;  %v3197_v32 = vpop.f32.mrb[27].mxu1 }
 0x116   :  { %2304 = vst.msk [vmem:[%s5568_s3 + $0x68] sm:$0xff] %vm2290_vm3, %v1360_v29  ;;  %3055 = vmatmul.mubr.msk.bf16.gmra.mrb[132].mxu0 %vm900_vm2, %v3491_v23  ;;  %2428 = vst.msk [vmem:[%s5568_s3 + $0x448] sm:$0xff] %vm2290_vm3, %v1856_v31  ;;  %3303 = vmatmul.mubr.msk.bf16.gmra.mrb[132].mxu1 %vm900_vm2, %v3492_v26  ;;  %v3501_v31 = vld [vmem:[%s5566_s0 + $0x130] sm:$0xff]  }
 0x117   :  { %3058 = vmatprep.mubr.msk.bf16.mxu0 %vm3551_vm0, %v3550_v0  ;;  %3306 = vmatprep.mubr.msk.bf16.mxu1 %vm3551_vm0, %v3550_v0 }
 0x119   :  { %v1364_v33 = vpop.f32.mrb[28].mxu0  ;;  %v1860_v34 = vpop.f32.mrb[28].mxu1 }
 0x11a   :  { %v1365_v35 = vadd.f32 %v3914_v59, %v1364_v33  ;;  %v2952_v36 = vpop.f32.mrb[29].mxu0  ;;  %v1861_v38 = vadd.f32 %v3914_v59, %v1860_v34  ;;  %v3200_v39 = vpop.f32.mrb[29].mxu1  ;;  %v3502_v34 = vld [vmem:[%s5566_s0 + $0x320] sm:$0xff]  }
 0x11b   :  { %v1367_v41 = vpop.f32.mrb[30].mxu0  ;;  %v1863_v42 = vpop.f32.mrb[30].mxu1 }
 0x11c   :  { %2305 = vst.msk [vmem:[%s5568_s3 + $0x70] sm:$0xff] %vm2290_vm3, %v1365_v35  ;;  %v1368_v43 = vadd.f32 %v3914_v59, %v1367_v41  ;;  %v2953_v44 = vpop.f32.mrb[31].mxu0  ;;  %2429 = vst.msk [vmem:[%s5568_s3 + $0x450] sm:$0xff] %vm2290_vm3, %v1861_v38  ;;  %v1864_v45 = vadd.f32 %v3914_v59, %v1863_v42  ;;  %v3201_v46 = vpop.f32.mrb[31].mxu1 }
 0x11e   :  { %2306 = vst.msk [vmem:[%s5568_s3 + $0x78] sm:$0xff] %vm2290_vm3, %v1368_v43  ;;  %3059 = vmatmul.mubr.msk.bf16.gmra.mrb[136].mxu0 %vm900_vm2, %v3493_v37  ;;  %2430 = vst.msk [vmem:[%s5568_s3 + $0x458] sm:$0xff] %vm2290_vm3, %v1864_v45  ;;  %3307 = vmatmul.mubr.msk.bf16.gmra.mrb[136].mxu1 %vm900_vm2, %v3494_v40  ;;  %v3503_v45 = vld [vmem:[%s5566_s0 + $0x138] sm:$0xff]  }
 0x11f   :  { %3062 = vmatprep.mubr.msk.bf16.mxu0 %vm3551_vm0, %v3550_v0  ;;  %3310 = vmatprep.mubr.msk.bf16.mxu1 %vm3551_vm0, %v3550_v0 }
 0x121   :  { %v1372_v47 = vpop.f32.mrb[32].mxu0  ;;  %v1868_v48 = vpop.f32.mrb[32].mxu1 }
 0x122   :  { %v1373_v49 = vadd.f32 %v3914_v59, %v1372_v47  ;;  %v2956_v50 = vpop.f32.mrb[33].mxu0  ;;  %v1869_v52 = vadd.f32 %v3914_v59, %v1868_v48  ;;  %v3204_v53 = vpop.f32.mrb[33].mxu1  ;;  %v3504_v48 = vld [vmem:[%s5566_s0 + $0x328] sm:$0xff]  }
 0x123   :  { %v1375_v55 = vpop.f32.mrb[34].mxu0  ;;  %v1871_v56 = vpop.f32.mrb[34].mxu1 }
 0x124   :  { %2307 = vst.msk [vmem:[%s5568_s3 + $0x80] sm:$0xff] %vm2290_vm3, %v1373_v49  ;;  %v1376_v57 = vadd.f32 %v3914_v59, %v1375_v55  ;;  %v2957_v58 = vpop.f32.mrb[35].mxu0  ;;  %2431 = vst.msk [vmem:[%s5568_s3 + $0x460] sm:$0xff] %vm2290_vm3, %v1869_v52  ;;  %v1872_v60 = vadd.f32 %v3914_v59, %v1871_v56  ;;  %v3205_v61 = vpop.f32.mrb[35].mxu1 }
 0x126   :  { %2308 = vst.msk [vmem:[%s5568_s3 + $0x88] sm:$0xff] %vm2290_vm3, %v1376_v57  ;;  %3063 = vmatmul.mubr.msk.bf16.gmra.mrb[140].mxu0 %vm900_vm2, %v3495_v51  ;;  %2432 = vst.msk [vmem:[%s5568_s3 + $0x468] sm:$0xff] %vm2290_vm3, %v1872_v60  ;;  %3311 = vmatmul.mubr.msk.bf16.gmra.mrb[140].mxu1 %vm900_vm2, %v3496_v54  ;;  %v3505_v60 = vld [vmem:[%s5566_s0 + $0x140] sm:$0xff]  }
 0x127   :  { %3066 = vmatprep.mubr.msk.bf16.mxu0 %vm3551_vm0, %v3550_v0  ;;  %3314 = vmatprep.mubr.msk.bf16.mxu1 %vm3551_vm0, %v3550_v0 }
 0x129   :  { %v1380_v62 = vpop.f32.mrb[36].mxu0  ;;  %v1876_v63 = vpop.f32.mrb[36].mxu1 }
 0x12a   :  { %v1381_v1 = vadd.f32 %v3914_v59, %v1380_v62  ;;  %v2960_v2 = vpop.f32.mrb[37].mxu0  ;;  %v1877_v4 = vadd.f32 %v3914_v59, %v1876_v63  ;;  %v3208_v5 = vpop.f32.mrb[37].mxu1  ;;  %v3506_v63 = vld [vmem:[%s5566_s0 + $0x330] sm:$0xff]  }
 0x12b   :  { %v1383_v7 = vpop.f32.mrb[38].mxu0  ;;  %v1879_v8 = vpop.f32.mrb[38].mxu1 }
 0x12c   :  { %2309 = vst.msk [vmem:[%s5568_s3 + $0x90] sm:$0xff] %vm2290_vm3, %v1381_v1  ;;  %v1384_v9 = vadd.f32 %v3914_v59, %v1383_v7  ;;  %v2961_v10 = vpop.f32.mrb[39].mxu0  ;;  %2433 = vst.msk [vmem:[%s5568_s3 + $0x470] sm:$0xff] %vm2290_vm3, %v1877_v4  ;;  %v1880_v11 = vadd.f32 %v3914_v59, %v1879_v8  ;;  %v3209_v12 = vpop.f32.mrb[39].mxu1 }
 0x12e   :  { %2310 = vst.msk [vmem:[%s5568_s3 + $0x98] sm:$0xff] %vm2290_vm3, %v1384_v9  ;;  %3067 = vmatmul.mubr.msk.bf16.gmra.mrb[144].mxu0 %vm900_vm2, %v3497_v3  ;;  %2434 = vst.msk [vmem:[%s5568_s3 + $0x478] sm:$0xff] %vm2290_vm3, %v1880_v11  ;;  %3315 = vmatmul.mubr.msk.bf16.gmra.mrb[144].mxu1 %vm900_vm2, %v3498_v6  ;;  %v3507_v11 = vld [vmem:[%s5566_s0 + $0x148] sm:$0xff]  }
 0x12f   :  { %3070 = vmatprep.mubr.msk.bf16.mxu0 %vm3551_vm0, %v3550_v0  ;;  %3318 = vmatprep.mubr.msk.bf16.mxu1 %vm3551_vm0, %v3550_v0 }
 0x131   :  { %v1388_v13 = vpop.f32.mrb[40].mxu0  ;;  %v1884_v14 = vpop.f32.mrb[40].mxu1 }
 0x132   :  { %v1389_v15 = vadd.f32 %v3914_v59, %v1388_v13  ;;  %v2964_v16 = vpop.f32.mrb[41].mxu0  ;;  %v1885_v18 = vadd.f32 %v3914_v59, %v1884_v14  ;;  %v3212_v19 = vpop.f32.mrb[41].mxu1  ;;  %v3508_v14 = vld [vmem:[%s5566_s0 + $0x338] sm:$0xff]  }
 0x133   :  { %v1391_v21 = vpop.f32.mrb[42].mxu0  ;;  %v1887_v22 = vpop.f32.mrb[42].mxu1 }
 0x134   :  { %2311 = vst.msk [vmem:[%s5568_s3 + $0xa0] sm:$0xff] %vm2290_vm3, %v1389_v15  ;;  %v1392_v23 = vadd.f32 %v3914_v59, %v1391_v21  ;;  %v2965_v24 = vpop.f32.mrb[43].mxu0  ;;  %2435 = vst.msk [vmem:[%s5568_s3 + $0x480] sm:$0xff] %vm2290_vm3, %v1885_v18  ;;  %v1888_v25 = vadd.f32 %v3914_v59, %v1887_v22  ;;  %v3213_v26 = vpop.f32.mrb[43].mxu1 }
 0x136   :  { %2312 = vst.msk [vmem:[%s5568_s3 + $0xa8] sm:$0xff] %vm2290_vm3, %v1392_v23  ;;  %3071 = vmatmul.mubr.msk.bf16.gmra.mrb[148].mxu0 %vm900_vm2, %v3499_v17  ;;  %2436 = vst.msk [vmem:[%s5568_s3 + $0x488] sm:$0xff] %vm2290_vm3, %v1888_v25  ;;  %3319 = vmatmul.mubr.msk.bf16.gmra.mrb[148].mxu1 %vm900_vm2, %v3500_v20  ;;  %v3509_v25 = vld [vmem:[%s5566_s0 + $0x150] sm:$0xff]  }
 0x137   :  { %3074 = vmatprep.mubr.msk.bf16.mxu0 %vm3551_vm0, %v3550_v0  ;;  %3322 = vmatprep.mubr.msk.bf16.mxu1 %vm3551_vm0, %v3550_v0 }
 0x139   :  { %v1396_v27 = vpop.f32.mrb[44].mxu0  ;;  %v1892_v28 = vpop.f32.mrb[44].mxu1 }
 0x13a   :  { %v1397_v29 = vadd.f32 %v3914_v59, %v1396_v27  ;;  %v2968_v30 = vpop.f32.mrb[45].mxu0  ;;  %v1893_v32 = vadd.f32 %v3914_v59, %v1892_v28  ;;  %v3216_v33 = vpop.f32.mrb[45].mxu1  ;;  %v3510_v28 = vld [vmem:[%s5566_s0 + $0x340] sm:$0xff]  }
 0x13b   :  { %v1399_v35 = vpop.f32.mrb[46].mxu0  ;;  %v1895_v36 = vpop.f32.mrb[46].mxu1 }
 0x13c   :  { %2313 = vst.msk [vmem:[%s5568_s3 + $0xb0] sm:$0xff] %vm2290_vm3, %v1397_v29  ;;  %v1400_v37 = vadd.f32 %v3914_v59, %v1399_v35  ;;  %v2969_v38 = vpop.f32.mrb[47].mxu0  ;;  %2437 = vst.msk [vmem:[%s5568_s3 + $0x490] sm:$0xff] %vm2290_vm3, %v1893_v32  ;;  %v1896_v39 = vadd.f32 %v3914_v59, %v1895_v36  ;;  %v3217_v40 = vpop.f32.mrb[47].mxu1 }
 0x13e   :  { %2314 = vst.msk [vmem:[%s5568_s3 + $0xb8] sm:$0xff] %vm2290_vm3, %v1400_v37  ;;  %3075 = vmatmul.mubr.msk.bf16.gmra.mrb[152].mxu0 %vm900_vm2, %v3501_v31  ;;  %2438 = vst.msk [vmem:[%s5568_s3 + $0x498] sm:$0xff] %vm2290_vm3, %v1896_v39  ;;  %3323 = vmatmul.mubr.msk.bf16.gmra.mrb[152].mxu1 %vm900_vm2, %v3502_v34  ;;  %v3511_v39 = vld [vmem:[%s5566_s0 + $0x158] sm:$0xff]  }
 0x13f   :  { %3078 = vmatprep.mubr.msk.bf16.mxu0 %vm3551_vm0, %v3550_v0  ;;  %3326 = vmatprep.mubr.msk.bf16.mxu1 %vm3551_vm0, %v3550_v0 }
 0x141   :  { %v1404_v41 = vpop.f32.mrb[48].mxu0  ;;  %v1900_v42 = vpop.f32.mrb[48].mxu1 }
 0x142   :  { %v1405_v43 = vadd.f32 %v3914_v59, %v1404_v41  ;;  %v2972_v44 = vpop.f32.mrb[49].mxu0  ;;  %v1901_v46 = vadd.f32 %v3914_v59, %v1900_v42  ;;  %v3220_v47 = vpop.f32.mrb[49].mxu1  ;;  %v3512_v42 = vld [vmem:[%s5566_s0 + $0x348] sm:$0xff]  }
 0x143   :  { %v1407_v49 = vpop.f32.mrb[50].mxu0  ;;  %v1903_v50 = vpop.f32.mrb[50].mxu1 }
 0x144   :  { %2315 = vst.msk [vmem:[%s5568_s3 + $0xc0] sm:$0xff] %vm2290_vm3, %v1405_v43  ;;  %v1408_v51 = vadd.f32 %v3914_v59, %v1407_v49  ;;  %v2973_v52 = vpop.f32.mrb[51].mxu0  ;;  %2439 = vst.msk [vmem:[%s5568_s3 + $0x4a0] sm:$0xff] %vm2290_vm3, %v1901_v46  ;;  %v1904_v53 = vadd.f32 %v3914_v59, %v1903_v50  ;;  %v3221_v54 = vpop.f32.mrb[51].mxu1 }
 0x146   :  { %2316 = vst.msk [vmem:[%s5568_s3 + $0xc8] sm:$0xff] %vm2290_vm3, %v1408_v51  ;;  %3079 = vmatmul.mubr.msk.bf16.gmra.mrb[156].mxu0 %vm900_vm2, %v3503_v45  ;;  %2440 = vst.msk [vmem:[%s5568_s3 + $0x4a8] sm:$0xff] %vm2290_vm3, %v1904_v53  ;;  %3327 = vmatmul.mubr.msk.bf16.gmra.mrb[156].mxu1 %vm900_vm2, %v3504_v48  ;;  %v3513_v53 = vld [vmem:[%s5566_s0 + $0x160] sm:$0xff]  }
 0x147   :  { %3082 = vmatprep.mubr.msk.bf16.mxu0 %vm3551_vm0, %v3550_v0  ;;  %3330 = vmatprep.mubr.msk.bf16.mxu1 %vm3551_vm0, %v3550_v0 }
 0x149   :  { %v1412_v55 = vpop.f32.mrb[52].mxu0  ;;  %v1908_v56 = vpop.f32.mrb[52].mxu1 }
 0x14a   :  { %v1413_v57 = vadd.f32 %v3914_v59, %v1412_v55  ;;  %v2976_v58 = vpop.f32.mrb[53].mxu0  ;;  %v1909_v61 = vadd.f32 %v3914_v59, %v1908_v56  ;;  %v3224_v62 = vpop.f32.mrb[53].mxu1  ;;  %v3514_v56 = vld [vmem:[%s5566_s0 + $0x350] sm:$0xff]  }
 0x14b   :  { %v1415_v1 = vpop.f32.mrb[54].mxu0  ;;  %v1911_v2 = vpop.f32.mrb[54].mxu1 }
 0x14c   :  { %2317 = vst.msk [vmem:[%s5568_s3 + $0xd0] sm:$0xff] %vm2290_vm3, %v1413_v57  ;;  %v1416_v3 = vadd.f32 %v3914_v59, %v1415_v1  ;;  %v2977_v4 = vpop.f32.mrb[55].mxu0  ;;  %2441 = vst.msk [vmem:[%s5568_s3 + $0x4b0] sm:$0xff] %vm2290_vm3, %v1909_v61  ;;  %v1912_v5 = vadd.f32 %v3914_v59, %v1911_v2  ;;  %v3225_v6 = vpop.f32.mrb[55].mxu1 }
 0x14e   :  { %2318 = vst.msk [vmem:[%s5568_s3 + $0xd8] sm:$0xff] %vm2290_vm3, %v1416_v3  ;;  %3083 = vmatmul.mubr.msk.bf16.gmra.mrb[160].mxu0 %vm900_vm2, %v3505_v60  ;;  %2442 = vst.msk [vmem:[%s5568_s3 + $0x4b8] sm:$0xff] %vm2290_vm3, %v1912_v5  ;;  %3331 = vmatmul.mubr.msk.bf16.gmra.mrb[160].mxu1 %vm900_vm2, %v3506_v63  ;;  %v3515_v5 = vld [vmem:[%s5566_s0 + $0x168] sm:$0xff]  }
 0x14f   :  { %3086 = vmatprep.mubr.msk.bf16.mxu0 %vm3551_vm0, %v3550_v0  ;;  %3334 = vmatprep.mubr.msk.bf16.mxu1 %vm3551_vm0, %v3550_v0 }
 0x151   :  { %v1420_v7 = vpop.f32.mrb[56].mxu0  ;;  %v1916_v8 = vpop.f32.mrb[56].mxu1 }
 0x152   :  { %v1421_v9 = vadd.f32 %v3914_v59, %v1420_v7  ;;  %v2980_v10 = vpop.f32.mrb[57].mxu0  ;;  %v1917_v12 = vadd.f32 %v3914_v59, %v1916_v8  ;;  %v3228_v13 = vpop.f32.mrb[57].mxu1  ;;  %v3516_v8 = vld [vmem:[%s5566_s0 + $0x358] sm:$0xff]  }
 0x153   :  { %v1423_v15 = vpop.f32.mrb[58].mxu0  ;;  %v1919_v16 = vpop.f32.mrb[58].mxu1 }
 0x154   :  { %2319 = vst.msk [vmem:[%s5568_s3 + $0xe0] sm:$0xff] %vm2290_vm3, %v1421_v9  ;;  %v1424_v17 = vadd.f32 %v3914_v59, %v1423_v15  ;;  %v2981_v18 = vpop.f32.mrb[59].mxu0  ;;  %2443 = vst.msk [vmem:[%s5568_s3 + $0x4c0] sm:$0xff] %vm2290_vm3, %v1917_v12  ;;  %v1920_v19 = vadd.f32 %v3914_v59, %v1919_v16  ;;  %v3229_v20 = vpop.f32.mrb[59].mxu1 }
 0x156   :  { %2320 = vst.msk [vmem:[%s5568_s3 + $0xe8] sm:$0xff] %vm2290_vm3, %v1424_v17  ;;  %3087 = vmatmul.mubr.msk.bf16.gmra.mrb[164].mxu0 %vm900_vm2, %v3507_v11  ;;  %2444 = vst.msk [vmem:[%s5568_s3 + $0x4c8] sm:$0xff] %vm2290_vm3, %v1920_v19  ;;  %3335 = vmatmul.mubr.msk.bf16.gmra.mrb[164].mxu1 %vm900_vm2, %v3508_v14  ;;  %v3517_v19 = vld [vmem:[%s5566_s0 + $0x170] sm:$0xff]  }
 0x157   :  { %3090 = vmatprep.mubr.msk.bf16.mxu0 %vm3551_vm0, %v3550_v0  ;;  %3338 = vmatprep.mubr.msk.bf16.mxu1 %vm3551_vm0, %v3550_v0 }
 0x159   :  { %v1428_v21 = vpop.f32.mrb[60].mxu0  ;;  %v1924_v22 = vpop.f32.mrb[60].mxu1 }
 0x15a   :  { %v1429_v23 = vadd.f32 %v3914_v59, %v1428_v21  ;;  %v2984_v24 = vpop.f32.mrb[61].mxu0  ;;  %v1925_v26 = vadd.f32 %v3914_v59, %v1924_v22  ;;  %v3232_v27 = vpop.f32.mrb[61].mxu1  ;;  %v3518_v22 = vld [vmem:[%s5566_s0 + $0x360] sm:$0xff]  }
 0x15b   :  { %v1431_v29 = vpop.f32.mrb[62].mxu0  ;;  %v1927_v30 = vpop.f32.mrb[62].mxu1 }
 0x15c   :  { %2321 = vst.msk [vmem:[%s5568_s3 + $0xf0] sm:$0xff] %vm2290_vm3, %v1429_v23  ;;  %v1432_v31 = vadd.f32 %v3914_v59, %v1431_v29  ;;  %v2985_v32 = vpop.f32.mrb[63].mxu0  ;;  %2445 = vst.msk [vmem:[%s5568_s3 + $0x4d0] sm:$0xff] %vm2290_vm3, %v1925_v26  ;;  %v1928_v33 = vadd.f32 %v3914_v59, %v1927_v30  ;;  %v3233_v34 = vpop.f32.mrb[63].mxu1 }
 0x15e   :  { %2322 = vst.msk [vmem:[%s5568_s3 + $0xf8] sm:$0xff] %vm2290_vm3, %v1432_v31  ;;  %3091 = vmatmul.mubr.msk.bf16.gmra.mrb[168].mxu0 %vm900_vm2, %v3509_v25  ;;  %2446 = vst.msk [vmem:[%s5568_s3 + $0x4d8] sm:$0xff] %vm2290_vm3, %v1928_v33  ;;  %3339 = vmatmul.mubr.msk.bf16.gmra.mrb[168].mxu1 %vm900_vm2, %v3510_v28  ;;  %v3519_v33 = vld [vmem:[%s5566_s0 + $0x178] sm:$0xff]  }
 0x15f   :  { %3094 = vmatprep.mubr.msk.bf16.mxu0 %vm3551_vm0, %v3550_v0  ;;  %3342 = vmatprep.mubr.msk.bf16.mxu1 %vm3551_vm0, %v3550_v0 }
 0x161   :  { %v1436_v35 = vpop.f32.mrb[64].mxu0  ;;  %v1932_v36 = vpop.f32.mrb[64].mxu1 }
 0x162   :  { %v1437_v37 = vadd.f32 %v3914_v59, %v1436_v35  ;;  %v2988_v38 = vpop.f32.mrb[65].mxu0  ;;  %v1933_v40 = vadd.f32 %v3914_v59, %v1932_v36  ;;  %v3236_v41 = vpop.f32.mrb[65].mxu1  ;;  %v3520_v36 = vld [vmem:[%s5566_s0 + $0x368] sm:$0xff]  }
 0x163   :  { %v1439_v43 = vpop.f32.mrb[66].mxu0  ;;  %v1935_v44 = vpop.f32.mrb[66].mxu1 }
 0x164   :  { %2323 = vst.msk [vmem:[%s5568_s3 + $0x100] sm:$0xff] %vm2290_vm3, %v1437_v37  ;;  %v1440_v45 = vadd.f32 %v3914_v59, %v1439_v43  ;;  %v2989_v46 = vpop.f32.mrb[67].mxu0  ;;  %2447 = vst.msk [vmem:[%s5568_s3 + $0x4e0] sm:$0xff] %vm2290_vm3, %v1933_v40  ;;  %v1936_v47 = vadd.f32 %v3914_v59, %v1935_v44  ;;  %v3237_v48 = vpop.f32.mrb[67].mxu1 }
 0x166   :  { %2324 = vst.msk [vmem:[%s5568_s3 + $0x108] sm:$0xff] %vm2290_vm3, %v1440_v45  ;;  %3095 = vmatmul.mubr.msk.bf16.gmra.mrb[172].mxu0 %vm900_vm2, %v3511_v39  ;;  %2448 = vst.msk [vmem:[%s5568_s3 + $0x4e8] sm:$0xff] %vm2290_vm3, %v1936_v47  ;;  %3343 = vmatmul.mubr.msk.bf16.gmra.mrb[172].mxu1 %vm900_vm2, %v3512_v42  ;;  %v3521_v47 = vld [vmem:[%s5566_s0 + $0x180] sm:$0xff]  }
 0x167   :  { %3098 = vmatprep.mubr.msk.bf16.mxu0 %vm3551_vm0, %v3550_v0  ;;  %3346 = vmatprep.mubr.msk.bf16.mxu1 %vm3551_vm0, %v3550_v0 }
 0x169   :  { %v1444_v49 = vpop.f32.mrb[68].mxu0  ;;  %v1940_v50 = vpop.f32.mrb[68].mxu1 }
 0x16a   :  { %v1445_v51 = vadd.f32 %v3914_v59, %v1444_v49  ;;  %v2992_v52 = vpop.f32.mrb[69].mxu0  ;;  %v1941_v54 = vadd.f32 %v3914_v59, %v1940_v50  ;;  %v3240_v55 = vpop.f32.mrb[69].mxu1  ;;  %v3522_v50 = vld [vmem:[%s5566_s0 + $0x370] sm:$0xff]  }
 0x16b   :  { %v1447_v57 = vpop.f32.mrb[70].mxu0  ;;  %v1943_v58 = vpop.f32.mrb[70].mxu1 }
 0x16c   :  { %2325 = vst.msk [vmem:[%s5568_s3 + $0x110] sm:$0xff] %vm2290_vm3, %v1445_v51  ;;  %v1448_v60 = vadd.f32 %v3914_v59, %v1447_v57  ;;  %v2993_v61 = vpop.f32.mrb[71].mxu0  ;;  %2449 = vst.msk [vmem:[%s5568_s3 + $0x4f0] sm:$0xff] %vm2290_vm3, %v1941_v54  ;;  %v1944_v62 = vadd.f32 %v3914_v59, %v1943_v58  ;;  %v3241_v63 = vpop.f32.mrb[71].mxu1 }
 0x16e   :  { %2326 = vst.msk [vmem:[%s5568_s3 + $0x118] sm:$0xff] %vm2290_vm3, %v1448_v60  ;;  %3099 = vmatmul.mubr.msk.bf16.gmra.mrb[176].mxu0 %vm900_vm2, %v3513_v53  ;;  %2450 = vst.msk [vmem:[%s5568_s3 + $0x4f8] sm:$0xff] %vm2290_vm3, %v1944_v62  ;;  %3347 = vmatmul.mubr.msk.bf16.gmra.mrb[176].mxu1 %vm900_vm2, %v3514_v56  ;;  %v3523_v62 = vld [vmem:[%s5566_s0 + $0x188] sm:$0xff]  }
 0x16f   :  { %3102 = vmatprep.mubr.msk.bf16.mxu0 %vm3551_vm0, %v3550_v0  ;;  %3350 = vmatprep.mubr.msk.bf16.mxu1 %vm3551_vm0, %v3550_v0 }
 0x171   :  { %v1452_v1 = vpop.f32.mrb[72].mxu0  ;;  %v1948_v2 = vpop.f32.mrb[72].mxu1 }
 0x172   :  { %v1453_v3 = vadd.f32 %v3914_v59, %v1452_v1  ;;  %v2996_v4 = vpop.f32.mrb[73].mxu0  ;;  %v1949_v6 = vadd.f32 %v3914_v59, %v1948_v2  ;;  %v3244_v7 = vpop.f32.mrb[73].mxu1  ;;  %v3524_v2 = vld [vmem:[%s5566_s0 + $0x378] sm:$0xff]  }
 0x173   :  { %v1455_v9 = vpop.f32.mrb[74].mxu0  ;;  %v1951_v10 = vpop.f32.mrb[74].mxu1 }
 0x174   :  { %2327 = vst.msk [vmem:[%s5568_s3 + $0x120] sm:$0xff] %vm2290_vm3, %v1453_v3  ;;  %v1456_v11 = vadd.f32 %v3914_v59, %v1455_v9  ;;  %v2997_v12 = vpop.f32.mrb[75].mxu0  ;;  %2451 = vst.msk [vmem:[%s5568_s3 + $0x500] sm:$0xff] %vm2290_vm3, %v1949_v6  ;;  %v1952_v13 = vadd.f32 %v3914_v59, %v1951_v10  ;;  %v3245_v14 = vpop.f32.mrb[75].mxu1  ;;  %v4659_v10 = vld [vmem:[%s5567_s2] ss:$0 sm:$0xff] }
 0x176   :  { %2328 = vst.msk [vmem:[%s5568_s3 + $0x128] sm:$0xff] %vm2290_vm3, %v1456_v11  ;;  %3103 = vmatmul.mubr.msk.bf16.gmra.mrb[180].mxu0 %vm900_vm2, %v3515_v5  ;;  %2452 = vst.msk [vmem:[%s5568_s3 + $0x508] sm:$0xff] %vm2290_vm3, %v1952_v13  ;;  %3351 = vmatmul.mubr.msk.bf16.gmra.mrb[180].mxu1 %vm900_vm2, %v3516_v8  ;;  %v3525_v13 = vld [vmem:[%s5566_s0 + $0x190] sm:$0xff]  }
 0x177   :  { %3106 = vmatprep.mubr.msk.bf16.mxu0 %vm3551_vm0, %v3550_v0  ;;  %3354 = vmatprep.mubr.msk.bf16.mxu1 %vm3551_vm0, %v3550_v0 }
 0x179   :  { %v1460_v15 = vpop.f32.mrb[76].mxu0  ;;  %v1956_v16 = vpop.f32.mrb[76].mxu1 }
 0x17a   :  { %v1461_v17 = vadd.f32 %v3914_v59, %v1460_v15  ;;  %v3000_v18 = vpop.f32.mrb[77].mxu0  ;;  %v1957_v20 = vadd.f32 %v3914_v59, %v1956_v16  ;;  %v3248_v21 = vpop.f32.mrb[77].mxu1  ;;  %v3526_v16 = vld [vmem:[%s5566_s0 + $0x380] sm:$0xff]  }
 0x17b   :  { %v1463_v23 = vpop.f32.mrb[78].mxu0  ;;  %v1959_v24 = vpop.f32.mrb[78].mxu1 }
 0x17c   :  { %2329 = vst.msk [vmem:[%s5568_s3 + $0x130] sm:$0xff] %vm2290_vm3, %v1461_v17  ;;  %v1464_v25 = vadd.f32 %v3914_v59, %v1463_v23  ;;  %v3001_v26 = vpop.f32.mrb[79].mxu0  ;;  %2453 = vst.msk [vmem:[%s5568_s3 + $0x510] sm:$0xff] %vm2290_vm3, %v1957_v20  ;;  %v1960_v27 = vadd.f32 %v3914_v59, %v1959_v24  ;;  %v3249_v28 = vpop.f32.mrb[79].mxu1 }
 0x17e   :  { %2330 = vst.msk [vmem:[%s5568_s3 + $0x138] sm:$0xff] %vm2290_vm3, %v1464_v25  ;;  %3107 = vmatmul.mubr.msk.bf16.gmra.mrb[184].mxu0 %vm900_vm2, %v3517_v19  ;;  %2454 = vst.msk [vmem:[%s5568_s3 + $0x518] sm:$0xff] %vm2290_vm3, %v1960_v27  ;;  %3355 = vmatmul.mubr.msk.bf16.gmra.mrb[184].mxu1 %vm900_vm2, %v3518_v22  ;;  %v3527_v27 = vld [vmem:[%s5566_s0 + $0x198] sm:$0xff]  }
 0x17f   :  { %3110 = vmatprep.mubr.msk.bf16.mxu0 %vm3551_vm0, %v3550_v0  ;;  %3358 = vmatprep.mubr.msk.bf16.mxu1 %vm3551_vm0, %v3550_v0 }
 0x181   :  { %v1468_v29 = vpop.f32.mrb[80].mxu0  ;;  %v1964_v30 = vpop.f32.mrb[80].mxu1 }
 0x182   :  { %v1469_v31 = vadd.f32 %v3914_v59, %v1468_v29  ;;  %v3004_v32 = vpop.f32.mrb[81].mxu0  ;;  %v1965_v34 = vadd.f32 %v3914_v59, %v1964_v30  ;;  %v3252_v35 = vpop.f32.mrb[81].mxu1  ;;  %v3528_v30 = vld [vmem:[%s5566_s0 + $0x388] sm:$0xff]  }
 0x183   :  { %v1471_v37 = vpop.f32.mrb[82].mxu0  ;;  %v1967_v38 = vpop.f32.mrb[82].mxu1 }
 0x184   :  { %2331 = vst.msk [vmem:[%s5568_s3 + $0x140] sm:$0xff] %vm2290_vm3, %v1469_v31  ;;  %v1472_v39 = vadd.f32 %v3914_v59, %v1471_v37  ;;  %v3005_v40 = vpop.f32.mrb[83].mxu0  ;;  %2455 = vst.msk [vmem:[%s5568_s3 + $0x520] sm:$0xff] %vm2290_vm3, %v1965_v34  ;;  %v1968_v41 = vadd.f32 %v3914_v59, %v1967_v38  ;;  %v3253_v42 = vpop.f32.mrb[83].mxu1 }
 0x186   :  { %2332 = vst.msk [vmem:[%s5568_s3 + $0x148] sm:$0xff] %vm2290_vm3, %v1472_v39  ;;  %3111 = vmatmul.mubr.msk.bf16.gmra.mrb[188].mxu0 %vm900_vm2, %v3519_v33  ;;  %2456 = vst.msk [vmem:[%s5568_s3 + $0x528] sm:$0xff] %vm2290_vm3, %v1968_v41  ;;  %3359 = vmatmul.mubr.msk.bf16.gmra.mrb[188].mxu1 %vm900_vm2, %v3520_v36  ;;  %v3529_v41 = vld [vmem:[%s5566_s0 + $0x1a0] sm:$0xff]  }
 0x187   :  { %3114 = vmatprep.mubr.msk.bf16.mxu0 %vm3551_vm0, %v3550_v0  ;;  %3362 = vmatprep.mubr.msk.bf16.mxu1 %vm3551_vm0, %v3550_v0 }
 0x189   :  { %v1476_v43 = vpop.f32.mrb[84].mxu0  ;;  %v1972_v44 = vpop.f32.mrb[84].mxu1 }
 0x18a   :  { %v1477_v45 = vadd.f32 %v3914_v59, %v1476_v43  ;;  %v3008_v46 = vpop.f32.mrb[85].mxu0  ;;  %v1973_v48 = vadd.f32 %v3914_v59, %v1972_v44  ;;  %v3256_v49 = vpop.f32.mrb[85].mxu1  ;;  %v3530_v44 = vld [vmem:[%s5566_s0 + $0x390] sm:$0xff]  }
 0x18b   :  { %v1479_v51 = vpop.f32.mrb[86].mxu0  ;;  %v1975_v52 = vpop.f32.mrb[86].mxu1 }
 0x18c   :  { %2333 = vst.msk [vmem:[%s5568_s3 + $0x150] sm:$0xff] %vm2290_vm3, %v1477_v45  ;;  %v1480_v53 = vadd.f32 %v3914_v59, %v1479_v51  ;;  %v3009_v54 = vpop.f32.mrb[87].mxu0  ;;  %2457 = vst.msk [vmem:[%s5568_s3 + $0x530] sm:$0xff] %vm2290_vm3, %v1973_v48  ;;  %v1976_v55 = vadd.f32 %v3914_v59, %v1975_v52  ;;  %v3257_v56 = vpop.f32.mrb[87].mxu1 }
 0x18e   :  { %2334 = vst.msk [vmem:[%s5568_s3 + $0x158] sm:$0xff] %vm2290_vm3, %v1480_v53  ;;  %3115 = vmatmul.mubr.msk.bf16.gmra.mrb[192].mxu0 %vm900_vm2, %v3521_v47  ;;  %2458 = vst.msk [vmem:[%s5568_s3 + $0x538] sm:$0xff] %vm2290_vm3, %v1976_v55  ;;  %3363 = vmatmul.mubr.msk.bf16.gmra.mrb[192].mxu1 %vm900_vm2, %v3522_v50  ;;  %v3531_v55 = vld [vmem:[%s5566_s0 + $0x1a8] sm:$0xff]  }
 0x18f   :  { %3118 = vmatprep.mubr.msk.bf16.mxu0 %vm3551_vm0, %v3550_v0  ;;  %3366 = vmatprep.mubr.msk.bf16.mxu1 %vm3551_vm0, %v3550_v0 }
 0x191   :  { %v1484_v57 = vpop.f32.mrb[88].mxu0  ;;  %v1980_v58 = vpop.f32.mrb[88].mxu1 }
 0x192   :  { %v1485_v60 = vadd.f32 %v3914_v59, %v1484_v57  ;;  %v3012_v61 = vpop.f32.mrb[89].mxu0  ;;  %v1981_v63 = vadd.f32 %v3914_v59, %v1980_v58  ;;  %v3260_v1 = vpop.f32.mrb[89].mxu1  ;;  %v3532_v58 = vld [vmem:[%s5566_s0 + $0x398] sm:$0xff]  }
 0x193   :  { %v1487_v3 = vpop.f32.mrb[90].mxu0  ;;  %v1983_v4 = vpop.f32.mrb[90].mxu1 }
 0x194   :  { %2335 = vst.msk [vmem:[%s5568_s3 + $0x160] sm:$0xff] %vm2290_vm3, %v1485_v60  ;;  %v1488_v5 = vadd.f32 %v3914_v59, %v1487_v3  ;;  %v3013_v6 = vpop.f32.mrb[91].mxu0  ;;  %2459 = vst.msk [vmem:[%s5568_s3 + $0x540] sm:$0xff] %vm2290_vm3, %v1981_v63  ;;  %v1984_v7 = vadd.f32 %v3914_v59, %v1983_v4  ;;  %v3261_v8 = vpop.f32.mrb[91].mxu1 }
 0x196   :  { %2336 = vst.msk [vmem:[%s5568_s3 + $0x168] sm:$0xff] %vm2290_vm3, %v1488_v5  ;;  %3119 = vmatmul.mubr.msk.bf16.gmra.mrb[196].mxu0 %vm900_vm2, %v3523_v62  ;;  %2460 = vst.msk [vmem:[%s5568_s3 + $0x548] sm:$0xff] %vm2290_vm3, %v1984_v7  ;;  %3367 = vmatmul.mubr.msk.bf16.gmra.mrb[196].mxu1 %vm900_vm2, %v3524_v2  ;;  %v3533_v7 = vld [vmem:[%s5566_s0 + $0x1b0] sm:$0xff]  }
 0x197   :  { %3122 = vmatprep.mubr.msk.bf16.mxu0 %vm3551_vm0, %v3550_v0  ;;  %3370 = vmatprep.mubr.msk.bf16.mxu1 %vm3551_vm0, %v3550_v0 }
 0x199   :  { %v1492_v59 = vpop.f32.mrb[92].mxu0  ;;  %v1988_v9 = vpop.f32.mrb[92].mxu1 }
 0x19a   :  { %v1493_v11 = vadd.f32 %v4659_v10, %v1492_v59  ;;  %v3016_v12 = vpop.f32.mrb[93].mxu0  ;;  %v1989_v14 = vadd.f32 %v4659_v10, %v1988_v9  ;;  %v3264_v15 = vpop.f32.mrb[93].mxu1  ;;  %v3534_v9 = vld [vmem:[%s5566_s0 + $0x3a0] sm:$0xff]  }
 0x19b   :  { %v1495_v17 = vpop.f32.mrb[94].mxu0  ;;  %v1991_v18 = vpop.f32.mrb[94].mxu1 }
 0x19c   :  { %2337 = vst.msk [vmem:[%s5568_s3 + $0x170] sm:$0xff] %vm2290_vm3, %v1493_v11  ;;  %v1496_v19 = vadd.f32 %v4659_v10, %v1495_v17  ;;  %v3017_v20 = vpop.f32.mrb[95].mxu0  ;;  %2461 = vst.msk [vmem:[%s5568_s3 + $0x550] sm:$0xff] %vm2290_vm3, %v1989_v14  ;;  %v1992_v21 = vadd.f32 %v4659_v10, %v1991_v18  ;;  %v3265_v22 = vpop.f32.mrb[95].mxu1 }
 0x19e   :  { %2338 = vst.msk [vmem:[%s5568_s3 + $0x178] sm:$0xff] %vm2290_vm3, %v1496_v19  ;;  %3123 = vmatmul.mubr.msk.bf16.gmra.mrb[200].mxu0 %vm900_vm2, %v3525_v13  ;;  %2462 = vst.msk [vmem:[%s5568_s3 + $0x558] sm:$0xff] %vm2290_vm3, %v1992_v21  ;;  %3371 = vmatmul.mubr.msk.bf16.gmra.mrb[200].mxu1 %vm900_vm2, %v3526_v16  ;;  %v3535_v21 = vld [vmem:[%s5566_s0 + $0x1b8] sm:$0xff]  }
 0x19f   :  { %3126 = vmatprep.mubr.msk.bf16.mxu0 %vm3551_vm0, %v3550_v0  ;;  %3374 = vmatprep.mubr.msk.bf16.mxu1 %vm3551_vm0, %v3550_v0 }
 0x1a1   :  { %v1500_v23 = vpop.f32.mrb[96].mxu0  ;;  %v1996_v24 = vpop.f32.mrb[96].mxu1 }
 0x1a2   :  { %v1501_v25 = vadd.f32 %v4659_v10, %v1500_v23  ;;  %v3020_v26 = vpop.f32.mrb[97].mxu0  ;;  %v1997_v28 = vadd.f32 %v4659_v10, %v1996_v24  ;;  %v3268_v29 = vpop.f32.mrb[97].mxu1  ;;  %v3536_v24 = vld [vmem:[%s5566_s0 + $0x3a8] sm:$0xff]  }
 0x1a3   :  { %v1503_v31 = vpop.f32.mrb[98].mxu0  ;;  %v1999_v32 = vpop.f32.mrb[98].mxu1 }
 0x1a4   :  { %2339 = vst.msk [vmem:[%s5568_s3 + $0x180] sm:$0xff] %vm2290_vm3, %v1501_v25  ;;  %v1504_v33 = vadd.f32 %v4659_v10, %v1503_v31  ;;  %v3021_v34 = vpop.f32.mrb[99].mxu0  ;;  %2463 = vst.msk [vmem:[%s5568_s3 + $0x560] sm:$0xff] %vm2290_vm3, %v1997_v28  ;;  %v2000_v35 = vadd.f32 %v4659_v10, %v1999_v32  ;;  %v3269_v36 = vpop.f32.mrb[99].mxu1 }
 0x1a6   :  { %2340 = vst.msk [vmem:[%s5568_s3 + $0x188] sm:$0xff] %vm2290_vm3, %v1504_v33  ;;  %3127 = vmatmul.mubr.msk.bf16.gmra.mrb[204].mxu0 %vm900_vm2, %v3527_v27  ;;  %2464 = vst.msk [vmem:[%s5568_s3 + $0x568] sm:$0xff] %vm2290_vm3, %v2000_v35  ;;  %3375 = vmatmul.mubr.msk.bf16.gmra.mrb[204].mxu1 %vm900_vm2, %v3528_v30  ;;  %v3537_v35 = vld [vmem:[%s5566_s0 + $0x1c0] sm:$0xff]  }
 0x1a7   :  { %3130 = vmatprep.mubr.msk.bf16.mxu0 %vm3551_vm0, %v3550_v0  ;;  %3378 = vmatprep.mubr.msk.bf16.mxu1 %vm3551_vm0, %v3550_v0 }
 0x1a9   :  { %v1508_v37 = vpop.f32.mrb[100].mxu0  ;;  %v2004_v38 = vpop.f32.mrb[100].mxu1 }
 0x1aa   :  { %v1509_v39 = vadd.f32 %v4659_v10, %v1508_v37  ;;  %v3024_v40 = vpop.f32.mrb[101].mxu0  ;;  %v2005_v42 = vadd.f32 %v4659_v10, %v2004_v38  ;;  %v3272_v43 = vpop.f32.mrb[101].mxu1  ;;  %v3538_v38 = vld [vmem:[%s5566_s0 + $0x3b0] sm:$0xff]  }
 0x1ab   :  { %v1511_v45 = vpop.f32.mrb[102].mxu0  ;;  %v2007_v46 = vpop.f32.mrb[102].mxu1 }
 0x1ac   :  { %2341 = vst.msk [vmem:[%s5568_s3 + $0x190] sm:$0xff] %vm2290_vm3, %v1509_v39  ;;  %v1512_v47 = vadd.f32 %v4659_v10, %v1511_v45  ;;  %v3025_v48 = vpop.f32.mrb[103].mxu0  ;;  %2465 = vst.msk [vmem:[%s5568_s3 + $0x570] sm:$0xff] %vm2290_vm3, %v2005_v42  ;;  %v2008_v49 = vadd.f32 %v4659_v10, %v2007_v46  ;;  %v3273_v50 = vpop.f32.mrb[103].mxu1 }
 0x1ae   :  { %2342 = vst.msk [vmem:[%s5568_s3 + $0x198] sm:$0xff] %vm2290_vm3, %v1512_v47  ;;  %3131 = vmatmul.mubr.msk.bf16.gmra.mrb[208].mxu0 %vm900_vm2, %v3529_v41  ;;  %2466 = vst.msk [vmem:[%s5568_s3 + $0x578] sm:$0xff] %vm2290_vm3, %v2008_v49  ;;  %3379 = vmatmul.mubr.msk.bf16.gmra.mrb[208].mxu1 %vm900_vm2, %v3530_v44  ;;  %v3539_v49 = vld [vmem:[%s5566_s0 + $0x1c8] sm:$0xff]  }
 0x1af   :  { %3134 = vmatprep.mubr.msk.bf16.mxu0 %vm3551_vm0, %v3550_v0  ;;  %3382 = vmatprep.mubr.msk.bf16.mxu1 %vm3551_vm0, %v3550_v0 }
 0x1b1   :  { %v1516_v51 = vpop.f32.mrb[104].mxu0  ;;  %v2012_v52 = vpop.f32.mrb[104].mxu1 }
 0x1b2   :  { %v1517_v53 = vadd.f32 %v4659_v10, %v1516_v51  ;;  %v3028_v54 = vpop.f32.mrb[105].mxu0  ;;  %v2013_v56 = vadd.f32 %v4659_v10, %v2012_v52  ;;  %v3276_v57 = vpop.f32.mrb[105].mxu1  ;;  %v3540_v52 = vld [vmem:[%s5566_s0 + $0x3b8] sm:$0xff]  }
 0x1b3   :  { %v1519_v60 = vpop.f32.mrb[106].mxu0  ;;  %v2015_v61 = vpop.f32.mrb[106].mxu1 }
 0x1b4   :  { %2343 = vst.msk [vmem:[%s5568_s3 + $0x1a0] sm:$0xff] %vm2290_vm3, %v1517_v53  ;;  %v1520_v62 = vadd.f32 %v4659_v10, %v1519_v60  ;;  %v3029_v63 = vpop.f32.mrb[107].mxu0  ;;  %2467 = vst.msk [vmem:[%s5568_s3 + $0x580] sm:$0xff] %vm2290_vm3, %v2013_v56  ;;  %v2016_v1 = vadd.f32 %v4659_v10, %v2015_v61  ;;  %v3277_v2 = vpop.f32.mrb[107].mxu1 }
 0x1b6   :  { %2344 = vst.msk [vmem:[%s5568_s3 + $0x1a8] sm:$0xff] %vm2290_vm3, %v1520_v62  ;;  %3135 = vmatmul.mubr.msk.bf16.gmra.mrb[212].mxu0 %vm900_vm2, %v3531_v55  ;;  %2468 = vst.msk [vmem:[%s5568_s3 + $0x588] sm:$0xff] %vm2290_vm3, %v2016_v1  ;;  %3383 = vmatmul.mubr.msk.bf16.gmra.mrb[212].mxu1 %vm900_vm2, %v3532_v58  ;;  %v3541_v1 = vld [vmem:[%s5566_s0 + $0x1d0] sm:$0xff]  }
 0x1b7   :  { %3138 = vmatprep.mubr.msk.bf16.mxu0 %vm3551_vm0, %v3550_v0  ;;  %3386 = vmatprep.mubr.msk.bf16.mxu1 %vm3551_vm0, %v3550_v0 }
 0x1b9   :  { %v1524_v3 = vpop.f32.mrb[108].mxu0  ;;  %v2020_v4 = vpop.f32.mrb[108].mxu1 }
 0x1ba   :  { %v1525_v5 = vadd.f32 %v4659_v10, %v1524_v3  ;;  %v3032_v6 = vpop.f32.mrb[109].mxu0  ;;  %v2021_v8 = vadd.f32 %v4659_v10, %v2020_v4  ;;  %v3280_v59 = vpop.f32.mrb[109].mxu1  ;;  %v3542_v4 = vld [vmem:[%s5566_s0 + $0x3c0] sm:$0xff]  }
 0x1bb   :  { %v1527_v11 = vpop.f32.mrb[110].mxu0  ;;  %v2023_v12 = vpop.f32.mrb[110].mxu1 }
 0x1bc   :  { %2345 = vst.msk [vmem:[%s5568_s3 + $0x1b0] sm:$0xff] %vm2290_vm3, %v1525_v5  ;;  %v1528_v13 = vadd.f32 %v4659_v10, %v1527_v11  ;;  %v3033_v14 = vpop.f32.mrb[111].mxu0  ;;  %2469 = vst.msk [vmem:[%s5568_s3 + $0x590] sm:$0xff] %vm2290_vm3, %v2021_v8  ;;  %v2024_v15 = vadd.f32 %v4659_v10, %v2023_v12  ;;  %v3281_v16 = vpop.f32.mrb[111].mxu1 }
 0x1be   :  { %2346 = vst.msk [vmem:[%s5568_s3 + $0x1b8] sm:$0xff] %vm2290_vm3, %v1528_v13  ;;  %3139 = vmatmul.mubr.msk.bf16.gmra.mrb[216].mxu0 %vm900_vm2, %v3533_v7  ;;  %2470 = vst.msk [vmem:[%s5568_s3 + $0x598] sm:$0xff] %vm2290_vm3, %v2024_v15  ;;  %3387 = vmatmul.mubr.msk.bf16.gmra.mrb[216].mxu1 %vm900_vm2, %v3534_v9  ;;  %v3543_v15 = vld [vmem:[%s5566_s0 + $0x1d8] sm:$0xff]  }
 0x1bf   :  { %3142 = vmatprep.mubr.msk.bf16.mxu0 %vm3551_vm0, %v3550_v0  ;;  %3390 = vmatprep.mubr.msk.bf16.mxu1 %vm3551_vm0, %v3550_v0 }
 0x1c1   :  { %v1532_v17 = vpop.f32.mrb[112].mxu0  ;;  %v2028_v18 = vpop.f32.mrb[112].mxu1 }
 0x1c2   :  { %v1533_v19 = vadd.f32 %v4659_v10, %v1532_v17  ;;  %v3036_v20 = vpop.f32.mrb[113].mxu0  ;;  %v2029_v22 = vadd.f32 %v4659_v10, %v2028_v18  ;;  %v3284_v23 = vpop.f32.mrb[113].mxu1  ;;  %v3544_v18 = vld [vmem:[%s5566_s0 + $0x3c8] sm:$0xff]  }
 0x1c3   :  { %v1535_v25 = vpop.f32.mrb[114].mxu0  ;;  %v2031_v26 = vpop.f32.mrb[114].mxu1 }
 0x1c4   :  { %2347 = vst.msk [vmem:[%s5568_s3 + $0x1c0] sm:$0xff] %vm2290_vm3, %v1533_v19  ;;  %v1536_v27 = vadd.f32 %v4659_v10, %v1535_v25  ;;  %v3037_v28 = vpop.f32.mrb[115].mxu0  ;;  %2471 = vst.msk [vmem:[%s5568_s3 + $0x5a0] sm:$0xff] %vm2290_vm3, %v2029_v22  ;;  %v2032_v29 = vadd.f32 %v4659_v10, %v2031_v26  ;;  %v3285_v30 = vpop.f32.mrb[115].mxu1 }
 0x1c6   :  { %2348 = vst.msk [vmem:[%s5568_s3 + $0x1c8] sm:$0xff] %vm2290_vm3, %v1536_v27  ;;  %3143 = vmatmul.mubr.msk.bf16.gmra.mrb[220].mxu0 %vm900_vm2, %v3535_v21  ;;  %2472 = vst.msk [vmem:[%s5568_s3 + $0x5a8] sm:$0xff] %vm2290_vm3, %v2032_v29  ;;  %3391 = vmatmul.mubr.msk.bf16.gmra.mrb[220].mxu1 %vm900_vm2, %v3536_v24  ;;  %v3545_v29 = vld [vmem:[%s5566_s0 + $0x1e0] sm:$0xff]  }
 0x1c7   :  { %3146 = vmatprep.mubr.msk.bf16.mxu0 %vm3551_vm0, %v3550_v0  ;;  %3394 = vmatprep.mubr.msk.bf16.mxu1 %vm3551_vm0, %v3550_v0 }
 0x1c9   :  { %v1540_v31 = vpop.f32.mrb[116].mxu0  ;;  %v2036_v32 = vpop.f32.mrb[116].mxu1 }
 0x1ca   :  { %v1541_v33 = vadd.f32 %v4659_v10, %v1540_v31  ;;  %v3040_v34 = vpop.f32.mrb[117].mxu0  ;;  %v2037_v36 = vadd.f32 %v4659_v10, %v2036_v32  ;;  %v3288_v37 = vpop.f32.mrb[117].mxu1  ;;  %v3546_v32 = vld [vmem:[%s5566_s0 + $0x3d0] ss:$0 sps:$4 sm:$0xff]  }
 0x1cb   :  { %v1543_v39 = vpop.f32.mrb[118].mxu0  ;;  %v2039_v40 = vpop.f32.mrb[118].mxu1 }
 0x1cc   :  { %2349 = vst.msk [vmem:[%s5568_s3 + $0x1d0] sm:$0xff] %vm2290_vm3, %v1541_v33  ;;  %v1544_v41 = vadd.f32 %v4659_v10, %v1543_v39  ;;  %v3041_v42 = vpop.f32.mrb[119].mxu0  ;;  %2473 = vst.msk [vmem:[%s5568_s3 + $0x5b0] sm:$0xff] %vm2290_vm3, %v2037_v36  ;;  %v2040_v43 = vadd.f32 %v4659_v10, %v2039_v40  ;;  %v3289_v44 = vpop.f32.mrb[119].mxu1 }
 0x1ce   :  { %2350 = vst.msk [vmem:[%s5568_s3 + $0x1d8] sm:$0xff] %vm2290_vm3, %v1544_v41  ;;  %3147 = vmatmul.mubr.msk.bf16.gmra.mrb[224].mxu0 %vm900_vm2, %v3537_v35  ;;  %2474 = vst.msk [vmem:[%s5568_s3 + $0x5b8] sm:$0xff] %vm2290_vm3, %v2040_v43  ;;  %3395 = vmatmul.mubr.msk.bf16.gmra.mrb[224].mxu1 %vm900_vm2, %v3538_v38  ;;  %v3547_v43 = vld [vmem:[%s5566_s0 + $0x1e8] sm:$0xff]  }
 0x1cf   :  { %3150 = vmatprep.mubr.msk.bf16.mxu0 %vm3551_vm0, %v3550_v0  ;;  %3398 = vmatprep.mubr.msk.bf16.mxu1 %vm3551_vm0, %v3550_v0 }
 0x1d1   :  { %v1548_v45 = vpop.f32.mrb[120].mxu0  ;;  %v2044_v46 = vpop.f32.mrb[120].mxu1 }
 0x1d2   :  { %v1549_v47 = vadd.f32 %v4659_v10, %v1548_v45  ;;  %v3044_v48 = vpop.f32.mrb[121].mxu0  ;;  %v2045_v50 = vadd.f32 %v4659_v10, %v2044_v46  ;;  %v3292_v51 = vpop.f32.mrb[121].mxu1 }
 0x1d3   :  { %v1551_v53 = vpop.f32.mrb[122].mxu0  ;;  %v2047_v54 = vpop.f32.mrb[122].mxu1 }
 0x1d4   :  { %2351 = vst.msk [vmem:[%s5568_s3 + $0x1e0] sm:$0xff] %vm2290_vm3, %v1549_v47  ;;  %v1552_v55 = vadd.f32 %v4659_v10, %v1551_v53  ;;  %v3045_v56 = vpop.f32.mrb[123].mxu0  ;;  %2475 = vst.msk [vmem:[%s5568_s3 + $0x5c0] sm:$0xff] %vm2290_vm3, %v2045_v50  ;;  %v2048_v57 = vadd.f32 %v4659_v10, %v2047_v54  ;;  %v3293_v58 = vpop.f32.mrb[123].mxu1 }
 0x1d6   :  { %2352 = vst.msk [vmem:[%s5568_s3 + $0x1e8] sm:$0xff] %vm2290_vm3, %v1552_v55  ;;  %3151 = vmatmul.mubr.msk.bf16.gmra.mrb[228].mxu0 %vm900_vm2, %v3539_v49  ;;  %2476 = vst.msk [vmem:[%s5568_s3 + $0x5c8] sm:$0xff] %vm2290_vm3, %v2048_v57  ;;  %3399 = vmatmul.mubr.msk.bf16.gmra.mrb[228].mxu1 %vm900_vm2, %v3540_v52 }
 0x1d7   :  { %3154 = vmatprep.mubr.msk.bf16.mxu0 %vm3551_vm0, %v3550_v0  ;;  %3402 = vmatprep.mubr.msk.bf16.mxu1 %vm3551_vm0, %v3550_v0 }
 0x1d9   :  { %v1556_v60 = vpop.f32.mrb[124].mxu0  ;;  %v2052_v61 = vpop.f32.mrb[124].mxu1 }
 0x1da   :  { %v1557_v62 = vadd.f32 %v4659_v10, %v1556_v60  ;;  %v3048_v63 = vpop.f32.mrb[125].mxu0  ;;  %v2053_v2 = vadd.f32 %v4659_v10, %v2052_v61  ;;  %v3296_v3 = vpop.f32.mrb[125].mxu1 }
 0x1db   :  { %v1559_v5 = vpop.f32.mrb[126].mxu0  ;;  %v2055_v6 = vpop.f32.mrb[126].mxu1 }
 0x1dc   :  { %2353 = vst.msk [vmem:[%s5568_s3 + $0x1f0] sm:$0xff] %vm2290_vm3, %v1557_v62  ;;  %v1560_v7 = vadd.f32 %v4659_v10, %v1559_v5  ;;  %v3049_v8 = vpop.f32.mrb[127].mxu0  ;;  %2477 = vst.msk [vmem:[%s5568_s3 + $0x5d0] sm:$0xff] %vm2290_vm3, %v2053_v2  ;;  %v2056_v59 = vadd.f32 %v4659_v10, %v2055_v6  ;;  %v3297_v9 = vpop.f32.mrb[127].mxu1 }
 0x1de   :  { %2354 = vst.msk [vmem:[%s5568_s3 + $0x1f8] sm:$0xff] %vm2290_vm3, %v1560_v7  ;;  %3155 = vmatmul.mubr.msk.bf16.gmra.mrb[232].mxu0 %vm900_vm2, %v3541_v1  ;;  %2478 = vst.msk [vmem:[%s5568_s3 + $0x5d8] sm:$0xff] %vm2290_vm3, %v2056_v59  ;;  %3403 = vmatmul.mubr.msk.bf16.gmra.mrb[232].mxu1 %vm900_vm2, %v3542_v4 }
 0x1df   :  { %3158 = vmatprep.mubr.msk.bf16.mxu0 %vm3551_vm0, %v3550_v0  ;;  %3406 = vmatprep.mubr.msk.bf16.mxu1 %vm3551_vm0, %v3550_v0 }
 0x1e1   :  { %v1564_v11 = vpop.f32.mrb[128].mxu0  ;;  %v2060_v12 = vpop.f32.mrb[128].mxu1 }
 0x1e2   :  { %v1565_v13 = vadd.f32 %v4659_v10, %v1564_v11  ;;  %v3052_v14 = vpop.f32.mrb[129].mxu0  ;;  %v2061_v16 = vadd.f32 %v4659_v10, %v2060_v12  ;;  %v3300_v17 = vpop.f32.mrb[129].mxu1 }
 0x1e3   :  { %v1567_v19 = vpop.f32.mrb[130].mxu0  ;;  %v2063_v20 = vpop.f32.mrb[130].mxu1 }
 0x1e4   :  { %2355 = vst.msk [vmem:[%s5568_s3 + $0x200] sm:$0xff] %vm2290_vm3, %v1565_v13  ;;  %v1568_v21 = vadd.f32 %v4659_v10, %v1567_v19  ;;  %v3053_v22 = vpop.f32.mrb[131].mxu0  ;;  %2479 = vst.msk [vmem:[%s5568_s3 + $0x5e0] sm:$0xff] %vm2290_vm3, %v2061_v16  ;;  %v2064_v23 = vadd.f32 %v4659_v10, %v2063_v20  ;;  %v3301_v24 = vpop.f32.mrb[131].mxu1 }
 0x1e6   :  { %2356 = vst.msk [vmem:[%s5568_s3 + $0x208] sm:$0xff] %vm2290_vm3, %v1568_v21  ;;  %3159 = vmatmul.mubr.msk.bf16.gmra.mrb[236].mxu0 %vm900_vm2, %v3543_v15  ;;  %2480 = vst.msk [vmem:[%s5568_s3 + $0x5e8] sm:$0xff] %vm2290_vm3, %v2064_v23  ;;  %3407 = vmatmul.mubr.msk.bf16.gmra.mrb[236].mxu1 %vm900_vm2, %v3544_v18 }
 0x1e7   :  { %3162 = vmatprep.mubr.msk.bf16.mxu0 %vm3551_vm0, %v3550_v0  ;;  %3410 = vmatprep.mubr.msk.bf16.mxu1 %vm3551_vm0, %v3550_v0 }
 0x1e9   :  { %v1572_v25 = vpop.f32.mrb[132].mxu0  ;;  %v2068_v26 = vpop.f32.mrb[132].mxu1 }
 0x1ea   :  { %v1573_v27 = vadd.f32 %v4659_v10, %v1572_v25  ;;  %v3056_v28 = vpop.f32.mrb[133].mxu0  ;;  %v2069_v30 = vadd.f32 %v4659_v10, %v2068_v26  ;;  %v3304_v31 = vpop.f32.mrb[133].mxu1 }
 0x1eb   :  { %v1575_v33 = vpop.f32.mrb[134].mxu0  ;;  %v2071_v34 = vpop.f32.mrb[134].mxu1 }
 0x1ec   :  { %2357 = vst.msk [vmem:[%s5568_s3 + $0x210] sm:$0xff] %vm2290_vm3, %v1573_v27  ;;  %v1576_v35 = vadd.f32 %v4659_v10, %v1575_v33  ;;  %v3057_v36 = vpop.f32.mrb[135].mxu0  ;;  %2481 = vst.msk [vmem:[%s5568_s3 + $0x5f0] sm:$0xff] %vm2290_vm3, %v2069_v30  ;;  %v2072_v37 = vadd.f32 %v4659_v10, %v2071_v34  ;;  %v3305_v38 = vpop.f32.mrb[135].mxu1 }
 0x1ee   :  { %2358 = vst.msk [vmem:[%s5568_s3 + $0x218] sm:$0xff] %vm2290_vm3, %v1576_v35  ;;  %3163 = vmatmul.mubr.msk.bf16.gmra.mrb[240].mxu0 %vm900_vm2, %v3545_v29  ;;  %2482 = vst.msk [vmem:[%s5568_s3 + $0x5f8] sm:$0xff] %vm2290_vm3, %v2072_v37  ;;  %3411 = vmatmul.mubr.msk.bf16.gmra.mrb[240].mxu1 %vm900_vm2, %v3546_v32 }
 0x1ef   :  { %3166 = vmatprep.mubr.msk.bf16.mxu0 %vm3551_vm0, %v3550_v0 }
 0x1f1   :  { %v1580_v39 = vpop.f32.mrb[136].mxu0  ;;  %v2076_v40 = vpop.f32.mrb[136].mxu1 }
 0x1f2   :  { %v1581_v41 = vadd.f32 %v4659_v10, %v1580_v39  ;;  %v3060_v42 = vpop.f32.mrb[137].mxu0  ;;  %v2077_v44 = vadd.f32 %v4659_v10, %v2076_v40  ;;  %v3308_v45 = vpop.f32.mrb[137].mxu1 }
 0x1f3   :  { %v1583_v46 = vpop.f32.mrb[138].mxu0  ;;  %v2079_v47 = vpop.f32.mrb[138].mxu1 }
 0x1f4   :  { %2359 = vst.msk [vmem:[%s5568_s3 + $0x220] sm:$0xff] %vm2290_vm3, %v1581_v41  ;;  %v1584_v0 = vadd.f32 %v4659_v10, %v1583_v46  ;;  %v3061_v48 = vpop.f32.mrb[139].mxu0  ;;  %2483 = vst.msk [vmem:[%s5568_s3 + $0x600] sm:$0xff] %vm2290_vm3, %v2077_v44  ;;  %v2080_v49 = vadd.f32 %v4659_v10, %v2079_v47  ;;  %v3309_v50 = vpop.f32.mrb[139].mxu1 }
 0x1f6   :  { %2360 = vst.msk [vmem:[%s5568_s3 + $0x228] sm:$0xff] %vm2290_vm3, %v1584_v0  ;;  %3167 = vmatmul.mubr.msk.bf16.gmra.mrb[244].mxu0 %vm900_vm2, %v3547_v43  ;;  %2484 = vst.msk [vmem:[%s5568_s3 + $0x608] sm:$0xff] %vm2290_vm3, %v2080_v49 }
 0x1f9   :  { %v1588_v51 = vpop.f32.mrb[140].mxu0  ;;  %v2084_v52 = vpop.f32.mrb[140].mxu1 }
 0x1fa   :  { %v1589_v53 = vadd.f32 %v4659_v10, %v1588_v51  ;;  %v3064_v54 = vpop.f32.mrb[141].mxu0  ;;  %v2085_v55 = vadd.f32 %v4659_v10, %v2084_v52  ;;  %v3312_v56 = vpop.f32.mrb[141].mxu1 }
 0x1fb   :  { %v1591_v57 = vpop.f32.mrb[142].mxu0  ;;  %v2087_v58 = vpop.f32.mrb[142].mxu1 }
 0x1fc   :  { %2361 = vst.msk [vmem:[%s5568_s3 + $0x230] sm:$0xff] %vm2290_vm3, %v1589_v53  ;;  %v1592_v60 = vadd.f32 %v4659_v10, %v1591_v57  ;;  %v3065_v61 = vpop.f32.mrb[143].mxu0  ;;  %2485 = vst.msk [vmem:[%s5568_s3 + $0x610] sm:$0xff] %vm2290_vm3, %v2085_v55  ;;  %v2088_v62 = vadd.f32 %v4659_v10, %v2087_v58  ;;  %v3313_v63 = vpop.f32.mrb[143].mxu1 }
 0x1fe   :  { %2362 = vst.msk [vmem:[%s5568_s3 + $0x238] sm:$0xff] %vm2290_vm3, %v1592_v60  ;;  %2486 = vst.msk [vmem:[%s5568_s3 + $0x618] sm:$0xff] %vm2290_vm3, %v2088_v62 }
 0x201   :  { %v1596_v1 = vpop.f32.mrb[144].mxu0  ;;  %v2092_v2 = vpop.f32.mrb[144].mxu1 }
 0x202   :  { %v1597_v3 = vadd.f32 %v4659_v10, %v1596_v1  ;;  %v3068_v4 = vpop.f32.mrb[145].mxu0  ;;  %v2093_v5 = vadd.f32 %v4659_v10, %v2092_v2  ;;  %v3316_v6 = vpop.f32.mrb[145].mxu1 }
 0x203   :  { %v1599_v7 = vpop.f32.mrb[146].mxu0  ;;  %v2095_v8 = vpop.f32.mrb[146].mxu1 }
 0x204   :  { %2363 = vst.msk [vmem:[%s5568_s3 + $0x240] sm:$0xff] %vm2290_vm3, %v1597_v3  ;;  %v1600_v59 = vadd.f32 %v4659_v10, %v1599_v7  ;;  %v3069_v9 = vpop.f32.mrb[147].mxu0  ;;  %2487 = vst.msk [vmem:[%s5568_s3 + $0x620] sm:$0xff] %vm2290_vm3, %v2093_v5  ;;  %v2096_v11 = vadd.f32 %v4659_v10, %v2095_v8  ;;  %v3317_v12 = vpop.f32.mrb[147].mxu1 }
 0x206   :  { %2364 = vst.msk [vmem:[%s5568_s3 + $0x248] sm:$0xff] %vm2290_vm3, %v1600_v59  ;;  %2488 = vst.msk [vmem:[%s5568_s3 + $0x628] sm:$0xff] %vm2290_vm3, %v2096_v11 }
 0x209   :  { %v1604_v13 = vpop.f32.mrb[148].mxu0  ;;  %v2100_v14 = vpop.f32.mrb[148].mxu1 }
 0x20a   :  { %v1605_v15 = vadd.f32 %v4659_v10, %v1604_v13  ;;  %v3072_v16 = vpop.f32.mrb[149].mxu0  ;;  %v2101_v17 = vadd.f32 %v4659_v10, %v2100_v14  ;;  %v3320_v18 = vpop.f32.mrb[149].mxu1 }
 0x20b   :  { %v1607_v19 = vpop.f32.mrb[150].mxu0  ;;  %v2103_v20 = vpop.f32.mrb[150].mxu1 }
 0x20c   :  { %2365 = vst.msk [vmem:[%s5568_s3 + $0x250] sm:$0xff] %vm2290_vm3, %v1605_v15  ;;  %v1608_v21 = vadd.f32 %v4659_v10, %v1607_v19  ;;  %v3073_v22 = vpop.f32.mrb[151].mxu0  ;;  %2489 = vst.msk [vmem:[%s5568_s3 + $0x630] sm:$0xff] %vm2290_vm3, %v2101_v17  ;;  %v2104_v23 = vadd.f32 %v4659_v10, %v2103_v20  ;;  %v3321_v24 = vpop.f32.mrb[151].mxu1 }
 0x20e   :  { %2366 = vst.msk [vmem:[%s5568_s3 + $0x258] sm:$0xff] %vm2290_vm3, %v1608_v21  ;;  %2490 = vst.msk [vmem:[%s5568_s3 + $0x638] sm:$0xff] %vm2290_vm3, %v2104_v23 }
 0x211   :  { %v1612_v25 = vpop.f32.mrb[152].mxu0  ;;  %v2108_v26 = vpop.f32.mrb[152].mxu1 }
 0x212   :  { %v1613_v27 = vadd.f32 %v4659_v10, %v1612_v25  ;;  %v3076_v28 = vpop.f32.mrb[153].mxu0  ;;  %v2109_v29 = vadd.f32 %v4659_v10, %v2108_v26  ;;  %v3324_v30 = vpop.f32.mrb[153].mxu1 }
 0x213   :  { %v1615_v31 = vpop.f32.mrb[154].mxu0  ;;  %v2111_v32 = vpop.f32.mrb[154].mxu1 }
 0x214   :  { %2367 = vst.msk [vmem:[%s5568_s3 + $0x260] sm:$0xff] %vm2290_vm3, %v1613_v27  ;;  %v1616_v33 = vadd.f32 %v4659_v10, %v1615_v31  ;;  %v3077_v34 = vpop.f32.mrb[155].mxu0  ;;  %2491 = vst.msk [vmem:[%s5568_s3 + $0x640] sm:$0xff] %vm2290_vm3, %v2109_v29  ;;  %v2112_v35 = vadd.f32 %v4659_v10, %v2111_v32  ;;  %v3325_v36 = vpop.f32.mrb[155].mxu1 }
 0x216   :  { %2368 = vst.msk [vmem:[%s5568_s3 + $0x268] sm:$0xff] %vm2290_vm3, %v1616_v33  ;;  %2492 = vst.msk [vmem:[%s5568_s3 + $0x648] sm:$0xff] %vm2290_vm3, %v2112_v35 }
 0x219   :  { %v1620_v37 = vpop.f32.mrb[156].mxu0  ;;  %v2116_v38 = vpop.f32.mrb[156].mxu1 }
 0x21a   :  { %v1621_v39 = vadd.f32 %v4659_v10, %v1620_v37  ;;  %v3080_v40 = vpop.f32.mrb[157].mxu0  ;;  %v2117_v41 = vadd.f32 %v4659_v10, %v2116_v38  ;;  %v3328_v42 = vpop.f32.mrb[157].mxu1 }
 0x21b   :  { %v1623_v43 = vpop.f32.mrb[158].mxu0  ;;  %v2119_v44 = vpop.f32.mrb[158].mxu1 }
 0x21c   :  { %2369 = vst.msk [vmem:[%s5568_s3 + $0x270] sm:$0xff] %vm2290_vm3, %v1621_v39  ;;  %v1624_v45 = vadd.f32 %v4659_v10, %v1623_v43  ;;  %v3081_v46 = vpop.f32.mrb[159].mxu0  ;;  %2493 = vst.msk [vmem:[%s5568_s3 + $0x650] sm:$0xff] %vm2290_vm3, %v2117_v41  ;;  %v2120_v47 = vadd.f32 %v4659_v10, %v2119_v44  ;;  %v3329_v0 = vpop.f32.mrb[159].mxu1 }
 0x21e   :  { %2370 = vst.msk [vmem:[%s5568_s3 + $0x278] sm:$0xff] %vm2290_vm3, %v1624_v45  ;;  %2494 = vst.msk [vmem:[%s5568_s3 + $0x658] sm:$0xff] %vm2290_vm3, %v2120_v47 }
 0x221   :  { %v1628_v48 = vpop.f32.mrb[160].mxu0  ;;  %v2124_v49 = vpop.f32.mrb[160].mxu1 }
 0x222   :  { %v1629_v50 = vadd.f32 %v4659_v10, %v1628_v48  ;;  %v3084_v51 = vpop.f32.mrb[161].mxu0  ;;  %v2125_v52 = vadd.f32 %v4659_v10, %v2124_v49  ;;  %v3332_v53 = vpop.f32.mrb[161].mxu1 }
 0x223   :  { %v1631_v54 = vpop.f32.mrb[162].mxu0  ;;  %v2127_v55 = vpop.f32.mrb[162].mxu1 }
 0x224   :  { %2371 = vst.msk [vmem:[%s5568_s3 + $0x280] sm:$0xff] %vm2290_vm3, %v1629_v50  ;;  %v1632_v56 = vadd.f32 %v4659_v10, %v1631_v54  ;;  %v3085_v57 = vpop.f32.mrb[163].mxu0  ;;  %2495 = vst.msk [vmem:[%s5568_s3 + $0x660] sm:$0xff] %vm2290_vm3, %v2125_v52  ;;  %v2128_v58 = vadd.f32 %v4659_v10, %v2127_v55  ;;  %v3333_v60 = vpop.f32.mrb[163].mxu1 }
 0x226   :  { %2372 = vst.msk [vmem:[%s5568_s3 + $0x288] sm:$0xff] %vm2290_vm3, %v1632_v56  ;;  %2496 = vst.msk [vmem:[%s5568_s3 + $0x668] sm:$0xff] %vm2290_vm3, %v2128_v58 }
 0x229   :  { %v1636_v61 = vpop.f32.mrb[164].mxu0  ;;  %v2132_v62 = vpop.f32.mrb[164].mxu1 }
 0x22a   :  { %v1637_v63 = vadd.f32 %v4659_v10, %v1636_v61  ;;  %v3088_v1 = vpop.f32.mrb[165].mxu0  ;;  %v2133_v2 = vadd.f32 %v4659_v10, %v2132_v62  ;;  %v3336_v3 = vpop.f32.mrb[165].mxu1 }
 0x22b   :  { %v1639_v4 = vpop.f32.mrb[166].mxu0  ;;  %v2135_v5 = vpop.f32.mrb[166].mxu1 }
 0x22c   :  { %2373 = vst.msk [vmem:[%s5568_s3 + $0x290] sm:$0xff] %vm2290_vm3, %v1637_v63  ;;  %v1640_v6 = vadd.f32 %v4659_v10, %v1639_v4  ;;  %v3089_v7 = vpop.f32.mrb[167].mxu0  ;;  %2497 = vst.msk [vmem:[%s5568_s3 + $0x670] sm:$0xff] %vm2290_vm3, %v2133_v2  ;;  %v2136_v8 = vadd.f32 %v4659_v10, %v2135_v5  ;;  %v3337_v59 = vpop.f32.mrb[167].mxu1 }
 0x22e   :  { %2374 = vst.msk [vmem:[%s5568_s3 + $0x298] sm:$0xff] %vm2290_vm3, %v1640_v6  ;;  %2498 = vst.msk [vmem:[%s5568_s3 + $0x678] sm:$0xff] %vm2290_vm3, %v2136_v8 }
 0x231   :  { %v1644_v9 = vpop.f32.mrb[168].mxu0  ;;  %v2140_v11 = vpop.f32.mrb[168].mxu1 }
 0x232   :  { %v1645_v12 = vadd.f32 %v4659_v10, %v1644_v9  ;;  %v3092_v13 = vpop.f32.mrb[169].mxu0  ;;  %v2141_v14 = vadd.f32 %v4659_v10, %v2140_v11  ;;  %v3340_v15 = vpop.f32.mrb[169].mxu1 }
 0x233   :  { %v1647_v16 = vpop.f32.mrb[170].mxu0  ;;  %v2143_v17 = vpop.f32.mrb[170].mxu1 }
 0x234   :  { %2375 = vst.msk [vmem:[%s5568_s3 + $0x2a0] sm:$0xff] %vm2290_vm3, %v1645_v12  ;;  %v1648_v18 = vadd.f32 %v4659_v10, %v1647_v16  ;;  %v3093_v19 = vpop.f32.mrb[171].mxu0  ;;  %2499 = vst.msk [vmem:[%s5568_s3 + $0x680] sm:$0xff] %vm2290_vm3, %v2141_v14  ;;  %v2144_v20 = vadd.f32 %v4659_v10, %v2143_v17  ;;  %v3341_v21 = vpop.f32.mrb[171].mxu1 }
 0x236   :  { %2376 = vst.msk [vmem:[%s5568_s3 + $0x2a8] sm:$0xff] %vm2290_vm3, %v1648_v18  ;;  %2500 = vst.msk [vmem:[%s5568_s3 + $0x688] sm:$0xff] %vm2290_vm3, %v2144_v20 }
 0x239   :  { %v1652_v22 = vpop.f32.mrb[172].mxu0  ;;  %v2148_v23 = vpop.f32.mrb[172].mxu1 }
 0x23a   :  { %v1653_v24 = vadd.f32 %v4659_v10, %v1652_v22  ;;  %v3096_v25 = vpop.f32.mrb[173].mxu0  ;;  %v2149_v26 = vadd.f32 %v4659_v10, %v2148_v23  ;;  %v3344_v27 = vpop.f32.mrb[173].mxu1 }
 0x23b   :  { %v1655_v28 = vpop.f32.mrb[174].mxu0  ;;  %v2151_v29 = vpop.f32.mrb[174].mxu1 }
 0x23c   :  { %2377 = vst.msk [vmem:[%s5568_s3 + $0x2b0] sm:$0xff] %vm2290_vm3, %v1653_v24  ;;  %v1656_v30 = vadd.f32 %v4659_v10, %v1655_v28  ;;  %v3097_v31 = vpop.f32.mrb[175].mxu0  ;;  %2501 = vst.msk [vmem:[%s5568_s3 + $0x690] sm:$0xff] %vm2290_vm3, %v2149_v26  ;;  %v2152_v32 = vadd.f32 %v4659_v10, %v2151_v29  ;;  %v3345_v33 = vpop.f32.mrb[175].mxu1 }
 0x23e   :  { %2378 = vst.msk [vmem:[%s5568_s3 + $0x2b8] sm:$0xff] %vm2290_vm3, %v1656_v30  ;;  %2502 = vst.msk [vmem:[%s5568_s3 + $0x698] sm:$0xff] %vm2290_vm3, %v2152_v32 }
 0x241   :  { %v1660_v34 = vpop.f32.mrb[176].mxu0  ;;  %v2156_v35 = vpop.f32.mrb[176].mxu1 }
 0x242   :  { %v1661_v36 = vadd.f32 %v4659_v10, %v1660_v34  ;;  %v3100_v37 = vpop.f32.mrb[177].mxu0  ;;  %v2157_v38 = vadd.f32 %v4659_v10, %v2156_v35  ;;  %v3348_v39 = vpop.f32.mrb[177].mxu1 }
 0x243   :  { %v1663_v40 = vpop.f32.mrb[178].mxu0  ;;  %v2159_v41 = vpop.f32.mrb[178].mxu1 }
 0x244   :  { %2379 = vst.msk [vmem:[%s5568_s3 + $0x2c0] sm:$0xff] %vm2290_vm3, %v1661_v36  ;;  %v1664_v42 = vadd.f32 %v4659_v10, %v1663_v40  ;;  %v3101_v43 = vpop.f32.mrb[179].mxu0  ;;  %2503 = vst.msk [vmem:[%s5568_s3 + $0x6a0] sm:$0xff] %vm2290_vm3, %v2157_v38  ;;  %v2160_v44 = vadd.f32 %v4659_v10, %v2159_v41  ;;  %v3349_v45 = vpop.f32.mrb[179].mxu1 }
 0x246   :  { %2380 = vst.msk [vmem:[%s5568_s3 + $0x2c8] sm:$0xff] %vm2290_vm3, %v1664_v42  ;;  %2504 = vst.msk [vmem:[%s5568_s3 + $0x6a8] sm:$0xff] %vm2290_vm3, %v2160_v44 }
 0x249   :  { %v1668_v46 = vpop.f32.mrb[180].mxu0  ;;  %v2164_v47 = vpop.f32.mrb[180].mxu1 }
 0x24a   :  { %v1669_v0 = vadd.f32 %v4659_v10, %v1668_v46  ;;  %v3104_v48 = vpop.f32.mrb[181].mxu0  ;;  %v2165_v49 = vadd.f32 %v4659_v10, %v2164_v47  ;;  %v3352_v50 = vpop.f32.mrb[181].mxu1 }
 0x24b   :  { %v1671_v51 = vpop.f32.mrb[182].mxu0  ;;  %v2167_v52 = vpop.f32.mrb[182].mxu1 }
 0x24c   :  { %2381 = vst.msk [vmem:[%s5568_s3 + $0x2d0] sm:$0xff] %vm2290_vm3, %v1669_v0  ;;  %v1672_v53 = vadd.f32 %v4659_v10, %v1671_v51  ;;  %v3105_v54 = vpop.f32.mrb[183].mxu0  ;;  %2505 = vst.msk [vmem:[%s5568_s3 + $0x6b0] sm:$0xff] %vm2290_vm3, %v2165_v49  ;;  %v2168_v55 = vadd.f32 %v4659_v10, %v2167_v52  ;;  %v3353_v56 = vpop.f32.mrb[183].mxu1 }
 0x24d   :  { %v5358_v56 = vld [vmem:[%s5567_s2] ss:$0 sm:$0xff] }
 0x24e   :  { %2382 = vst.msk [vmem:[%s5568_s3 + $0x2d8] sm:$0xff] %vm2290_vm3, %v1672_v53  ;;  %2506 = vst.msk [vmem:[%s5568_s3 + $0x6b8] sm:$0xff] %vm2290_vm3, %v2168_v55 }
 0x251   :  { %v1676_v57 = vpop.f32.mrb[184].mxu0  ;;  %v2172_v58 = vpop.f32.mrb[184].mxu1 }
 0x252   :  { %v1677_v60 = vadd.f32 %v4659_v10, %v1676_v57  ;;  %v3108_v61 = vpop.f32.mrb[185].mxu0  ;;  %v2173_v62 = vadd.f32 %v4659_v10, %v2172_v58  ;;  %v3356_v63 = vpop.f32.mrb[185].mxu1 }
 0x253   :  { %v1679_v1 = vpop.f32.mrb[186].mxu0  ;;  %v2175_v2 = vpop.f32.mrb[186].mxu1 }
 0x254   :  { %2383 = vst.msk [vmem:[%s5568_s3 + $0x2e0] sm:$0xff] %vm2290_vm3, %v1677_v60  ;;  %v1680_v3 = vadd.f32 %v4659_v10, %v1679_v1  ;;  %v3109_v4 = vpop.f32.mrb[187].mxu0  ;;  %2507 = vst.msk [vmem:[%s5568_s3 + $0x6c0] sm:$0xff] %vm2290_vm3, %v2173_v62  ;;  %v2176_v5 = vadd.f32 %v4659_v10, %v2175_v2  ;;  %v3357_v6 = vpop.f32.mrb[187].mxu1 }
 0x256   :  { %2384 = vst.msk [vmem:[%s5568_s3 + $0x2e8] sm:$0xff] %vm2290_vm3, %v1680_v3  ;;  %2508 = vst.msk [vmem:[%s5568_s3 + $0x6c8] sm:$0xff] %vm2290_vm3, %v2176_v5 }
 0x259   :  { %v1684_v7 = vpop.f32.mrb[188].mxu0  ;;  %v2180_v8 = vpop.f32.mrb[188].mxu1 }
 0x25a   :  { %v1685_v59 = vadd.f32 %v4659_v10, %v1684_v7  ;;  %v3112_v9 = vpop.f32.mrb[189].mxu0  ;;  %v2181_v11 = vadd.f32 %v4659_v10, %v2180_v8  ;;  %v3360_v12 = vpop.f32.mrb[189].mxu1 }
 0x25b   :  { %v1687_v13 = vpop.f32.mrb[190].mxu0  ;;  %v2183_v14 = vpop.f32.mrb[190].mxu1 }
 0x25c   :  { %2385 = vst.msk [vmem:[%s5568_s3 + $0x2f0] sm:$0xff] %vm2290_vm3, %v1685_v59  ;;  %v1688_v15 = vadd.f32 %v4659_v10, %v1687_v13  ;;  %v3113_v16 = vpop.f32.mrb[191].mxu0  ;;  %2509 = vst.msk [vmem:[%s5568_s3 + $0x6d0] sm:$0xff] %vm2290_vm3, %v2181_v11  ;;  %v2184_v17 = vadd.f32 %v4659_v10, %v2183_v14  ;;  %v3361_v18 = vpop.f32.mrb[191].mxu1 }
 0x25e   :  { %2386 = vst.msk [vmem:[%s5568_s3 + $0x2f8] sm:$0xff] %vm2290_vm3, %v1688_v15  ;;  %2510 = vst.msk [vmem:[%s5568_s3 + $0x6d8] sm:$0xff] %vm2290_vm3, %v2184_v17 }
 0x261   :  { %v1692_v19 = vpop.f32.mrb[192].mxu0  ;;  %v2188_v20 = vpop.f32.mrb[192].mxu1 }
 0x262   :  { %v1693_v21 = vadd.f32 %v4659_v10, %v1692_v19  ;;  %v3116_v22 = vpop.f32.mrb[193].mxu0  ;;  %v2189_v23 = vadd.f32 %v4659_v10, %v2188_v20  ;;  %v3364_v24 = vpop.f32.mrb[193].mxu1 }
 0x263   :  { %v1695_v25 = vpop.f32.mrb[194].mxu0  ;;  %v2191_v26 = vpop.f32.mrb[194].mxu1 }
 0x264   :  { %2387 = vst.msk [vmem:[%s5568_s3 + $0x300] sm:$0xff] %vm2290_vm3, %v1693_v21  ;;  %v1696_v27 = vadd.f32 %v4659_v10, %v1695_v25  ;;  %v3117_v28 = vpop.f32.mrb[195].mxu0  ;;  %2511 = vst.msk [vmem:[%s5568_s3 + $0x6e0] sm:$0xff] %vm2290_vm3, %v2189_v23  ;;  %v2192_v29 = vadd.f32 %v4659_v10, %v2191_v26  ;;  %v3365_v30 = vpop.f32.mrb[195].mxu1 }
 0x266   :  { %2388 = vst.msk [vmem:[%s5568_s3 + $0x308] sm:$0xff] %vm2290_vm3, %v1696_v27  ;;  %2512 = vst.msk [vmem:[%s5568_s3 + $0x6e8] sm:$0xff] %vm2290_vm3, %v2192_v29 }
 0x269   :  { %v1700_v31 = vpop.f32.mrb[196].mxu0  ;;  %v2196_v32 = vpop.f32.mrb[196].mxu1 }
 0x26a   :  { %v1701_v33 = vadd.f32 %v4659_v10, %v1700_v31  ;;  %v3120_v34 = vpop.f32.mrb[197].mxu0  ;;  %v2197_v35 = vadd.f32 %v4659_v10, %v2196_v32  ;;  %v3368_v36 = vpop.f32.mrb[197].mxu1 }
 0x26b   :  { %v1703_v37 = vpop.f32.mrb[198].mxu0  ;;  %v2199_v38 = vpop.f32.mrb[198].mxu1 }
 0x26c   :  { %2389 = vst.msk [vmem:[%s5568_s3 + $0x310] sm:$0xff] %vm2290_vm3, %v1701_v33  ;;  %v1704_v39 = vadd.f32 %v4659_v10, %v1703_v37  ;;  %v3121_v40 = vpop.f32.mrb[199].mxu0  ;;  %2513 = vst.msk [vmem:[%s5568_s3 + $0x6f0] sm:$0xff] %vm2290_vm3, %v2197_v35  ;;  %v2200_v41 = vadd.f32 %v4659_v10, %v2199_v38  ;;  %v3369_v42 = vpop.f32.mrb[199].mxu1 }
 0x26e   :  { %2390 = vst.msk [vmem:[%s5568_s3 + $0x318] sm:$0xff] %vm2290_vm3, %v1704_v39  ;;  %2514 = vst.msk [vmem:[%s5568_s3 + $0x6f8] sm:$0xff] %vm2290_vm3, %v2200_v41 }
 0x271   :  { %v1708_v43 = vpop.f32.mrb[200].mxu0  ;;  %v2204_v44 = vpop.f32.mrb[200].mxu1 }
 0x272   :  { %v1709_v45 = vadd.f32 %v4659_v10, %v1708_v43  ;;  %v3124_v46 = vpop.f32.mrb[201].mxu0  ;;  %v2205_v47 = vadd.f32 %v4659_v10, %v2204_v44  ;;  %v3372_v0 = vpop.f32.mrb[201].mxu1 }
 0x273   :  { %v1711_v48 = vpop.f32.mrb[202].mxu0  ;;  %v2207_v49 = vpop.f32.mrb[202].mxu1 }
 0x274   :  { %2391 = vst.msk [vmem:[%s5568_s3 + $0x320] sm:$0xff] %vm2290_vm3, %v1709_v45  ;;  %v1712_v50 = vadd.f32 %v4659_v10, %v1711_v48  ;;  %v3125_v51 = vpop.f32.mrb[203].mxu0  ;;  %2515 = vst.msk [vmem:[%s5568_s3 + $0x700] sm:$0xff] %vm2290_vm3, %v2205_v47  ;;  %v2208_v52 = vadd.f32 %v4659_v10, %v2207_v49  ;;  %v3373_v53 = vpop.f32.mrb[203].mxu1 }
 0x276   :  { %2392 = vst.msk [vmem:[%s5568_s3 + $0x328] sm:$0xff] %vm2290_vm3, %v1712_v50  ;;  %2516 = vst.msk [vmem:[%s5568_s3 + $0x708] sm:$0xff] %vm2290_vm3, %v2208_v52 }
 0x279   :  { %v1716_v54 = vpop.f32.mrb[204].mxu0  ;;  %v2212_v55 = vpop.f32.mrb[204].mxu1 }
 0x27a   :  { %v1717_v10 = vadd.f32 %v5358_v56, %v1716_v54  ;;  %v3128_v57 = vpop.f32.mrb[205].mxu0  ;;  %v2213_v58 = vadd.f32 %v5358_v56, %v2212_v55  ;;  %v3376_v60 = vpop.f32.mrb[205].mxu1 }
 0x27b   :  { %v1719_v61 = vpop.f32.mrb[206].mxu0  ;;  %v2215_v62 = vpop.f32.mrb[206].mxu1 }
 0x27c   :  { %2393 = vst.msk [vmem:[%s5568_s3 + $0x330] sm:$0xff] %vm2290_vm3, %v1717_v10  ;;  %v1720_v63 = vadd.f32 %v5358_v56, %v1719_v61  ;;  %v3129_v1 = vpop.f32.mrb[207].mxu0  ;;  %2517 = vst.msk [vmem:[%s5568_s3 + $0x710] sm:$0xff] %vm2290_vm3, %v2213_v58  ;;  %v2216_v2 = vadd.f32 %v5358_v56, %v2215_v62  ;;  %v3377_v3 = vpop.f32.mrb[207].mxu1 }
 0x27e   :  { %2394 = vst.msk [vmem:[%s5568_s3 + $0x338] sm:$0xff] %vm2290_vm3, %v1720_v63  ;;  %2518 = vst.msk [vmem:[%s5568_s3 + $0x718] sm:$0xff] %vm2290_vm3, %v2216_v2 }
 0x281   :  { %v1724_v4 = vpop.f32.mrb[208].mxu0  ;;  %v2220_v5 = vpop.f32.mrb[208].mxu1 }
 0x282   :  { %v1725_v6 = vadd.f32 %v5358_v56, %v1724_v4  ;;  %v3132_v7 = vpop.f32.mrb[209].mxu0  ;;  %v2221_v8 = vadd.f32 %v5358_v56, %v2220_v5  ;;  %v3380_v59 = vpop.f32.mrb[209].mxu1 }
 0x283   :  { %v1727_v9 = vpop.f32.mrb[210].mxu0  ;;  %v2223_v11 = vpop.f32.mrb[210].mxu1 }
 0x284   :  { %2395 = vst.msk [vmem:[%s5568_s3 + $0x340] sm:$0xff] %vm2290_vm3, %v1725_v6  ;;  %v1728_v12 = vadd.f32 %v5358_v56, %v1727_v9  ;;  %v3133_v13 = vpop.f32.mrb[211].mxu0  ;;  %2519 = vst.msk [vmem:[%s5568_s3 + $0x720] sm:$0xff] %vm2290_vm3, %v2221_v8  ;;  %v2224_v14 = vadd.f32 %v5358_v56, %v2223_v11  ;;  %v3381_v15 = vpop.f32.mrb[211].mxu1 }
 0x286   :  { %2396 = vst.msk [vmem:[%s5568_s3 + $0x348] sm:$0xff] %vm2290_vm3, %v1728_v12  ;;  %2520 = vst.msk [vmem:[%s5568_s3 + $0x728] sm:$0xff] %vm2290_vm3, %v2224_v14 }
 0x289   :  { %v1732_v16 = vpop.f32.mrb[212].mxu0  ;;  %v2228_v17 = vpop.f32.mrb[212].mxu1 }
 0x28a   :  { %v1733_v18 = vadd.f32 %v5358_v56, %v1732_v16  ;;  %v3136_v19 = vpop.f32.mrb[213].mxu0  ;;  %v2229_v20 = vadd.f32 %v5358_v56, %v2228_v17  ;;  %v3384_v21 = vpop.f32.mrb[213].mxu1 }
 0x28b   :  { %v1735_v22 = vpop.f32.mrb[214].mxu0  ;;  %v2231_v23 = vpop.f32.mrb[214].mxu1 }
 0x28c   :  { %2397 = vst.msk [vmem:[%s5568_s3 + $0x350] sm:$0xff] %vm2290_vm3, %v1733_v18  ;;  %v1736_v24 = vadd.f32 %v5358_v56, %v1735_v22  ;;  %v3137_v25 = vpop.f32.mrb[215].mxu0  ;;  %2521 = vst.msk [vmem:[%s5568_s3 + $0x730] sm:$0xff] %vm2290_vm3, %v2229_v20  ;;  %v2232_v26 = vadd.f32 %v5358_v56, %v2231_v23  ;;  %v3385_v27 = vpop.f32.mrb[215].mxu1 }
 0x28e   :  { %2398 = vst.msk [vmem:[%s5568_s3 + $0x358] sm:$0xff] %vm2290_vm3, %v1736_v24  ;;  %2522 = vst.msk [vmem:[%s5568_s3 + $0x738] sm:$0xff] %vm2290_vm3, %v2232_v26 }
 0x291   :  { %v1740_v28 = vpop.f32.mrb[216].mxu0  ;;  %v2236_v29 = vpop.f32.mrb[216].mxu1 }
 0x292   :  { %v1741_v30 = vadd.f32 %v5358_v56, %v1740_v28  ;;  %v3140_v31 = vpop.f32.mrb[217].mxu0  ;;  %v2237_v32 = vadd.f32 %v5358_v56, %v2236_v29  ;;  %v3388_v33 = vpop.f32.mrb[217].mxu1 }
 0x293   :  { %v1743_v34 = vpop.f32.mrb[218].mxu0  ;;  %v2239_v35 = vpop.f32.mrb[218].mxu1 }
 0x294   :  { %2399 = vst.msk [vmem:[%s5568_s3 + $0x360] sm:$0xff] %vm2290_vm3, %v1741_v30  ;;  %v1744_v36 = vadd.f32 %v5358_v56, %v1743_v34  ;;  %v3141_v37 = vpop.f32.mrb[219].mxu0  ;;  %2523 = vst.msk [vmem:[%s5568_s3 + $0x740] sm:$0xff] %vm2290_vm3, %v2237_v32  ;;  %v2240_v38 = vadd.f32 %v5358_v56, %v2239_v35  ;;  %v3389_v39 = vpop.f32.mrb[219].mxu1 }
 0x296   :  { %2400 = vst.msk [vmem:[%s5568_s3 + $0x368] sm:$0xff] %vm2290_vm3, %v1744_v36  ;;  %2524 = vst.msk [vmem:[%s5568_s3 + $0x748] sm:$0xff] %vm2290_vm3, %v2240_v38 }
 0x299   :  { %v1748_v40 = vpop.f32.mrb[220].mxu0  ;;  %v2244_v41 = vpop.f32.mrb[220].mxu1 }
 0x29a   :  { %v1749_v42 = vadd.f32 %v5358_v56, %v1748_v40  ;;  %v3144_v43 = vpop.f32.mrb[221].mxu0  ;;  %v2245_v44 = vadd.f32 %v5358_v56, %v2244_v41  ;;  %v3392_v45 = vpop.f32.mrb[221].mxu1 }
 0x29b   :  { %v1751_v46 = vpop.f32.mrb[222].mxu0  ;;  %v2247_v47 = vpop.f32.mrb[222].mxu1 }
 0x29c   :  { %2401 = vst.msk [vmem:[%s5568_s3 + $0x370] sm:$0xff] %vm2290_vm3, %v1749_v42  ;;  %v1752_v0 = vadd.f32 %v5358_v56, %v1751_v46  ;;  %v3145_v48 = vpop.f32.mrb[223].mxu0  ;;  %2525 = vst.msk [vmem:[%s5568_s3 + $0x750] sm:$0xff] %vm2290_vm3, %v2245_v44  ;;  %v2248_v49 = vadd.f32 %v5358_v56, %v2247_v47  ;;  %v3393_v50 = vpop.f32.mrb[223].mxu1 }
 0x29e   :  { %2402 = vst.msk [vmem:[%s5568_s3 + $0x378] sm:$0xff] %vm2290_vm3, %v1752_v0  ;;  %2526 = vst.msk [vmem:[%s5568_s3 + $0x758] sm:$0xff] %vm2290_vm3, %v2248_v49 }
 0x2a1   :  { %v1756_v51 = vpop.f32.mrb[224].mxu0  ;;  %v2252_v52 = vpop.f32.mrb[224].mxu1 }
 0x2a2   :  { %v1757_v53 = vadd.f32 %v5358_v56, %v1756_v51  ;;  %v3148_v54 = vpop.f32.mrb[225].mxu0  ;;  %v2253_v55 = vadd.f32 %v5358_v56, %v2252_v52  ;;  %v3396_v10 = vpop.f32.mrb[225].mxu1 }
 0x2a3   :  { %v1759_v57 = vpop.f32.mrb[226].mxu0  ;;  %v2255_v58 = vpop.f32.mrb[226].mxu1 }
 0x2a4   :  { %2403 = vst.msk [vmem:[%s5568_s3 + $0x380] sm:$0xff] %vm2290_vm3, %v1757_v53  ;;  %v1760_v60 = vadd.f32 %v5358_v56, %v1759_v57  ;;  %v3149_v61 = vpop.f32.mrb[227].mxu0  ;;  %2527 = vst.msk [vmem:[%s5568_s3 + $0x760] sm:$0xff] %vm2290_vm3, %v2253_v55  ;;  %v2256_v62 = vadd.f32 %v5358_v56, %v2255_v58  ;;  %v3397_v63 = vpop.f32.mrb[227].mxu1 }
 0x2a6   :  { %2404 = vst.msk [vmem:[%s5568_s3 + $0x388] sm:$0xff] %vm2290_vm3, %v1760_v60  ;;  %2528 = vst.msk [vmem:[%s5568_s3 + $0x768] sm:$0xff] %vm2290_vm3, %v2256_v62 }
 0x2a9   :  { %v1764_v1 = vpop.f32.mrb[228].mxu0  ;;  %v2260_v2 = vpop.f32.mrb[228].mxu1 }
 0x2aa   :  { %v1765_v3 = vadd.f32 %v5358_v56, %v1764_v1  ;;  %v3152_v4 = vpop.f32.mrb[229].mxu0  ;;  %v2261_v5 = vadd.f32 %v5358_v56, %v2260_v2  ;;  %v3400_v6 = vpop.f32.mrb[229].mxu1 }
 0x2ab   :  { %v1767_v7 = vpop.f32.mrb[230].mxu0  ;;  %v2263_v8 = vpop.f32.mrb[230].mxu1 }
 0x2ac   :  { %2405 = vst.msk [vmem:[%s5568_s3 + $0x390] sm:$0xff] %vm2290_vm3, %v1765_v3  ;;  %v1768_v59 = vadd.f32 %v5358_v56, %v1767_v7  ;;  %v3153_v9 = vpop.f32.mrb[231].mxu0  ;;  %2529 = vst.msk [vmem:[%s5568_s3 + $0x770] sm:$0xff] %vm2290_vm3, %v2261_v5  ;;  %v2264_v11 = vadd.f32 %v5358_v56, %v2263_v8  ;;  %v3401_v12 = vpop.f32.mrb[231].mxu1 }
 0x2ae   :  { %2406 = vst.msk [vmem:[%s5568_s3 + $0x398] sm:$0xff] %vm2290_vm3, %v1768_v59  ;;  %2530 = vst.msk [vmem:[%s5568_s3 + $0x778] sm:$0xff] %vm2290_vm3, %v2264_v11 }
 0x2b1   :  { %v1772_v13 = vpop.f32.mrb[232].mxu0  ;;  %v2268_v14 = vpop.f32.mrb[232].mxu1 }
 0x2b2   :  { %v1773_v15 = vadd.f32 %v5358_v56, %v1772_v13  ;;  %v3156_v16 = vpop.f32.mrb[233].mxu0  ;;  %v2269_v17 = vadd.f32 %v5358_v56, %v2268_v14  ;;  %v3404_v18 = vpop.f32.mrb[233].mxu1 }
 0x2b3   :  { %v1775_v19 = vpop.f32.mrb[234].mxu0  ;;  %v2271_v20 = vpop.f32.mrb[234].mxu1 }
 0x2b4   :  { %2407 = vst.msk [vmem:[%s5568_s3 + $0x3a0] sm:$0xff] %vm2290_vm3, %v1773_v15  ;;  %v1776_v21 = vadd.f32 %v5358_v56, %v1775_v19  ;;  %v3157_v22 = vpop.f32.mrb[235].mxu0  ;;  %2531 = vst.msk [vmem:[%s5568_s3 + $0x780] sm:$0xff] %vm2290_vm3, %v2269_v17  ;;  %v2272_v23 = vadd.f32 %v5358_v56, %v2271_v20  ;;  %v3405_v24 = vpop.f32.mrb[235].mxu1 }
 0x2b6   :  { %2408 = vst.msk [vmem:[%s5568_s3 + $0x3a8] sm:$0xff] %vm2290_vm3, %v1776_v21  ;;  %2532 = vst.msk [vmem:[%s5568_s3 + $0x788] sm:$0xff] %vm2290_vm3, %v2272_v23 }
 0x2b9   :  { %v1780_v25 = vpop.f32.mrb[236].mxu0  ;;  %v2276_v26 = vpop.f32.mrb[236].mxu1 }
 0x2ba   :  { %v1781_v27 = vadd.f32 %v5358_v56, %v1780_v25  ;;  %v3160_v28 = vpop.f32.mrb[237].mxu0  ;;  %v2277_v29 = vadd.f32 %v5358_v56, %v2276_v26  ;;  %v3408_v30 = vpop.f32.mrb[237].mxu1 }
 0x2bb   :  { %v1783_v31 = vpop.f32.mrb[238].mxu0  ;;  %v2279_v32 = vpop.f32.mrb[238].mxu1 }
 0x2bc   :  { %2409 = vst.msk [vmem:[%s5568_s3 + $0x3b0] sm:$0xff] %vm2290_vm3, %v1781_v27  ;;  %v1784_v33 = vadd.f32 %v5358_v56, %v1783_v31  ;;  %v3161_v34 = vpop.f32.mrb[239].mxu0  ;;  %2533 = vst.msk [vmem:[%s5568_s3 + $0x790] sm:$0xff] %vm2290_vm3, %v2277_v29  ;;  %v2280_v35 = vadd.f32 %v5358_v56, %v2279_v32  ;;  %v3409_v36 = vpop.f32.mrb[239].mxu1 }
 0x2be   :  { %2410 = vst.msk [vmem:[%s5568_s3 + $0x3b8] sm:$0xff] %vm2290_vm3, %v1784_v33  ;;  %2534 = vst.msk [vmem:[%s5568_s3 + $0x798] sm:$0xff] %vm2290_vm3, %v2280_v35 }
 0x2c1   :  { %v1788_v37 = vpop.f32.mrb[240].mxu0  ;;  %v2284_v38 = vpop.f32.mrb[240].mxu1 }
 0x2c2   :  { %v1789_v39 = vadd.f32 %v5358_v56, %v1788_v37  ;;  %v3164_v40 = vpop.f32.mrb[241].mxu0  ;;  %v2285_v41 = vadd.f32 %v5358_v56, %v2284_v38  ;;  %v3412_v42 = vpop.f32.mrb[241].mxu1 }
 0x2c3   :  { %v1791_v43 = vpop.f32.mrb[242].mxu0  ;;  %v2287_v44 = vpop.f32.mrb[242].mxu1 }
 0x2c4   :  { %2411 = vst.msk [vmem:[%s5568_s3 + $0x3c0] sm:$0xff] %vm2290_vm3, %v1789_v39  ;;  %v1792_v45 = vadd.f32 %v5358_v56, %v1791_v43  ;;  %v3165_v46 = vpop.f32.mrb[243].mxu0  ;;  %2535 = vst.msk [vmem:[%s5568_s3 + $0x7a0] sm:$0xff] %vm2290_vm3, %v2285_v41  ;;  %v3413_v47 = vpop.f32.mrb[243].mxu1 }
 0x2c6   :  { %2412 = vst.msk [vmem:[%s5568_s3 + $0x3c8] sm:$0xff] %vm2290_vm3, %v1792_v45 }
 0x2c9   :  { %v1796_v0 = vpop.f32.mrb[244].mxu0 }
 0x2ca   :  { %v1797_v48 = vadd.f32 %v5358_v56, %v1796_v0  ;;  %v3168_v49 = vpop.f32.mrb[245].mxu0 }
 0x2cb   :  { %v1799_v50 = vpop.f32.mrb[246].mxu0 }
 0x2cc   :  { %2413 = vst.msk [vmem:[%s5568_s3 + $0x3d0] sm:$0xff] %vm2290_vm3, %v1797_v48  ;;  %v1800_v51 = vadd.f32 %v5358_v56, %v1799_v50  ;;  %v3169_v52 = vpop.f32.mrb[247].mxu0 }
 0x2ce   :  { %2414 = vst.msk [vmem:[%s5568_s3 + $0x3d8] sm:$0xff] %vm2290_vm3, %v1800_v51 }

// kernel: gcb_forward.8
= control target key start
LH: loop header
LB: loop body
LE: loop exit
PB: predicated region body
PF: predicated region fallthrough
CT: control target
= control target key end

     0   :  { %v3580_v0 = vmov 0.0   ;;  %vm3581_vm0 = vmmov 0   ;;  %vm1286_vm1 = vcmask 1043456   ;;  %vm916_vm2 = vcmask 588800   ;;  %s5605_s1 = inlined_call_operand.vmem [shape: bf16[72,24], index: 1, kind: input, shape index: {}]   ;;  %s5606_s0 = inlined_call_operand.vmem [shape: bf16[1960,72], index: 0, kind: input, shape index: {}]   ;;  %s5607_s2 = inlined_call_operand.vmem [shape: f32[1,24], index: 2, kind: input, shape index: {}]   ;;  %s5608_s3 = inlined_call_operand.vmem [shape: f32[1960,24], index: 3, kind: output, shape index: {}]  }
   0x1   :  { %2936 = vmatprep.subr.bf16.mxu0 %v3580_v0  ;;  %v3450_v1 = vld [vmem:[%s5605_s1] sm:$0xff]   ;;  %3438 = vmatprep.subr.bf16.mxu1 %v3580_v0  ;;  %v3451_v2 = vld [vmem:[%s5605_s1 + $0x8] sm:$0xff]   ;;  %v3452_v3 = vld [vmem:[%s5605_s1 + $0x10] sm:$0xff]   ;;  %vm2306_vm3 = vcmask 195584  }
   0x2   :  { %2946 = vmatprep.mubr.msk.bf16.mxu0 %vm3581_vm0, %v3580_v0  ;;  %3194 = vmatprep.mubr.msk.bf16.mxu1 %vm3581_vm0, %v3580_v0  ;;  %v3453_v4 = vld [vmem:[%s5605_s1 + $0x18] sm:$0xff]   ;;  %v3454_v5 = vld [vmem:[%s5605_s1 + $0x20] ss:$0 sps:$4 sm:$0xff]   ;;  %v3456_v8 = vld [vmem:[%s5606_s0 + $0x1f0] sm:$0xff]  }
   0x3   :  { %2937 = vmatpush3.bf16.msra.mxu0 %v3450_v1  ;;  %3443 = vmatpush3.bf16.msra.mxu1 %v3450_v1  ;;  %v1288_v6 = vsel %vm1286_vm1, %v3454_v5, 0  ;;  %v3455_v7 = vld [vmem:[%s5606_s0] sm:$0xff]   ;;  %v3457_v9 = vld [vmem:[%s5606_s0 + $0x8] sm:$0xff]   ;;  %v3458_v10 = vld [vmem:[%s5606_s0 + $0x1f8] sm:$0xff]  }
   0x4   :  { %2938 = vmatprep.subr.bf16.mxu0 %v3580_v0  ;;  %3439 = vmatprep.subr.bf16.mxu1 %v3580_v0  ;;  %v3459_v11 = vld [vmem:[%s5606_s0 + $0x10] sm:$0xff]   ;;  %v3460_v12 = vld [vmem:[%s5606_s0 + $0x200] sm:$0xff]   ;;  %v3461_v13 = vld [vmem:[%s5606_s0 + $0x18] sm:$0xff]  }
   0x5   :  { %v3462_v14 = vld [vmem:[%s5606_s0 + $0x208] sm:$0xff]   ;;  %v3463_v15 = vld [vmem:[%s5606_s0 + $0x20] sm:$0xff]   ;;  %v3464_v16 = vld [vmem:[%s5606_s0 + $0x210] sm:$0xff]  }
   0x6   :  { %v3465_v17 = vld [vmem:[%s5606_s0 + $0x28] sm:$0xff]   ;;  %v3466_v18 = vld [vmem:[%s5606_s0 + $0x218] sm:$0xff]   ;;  %v3467_v19 = vld [vmem:[%s5606_s0 + $0x30] sm:$0xff]  }
   0x7   :  { %2939 = vmatpush3.bf16.msra.mxu0 %v3451_v2  ;;  %3444 = vmatpush3.bf16.msra.mxu1 %v3451_v2  ;;  %v3468_v20 = vld [vmem:[%s5606_s0 + $0x220] sm:$0xff]   ;;  %v3469_v21 = vld [vmem:[%s5606_s0 + $0x38] sm:$0xff]   ;;  %v3470_v22 = vld [vmem:[%s5606_s0 + $0x228] sm:$0xff]  }
   0x8   :  { %2940 = vmatprep.subr.bf16.mxu0 %v3580_v0  ;;  %3440 = vmatprep.subr.bf16.mxu1 %v3580_v0  ;;  %v3471_v23 = vld [vmem:[%s5606_s0 + $0x40] sm:$0xff]   ;;  %v3472_v24 = vld [vmem:[%s5606_s0 + $0x230] sm:$0xff]   ;;  %v3473_v25 = vld [vmem:[%s5606_s0 + $0x48] sm:$0xff]  }
   0x9   :  { %v3474_v26 = vld [vmem:[%s5606_s0 + $0x238] sm:$0xff]   ;;  %v3475_v27 = vld [vmem:[%s5606_s0 + $0x50] sm:$0xff]   ;;  %v3476_v28 = vld [vmem:[%s5606_s0 + $0x240] sm:$0xff]  }
   0xa   :  { %v3477_v29 = vld [vmem:[%s5606_s0 + $0x58] sm:$0xff]   ;;  %v3478_v30 = vld [vmem:[%s5606_s0 + $0x248] sm:$0xff]   ;;  %v3479_v31 = vld [vmem:[%s5606_s0 + $0x60] sm:$0xff]  }
   0xb   :  { %2941 = vmatpush3.bf16.msra.mxu0 %v3452_v3  ;;  %3445 = vmatpush3.bf16.msra.mxu1 %v3452_v3  ;;  %v3480_v32 = vld [vmem:[%s5606_s0 + $0x250] sm:$0xff]   ;;  %v3481_v33 = vld [vmem:[%s5606_s0 + $0x68] sm:$0xff]   ;;  %v3482_v34 = vld [vmem:[%s5606_s0 + $0x258] sm:$0xff]  }
   0xc   :  { %2942 = vmatprep.subr.bf16.mxu0 %v3580_v0  ;;  %3441 = vmatprep.subr.bf16.mxu1 %v3580_v0  ;;  %v3483_v35 = vld [vmem:[%s5606_s0 + $0x70] sm:$0xff]   ;;  %v3484_v36 = vld [vmem:[%s5606_s0 + $0x260] sm:$0xff]   ;;  %v3485_v37 = vld [vmem:[%s5606_s0 + $0x78] sm:$0xff]  }
   0xd   :  { %v3486_v38 = vld [vmem:[%s5606_s0 + $0x268] sm:$0xff]   ;;  %v3487_v39 = vld [vmem:[%s5606_s0 + $0x80] sm:$0xff]   ;;  %v3488_v40 = vld [vmem:[%s5606_s0 + $0x270] sm:$0xff]  }
   0xe   :  { %v3489_v41 = vld [vmem:[%s5606_s0 + $0x88] sm:$0xff]   ;;  %v3490_v42 = vld [vmem:[%s5606_s0 + $0x278] sm:$0xff]   ;;  %v3491_v43 = vld [vmem:[%s5606_s0 + $0x90] sm:$0xff]  }
   0xf   :  { %2943 = vmatpush3.bf16.msra.mxu0 %v3453_v4  ;;  %3446 = vmatpush3.bf16.msra.mxu1 %v3453_v4  ;;  %v3492_v44 = vld [vmem:[%s5606_s0 + $0x280] sm:$0xff]   ;;  %v3493_v45 = vld [vmem:[%s5606_s0 + $0x98] sm:$0xff]   ;;  %v3494_v46 = vld [vmem:[%s5606_s0 + $0x288] sm:$0xff]  }
  0x10   :  { %2944 = vmatprep.subr.bf16.mxu0 %v3580_v0  ;;  %3442 = vmatprep.subr.bf16.mxu1 %v3580_v0  ;;  %v3495_v47 = vld [vmem:[%s5606_s0 + $0xa0] sm:$0xff]   ;;  %v3496_v48 = vld [vmem:[%s5606_s0 + $0x290] sm:$0xff]   ;;  %v3497_v49 = vld [vmem:[%s5606_s0 + $0xa8] sm:$0xff]  }
  0x11   :  { %v3498_v50 = vld [vmem:[%s5606_s0 + $0x298] sm:$0xff]   ;;  %v3499_v51 = vld [vmem:[%s5606_s0 + $0xb0] sm:$0xff]   ;;  %v3500_v52 = vld [vmem:[%s5606_s0 + $0x2a0] sm:$0xff]  }
  0x12   :  { %v3501_v53 = vld [vmem:[%s5606_s0 + $0xb8] sm:$0xff]   ;;  %v3502_v54 = vld [vmem:[%s5606_s0 + $0x2a8] sm:$0xff]   ;;  %v3503_v55 = vld [vmem:[%s5606_s0 + $0xc0] sm:$0xff]  }
  0x13   :  { %2945 = vmatpush3.bf16.msra.mxu0 %v1288_v6  ;;  %3447 = vmatpush3.bf16.msra.mxu1 %v1288_v6  ;;  %v3504_v56 = vld [vmem:[%s5606_s0 + $0x2b0] sm:$0xff]   ;;  %v3505_v57 = vld [vmem:[%s5606_s0 + $0xc8] sm:$0xff]   ;;  %v3506_v58 = vld [vmem:[%s5606_s0 + $0x2b8] sm:$0xff]  }
  0x14   :  { %v3507_v59 = vld [vmem:[%s5606_s0 + $0xd0] sm:$0xff]   ;;  %v3508_v60 = vld [vmem:[%s5606_s0 + $0x2c0] sm:$0xff]   ;;  %v3509_v3 = vld [vmem:[%s5606_s0 + $0xd8] sm:$0xff]  }
  0x15   :  { %v3954_v61 = vld [vmem:[%s5607_s2] ss:$0 sm:$0xff]  ;;  %v3510_v6 = vld [vmem:[%s5606_s0 + $0x2c8] sm:$0xff]  }
  0x16   :  { %2947 = vmatmul.mubr.msk.bf16.vlgmr.msra.gmra.mrb[0].mxu0 %vm916_vm2, %v3455_v7  ;;  %3195 = vmatmul.mubr.msk.bf16.vlgmr.msra.gmra.mrb[0].mxu1 %vm916_vm2, %v3456_v8 }
  0x17   :  { %2950 = vmatprep.mubr.msk.bf16.mxu0 %vm3581_vm0, %v3580_v0  ;;  %3198 = vmatprep.mubr.msk.bf16.mxu1 %vm3581_vm0, %v3580_v0 }
  0x1e   :  { %2951 = vmatmul.mubr.msk.bf16.gmra.mrb[4].mxu0 %vm916_vm2, %v3457_v9  ;;  %3199 = vmatmul.mubr.msk.bf16.gmra.mrb[4].mxu1 %vm916_vm2, %v3458_v10 }
  0x1f   :  { %2954 = vmatprep.mubr.msk.bf16.mxu0 %vm3581_vm0, %v3580_v0  ;;  %3202 = vmatprep.mubr.msk.bf16.mxu1 %vm3581_vm0, %v3580_v0 }
  0x26   :  { %2955 = vmatmul.mubr.msk.bf16.gmra.mrb[8].mxu0 %vm916_vm2, %v3459_v11  ;;  %3203 = vmatmul.mubr.msk.bf16.gmra.mrb[8].mxu1 %vm916_vm2, %v3460_v12 }
  0x27   :  { %2958 = vmatprep.mubr.msk.bf16.mxu0 %vm3581_vm0, %v3580_v0  ;;  %3206 = vmatprep.mubr.msk.bf16.mxu1 %vm3581_vm0, %v3580_v0 }
  0x2e   :  { %2959 = vmatmul.mubr.msk.bf16.gmra.mrb[12].mxu0 %vm916_vm2, %v3461_v13  ;;  %3207 = vmatmul.mubr.msk.bf16.gmra.mrb[12].mxu1 %vm916_vm2, %v3462_v14 }
  0x2f   :  { %2962 = vmatprep.mubr.msk.bf16.mxu0 %vm3581_vm0, %v3580_v0  ;;  %3210 = vmatprep.mubr.msk.bf16.mxu1 %vm3581_vm0, %v3580_v0 }
  0x36   :  { %2963 = vmatmul.mubr.msk.bf16.gmra.mrb[16].mxu0 %vm916_vm2, %v3463_v15  ;;  %3211 = vmatmul.mubr.msk.bf16.gmra.mrb[16].mxu1 %vm916_vm2, %v3464_v16 }
  0x37   :  { %2966 = vmatprep.mubr.msk.bf16.mxu0 %vm3581_vm0, %v3580_v0  ;;  %3214 = vmatprep.mubr.msk.bf16.mxu1 %vm3581_vm0, %v3580_v0 }
  0x3e   :  { %2967 = vmatmul.mubr.msk.bf16.gmra.mrb[20].mxu0 %vm916_vm2, %v3465_v17  ;;  %3215 = vmatmul.mubr.msk.bf16.gmra.mrb[20].mxu1 %vm916_vm2, %v3466_v18  ;;  %v3511_v17 = vld [vmem:[%s5606_s0 + $0xe0] sm:$0xff]  }
  0x3f   :  { %2970 = vmatprep.mubr.msk.bf16.mxu0 %vm3581_vm0, %v3580_v0  ;;  %3218 = vmatprep.mubr.msk.bf16.mxu1 %vm3581_vm0, %v3580_v0 }
  0x46   :  { %2971 = vmatmul.mubr.msk.bf16.gmra.mrb[24].mxu0 %vm916_vm2, %v3467_v19  ;;  %3219 = vmatmul.mubr.msk.bf16.gmra.mrb[24].mxu1 %vm916_vm2, %v3468_v20  ;;  %v3512_v20 = vld [vmem:[%s5606_s0 + $0x2d0] sm:$0xff]  }
  0x47   :  { %2974 = vmatprep.mubr.msk.bf16.mxu0 %vm3581_vm0, %v3580_v0  ;;  %3222 = vmatprep.mubr.msk.bf16.mxu1 %vm3581_vm0, %v3580_v0 }
  0x4e   :  { %2975 = vmatmul.mubr.msk.bf16.gmra.mrb[28].mxu0 %vm916_vm2, %v3469_v21  ;;  %3223 = vmatmul.mubr.msk.bf16.gmra.mrb[28].mxu1 %vm916_vm2, %v3470_v22 }
  0x4f   :  { %2978 = vmatprep.mubr.msk.bf16.mxu0 %vm3581_vm0, %v3580_v0  ;;  %3226 = vmatprep.mubr.msk.bf16.mxu1 %vm3581_vm0, %v3580_v0 }
  0x56   :  { %2979 = vmatmul.mubr.msk.bf16.gmra.mrb[32].mxu0 %vm916_vm2, %v3471_v23  ;;  %3227 = vmatmul.mubr.msk.bf16.gmra.mrb[32].mxu1 %vm916_vm2, %v3472_v24 }
  0x57   :  { %2982 = vmatprep.mubr.msk.bf16.mxu0 %vm3581_vm0, %v3580_v0  ;;  %3230 = vmatprep.mubr.msk.bf16.mxu1 %vm3581_vm0, %v3580_v0 }
  0x5e   :  { %2983 = vmatmul.mubr.msk.bf16.gmra.mrb[36].mxu0 %vm916_vm2, %v3473_v25  ;;  %3231 = vmatmul.mubr.msk.bf16.gmra.mrb[36].mxu1 %vm916_vm2, %v3474_v26 }
  0x5f   :  { %2986 = vmatprep.mubr.msk.bf16.mxu0 %vm3581_vm0, %v3580_v0  ;;  %3234 = vmatprep.mubr.msk.bf16.mxu1 %vm3581_vm0, %v3580_v0 }
  0x66   :  { %2987 = vmatmul.mubr.msk.bf16.gmra.mrb[40].mxu0 %vm916_vm2, %v3475_v27  ;;  %3235 = vmatmul.mubr.msk.bf16.gmra.mrb[40].mxu1 %vm916_vm2, %v3476_v28 }
  0x67   :  { %2990 = vmatprep.mubr.msk.bf16.mxu0 %vm3581_vm0, %v3580_v0  ;;  %3238 = vmatprep.mubr.msk.bf16.mxu1 %vm3581_vm0, %v3580_v0 }
  0x6e   :  { %2991 = vmatmul.mubr.msk.bf16.gmra.mrb[44].mxu0 %vm916_vm2, %v3477_v29  ;;  %3239 = vmatmul.mubr.msk.bf16.gmra.mrb[44].mxu1 %vm916_vm2, %v3478_v30 }
  0x6f   :  { %2994 = vmatprep.mubr.msk.bf16.mxu0 %vm3581_vm0, %v3580_v0  ;;  %3242 = vmatprep.mubr.msk.bf16.mxu1 %vm3581_vm0, %v3580_v0 }
  0x76   :  { %2995 = vmatmul.mubr.msk.bf16.gmra.mrb[48].mxu0 %vm916_vm2, %v3479_v31  ;;  %3243 = vmatmul.mubr.msk.bf16.gmra.mrb[48].mxu1 %vm916_vm2, %v3480_v32  ;;  %v3513_v31 = vld [vmem:[%s5606_s0 + $0xe8] sm:$0xff]  }
  0x77   :  { %2998 = vmatprep.mubr.msk.bf16.mxu0 %vm3581_vm0, %v3580_v0  ;;  %3246 = vmatprep.mubr.msk.bf16.mxu1 %vm3581_vm0, %v3580_v0 }
  0x7e   :  { %2999 = vmatmul.mubr.msk.bf16.gmra.mrb[52].mxu0 %vm916_vm2, %v3481_v33  ;;  %3247 = vmatmul.mubr.msk.bf16.gmra.mrb[52].mxu1 %vm916_vm2, %v3482_v34  ;;  %v3514_v34 = vld [vmem:[%s5606_s0 + $0x2d8] sm:$0xff]  }
  0x7f   :  { %3002 = vmatprep.mubr.msk.bf16.mxu0 %vm3581_vm0, %v3580_v0  ;;  %3250 = vmatprep.mubr.msk.bf16.mxu1 %vm3581_vm0, %v3580_v0 }
  0x86   :  { %3003 = vmatmul.mubr.msk.bf16.gmra.mrb[56].mxu0 %vm916_vm2, %v3483_v35  ;;  %3251 = vmatmul.mubr.msk.bf16.gmra.mrb[56].mxu1 %vm916_vm2, %v3484_v36 }
  0x87   :  { %3006 = vmatprep.mubr.msk.bf16.mxu0 %vm3581_vm0, %v3580_v0  ;;  %3254 = vmatprep.mubr.msk.bf16.mxu1 %vm3581_vm0, %v3580_v0 }
  0x8e   :  { %3007 = vmatmul.mubr.msk.bf16.gmra.mrb[60].mxu0 %vm916_vm2, %v3485_v37  ;;  %3255 = vmatmul.mubr.msk.bf16.gmra.mrb[60].mxu1 %vm916_vm2, %v3486_v38 }
  0x8f   :  { %3010 = vmatprep.mubr.msk.bf16.mxu0 %vm3581_vm0, %v3580_v0  ;;  %3258 = vmatprep.mubr.msk.bf16.mxu1 %vm3581_vm0, %v3580_v0 }
  0x96   :  { %3011 = vmatmul.mubr.msk.bf16.gmra.mrb[64].mxu0 %vm916_vm2, %v3487_v39  ;;  %3259 = vmatmul.mubr.msk.bf16.gmra.mrb[64].mxu1 %vm916_vm2, %v3488_v40 }
  0x97   :  { %3014 = vmatprep.mubr.msk.bf16.mxu0 %vm3581_vm0, %v3580_v0  ;;  %3262 = vmatprep.mubr.msk.bf16.mxu1 %vm3581_vm0, %v3580_v0 }
  0x9e   :  { %3015 = vmatmul.mubr.msk.bf16.gmra.mrb[68].mxu0 %vm916_vm2, %v3489_v41  ;;  %3263 = vmatmul.mubr.msk.bf16.gmra.mrb[68].mxu1 %vm916_vm2, %v3490_v42 }
  0x9f   :  { %3018 = vmatprep.mubr.msk.bf16.mxu0 %vm3581_vm0, %v3580_v0  ;;  %3266 = vmatprep.mubr.msk.bf16.mxu1 %vm3581_vm0, %v3580_v0 }
  0xa6   :  { %3019 = vmatmul.mubr.msk.bf16.gmra.mrb[72].mxu0 %vm916_vm2, %v3491_v43  ;;  %3267 = vmatmul.mubr.msk.bf16.gmra.mrb[72].mxu1 %vm916_vm2, %v3492_v44 }
  0xa7   :  { %3022 = vmatprep.mubr.msk.bf16.mxu0 %vm3581_vm0, %v3580_v0  ;;  %3270 = vmatprep.mubr.msk.bf16.mxu1 %vm3581_vm0, %v3580_v0 }
  0xae   :  { %3023 = vmatmul.mubr.msk.bf16.gmra.mrb[76].mxu0 %vm916_vm2, %v3493_v45  ;;  %3271 = vmatmul.mubr.msk.bf16.gmra.mrb[76].mxu1 %vm916_vm2, %v3494_v46  ;;  %v3515_v45 = vld [vmem:[%s5606_s0 + $0xf0] sm:$0xff]  }
  0xaf   :  { %3026 = vmatprep.mubr.msk.bf16.mxu0 %vm3581_vm0, %v3580_v0  ;;  %3274 = vmatprep.mubr.msk.bf16.mxu1 %vm3581_vm0, %v3580_v0 }
  0xb6   :  { %3027 = vmatmul.mubr.msk.bf16.gmra.mrb[80].mxu0 %vm916_vm2, %v3495_v47  ;;  %3275 = vmatmul.mubr.msk.bf16.gmra.mrb[80].mxu1 %vm916_vm2, %v3496_v48  ;;  %v3516_v48 = vld [vmem:[%s5606_s0 + $0x2e0] sm:$0xff]  }
  0xb7   :  { %3030 = vmatprep.mubr.msk.bf16.mxu0 %vm3581_vm0, %v3580_v0  ;;  %3278 = vmatprep.mubr.msk.bf16.mxu1 %vm3581_vm0, %v3580_v0 }
  0xbe   :  { %3031 = vmatmul.mubr.msk.bf16.gmra.mrb[84].mxu0 %vm916_vm2, %v3497_v49  ;;  %3279 = vmatmul.mubr.msk.bf16.gmra.mrb[84].mxu1 %vm916_vm2, %v3498_v50 }
  0xbf   :  { %3034 = vmatprep.mubr.msk.bf16.mxu0 %vm3581_vm0, %v3580_v0  ;;  %3282 = vmatprep.mubr.msk.bf16.mxu1 %vm3581_vm0, %v3580_v0 }
  0xc6   :  { %3035 = vmatmul.mubr.msk.bf16.gmra.mrb[88].mxu0 %vm916_vm2, %v3499_v51  ;;  %3283 = vmatmul.mubr.msk.bf16.gmra.mrb[88].mxu1 %vm916_vm2, %v3500_v52 }
  0xc7   :  { %3038 = vmatprep.mubr.msk.bf16.mxu0 %vm3581_vm0, %v3580_v0  ;;  %3286 = vmatprep.mubr.msk.bf16.mxu1 %vm3581_vm0, %v3580_v0 }
  0xce   :  { %3039 = vmatmul.mubr.msk.bf16.gmra.mrb[92].mxu0 %vm916_vm2, %v3501_v53  ;;  %3287 = vmatmul.mubr.msk.bf16.gmra.mrb[92].mxu1 %vm916_vm2, %v3502_v54 }
  0xcf   :  { %3042 = vmatprep.mubr.msk.bf16.mxu0 %vm3581_vm0, %v3580_v0  ;;  %3290 = vmatprep.mubr.msk.bf16.mxu1 %vm3581_vm0, %v3580_v0 }
  0xd6   :  { %3043 = vmatmul.mubr.msk.bf16.gmra.mrb[96].mxu0 %vm916_vm2, %v3503_v55  ;;  %3291 = vmatmul.mubr.msk.bf16.gmra.mrb[96].mxu1 %vm916_vm2, %v3504_v56 }
  0xd7   :  { %3046 = vmatprep.mubr.msk.bf16.mxu0 %vm3581_vm0, %v3580_v0  ;;  %3294 = vmatprep.mubr.msk.bf16.mxu1 %vm3581_vm0, %v3580_v0 }
  0xde   :  { %3047 = vmatmul.mubr.msk.bf16.gmra.mrb[100].mxu0 %vm916_vm2, %v3505_v57  ;;  %3295 = vmatmul.mubr.msk.bf16.gmra.mrb[100].mxu1 %vm916_vm2, %v3506_v58 }
  0xdf   :  { %3050 = vmatprep.mubr.msk.bf16.mxu0 %vm3581_vm0, %v3580_v0  ;;  %3298 = vmatprep.mubr.msk.bf16.mxu1 %vm3581_vm0, %v3580_v0 }
  0xe6   :  { %3051 = vmatmul.mubr.msk.bf16.gmra.mrb[104].mxu0 %vm916_vm2, %v3507_v59  ;;  %3299 = vmatmul.mubr.msk.bf16.gmra.mrb[104].mxu1 %vm916_vm2, %v3508_v60  ;;  %v3517_v59 = vld [vmem:[%s5606_s0 + $0xf8] sm:$0xff]  }
  0xe7   :  { %3054 = vmatprep.mubr.msk.bf16.mxu0 %vm3581_vm0, %v3580_v0  ;;  %3302 = vmatprep.mubr.msk.bf16.mxu1 %vm3581_vm0, %v3580_v0 }
  0xe9   :  { %v1324_v62 = vpop.f32.mrb[0].mxu0  ;;  %v1820_v63 = vpop.f32.mrb[0].mxu1 }
  0xea   :  { %v1325_v1 = vadd.f32 %v3954_v61, %v1324_v62  ;;  %v2948_v2 = vpop.f32.mrb[1].mxu0  ;;  %v1821_v4 = vadd.f32 %v3954_v61, %v1820_v63  ;;  %v3196_v5 = vpop.f32.mrb[1].mxu1  ;;  %v3518_v63 = vld [vmem:[%s5606_s0 + $0x2e8] sm:$0xff]  }
  0xeb   :  { %v1327_v7 = vpop.f32.mrb[2].mxu0  ;;  %v1823_v8 = vpop.f32.mrb[2].mxu1 }
  0xec   :  { %2307 = vst.msk [vmem:[%s5608_s3] sm:$0xff] %vm2306_vm3, %v1325_v1  ;;  %v1328_v9 = vadd.f32 %v3954_v61, %v1327_v7  ;;  %v2949_v10 = vpop.f32.mrb[3].mxu0  ;;  %2431 = vst.msk [vmem:[%s5608_s3 + $0x3e0] sm:$0xff] %vm2306_vm3, %v1821_v4  ;;  %v1824_v11 = vadd.f32 %v3954_v61, %v1823_v8  ;;  %v3197_v12 = vpop.f32.mrb[3].mxu1 }
  0xee   :  { %2308 = vst.msk [vmem:[%s5608_s3 + $0x8] sm:$0xff] %vm2306_vm3, %v1328_v9  ;;  %3055 = vmatmul.mubr.msk.bf16.gmra.mrb[108].mxu0 %vm916_vm2, %v3509_v3  ;;  %2432 = vst.msk [vmem:[%s5608_s3 + $0x3e8] sm:$0xff] %vm2306_vm3, %v1824_v11  ;;  %3303 = vmatmul.mubr.msk.bf16.gmra.mrb[108].mxu1 %vm916_vm2, %v3510_v6  ;;  %v3519_v11 = vld [vmem:[%s5606_s0 + $0x100] sm:$0xff]  }
  0xef   :  { %3058 = vmatprep.mubr.msk.bf16.mxu0 %vm3581_vm0, %v3580_v0  ;;  %3306 = vmatprep.mubr.msk.bf16.mxu1 %vm3581_vm0, %v3580_v0 }
  0xf1   :  { %v1332_v13 = vpop.f32.mrb[4].mxu0  ;;  %v1828_v14 = vpop.f32.mrb[4].mxu1 }
  0xf2   :  { %v1333_v15 = vadd.f32 %v3954_v61, %v1332_v13  ;;  %v2952_v16 = vpop.f32.mrb[5].mxu0  ;;  %v1829_v18 = vadd.f32 %v3954_v61, %v1828_v14  ;;  %v3200_v19 = vpop.f32.mrb[5].mxu1  ;;  %v3520_v14 = vld [vmem:[%s5606_s0 + $0x2f0] sm:$0xff]  }
  0xf3   :  { %v1335_v21 = vpop.f32.mrb[6].mxu0  ;;  %v1831_v22 = vpop.f32.mrb[6].mxu1 }
  0xf4   :  { %2309 = vst.msk [vmem:[%s5608_s3 + $0x10] sm:$0xff] %vm2306_vm3, %v1333_v15  ;;  %v1336_v23 = vadd.f32 %v3954_v61, %v1335_v21  ;;  %v2953_v24 = vpop.f32.mrb[7].mxu0  ;;  %2433 = vst.msk [vmem:[%s5608_s3 + $0x3f0] sm:$0xff] %vm2306_vm3, %v1829_v18  ;;  %v1832_v25 = vadd.f32 %v3954_v61, %v1831_v22  ;;  %v3201_v26 = vpop.f32.mrb[7].mxu1 }
  0xf6   :  { %2310 = vst.msk [vmem:[%s5608_s3 + $0x18] sm:$0xff] %vm2306_vm3, %v1336_v23  ;;  %3059 = vmatmul.mubr.msk.bf16.gmra.mrb[112].mxu0 %vm916_vm2, %v3511_v17  ;;  %2434 = vst.msk [vmem:[%s5608_s3 + $0x3f8] sm:$0xff] %vm2306_vm3, %v1832_v25  ;;  %3307 = vmatmul.mubr.msk.bf16.gmra.mrb[112].mxu1 %vm916_vm2, %v3512_v20  ;;  %v3521_v25 = vld [vmem:[%s5606_s0 + $0x108] sm:$0xff]  }
  0xf7   :  { %3062 = vmatprep.mubr.msk.bf16.mxu0 %vm3581_vm0, %v3580_v0  ;;  %3310 = vmatprep.mubr.msk.bf16.mxu1 %vm3581_vm0, %v3580_v0 }
  0xf9   :  { %v1340_v27 = vpop.f32.mrb[8].mxu0  ;;  %v1836_v28 = vpop.f32.mrb[8].mxu1 }
  0xfa   :  { %v1341_v29 = vadd.f32 %v3954_v61, %v1340_v27  ;;  %v2956_v30 = vpop.f32.mrb[9].mxu0  ;;  %v1837_v32 = vadd.f32 %v3954_v61, %v1836_v28  ;;  %v3204_v33 = vpop.f32.mrb[9].mxu1  ;;  %v3522_v28 = vld [vmem:[%s5606_s0 + $0x2f8] sm:$0xff]  }
  0xfb   :  { %v1343_v35 = vpop.f32.mrb[10].mxu0  ;;  %v1839_v36 = vpop.f32.mrb[10].mxu1 }
  0xfc   :  { %2311 = vst.msk [vmem:[%s5608_s3 + $0x20] sm:$0xff] %vm2306_vm3, %v1341_v29  ;;  %v1344_v37 = vadd.f32 %v3954_v61, %v1343_v35  ;;  %v2957_v38 = vpop.f32.mrb[11].mxu0  ;;  %2435 = vst.msk [vmem:[%s5608_s3 + $0x400] sm:$0xff] %vm2306_vm3, %v1837_v32  ;;  %v1840_v39 = vadd.f32 %v3954_v61, %v1839_v36  ;;  %v3205_v40 = vpop.f32.mrb[11].mxu1 }
  0xfe   :  { %2312 = vst.msk [vmem:[%s5608_s3 + $0x28] sm:$0xff] %vm2306_vm3, %v1344_v37  ;;  %3063 = vmatmul.mubr.msk.bf16.gmra.mrb[116].mxu0 %vm916_vm2, %v3513_v31  ;;  %2436 = vst.msk [vmem:[%s5608_s3 + $0x408] sm:$0xff] %vm2306_vm3, %v1840_v39  ;;  %3311 = vmatmul.mubr.msk.bf16.gmra.mrb[116].mxu1 %vm916_vm2, %v3514_v34  ;;  %v3523_v39 = vld [vmem:[%s5606_s0 + $0x110] sm:$0xff]  }
  0xff   :  { %3066 = vmatprep.mubr.msk.bf16.mxu0 %vm3581_vm0, %v3580_v0  ;;  %3314 = vmatprep.mubr.msk.bf16.mxu1 %vm3581_vm0, %v3580_v0 }
 0x101   :  { %v1348_v41 = vpop.f32.mrb[12].mxu0  ;;  %v1844_v42 = vpop.f32.mrb[12].mxu1 }
 0x102   :  { %v1349_v43 = vadd.f32 %v3954_v61, %v1348_v41  ;;  %v2960_v44 = vpop.f32.mrb[13].mxu0  ;;  %v1845_v46 = vadd.f32 %v3954_v61, %v1844_v42  ;;  %v3208_v47 = vpop.f32.mrb[13].mxu1  ;;  %v3524_v42 = vld [vmem:[%s5606_s0 + $0x300] sm:$0xff]  }
 0x103   :  { %v1351_v49 = vpop.f32.mrb[14].mxu0  ;;  %v1847_v50 = vpop.f32.mrb[14].mxu1 }
 0x104   :  { %2313 = vst.msk [vmem:[%s5608_s3 + $0x30] sm:$0xff] %vm2306_vm3, %v1349_v43  ;;  %v1352_v51 = vadd.f32 %v3954_v61, %v1351_v49  ;;  %v2961_v52 = vpop.f32.mrb[15].mxu0  ;;  %2437 = vst.msk [vmem:[%s5608_s3 + $0x410] sm:$0xff] %vm2306_vm3, %v1845_v46  ;;  %v1848_v53 = vadd.f32 %v3954_v61, %v1847_v50  ;;  %v3209_v54 = vpop.f32.mrb[15].mxu1 }
 0x106   :  { %2314 = vst.msk [vmem:[%s5608_s3 + $0x38] sm:$0xff] %vm2306_vm3, %v1352_v51  ;;  %3067 = vmatmul.mubr.msk.bf16.gmra.mrb[120].mxu0 %vm916_vm2, %v3515_v45  ;;  %2438 = vst.msk [vmem:[%s5608_s3 + $0x418] sm:$0xff] %vm2306_vm3, %v1848_v53  ;;  %3315 = vmatmul.mubr.msk.bf16.gmra.mrb[120].mxu1 %vm916_vm2, %v3516_v48  ;;  %v3525_v53 = vld [vmem:[%s5606_s0 + $0x118] sm:$0xff]  }
 0x107   :  { %3070 = vmatprep.mubr.msk.bf16.mxu0 %vm3581_vm0, %v3580_v0  ;;  %3318 = vmatprep.mubr.msk.bf16.mxu1 %vm3581_vm0, %v3580_v0 }
 0x109   :  { %v1356_v55 = vpop.f32.mrb[16].mxu0  ;;  %v1852_v56 = vpop.f32.mrb[16].mxu1 }
 0x10a   :  { %v1357_v57 = vadd.f32 %v3954_v61, %v1356_v55  ;;  %v2964_v58 = vpop.f32.mrb[17].mxu0  ;;  %v1853_v60 = vadd.f32 %v3954_v61, %v1852_v56  ;;  %v3212_v62 = vpop.f32.mrb[17].mxu1  ;;  %v3526_v56 = vld [vmem:[%s5606_s0 + $0x308] sm:$0xff]  }
 0x10b   :  { %v1359_v1 = vpop.f32.mrb[18].mxu0  ;;  %v1855_v2 = vpop.f32.mrb[18].mxu1 }
 0x10c   :  { %2315 = vst.msk [vmem:[%s5608_s3 + $0x40] sm:$0xff] %vm2306_vm3, %v1357_v57  ;;  %v1360_v3 = vadd.f32 %v3954_v61, %v1359_v1  ;;  %v2965_v4 = vpop.f32.mrb[19].mxu0  ;;  %2439 = vst.msk [vmem:[%s5608_s3 + $0x420] sm:$0xff] %vm2306_vm3, %v1853_v60  ;;  %v1856_v5 = vadd.f32 %v3954_v61, %v1855_v2  ;;  %v3213_v6 = vpop.f32.mrb[19].mxu1 }
 0x10e   :  { %2316 = vst.msk [vmem:[%s5608_s3 + $0x48] sm:$0xff] %vm2306_vm3, %v1360_v3  ;;  %3071 = vmatmul.mubr.msk.bf16.gmra.mrb[124].mxu0 %vm916_vm2, %v3517_v59  ;;  %2440 = vst.msk [vmem:[%s5608_s3 + $0x428] sm:$0xff] %vm2306_vm3, %v1856_v5  ;;  %3319 = vmatmul.mubr.msk.bf16.gmra.mrb[124].mxu1 %vm916_vm2, %v3518_v63  ;;  %v3527_v5 = vld [vmem:[%s5606_s0 + $0x120] sm:$0xff]  }
 0x10f   :  { %3074 = vmatprep.mubr.msk.bf16.mxu0 %vm3581_vm0, %v3580_v0  ;;  %3322 = vmatprep.mubr.msk.bf16.mxu1 %vm3581_vm0, %v3580_v0 }
 0x111   :  { %v1364_v7 = vpop.f32.mrb[20].mxu0  ;;  %v1860_v8 = vpop.f32.mrb[20].mxu1 }
 0x112   :  { %v1365_v9 = vadd.f32 %v3954_v61, %v1364_v7  ;;  %v2968_v10 = vpop.f32.mrb[21].mxu0  ;;  %v1861_v12 = vadd.f32 %v3954_v61, %v1860_v8  ;;  %v3216_v13 = vpop.f32.mrb[21].mxu1  ;;  %v3528_v8 = vld [vmem:[%s5606_s0 + $0x310] sm:$0xff]  }
 0x113   :  { %v1367_v15 = vpop.f32.mrb[22].mxu0  ;;  %v1863_v16 = vpop.f32.mrb[22].mxu1 }
 0x114   :  { %2317 = vst.msk [vmem:[%s5608_s3 + $0x50] sm:$0xff] %vm2306_vm3, %v1365_v9  ;;  %v1368_v17 = vadd.f32 %v3954_v61, %v1367_v15  ;;  %v2969_v18 = vpop.f32.mrb[23].mxu0  ;;  %2441 = vst.msk [vmem:[%s5608_s3 + $0x430] sm:$0xff] %vm2306_vm3, %v1861_v12  ;;  %v1864_v19 = vadd.f32 %v3954_v61, %v1863_v16  ;;  %v3217_v20 = vpop.f32.mrb[23].mxu1 }
 0x116   :  { %2318 = vst.msk [vmem:[%s5608_s3 + $0x58] sm:$0xff] %vm2306_vm3, %v1368_v17  ;;  %3075 = vmatmul.mubr.msk.bf16.gmra.mrb[128].mxu0 %vm916_vm2, %v3519_v11  ;;  %2442 = vst.msk [vmem:[%s5608_s3 + $0x438] sm:$0xff] %vm2306_vm3, %v1864_v19  ;;  %3323 = vmatmul.mubr.msk.bf16.gmra.mrb[128].mxu1 %vm916_vm2, %v3520_v14  ;;  %v3529_v19 = vld [vmem:[%s5606_s0 + $0x128] sm:$0xff]  }
 0x117   :  { %3078 = vmatprep.mubr.msk.bf16.mxu0 %vm3581_vm0, %v3580_v0  ;;  %3326 = vmatprep.mubr.msk.bf16.mxu1 %vm3581_vm0, %v3580_v0 }
 0x119   :  { %v1372_v21 = vpop.f32.mrb[24].mxu0  ;;  %v1868_v22 = vpop.f32.mrb[24].mxu1 }
 0x11a   :  { %v1373_v23 = vadd.f32 %v3954_v61, %v1372_v21  ;;  %v2972_v24 = vpop.f32.mrb[25].mxu0  ;;  %v1869_v26 = vadd.f32 %v3954_v61, %v1868_v22  ;;  %v3220_v27 = vpop.f32.mrb[25].mxu1  ;;  %v3530_v22 = vld [vmem:[%s5606_s0 + $0x318] sm:$0xff]  }
 0x11b   :  { %v1375_v29 = vpop.f32.mrb[26].mxu0  ;;  %v1871_v30 = vpop.f32.mrb[26].mxu1 }
 0x11c   :  { %2319 = vst.msk [vmem:[%s5608_s3 + $0x60] sm:$0xff] %vm2306_vm3, %v1373_v23  ;;  %v1376_v31 = vadd.f32 %v3954_v61, %v1375_v29  ;;  %v2973_v32 = vpop.f32.mrb[27].mxu0  ;;  %2443 = vst.msk [vmem:[%s5608_s3 + $0x440] sm:$0xff] %vm2306_vm3, %v1869_v26  ;;  %v1872_v33 = vadd.f32 %v3954_v61, %v1871_v30  ;;  %v3221_v34 = vpop.f32.mrb[27].mxu1 }
 0x11e   :  { %2320 = vst.msk [vmem:[%s5608_s3 + $0x68] sm:$0xff] %vm2306_vm3, %v1376_v31  ;;  %3079 = vmatmul.mubr.msk.bf16.gmra.mrb[132].mxu0 %vm916_vm2, %v3521_v25  ;;  %2444 = vst.msk [vmem:[%s5608_s3 + $0x448] sm:$0xff] %vm2306_vm3, %v1872_v33  ;;  %3327 = vmatmul.mubr.msk.bf16.gmra.mrb[132].mxu1 %vm916_vm2, %v3522_v28  ;;  %v3531_v33 = vld [vmem:[%s5606_s0 + $0x130] sm:$0xff]  }
 0x11f   :  { %3082 = vmatprep.mubr.msk.bf16.mxu0 %vm3581_vm0, %v3580_v0  ;;  %3330 = vmatprep.mubr.msk.bf16.mxu1 %vm3581_vm0, %v3580_v0 }
 0x121   :  { %v1380_v35 = vpop.f32.mrb[28].mxu0  ;;  %v1876_v36 = vpop.f32.mrb[28].mxu1 }
 0x122   :  { %v1381_v37 = vadd.f32 %v3954_v61, %v1380_v35  ;;  %v2976_v38 = vpop.f32.mrb[29].mxu0  ;;  %v1877_v40 = vadd.f32 %v3954_v61, %v1876_v36  ;;  %v3224_v41 = vpop.f32.mrb[29].mxu1  ;;  %v3532_v36 = vld [vmem:[%s5606_s0 + $0x320] sm:$0xff]  }
 0x123   :  { %v1383_v43 = vpop.f32.mrb[30].mxu0  ;;  %v1879_v44 = vpop.f32.mrb[30].mxu1 }
 0x124   :  { %2321 = vst.msk [vmem:[%s5608_s3 + $0x70] sm:$0xff] %vm2306_vm3, %v1381_v37  ;;  %v1384_v45 = vadd.f32 %v3954_v61, %v1383_v43  ;;  %v2977_v46 = vpop.f32.mrb[31].mxu0  ;;  %2445 = vst.msk [vmem:[%s5608_s3 + $0x450] sm:$0xff] %vm2306_vm3, %v1877_v40  ;;  %v1880_v47 = vadd.f32 %v3954_v61, %v1879_v44  ;;  %v3225_v48 = vpop.f32.mrb[31].mxu1 }
 0x126   :  { %2322 = vst.msk [vmem:[%s5608_s3 + $0x78] sm:$0xff] %vm2306_vm3, %v1384_v45  ;;  %3083 = vmatmul.mubr.msk.bf16.gmra.mrb[136].mxu0 %vm916_vm2, %v3523_v39  ;;  %2446 = vst.msk [vmem:[%s5608_s3 + $0x458] sm:$0xff] %vm2306_vm3, %v1880_v47  ;;  %3331 = vmatmul.mubr.msk.bf16.gmra.mrb[136].mxu1 %vm916_vm2, %v3524_v42  ;;  %v3533_v47 = vld [vmem:[%s5606_s0 + $0x138] sm:$0xff]  }
 0x127   :  { %3086 = vmatprep.mubr.msk.bf16.mxu0 %vm3581_vm0, %v3580_v0  ;;  %3334 = vmatprep.mubr.msk.bf16.mxu1 %vm3581_vm0, %v3580_v0 }
 0x129   :  { %v1388_v49 = vpop.f32.mrb[32].mxu0  ;;  %v1884_v50 = vpop.f32.mrb[32].mxu1 }
 0x12a   :  { %v1389_v51 = vadd.f32 %v3954_v61, %v1388_v49  ;;  %v2980_v52 = vpop.f32.mrb[33].mxu0  ;;  %v1885_v54 = vadd.f32 %v3954_v61, %v1884_v50  ;;  %v3228_v55 = vpop.f32.mrb[33].mxu1  ;;  %v3534_v50 = vld [vmem:[%s5606_s0 + $0x328] sm:$0xff]  }
 0x12b   :  { %v1391_v57 = vpop.f32.mrb[34].mxu0  ;;  %v1887_v58 = vpop.f32.mrb[34].mxu1 }
 0x12c   :  { %2323 = vst.msk [vmem:[%s5608_s3 + $0x80] sm:$0xff] %vm2306_vm3, %v1389_v51  ;;  %v1392_v59 = vadd.f32 %v3954_v61, %v1391_v57  ;;  %v2981_v60 = vpop.f32.mrb[35].mxu0  ;;  %2447 = vst.msk [vmem:[%s5608_s3 + $0x460] sm:$0xff] %vm2306_vm3, %v1885_v54  ;;  %v1888_v62 = vadd.f32 %v3954_v61, %v1887_v58  ;;  %v3229_v63 = vpop.f32.mrb[35].mxu1 }
 0x12e   :  { %2324 = vst.msk [vmem:[%s5608_s3 + $0x88] sm:$0xff] %vm2306_vm3, %v1392_v59  ;;  %3087 = vmatmul.mubr.msk.bf16.gmra.mrb[140].mxu0 %vm916_vm2, %v3525_v53  ;;  %2448 = vst.msk [vmem:[%s5608_s3 + $0x468] sm:$0xff] %vm2306_vm3, %v1888_v62  ;;  %3335 = vmatmul.mubr.msk.bf16.gmra.mrb[140].mxu1 %vm916_vm2, %v3526_v56  ;;  %v3535_v62 = vld [vmem:[%s5606_s0 + $0x140] sm:$0xff]  }
 0x12f   :  { %3090 = vmatprep.mubr.msk.bf16.mxu0 %vm3581_vm0, %v3580_v0  ;;  %3338 = vmatprep.mubr.msk.bf16.mxu1 %vm3581_vm0, %v3580_v0 }
 0x131   :  { %v1396_v1 = vpop.f32.mrb[36].mxu0  ;;  %v1892_v2 = vpop.f32.mrb[36].mxu1 }
 0x132   :  { %v1397_v3 = vadd.f32 %v3954_v61, %v1396_v1  ;;  %v2984_v4 = vpop.f32.mrb[37].mxu0  ;;  %v1893_v6 = vadd.f32 %v3954_v61, %v1892_v2  ;;  %v3232_v7 = vpop.f32.mrb[37].mxu1  ;;  %v3536_v2 = vld [vmem:[%s5606_s0 + $0x330] sm:$0xff]  }
 0x133   :  { %v1399_v9 = vpop.f32.mrb[38].mxu0  ;;  %v1895_v10 = vpop.f32.mrb[38].mxu1 }
 0x134   :  { %2325 = vst.msk [vmem:[%s5608_s3 + $0x90] sm:$0xff] %vm2306_vm3, %v1397_v3  ;;  %v1400_v11 = vadd.f32 %v3954_v61, %v1399_v9  ;;  %v2985_v12 = vpop.f32.mrb[39].mxu0  ;;  %2449 = vst.msk [vmem:[%s5608_s3 + $0x470] sm:$0xff] %vm2306_vm3, %v1893_v6  ;;  %v1896_v13 = vadd.f32 %v3954_v61, %v1895_v10  ;;  %v3233_v14 = vpop.f32.mrb[39].mxu1 }
 0x136   :  { %2326 = vst.msk [vmem:[%s5608_s3 + $0x98] sm:$0xff] %vm2306_vm3, %v1400_v11  ;;  %3091 = vmatmul.mubr.msk.bf16.gmra.mrb[144].mxu0 %vm916_vm2, %v3527_v5  ;;  %2450 = vst.msk [vmem:[%s5608_s3 + $0x478] sm:$0xff] %vm2306_vm3, %v1896_v13  ;;  %3339 = vmatmul.mubr.msk.bf16.gmra.mrb[144].mxu1 %vm916_vm2, %v3528_v8  ;;  %v3537_v13 = vld [vmem:[%s5606_s0 + $0x148] sm:$0xff]  }
 0x137   :  { %3094 = vmatprep.mubr.msk.bf16.mxu0 %vm3581_vm0, %v3580_v0  ;;  %3342 = vmatprep.mubr.msk.bf16.mxu1 %vm3581_vm0, %v3580_v0 }
 0x139   :  { %v1404_v15 = vpop.f32.mrb[40].mxu0  ;;  %v1900_v16 = vpop.f32.mrb[40].mxu1 }
 0x13a   :  { %v1405_v17 = vadd.f32 %v3954_v61, %v1404_v15  ;;  %v2988_v18 = vpop.f32.mrb[41].mxu0  ;;  %v1901_v20 = vadd.f32 %v3954_v61, %v1900_v16  ;;  %v3236_v21 = vpop.f32.mrb[41].mxu1  ;;  %v3538_v16 = vld [vmem:[%s5606_s0 + $0x338] sm:$0xff]  }
 0x13b   :  { %v1407_v23 = vpop.f32.mrb[42].mxu0  ;;  %v1903_v24 = vpop.f32.mrb[42].mxu1 }
 0x13c   :  { %2327 = vst.msk [vmem:[%s5608_s3 + $0xa0] sm:$0xff] %vm2306_vm3, %v1405_v17  ;;  %v1408_v25 = vadd.f32 %v3954_v61, %v1407_v23  ;;  %v2989_v26 = vpop.f32.mrb[43].mxu0  ;;  %2451 = vst.msk [vmem:[%s5608_s3 + $0x480] sm:$0xff] %vm2306_vm3, %v1901_v20  ;;  %v1904_v27 = vadd.f32 %v3954_v61, %v1903_v24  ;;  %v3237_v28 = vpop.f32.mrb[43].mxu1 }
 0x13e   :  { %2328 = vst.msk [vmem:[%s5608_s3 + $0xa8] sm:$0xff] %vm2306_vm3, %v1408_v25  ;;  %3095 = vmatmul.mubr.msk.bf16.gmra.mrb[148].mxu0 %vm916_vm2, %v3529_v19  ;;  %2452 = vst.msk [vmem:[%s5608_s3 + $0x488] sm:$0xff] %vm2306_vm3, %v1904_v27  ;;  %3343 = vmatmul.mubr.msk.bf16.gmra.mrb[148].mxu1 %vm916_vm2, %v3530_v22  ;;  %v3539_v27 = vld [vmem:[%s5606_s0 + $0x150] sm:$0xff]  }
 0x13f   :  { %3098 = vmatprep.mubr.msk.bf16.mxu0 %vm3581_vm0, %v3580_v0  ;;  %3346 = vmatprep.mubr.msk.bf16.mxu1 %vm3581_vm0, %v3580_v0 }
 0x141   :  { %v1412_v29 = vpop.f32.mrb[44].mxu0  ;;  %v1908_v30 = vpop.f32.mrb[44].mxu1 }
 0x142   :  { %v1413_v31 = vadd.f32 %v3954_v61, %v1412_v29  ;;  %v2992_v32 = vpop.f32.mrb[45].mxu0  ;;  %v1909_v34 = vadd.f32 %v3954_v61, %v1908_v30  ;;  %v3240_v35 = vpop.f32.mrb[45].mxu1  ;;  %v3540_v30 = vld [vmem:[%s5606_s0 + $0x340] sm:$0xff]  }
 0x143   :  { %v1415_v37 = vpop.f32.mrb[46].mxu0  ;;  %v1911_v38 = vpop.f32.mrb[46].mxu1 }
 0x144   :  { %2329 = vst.msk [vmem:[%s5608_s3 + $0xb0] sm:$0xff] %vm2306_vm3, %v1413_v31  ;;  %v1416_v39 = vadd.f32 %v3954_v61, %v1415_v37  ;;  %v2993_v40 = vpop.f32.mrb[47].mxu0  ;;  %2453 = vst.msk [vmem:[%s5608_s3 + $0x490] sm:$0xff] %vm2306_vm3, %v1909_v34  ;;  %v1912_v41 = vadd.f32 %v3954_v61, %v1911_v38  ;;  %v3241_v42 = vpop.f32.mrb[47].mxu1 }
 0x146   :  { %2330 = vst.msk [vmem:[%s5608_s3 + $0xb8] sm:$0xff] %vm2306_vm3, %v1416_v39  ;;  %3099 = vmatmul.mubr.msk.bf16.gmra.mrb[152].mxu0 %vm916_vm2, %v3531_v33  ;;  %2454 = vst.msk [vmem:[%s5608_s3 + $0x498] sm:$0xff] %vm2306_vm3, %v1912_v41  ;;  %3347 = vmatmul.mubr.msk.bf16.gmra.mrb[152].mxu1 %vm916_vm2, %v3532_v36  ;;  %v3541_v41 = vld [vmem:[%s5606_s0 + $0x158] sm:$0xff]  }
 0x147   :  { %3102 = vmatprep.mubr.msk.bf16.mxu0 %vm3581_vm0, %v3580_v0  ;;  %3350 = vmatprep.mubr.msk.bf16.mxu1 %vm3581_vm0, %v3580_v0 }
 0x149   :  { %v1420_v43 = vpop.f32.mrb[48].mxu0  ;;  %v1916_v44 = vpop.f32.mrb[48].mxu1 }
 0x14a   :  { %v1421_v45 = vadd.f32 %v3954_v61, %v1420_v43  ;;  %v2996_v46 = vpop.f32.mrb[49].mxu0  ;;  %v1917_v48 = vadd.f32 %v3954_v61, %v1916_v44  ;;  %v3244_v49 = vpop.f32.mrb[49].mxu1  ;;  %v3542_v44 = vld [vmem:[%s5606_s0 + $0x348] sm:$0xff]  }
 0x14b   :  { %v1423_v51 = vpop.f32.mrb[50].mxu0  ;;  %v1919_v52 = vpop.f32.mrb[50].mxu1 }
 0x14c   :  { %2331 = vst.msk [vmem:[%s5608_s3 + $0xc0] sm:$0xff] %vm2306_vm3, %v1421_v45  ;;  %v1424_v53 = vadd.f32 %v3954_v61, %v1423_v51  ;;  %v2997_v54 = vpop.f32.mrb[51].mxu0  ;;  %2455 = vst.msk [vmem:[%s5608_s3 + $0x4a0] sm:$0xff] %vm2306_vm3, %v1917_v48  ;;  %v1920_v55 = vadd.f32 %v3954_v61, %v1919_v52  ;;  %v3245_v56 = vpop.f32.mrb[51].mxu1 }
 0x14e   :  { %2332 = vst.msk [vmem:[%s5608_s3 + $0xc8] sm:$0xff] %vm2306_vm3, %v1424_v53  ;;  %3103 = vmatmul.mubr.msk.bf16.gmra.mrb[156].mxu0 %vm916_vm2, %v3533_v47  ;;  %2456 = vst.msk [vmem:[%s5608_s3 + $0x4a8] sm:$0xff] %vm2306_vm3, %v1920_v55  ;;  %3351 = vmatmul.mubr.msk.bf16.gmra.mrb[156].mxu1 %vm916_vm2, %v3534_v50  ;;  %v3543_v55 = vld [vmem:[%s5606_s0 + $0x160] sm:$0xff]  }
 0x14f   :  { %3106 = vmatprep.mubr.msk.bf16.mxu0 %vm3581_vm0, %v3580_v0  ;;  %3354 = vmatprep.mubr.msk.bf16.mxu1 %vm3581_vm0, %v3580_v0 }
 0x151   :  { %v1428_v57 = vpop.f32.mrb[52].mxu0  ;;  %v1924_v58 = vpop.f32.mrb[52].mxu1 }
 0x152   :  { %v1429_v59 = vadd.f32 %v3954_v61, %v1428_v57  ;;  %v3000_v60 = vpop.f32.mrb[53].mxu0  ;;  %v1925_v63 = vadd.f32 %v3954_v61, %v1924_v58  ;;  %v3248_v1 = vpop.f32.mrb[53].mxu1  ;;  %v3544_v58 = vld [vmem:[%s5606_s0 + $0x350] sm:$0xff]  }
 0x153   :  { %v1431_v3 = vpop.f32.mrb[54].mxu0  ;;  %v1927_v4 = vpop.f32.mrb[54].mxu1 }
 0x154   :  { %2333 = vst.msk [vmem:[%s5608_s3 + $0xd0] sm:$0xff] %vm2306_vm3, %v1429_v59  ;;  %v1432_v5 = vadd.f32 %v3954_v61, %v1431_v3  ;;  %v3001_v6 = vpop.f32.mrb[55].mxu0  ;;  %2457 = vst.msk [vmem:[%s5608_s3 + $0x4b0] sm:$0xff] %vm2306_vm3, %v1925_v63  ;;  %v1928_v7 = vadd.f32 %v3954_v61, %v1927_v4  ;;  %v3249_v8 = vpop.f32.mrb[55].mxu1 }
 0x156   :  { %2334 = vst.msk [vmem:[%s5608_s3 + $0xd8] sm:$0xff] %vm2306_vm3, %v1432_v5  ;;  %3107 = vmatmul.mubr.msk.bf16.gmra.mrb[160].mxu0 %vm916_vm2, %v3535_v62  ;;  %2458 = vst.msk [vmem:[%s5608_s3 + $0x4b8] sm:$0xff] %vm2306_vm3, %v1928_v7  ;;  %3355 = vmatmul.mubr.msk.bf16.gmra.mrb[160].mxu1 %vm916_vm2, %v3536_v2  ;;  %v3545_v7 = vld [vmem:[%s5606_s0 + $0x168] sm:$0xff]  }
 0x157   :  { %3110 = vmatprep.mubr.msk.bf16.mxu0 %vm3581_vm0, %v3580_v0  ;;  %3358 = vmatprep.mubr.msk.bf16.mxu1 %vm3581_vm0, %v3580_v0 }
 0x159   :  { %v1436_v9 = vpop.f32.mrb[56].mxu0  ;;  %v1932_v10 = vpop.f32.mrb[56].mxu1 }
 0x15a   :  { %v1437_v11 = vadd.f32 %v3954_v61, %v1436_v9  ;;  %v3004_v12 = vpop.f32.mrb[57].mxu0  ;;  %v1933_v14 = vadd.f32 %v3954_v61, %v1932_v10  ;;  %v3252_v15 = vpop.f32.mrb[57].mxu1  ;;  %v3546_v10 = vld [vmem:[%s5606_s0 + $0x358] sm:$0xff]  }
 0x15b   :  { %v1439_v17 = vpop.f32.mrb[58].mxu0  ;;  %v1935_v18 = vpop.f32.mrb[58].mxu1 }
 0x15c   :  { %2335 = vst.msk [vmem:[%s5608_s3 + $0xe0] sm:$0xff] %vm2306_vm3, %v1437_v11  ;;  %v1440_v19 = vadd.f32 %v3954_v61, %v1439_v17  ;;  %v3005_v20 = vpop.f32.mrb[59].mxu0  ;;  %2459 = vst.msk [vmem:[%s5608_s3 + $0x4c0] sm:$0xff] %vm2306_vm3, %v1933_v14  ;;  %v1936_v21 = vadd.f32 %v3954_v61, %v1935_v18  ;;  %v3253_v22 = vpop.f32.mrb[59].mxu1 }
 0x15e   :  { %2336 = vst.msk [vmem:[%s5608_s3 + $0xe8] sm:$0xff] %vm2306_vm3, %v1440_v19  ;;  %3111 = vmatmul.mubr.msk.bf16.gmra.mrb[164].mxu0 %vm916_vm2, %v3537_v13  ;;  %2460 = vst.msk [vmem:[%s5608_s3 + $0x4c8] sm:$0xff] %vm2306_vm3, %v1936_v21  ;;  %3359 = vmatmul.mubr.msk.bf16.gmra.mrb[164].mxu1 %vm916_vm2, %v3538_v16  ;;  %v3547_v21 = vld [vmem:[%s5606_s0 + $0x170] sm:$0xff]  }
 0x15f   :  { %3114 = vmatprep.mubr.msk.bf16.mxu0 %vm3581_vm0, %v3580_v0  ;;  %3362 = vmatprep.mubr.msk.bf16.mxu1 %vm3581_vm0, %v3580_v0 }
 0x161   :  { %v1444_v23 = vpop.f32.mrb[60].mxu0  ;;  %v1940_v24 = vpop.f32.mrb[60].mxu1 }
 0x162   :  { %v1445_v25 = vadd.f32 %v3954_v61, %v1444_v23  ;;  %v3008_v26 = vpop.f32.mrb[61].mxu0  ;;  %v1941_v28 = vadd.f32 %v3954_v61, %v1940_v24  ;;  %v3256_v29 = vpop.f32.mrb[61].mxu1  ;;  %v3548_v24 = vld [vmem:[%s5606_s0 + $0x360] sm:$0xff]  }
 0x163   :  { %v1447_v31 = vpop.f32.mrb[62].mxu0  ;;  %v1943_v32 = vpop.f32.mrb[62].mxu1 }
 0x164   :  { %2337 = vst.msk [vmem:[%s5608_s3 + $0xf0] sm:$0xff] %vm2306_vm3, %v1445_v25  ;;  %v1448_v33 = vadd.f32 %v3954_v61, %v1447_v31  ;;  %v3009_v34 = vpop.f32.mrb[63].mxu0  ;;  %2461 = vst.msk [vmem:[%s5608_s3 + $0x4d0] sm:$0xff] %vm2306_vm3, %v1941_v28  ;;  %v1944_v35 = vadd.f32 %v3954_v61, %v1943_v32  ;;  %v3257_v36 = vpop.f32.mrb[63].mxu1 }
 0x166   :  { %2338 = vst.msk [vmem:[%s5608_s3 + $0xf8] sm:$0xff] %vm2306_vm3, %v1448_v33  ;;  %3115 = vmatmul.mubr.msk.bf16.gmra.mrb[168].mxu0 %vm916_vm2, %v3539_v27  ;;  %2462 = vst.msk [vmem:[%s5608_s3 + $0x4d8] sm:$0xff] %vm2306_vm3, %v1944_v35  ;;  %3363 = vmatmul.mubr.msk.bf16.gmra.mrb[168].mxu1 %vm916_vm2, %v3540_v30  ;;  %v3549_v35 = vld [vmem:[%s5606_s0 + $0x178] sm:$0xff]  }
 0x167   :  { %3118 = vmatprep.mubr.msk.bf16.mxu0 %vm3581_vm0, %v3580_v0  ;;  %3366 = vmatprep.mubr.msk.bf16.mxu1 %vm3581_vm0, %v3580_v0 }
 0x169   :  { %v1452_v37 = vpop.f32.mrb[64].mxu0  ;;  %v1948_v38 = vpop.f32.mrb[64].mxu1 }
 0x16a   :  { %v1453_v39 = vadd.f32 %v3954_v61, %v1452_v37  ;;  %v3012_v40 = vpop.f32.mrb[65].mxu0  ;;  %v1949_v42 = vadd.f32 %v3954_v61, %v1948_v38  ;;  %v3260_v43 = vpop.f32.mrb[65].mxu1  ;;  %v3550_v38 = vld [vmem:[%s5606_s0 + $0x368] sm:$0xff]  }
 0x16b   :  { %v1455_v45 = vpop.f32.mrb[66].mxu0  ;;  %v1951_v46 = vpop.f32.mrb[66].mxu1 }
 0x16c   :  { %2339 = vst.msk [vmem:[%s5608_s3 + $0x100] sm:$0xff] %vm2306_vm3, %v1453_v39  ;;  %v1456_v47 = vadd.f32 %v3954_v61, %v1455_v45  ;;  %v3013_v48 = vpop.f32.mrb[67].mxu0  ;;  %2463 = vst.msk [vmem:[%s5608_s3 + $0x4e0] sm:$0xff] %vm2306_vm3, %v1949_v42  ;;  %v1952_v49 = vadd.f32 %v3954_v61, %v1951_v46  ;;  %v3261_v50 = vpop.f32.mrb[67].mxu1 }
 0x16e   :  { %2340 = vst.msk [vmem:[%s5608_s3 + $0x108] sm:$0xff] %vm2306_vm3, %v1456_v47  ;;  %3119 = vmatmul.mubr.msk.bf16.gmra.mrb[172].mxu0 %vm916_vm2, %v3541_v41  ;;  %2464 = vst.msk [vmem:[%s5608_s3 + $0x4e8] sm:$0xff] %vm2306_vm3, %v1952_v49  ;;  %3367 = vmatmul.mubr.msk.bf16.gmra.mrb[172].mxu1 %vm916_vm2, %v3542_v44  ;;  %v3551_v49 = vld [vmem:[%s5606_s0 + $0x180] sm:$0xff]  }
 0x16f   :  { %3122 = vmatprep.mubr.msk.bf16.mxu0 %vm3581_vm0, %v3580_v0  ;;  %3370 = vmatprep.mubr.msk.bf16.mxu1 %vm3581_vm0, %v3580_v0 }
 0x171   :  { %v1460_v51 = vpop.f32.mrb[68].mxu0  ;;  %v1956_v52 = vpop.f32.mrb[68].mxu1 }
 0x172   :  { %v1461_v53 = vadd.f32 %v3954_v61, %v1460_v51  ;;  %v3016_v54 = vpop.f32.mrb[69].mxu0  ;;  %v1957_v56 = vadd.f32 %v3954_v61, %v1956_v52  ;;  %v3264_v57 = vpop.f32.mrb[69].mxu1  ;;  %v3552_v52 = vld [vmem:[%s5606_s0 + $0x370] sm:$0xff]  }
 0x173   :  { %v1463_v59 = vpop.f32.mrb[70].mxu0  ;;  %v1959_v60 = vpop.f32.mrb[70].mxu1 }
 0x174   :  { %2341 = vst.msk [vmem:[%s5608_s3 + $0x110] sm:$0xff] %vm2306_vm3, %v1461_v53  ;;  %v1464_v62 = vadd.f32 %v3954_v61, %v1463_v59  ;;  %v3017_v63 = vpop.f32.mrb[71].mxu0  ;;  %2465 = vst.msk [vmem:[%s5608_s3 + $0x4f0] sm:$0xff] %vm2306_vm3, %v1957_v56  ;;  %v1960_v1 = vadd.f32 %v3954_v61, %v1959_v60  ;;  %v3265_v2 = vpop.f32.mrb[71].mxu1 }
 0x176   :  { %2342 = vst.msk [vmem:[%s5608_s3 + $0x118] sm:$0xff] %vm2306_vm3, %v1464_v62  ;;  %3123 = vmatmul.mubr.msk.bf16.gmra.mrb[176].mxu0 %vm916_vm2, %v3543_v55  ;;  %2466 = vst.msk [vmem:[%s5608_s3 + $0x4f8] sm:$0xff] %vm2306_vm3, %v1960_v1  ;;  %3371 = vmatmul.mubr.msk.bf16.gmra.mrb[176].mxu1 %vm916_vm2, %v3544_v58  ;;  %v3553_v1 = vld [vmem:[%s5606_s0 + $0x188] sm:$0xff]  }
 0x177   :  { %3126 = vmatprep.mubr.msk.bf16.mxu0 %vm3581_vm0, %v3580_v0  ;;  %3374 = vmatprep.mubr.msk.bf16.mxu1 %vm3581_vm0, %v3580_v0 }
 0x179   :  { %v1468_v3 = vpop.f32.mrb[72].mxu0  ;;  %v1964_v4 = vpop.f32.mrb[72].mxu1 }
 0x17a   :  { %v1469_v5 = vadd.f32 %v3954_v61, %v1468_v3  ;;  %v3020_v6 = vpop.f32.mrb[73].mxu0  ;;  %v1965_v8 = vadd.f32 %v3954_v61, %v1964_v4  ;;  %v3268_v9 = vpop.f32.mrb[73].mxu1  ;;  %v3554_v4 = vld [vmem:[%s5606_s0 + $0x378] sm:$0xff]  }
 0x17b   :  { %v1471_v11 = vpop.f32.mrb[74].mxu0  ;;  %v1967_v12 = vpop.f32.mrb[74].mxu1 }
 0x17c   :  { %2343 = vst.msk [vmem:[%s5608_s3 + $0x120] sm:$0xff] %vm2306_vm3, %v1469_v5  ;;  %v1472_v13 = vadd.f32 %v3954_v61, %v1471_v11  ;;  %v3021_v14 = vpop.f32.mrb[75].mxu0  ;;  %2467 = vst.msk [vmem:[%s5608_s3 + $0x500] sm:$0xff] %vm2306_vm3, %v1965_v8  ;;  %v1968_v15 = vadd.f32 %v3954_v61, %v1967_v12  ;;  %v3269_v16 = vpop.f32.mrb[75].mxu1  ;;  %v4699_v12 = vld [vmem:[%s5607_s2] ss:$0 sm:$0xff] }
 0x17e   :  { %2344 = vst.msk [vmem:[%s5608_s3 + $0x128] sm:$0xff] %vm2306_vm3, %v1472_v13  ;;  %3127 = vmatmul.mubr.msk.bf16.gmra.mrb[180].mxu0 %vm916_vm2, %v3545_v7  ;;  %2468 = vst.msk [vmem:[%s5608_s3 + $0x508] sm:$0xff] %vm2306_vm3, %v1968_v15  ;;  %3375 = vmatmul.mubr.msk.bf16.gmra.mrb[180].mxu1 %vm916_vm2, %v3546_v10  ;;  %v3555_v15 = vld [vmem:[%s5606_s0 + $0x190] sm:$0xff]  }
 0x17f   :  { %3130 = vmatprep.mubr.msk.bf16.mxu0 %vm3581_vm0, %v3580_v0  ;;  %3378 = vmatprep.mubr.msk.bf16.mxu1 %vm3581_vm0, %v3580_v0 }
 0x181   :  { %v1476_v17 = vpop.f32.mrb[76].mxu0  ;;  %v1972_v18 = vpop.f32.mrb[76].mxu1 }
 0x182   :  { %v1477_v19 = vadd.f32 %v3954_v61, %v1476_v17  ;;  %v3024_v20 = vpop.f32.mrb[77].mxu0  ;;  %v1973_v22 = vadd.f32 %v3954_v61, %v1972_v18  ;;  %v3272_v23 = vpop.f32.mrb[77].mxu1  ;;  %v3556_v18 = vld [vmem:[%s5606_s0 + $0x380] sm:$0xff]  }
 0x183   :  { %v1479_v25 = vpop.f32.mrb[78].mxu0  ;;  %v1975_v26 = vpop.f32.mrb[78].mxu1 }
 0x184   :  { %2345 = vst.msk [vmem:[%s5608_s3 + $0x130] sm:$0xff] %vm2306_vm3, %v1477_v19  ;;  %v1480_v27 = vadd.f32 %v3954_v61, %v1479_v25  ;;  %v3025_v28 = vpop.f32.mrb[79].mxu0  ;;  %2469 = vst.msk [vmem:[%s5608_s3 + $0x510] sm:$0xff] %vm2306_vm3, %v1973_v22  ;;  %v1976_v29 = vadd.f32 %v3954_v61, %v1975_v26  ;;  %v3273_v30 = vpop.f32.mrb[79].mxu1 }
 0x186   :  { %2346 = vst.msk [vmem:[%s5608_s3 + $0x138] sm:$0xff] %vm2306_vm3, %v1480_v27  ;;  %3131 = vmatmul.mubr.msk.bf16.gmra.mrb[184].mxu0 %vm916_vm2, %v3547_v21  ;;  %2470 = vst.msk [vmem:[%s5608_s3 + $0x518] sm:$0xff] %vm2306_vm3, %v1976_v29  ;;  %3379 = vmatmul.mubr.msk.bf16.gmra.mrb[184].mxu1 %vm916_vm2, %v3548_v24  ;;  %v3557_v29 = vld [vmem:[%s5606_s0 + $0x198] sm:$0xff]  }
 0x187   :  { %3134 = vmatprep.mubr.msk.bf16.mxu0 %vm3581_vm0, %v3580_v0  ;;  %3382 = vmatprep.mubr.msk.bf16.mxu1 %vm3581_vm0, %v3580_v0 }
 0x189   :  { %v1484_v31 = vpop.f32.mrb[80].mxu0  ;;  %v1980_v32 = vpop.f32.mrb[80].mxu1 }
 0x18a   :  { %v1485_v33 = vadd.f32 %v3954_v61, %v1484_v31  ;;  %v3028_v34 = vpop.f32.mrb[81].mxu0  ;;  %v1981_v36 = vadd.f32 %v3954_v61, %v1980_v32  ;;  %v3276_v37 = vpop.f32.mrb[81].mxu1  ;;  %v3558_v32 = vld [vmem:[%s5606_s0 + $0x388] sm:$0xff]  }
 0x18b   :  { %v1487_v39 = vpop.f32.mrb[82].mxu0  ;;  %v1983_v40 = vpop.f32.mrb[82].mxu1 }
 0x18c   :  { %2347 = vst.msk [vmem:[%s5608_s3 + $0x140] sm:$0xff] %vm2306_vm3, %v1485_v33  ;;  %v1488_v41 = vadd.f32 %v3954_v61, %v1487_v39  ;;  %v3029_v42 = vpop.f32.mrb[83].mxu0  ;;  %2471 = vst.msk [vmem:[%s5608_s3 + $0x520] sm:$0xff] %vm2306_vm3, %v1981_v36  ;;  %v1984_v43 = vadd.f32 %v3954_v61, %v1983_v40  ;;  %v3277_v44 = vpop.f32.mrb[83].mxu1 }
 0x18e   :  { %2348 = vst.msk [vmem:[%s5608_s3 + $0x148] sm:$0xff] %vm2306_vm3, %v1488_v41  ;;  %3135 = vmatmul.mubr.msk.bf16.gmra.mrb[188].mxu0 %vm916_vm2, %v3549_v35  ;;  %2472 = vst.msk [vmem:[%s5608_s3 + $0x528] sm:$0xff] %vm2306_vm3, %v1984_v43  ;;  %3383 = vmatmul.mubr.msk.bf16.gmra.mrb[188].mxu1 %vm916_vm2, %v3550_v38  ;;  %v3559_v43 = vld [vmem:[%s5606_s0 + $0x1a0] sm:$0xff]  }
 0x18f   :  { %3138 = vmatprep.mubr.msk.bf16.mxu0 %vm3581_vm0, %v3580_v0  ;;  %3386 = vmatprep.mubr.msk.bf16.mxu1 %vm3581_vm0, %v3580_v0 }
 0x191   :  { %v1492_v45 = vpop.f32.mrb[84].mxu0  ;;  %v1988_v46 = vpop.f32.mrb[84].mxu1 }
 0x192   :  { %v1493_v47 = vadd.f32 %v3954_v61, %v1492_v45  ;;  %v3032_v48 = vpop.f32.mrb[85].mxu0  ;;  %v1989_v50 = vadd.f32 %v3954_v61, %v1988_v46  ;;  %v3280_v51 = vpop.f32.mrb[85].mxu1  ;;  %v3560_v46 = vld [vmem:[%s5606_s0 + $0x390] sm:$0xff]  }
 0x193   :  { %v1495_v53 = vpop.f32.mrb[86].mxu0  ;;  %v1991_v54 = vpop.f32.mrb[86].mxu1 }
 0x194   :  { %2349 = vst.msk [vmem:[%s5608_s3 + $0x150] sm:$0xff] %vm2306_vm3, %v1493_v47  ;;  %v1496_v55 = vadd.f32 %v3954_v61, %v1495_v53  ;;  %v3033_v56 = vpop.f32.mrb[87].mxu0  ;;  %2473 = vst.msk [vmem:[%s5608_s3 + $0x530] sm:$0xff] %vm2306_vm3, %v1989_v50  ;;  %v1992_v57 = vadd.f32 %v3954_v61, %v1991_v54  ;;  %v3281_v58 = vpop.f32.mrb[87].mxu1 }
 0x196   :  { %2350 = vst.msk [vmem:[%s5608_s3 + $0x158] sm:$0xff] %vm2306_vm3, %v1496_v55  ;;  %3139 = vmatmul.mubr.msk.bf16.gmra.mrb[192].mxu0 %vm916_vm2, %v3551_v49  ;;  %2474 = vst.msk [vmem:[%s5608_s3 + $0x538] sm:$0xff] %vm2306_vm3, %v1992_v57  ;;  %3387 = vmatmul.mubr.msk.bf16.gmra.mrb[192].mxu1 %vm916_vm2, %v3552_v52  ;;  %v3561_v57 = vld [vmem:[%s5606_s0 + $0x1a8] sm:$0xff]  }
 0x197   :  { %3142 = vmatprep.mubr.msk.bf16.mxu0 %vm3581_vm0, %v3580_v0  ;;  %3390 = vmatprep.mubr.msk.bf16.mxu1 %vm3581_vm0, %v3580_v0 }
 0x199   :  { %v1500_v59 = vpop.f32.mrb[88].mxu0  ;;  %v1996_v60 = vpop.f32.mrb[88].mxu1 }
 0x19a   :  { %v1501_v62 = vadd.f32 %v3954_v61, %v1500_v59  ;;  %v3036_v63 = vpop.f32.mrb[89].mxu0  ;;  %v1997_v2 = vadd.f32 %v3954_v61, %v1996_v60  ;;  %v3284_v3 = vpop.f32.mrb[89].mxu1  ;;  %v3562_v60 = vld [vmem:[%s5606_s0 + $0x398] sm:$0xff]  }
 0x19b   :  { %v1503_v5 = vpop.f32.mrb[90].mxu0  ;;  %v1999_v6 = vpop.f32.mrb[90].mxu1 }
 0x19c   :  { %2351 = vst.msk [vmem:[%s5608_s3 + $0x160] sm:$0xff] %vm2306_vm3, %v1501_v62  ;;  %v1504_v7 = vadd.f32 %v3954_v61, %v1503_v5  ;;  %v3037_v8 = vpop.f32.mrb[91].mxu0  ;;  %2475 = vst.msk [vmem:[%s5608_s3 + $0x540] sm:$0xff] %vm2306_vm3, %v1997_v2  ;;  %v2000_v9 = vadd.f32 %v3954_v61, %v1999_v6  ;;  %v3285_v10 = vpop.f32.mrb[91].mxu1 }
 0x19e   :  { %2352 = vst.msk [vmem:[%s5608_s3 + $0x168] sm:$0xff] %vm2306_vm3, %v1504_v7  ;;  %3143 = vmatmul.mubr.msk.bf16.gmra.mrb[196].mxu0 %vm916_vm2, %v3553_v1  ;;  %2476 = vst.msk [vmem:[%s5608_s3 + $0x548] sm:$0xff] %vm2306_vm3, %v2000_v9  ;;  %3391 = vmatmul.mubr.msk.bf16.gmra.mrb[196].mxu1 %vm916_vm2, %v3554_v4  ;;  %v3563_v9 = vld [vmem:[%s5606_s0 + $0x1b0] sm:$0xff]  }
 0x19f   :  { %3146 = vmatprep.mubr.msk.bf16.mxu0 %vm3581_vm0, %v3580_v0  ;;  %3394 = vmatprep.mubr.msk.bf16.mxu1 %vm3581_vm0, %v3580_v0 }
 0x1a1   :  { %v1508_v61 = vpop.f32.mrb[92].mxu0  ;;  %v2004_v11 = vpop.f32.mrb[92].mxu1 }
 0x1a2   :  { %v1509_v13 = vadd.f32 %v4699_v12, %v1508_v61  ;;  %v3040_v14 = vpop.f32.mrb[93].mxu0  ;;  %v2005_v16 = vadd.f32 %v4699_v12, %v2004_v11  ;;  %v3288_v17 = vpop.f32.mrb[93].mxu1  ;;  %v3564_v11 = vld [vmem:[%s5606_s0 + $0x3a0] sm:$0xff]  }
 0x1a3   :  { %v1511_v19 = vpop.f32.mrb[94].mxu0  ;;  %v2007_v20 = vpop.f32.mrb[94].mxu1 }
 0x1a4   :  { %2353 = vst.msk [vmem:[%s5608_s3 + $0x170] sm:$0xff] %vm2306_vm3, %v1509_v13  ;;  %v1512_v21 = vadd.f32 %v4699_v12, %v1511_v19  ;;  %v3041_v22 = vpop.f32.mrb[95].mxu0  ;;  %2477 = vst.msk [vmem:[%s5608_s3 + $0x550] sm:$0xff] %vm2306_vm3, %v2005_v16  ;;  %v2008_v23 = vadd.f32 %v4699_v12, %v2007_v20  ;;  %v3289_v24 = vpop.f32.mrb[95].mxu1 }
 0x1a6   :  { %2354 = vst.msk [vmem:[%s5608_s3 + $0x178] sm:$0xff] %vm2306_vm3, %v1512_v21  ;;  %3147 = vmatmul.mubr.msk.bf16.gmra.mrb[200].mxu0 %vm916_vm2, %v3555_v15  ;;  %2478 = vst.msk [vmem:[%s5608_s3 + $0x558] sm:$0xff] %vm2306_vm3, %v2008_v23  ;;  %3395 = vmatmul.mubr.msk.bf16.gmra.mrb[200].mxu1 %vm916_vm2, %v3556_v18  ;;  %v3565_v23 = vld [vmem:[%s5606_s0 + $0x1b8] sm:$0xff]  }
 0x1a7   :  { %3150 = vmatprep.mubr.msk.bf16.mxu0 %vm3581_vm0, %v3580_v0  ;;  %3398 = vmatprep.mubr.msk.bf16.mxu1 %vm3581_vm0, %v3580_v0 }
 0x1a9   :  { %v1516_v25 = vpop.f32.mrb[96].mxu0  ;;  %v2012_v26 = vpop.f32.mrb[96].mxu1 }
 0x1aa   :  { %v1517_v27 = vadd.f32 %v4699_v12, %v1516_v25  ;;  %v3044_v28 = vpop.f32.mrb[97].mxu0  ;;  %v2013_v30 = vadd.f32 %v4699_v12, %v2012_v26  ;;  %v3292_v31 = vpop.f32.mrb[97].mxu1  ;;  %v3566_v26 = vld [vmem:[%s5606_s0 + $0x3a8] sm:$0xff]  }
 0x1ab   :  { %v1519_v33 = vpop.f32.mrb[98].mxu0  ;;  %v2015_v34 = vpop.f32.mrb[98].mxu1 }
 0x1ac   :  { %2355 = vst.msk [vmem:[%s5608_s3 + $0x180] sm:$0xff] %vm2306_vm3, %v1517_v27  ;;  %v1520_v35 = vadd.f32 %v4699_v12, %v1519_v33  ;;  %v3045_v36 = vpop.f32.mrb[99].mxu0  ;;  %2479 = vst.msk [vmem:[%s5608_s3 + $0x560] sm:$0xff] %vm2306_vm3, %v2013_v30  ;;  %v2016_v37 = vadd.f32 %v4699_v12, %v2015_v34  ;;  %v3293_v38 = vpop.f32.mrb[99].mxu1 }
 0x1ae   :  { %2356 = vst.msk [vmem:[%s5608_s3 + $0x188] sm:$0xff] %vm2306_vm3, %v1520_v35  ;;  %3151 = vmatmul.mubr.msk.bf16.gmra.mrb[204].mxu0 %vm916_vm2, %v3557_v29  ;;  %2480 = vst.msk [vmem:[%s5608_s3 + $0x568] sm:$0xff] %vm2306_vm3, %v2016_v37  ;;  %3399 = vmatmul.mubr.msk.bf16.gmra.mrb[204].mxu1 %vm916_vm2, %v3558_v32  ;;  %v3567_v37 = vld [vmem:[%s5606_s0 + $0x1c0] sm:$0xff]  }
 0x1af   :  { %3154 = vmatprep.mubr.msk.bf16.mxu0 %vm3581_vm0, %v3580_v0  ;;  %3402 = vmatprep.mubr.msk.bf16.mxu1 %vm3581_vm0, %v3580_v0 }
 0x1b1   :  { %v1524_v39 = vpop.f32.mrb[100].mxu0  ;;  %v2020_v40 = vpop.f32.mrb[100].mxu1 }
 0x1b2   :  { %v1525_v41 = vadd.f32 %v4699_v12, %v1524_v39  ;;  %v3048_v42 = vpop.f32.mrb[101].mxu0  ;;  %v2021_v44 = vadd.f32 %v4699_v12, %v2020_v40  ;;  %v3296_v45 = vpop.f32.mrb[101].mxu1  ;;  %v3568_v40 = vld [vmem:[%s5606_s0 + $0x3b0] sm:$0xff]  }
 0x1b3   :  { %v1527_v47 = vpop.f32.mrb[102].mxu0  ;;  %v2023_v48 = vpop.f32.mrb[102].mxu1 }
 0x1b4   :  { %2357 = vst.msk [vmem:[%s5608_s3 + $0x190] sm:$0xff] %vm2306_vm3, %v1525_v41  ;;  %v1528_v49 = vadd.f32 %v4699_v12, %v1527_v47  ;;  %v3049_v50 = vpop.f32.mrb[103].mxu0  ;;  %2481 = vst.msk [vmem:[%s5608_s3 + $0x570] sm:$0xff] %vm2306_vm3, %v2021_v44  ;;  %v2024_v51 = vadd.f32 %v4699_v12, %v2023_v48  ;;  %v3297_v52 = vpop.f32.mrb[103].mxu1 }
 0x1b6   :  { %2358 = vst.msk [vmem:[%s5608_s3 + $0x198] sm:$0xff] %vm2306_vm3, %v1528_v49  ;;  %3155 = vmatmul.mubr.msk.bf16.gmra.mrb[208].mxu0 %vm916_vm2, %v3559_v43  ;;  %2482 = vst.msk [vmem:[%s5608_s3 + $0x578] sm:$0xff] %vm2306_vm3, %v2024_v51  ;;  %3403 = vmatmul.mubr.msk.bf16.gmra.mrb[208].mxu1 %vm916_vm2, %v3560_v46  ;;  %v3569_v51 = vld [vmem:[%s5606_s0 + $0x1c8] sm:$0xff]  }
 0x1b7   :  { %3158 = vmatprep.mubr.msk.bf16.mxu0 %vm3581_vm0, %v3580_v0  ;;  %3406 = vmatprep.mubr.msk.bf16.mxu1 %vm3581_vm0, %v3580_v0 }
 0x1b9   :  { %v1532_v53 = vpop.f32.mrb[104].mxu0  ;;  %v2028_v54 = vpop.f32.mrb[104].mxu1 }
 0x1ba   :  { %v1533_v55 = vadd.f32 %v4699_v12, %v1532_v53  ;;  %v3052_v56 = vpop.f32.mrb[105].mxu0  ;;  %v2029_v58 = vadd.f32 %v4699_v12, %v2028_v54  ;;  %v3300_v59 = vpop.f32.mrb[105].mxu1  ;;  %v3570_v54 = vld [vmem:[%s5606_s0 + $0x3b8] sm:$0xff]  }
 0x1bb   :  { %v1535_v62 = vpop.f32.mrb[106].mxu0  ;;  %v2031_v63 = vpop.f32.mrb[106].mxu1 }
 0x1bc   :  { %2359 = vst.msk [vmem:[%s5608_s3 + $0x1a0] sm:$0xff] %vm2306_vm3, %v1533_v55  ;;  %v1536_v1 = vadd.f32 %v4699_v12, %v1535_v62  ;;  %v3053_v2 = vpop.f32.mrb[107].mxu0  ;;  %2483 = vst.msk [vmem:[%s5608_s3 + $0x580] sm:$0xff] %vm2306_vm3, %v2029_v58  ;;  %v2032_v3 = vadd.f32 %v4699_v12, %v2031_v63  ;;  %v3301_v4 = vpop.f32.mrb[107].mxu1 }
 0x1be   :  { %2360 = vst.msk [vmem:[%s5608_s3 + $0x1a8] sm:$0xff] %vm2306_vm3, %v1536_v1  ;;  %3159 = vmatmul.mubr.msk.bf16.gmra.mrb[212].mxu0 %vm916_vm2, %v3561_v57  ;;  %2484 = vst.msk [vmem:[%s5608_s3 + $0x588] sm:$0xff] %vm2306_vm3, %v2032_v3  ;;  %3407 = vmatmul.mubr.msk.bf16.gmra.mrb[212].mxu1 %vm916_vm2, %v3562_v60  ;;  %v3571_v3 = vld [vmem:[%s5606_s0 + $0x1d0] sm:$0xff]  }
 0x1bf   :  { %3162 = vmatprep.mubr.msk.bf16.mxu0 %vm3581_vm0, %v3580_v0  ;;  %3410 = vmatprep.mubr.msk.bf16.mxu1 %vm3581_vm0, %v3580_v0 }
 0x1c1   :  { %v1540_v5 = vpop.f32.mrb[108].mxu0  ;;  %v2036_v6 = vpop.f32.mrb[108].mxu1 }
 0x1c2   :  { %v1541_v7 = vadd.f32 %v4699_v12, %v1540_v5  ;;  %v3056_v8 = vpop.f32.mrb[109].mxu0  ;;  %v2037_v10 = vadd.f32 %v4699_v12, %v2036_v6  ;;  %v3304_v61 = vpop.f32.mrb[109].mxu1  ;;  %v3572_v6 = vld [vmem:[%s5606_s0 + $0x3c0] sm:$0xff]  }
 0x1c3   :  { %v1543_v13 = vpop.f32.mrb[110].mxu0  ;;  %v2039_v14 = vpop.f32.mrb[110].mxu1 }
 0x1c4   :  { %2361 = vst.msk [vmem:[%s5608_s3 + $0x1b0] sm:$0xff] %vm2306_vm3, %v1541_v7  ;;  %v1544_v15 = vadd.f32 %v4699_v12, %v1543_v13  ;;  %v3057_v16 = vpop.f32.mrb[111].mxu0  ;;  %2485 = vst.msk [vmem:[%s5608_s3 + $0x590] sm:$0xff] %vm2306_vm3, %v2037_v10  ;;  %v2040_v17 = vadd.f32 %v4699_v12, %v2039_v14  ;;  %v3305_v18 = vpop.f32.mrb[111].mxu1 }
 0x1c6   :  { %2362 = vst.msk [vmem:[%s5608_s3 + $0x1b8] sm:$0xff] %vm2306_vm3, %v1544_v15  ;;  %3163 = vmatmul.mubr.msk.bf16.gmra.mrb[216].mxu0 %vm916_vm2, %v3563_v9  ;;  %2486 = vst.msk [vmem:[%s5608_s3 + $0x598] sm:$0xff] %vm2306_vm3, %v2040_v17  ;;  %3411 = vmatmul.mubr.msk.bf16.gmra.mrb[216].mxu1 %vm916_vm2, %v3564_v11  ;;  %v3573_v17 = vld [vmem:[%s5606_s0 + $0x1d8] sm:$0xff]  }
 0x1c7   :  { %3166 = vmatprep.mubr.msk.bf16.mxu0 %vm3581_vm0, %v3580_v0  ;;  %3414 = vmatprep.mubr.msk.bf16.mxu1 %vm3581_vm0, %v3580_v0 }
 0x1c9   :  { %v1548_v19 = vpop.f32.mrb[112].mxu0  ;;  %v2044_v20 = vpop.f32.mrb[112].mxu1 }
 0x1ca   :  { %v1549_v21 = vadd.f32 %v4699_v12, %v1548_v19  ;;  %v3060_v22 = vpop.f32.mrb[113].mxu0  ;;  %v2045_v24 = vadd.f32 %v4699_v12, %v2044_v20  ;;  %v3308_v25 = vpop.f32.mrb[113].mxu1  ;;  %v3574_v20 = vld [vmem:[%s5606_s0 + $0x3c8] sm:$0xff]  }
 0x1cb   :  { %v1551_v27 = vpop.f32.mrb[114].mxu0  ;;  %v2047_v28 = vpop.f32.mrb[114].mxu1 }
 0x1cc   :  { %2363 = vst.msk [vmem:[%s5608_s3 + $0x1c0] sm:$0xff] %vm2306_vm3, %v1549_v21  ;;  %v1552_v29 = vadd.f32 %v4699_v12, %v1551_v27  ;;  %v3061_v30 = vpop.f32.mrb[115].mxu0  ;;  %2487 = vst.msk [vmem:[%s5608_s3 + $0x5a0] sm:$0xff] %vm2306_vm3, %v2045_v24  ;;  %v2048_v31 = vadd.f32 %v4699_v12, %v2047_v28  ;;  %v3309_v32 = vpop.f32.mrb[115].mxu1 }
 0x1ce   :  { %2364 = vst.msk [vmem:[%s5608_s3 + $0x1c8] sm:$0xff] %vm2306_vm3, %v1552_v29  ;;  %3167 = vmatmul.mubr.msk.bf16.gmra.mrb[220].mxu0 %vm916_vm2, %v3565_v23  ;;  %2488 = vst.msk [vmem:[%s5608_s3 + $0x5a8] sm:$0xff] %vm2306_vm3, %v2048_v31  ;;  %3415 = vmatmul.mubr.msk.bf16.gmra.mrb[220].mxu1 %vm916_vm2, %v3566_v26  ;;  %v3575_v31 = vld [vmem:[%s5606_s0 + $0x1e0] sm:$0xff]  }
 0x1cf   :  { %3170 = vmatprep.mubr.msk.bf16.mxu0 %vm3581_vm0, %v3580_v0  ;;  %3418 = vmatprep.mubr.msk.bf16.mxu1 %vm3581_vm0, %v3580_v0 }
 0x1d1   :  { %v1556_v33 = vpop.f32.mrb[116].mxu0  ;;  %v2052_v34 = vpop.f32.mrb[116].mxu1 }
 0x1d2   :  { %v1557_v35 = vadd.f32 %v4699_v12, %v1556_v33  ;;  %v3064_v36 = vpop.f32.mrb[117].mxu0  ;;  %v2053_v38 = vadd.f32 %v4699_v12, %v2052_v34  ;;  %v3312_v39 = vpop.f32.mrb[117].mxu1  ;;  %v3576_v34 = vld [vmem:[%s5606_s0 + $0x3d0] ss:$0 sps:$4 sm:$0xff]  }
 0x1d3   :  { %v1559_v41 = vpop.f32.mrb[118].mxu0  ;;  %v2055_v42 = vpop.f32.mrb[118].mxu1 }
 0x1d4   :  { %2365 = vst.msk [vmem:[%s5608_s3 + $0x1d0] sm:$0xff] %vm2306_vm3, %v1557_v35  ;;  %v1560_v43 = vadd.f32 %v4699_v12, %v1559_v41  ;;  %v3065_v44 = vpop.f32.mrb[119].mxu0  ;;  %2489 = vst.msk [vmem:[%s5608_s3 + $0x5b0] sm:$0xff] %vm2306_vm3, %v2053_v38  ;;  %v2056_v45 = vadd.f32 %v4699_v12, %v2055_v42  ;;  %v3313_v46 = vpop.f32.mrb[119].mxu1 }
 0x1d6   :  { %2366 = vst.msk [vmem:[%s5608_s3 + $0x1d8] sm:$0xff] %vm2306_vm3, %v1560_v43  ;;  %3171 = vmatmul.mubr.msk.bf16.gmra.mrb[224].mxu0 %vm916_vm2, %v3567_v37  ;;  %2490 = vst.msk [vmem:[%s5608_s3 + $0x5b8] sm:$0xff] %vm2306_vm3, %v2056_v45  ;;  %3419 = vmatmul.mubr.msk.bf16.gmra.mrb[224].mxu1 %vm916_vm2, %v3568_v40  ;;  %v3577_v45 = vld [vmem:[%s5606_s0 + $0x1e8] sm:$0xff]  }
 0x1d7   :  { %3174 = vmatprep.mubr.msk.bf16.mxu0 %vm3581_vm0, %v3580_v0  ;;  %3422 = vmatprep.mubr.msk.bf16.mxu1 %vm3581_vm0, %v3580_v0 }
 0x1d9   :  { %v1564_v47 = vpop.f32.mrb[120].mxu0  ;;  %v2060_v48 = vpop.f32.mrb[120].mxu1 }
 0x1da   :  { %v1565_v49 = vadd.f32 %v4699_v12, %v1564_v47  ;;  %v3068_v50 = vpop.f32.mrb[121].mxu0  ;;  %v2061_v52 = vadd.f32 %v4699_v12, %v2060_v48  ;;  %v3316_v53 = vpop.f32.mrb[121].mxu1 }
 0x1db   :  { %v1567_v55 = vpop.f32.mrb[122].mxu0  ;;  %v2063_v56 = vpop.f32.mrb[122].mxu1 }
 0x1dc   :  { %2367 = vst.msk [vmem:[%s5608_s3 + $0x1e0] sm:$0xff] %vm2306_vm3, %v1565_v49  ;;  %v1568_v57 = vadd.f32 %v4699_v12, %v1567_v55  ;;  %v3069_v58 = vpop.f32.mrb[123].mxu0  ;;  %2491 = vst.msk [vmem:[%s5608_s3 + $0x5c0] sm:$0xff] %vm2306_vm3, %v2061_v52  ;;  %v2064_v59 = vadd.f32 %v4699_v12, %v2063_v56  ;;  %v3317_v60 = vpop.f32.mrb[123].mxu1 }
 0x1de   :  { %2368 = vst.msk [vmem:[%s5608_s3 + $0x1e8] sm:$0xff] %vm2306_vm3, %v1568_v57  ;;  %3175 = vmatmul.mubr.msk.bf16.gmra.mrb[228].mxu0 %vm916_vm2, %v3569_v51  ;;  %2492 = vst.msk [vmem:[%s5608_s3 + $0x5c8] sm:$0xff] %vm2306_vm3, %v2064_v59  ;;  %3423 = vmatmul.mubr.msk.bf16.gmra.mrb[228].mxu1 %vm916_vm2, %v3570_v54 }
 0x1df   :  { %3178 = vmatprep.mubr.msk.bf16.mxu0 %vm3581_vm0, %v3580_v0  ;;  %3426 = vmatprep.mubr.msk.bf16.mxu1 %vm3581_vm0, %v3580_v0 }
 0x1e1   :  { %v1572_v62 = vpop.f32.mrb[124].mxu0  ;;  %v2068_v63 = vpop.f32.mrb[124].mxu1 }
 0x1e2   :  { %v1573_v1 = vadd.f32 %v4699_v12, %v1572_v62  ;;  %v3072_v2 = vpop.f32.mrb[125].mxu0  ;;  %v2069_v4 = vadd.f32 %v4699_v12, %v2068_v63  ;;  %v3320_v5 = vpop.f32.mrb[125].mxu1 }
 0x1e3   :  { %v1575_v7 = vpop.f32.mrb[126].mxu0  ;;  %v2071_v8 = vpop.f32.mrb[126].mxu1 }
 0x1e4   :  { %2369 = vst.msk [vmem:[%s5608_s3 + $0x1f0] sm:$0xff] %vm2306_vm3, %v1573_v1  ;;  %v1576_v9 = vadd.f32 %v4699_v12, %v1575_v7  ;;  %v3073_v10 = vpop.f32.mrb[127].mxu0  ;;  %2493 = vst.msk [vmem:[%s5608_s3 + $0x5d0] sm:$0xff] %vm2306_vm3, %v2069_v4  ;;  %v2072_v61 = vadd.f32 %v4699_v12, %v2071_v8  ;;  %v3321_v11 = vpop.f32.mrb[127].mxu1 }
 0x1e6   :  { %2370 = vst.msk [vmem:[%s5608_s3 + $0x1f8] sm:$0xff] %vm2306_vm3, %v1576_v9  ;;  %3179 = vmatmul.mubr.msk.bf16.gmra.mrb[232].mxu0 %vm916_vm2, %v3571_v3  ;;  %2494 = vst.msk [vmem:[%s5608_s3 + $0x5d8] sm:$0xff] %vm2306_vm3, %v2072_v61  ;;  %3427 = vmatmul.mubr.msk.bf16.gmra.mrb[232].mxu1 %vm916_vm2, %v3572_v6 }
 0x1e7   :  { %3182 = vmatprep.mubr.msk.bf16.mxu0 %vm3581_vm0, %v3580_v0  ;;  %3430 = vmatprep.mubr.msk.bf16.mxu1 %vm3581_vm0, %v3580_v0 }
 0x1e9   :  { %v1580_v13 = vpop.f32.mrb[128].mxu0  ;;  %v2076_v14 = vpop.f32.mrb[128].mxu1 }
 0x1ea   :  { %v1581_v15 = vadd.f32 %v4699_v12, %v1580_v13  ;;  %v3076_v16 = vpop.f32.mrb[129].mxu0  ;;  %v2077_v18 = vadd.f32 %v4699_v12, %v2076_v14  ;;  %v3324_v19 = vpop.f32.mrb[129].mxu1 }
 0x1eb   :  { %v1583_v21 = vpop.f32.mrb[130].mxu0  ;;  %v2079_v22 = vpop.f32.mrb[130].mxu1 }
 0x1ec   :  { %2371 = vst.msk [vmem:[%s5608_s3 + $0x200] sm:$0xff] %vm2306_vm3, %v1581_v15  ;;  %v1584_v23 = vadd.f32 %v4699_v12, %v1583_v21  ;;  %v3077_v24 = vpop.f32.mrb[131].mxu0  ;;  %2495 = vst.msk [vmem:[%s5608_s3 + $0x5e0] sm:$0xff] %vm2306_vm3, %v2077_v18  ;;  %v2080_v25 = vadd.f32 %v4699_v12, %v2079_v22  ;;  %v3325_v26 = vpop.f32.mrb[131].mxu1 }
 0x1ee   :  { %2372 = vst.msk [vmem:[%s5608_s3 + $0x208] sm:$0xff] %vm2306_vm3, %v1584_v23  ;;  %3183 = vmatmul.mubr.msk.bf16.gmra.mrb[236].mxu0 %vm916_vm2, %v3573_v17  ;;  %2496 = vst.msk [vmem:[%s5608_s3 + $0x5e8] sm:$0xff] %vm2306_vm3, %v2080_v25  ;;  %3431 = vmatmul.mubr.msk.bf16.gmra.mrb[236].mxu1 %vm916_vm2, %v3574_v20 }
 0x1ef   :  { %3186 = vmatprep.mubr.msk.bf16.mxu0 %vm3581_vm0, %v3580_v0  ;;  %3434 = vmatprep.mubr.msk.bf16.mxu1 %vm3581_vm0, %v3580_v0 }
 0x1f1   :  { %v1588_v27 = vpop.f32.mrb[132].mxu0  ;;  %v2084_v28 = vpop.f32.mrb[132].mxu1 }
 0x1f2   :  { %v1589_v29 = vadd.f32 %v4699_v12, %v1588_v27  ;;  %v3080_v30 = vpop.f32.mrb[133].mxu0  ;;  %v2085_v32 = vadd.f32 %v4699_v12, %v2084_v28  ;;  %v3328_v33 = vpop.f32.mrb[133].mxu1 }
 0x1f3   :  { %v1591_v35 = vpop.f32.mrb[134].mxu0  ;;  %v2087_v36 = vpop.f32.mrb[134].mxu1 }
 0x1f4   :  { %2373 = vst.msk [vmem:[%s5608_s3 + $0x210] sm:$0xff] %vm2306_vm3, %v1589_v29  ;;  %v1592_v37 = vadd.f32 %v4699_v12, %v1591_v35  ;;  %v3081_v38 = vpop.f32.mrb[135].mxu0  ;;  %2497 = vst.msk [vmem:[%s5608_s3 + $0x5f0] sm:$0xff] %vm2306_vm3, %v2085_v32  ;;  %v2088_v39 = vadd.f32 %v4699_v12, %v2087_v36  ;;  %v3329_v40 = vpop.f32.mrb[135].mxu1 }
 0x1f6   :  { %2374 = vst.msk [vmem:[%s5608_s3 + $0x218] sm:$0xff] %vm2306_vm3, %v1592_v37  ;;  %3187 = vmatmul.mubr.msk.bf16.gmra.mrb[240].mxu0 %vm916_vm2, %v3575_v31  ;;  %2498 = vst.msk [vmem:[%s5608_s3 + $0x5f8] sm:$0xff] %vm2306_vm3, %v2088_v39  ;;  %3435 = vmatmul.mubr.msk.bf16.gmra.mrb[240].mxu1 %vm916_vm2, %v3576_v34 }
 0x1f7   :  { %3190 = vmatprep.mubr.msk.bf16.mxu0 %vm3581_vm0, %v3580_v0 }
 0x1f9   :  { %v1596_v41 = vpop.f32.mrb[136].mxu0  ;;  %v2092_v42 = vpop.f32.mrb[136].mxu1 }
 0x1fa   :  { %v1597_v43 = vadd.f32 %v4699_v12, %v1596_v41  ;;  %v3084_v44 = vpop.f32.mrb[137].mxu0  ;;  %v2093_v46 = vadd.f32 %v4699_v12, %v2092_v42  ;;  %v3332_v47 = vpop.f32.mrb[137].mxu1 }
 0x1fb   :  { %v1599_v48 = vpop.f32.mrb[138].mxu0  ;;  %v2095_v49 = vpop.f32.mrb[138].mxu1 }
 0x1fc   :  { %2375 = vst.msk [vmem:[%s5608_s3 + $0x220] sm:$0xff] %vm2306_vm3, %v1597_v43  ;;  %v1600_v0 = vadd.f32 %v4699_v12, %v1599_v48  ;;  %v3085_v50 = vpop.f32.mrb[139].mxu0  ;;  %2499 = vst.msk [vmem:[%s5608_s3 + $0x600] sm:$0xff] %vm2306_vm3, %v2093_v46  ;;  %v2096_v51 = vadd.f32 %v4699_v12, %v2095_v49  ;;  %v3333_v52 = vpop.f32.mrb[139].mxu1 }
 0x1fe   :  { %2376 = vst.msk [vmem:[%s5608_s3 + $0x228] sm:$0xff] %vm2306_vm3, %v1600_v0  ;;  %3191 = vmatmul.mubr.msk.bf16.gmra.mrb[244].mxu0 %vm916_vm2, %v3577_v45  ;;  %2500 = vst.msk [vmem:[%s5608_s3 + $0x608] sm:$0xff] %vm2306_vm3, %v2096_v51 }
 0x201   :  { %v1604_v53 = vpop.f32.mrb[140].mxu0  ;;  %v2100_v54 = vpop.f32.mrb[140].mxu1 }
 0x202   :  { %v1605_v55 = vadd.f32 %v4699_v12, %v1604_v53  ;;  %v3088_v56 = vpop.f32.mrb[141].mxu0  ;;  %v2101_v57 = vadd.f32 %v4699_v12, %v2100_v54  ;;  %v3336_v58 = vpop.f32.mrb[141].mxu1 }
 0x203   :  { %v1607_v59 = vpop.f32.mrb[142].mxu0  ;;  %v2103_v60 = vpop.f32.mrb[142].mxu1 }
 0x204   :  { %2377 = vst.msk [vmem:[%s5608_s3 + $0x230] sm:$0xff] %vm2306_vm3, %v1605_v55  ;;  %v1608_v62 = vadd.f32 %v4699_v12, %v1607_v59  ;;  %v3089_v63 = vpop.f32.mrb[143].mxu0  ;;  %2501 = vst.msk [vmem:[%s5608_s3 + $0x610] sm:$0xff] %vm2306_vm3, %v2101_v57  ;;  %v2104_v1 = vadd.f32 %v4699_v12, %v2103_v60  ;;  %v3337_v2 = vpop.f32.mrb[143].mxu1 }
 0x206   :  { %2378 = vst.msk [vmem:[%s5608_s3 + $0x238] sm:$0xff] %vm2306_vm3, %v1608_v62  ;;  %2502 = vst.msk [vmem:[%s5608_s3 + $0x618] sm:$0xff] %vm2306_vm3, %v2104_v1 }
 0x209   :  { %v1612_v3 = vpop.f32.mrb[144].mxu0  ;;  %v2108_v4 = vpop.f32.mrb[144].mxu1 }
 0x20a   :  { %v1613_v5 = vadd.f32 %v4699_v12, %v1612_v3  ;;  %v3092_v6 = vpop.f32.mrb[145].mxu0  ;;  %v2109_v7 = vadd.f32 %v4699_v12, %v2108_v4  ;;  %v3340_v8 = vpop.f32.mrb[145].mxu1 }
 0x20b   :  { %v1615_v9 = vpop.f32.mrb[146].mxu0  ;;  %v2111_v10 = vpop.f32.mrb[146].mxu1 }
 0x20c   :  { %2379 = vst.msk [vmem:[%s5608_s3 + $0x240] sm:$0xff] %vm2306_vm3, %v1613_v5  ;;  %v1616_v61 = vadd.f32 %v4699_v12, %v1615_v9  ;;  %v3093_v11 = vpop.f32.mrb[147].mxu0  ;;  %2503 = vst.msk [vmem:[%s5608_s3 + $0x620] sm:$0xff] %vm2306_vm3, %v2109_v7  ;;  %v2112_v13 = vadd.f32 %v4699_v12, %v2111_v10  ;;  %v3341_v14 = vpop.f32.mrb[147].mxu1 }
 0x20e   :  { %2380 = vst.msk [vmem:[%s5608_s3 + $0x248] sm:$0xff] %vm2306_vm3, %v1616_v61  ;;  %2504 = vst.msk [vmem:[%s5608_s3 + $0x628] sm:$0xff] %vm2306_vm3, %v2112_v13 }
 0x211   :  { %v1620_v15 = vpop.f32.mrb[148].mxu0  ;;  %v2116_v16 = vpop.f32.mrb[148].mxu1 }
 0x212   :  { %v1621_v17 = vadd.f32 %v4699_v12, %v1620_v15  ;;  %v3096_v18 = vpop.f32.mrb[149].mxu0  ;;  %v2117_v19 = vadd.f32 %v4699_v12, %v2116_v16  ;;  %v3344_v20 = vpop.f32.mrb[149].mxu1 }
 0x213   :  { %v1623_v21 = vpop.f32.mrb[150].mxu0  ;;  %v2119_v22 = vpop.f32.mrb[150].mxu1 }
 0x214   :  { %2381 = vst.msk [vmem:[%s5608_s3 + $0x250] sm:$0xff] %vm2306_vm3, %v1621_v17  ;;  %v1624_v23 = vadd.f32 %v4699_v12, %v1623_v21  ;;  %v3097_v24 = vpop.f32.mrb[151].mxu0  ;;  %2505 = vst.msk [vmem:[%s5608_s3 + $0x630] sm:$0xff] %vm2306_vm3, %v2117_v19  ;;  %v2120_v25 = vadd.f32 %v4699_v12, %v2119_v22  ;;  %v3345_v26 = vpop.f32.mrb[151].mxu1 }
 0x216   :  { %2382 = vst.msk [vmem:[%s5608_s3 + $0x258] sm:$0xff] %vm2306_vm3, %v1624_v23  ;;  %2506 = vst.msk [vmem:[%s5608_s3 + $0x638] sm:$0xff] %vm2306_vm3, %v2120_v25 }
 0x219   :  { %v1628_v27 = vpop.f32.mrb[152].mxu0  ;;  %v2124_v28 = vpop.f32.mrb[152].mxu1 }
 0x21a   :  { %v1629_v29 = vadd.f32 %v4699_v12, %v1628_v27  ;;  %v3100_v30 = vpop.f32.mrb[153].mxu0  ;;  %v2125_v31 = vadd.f32 %v4699_v12, %v2124_v28  ;;  %v3348_v32 = vpop.f32.mrb[153].mxu1 }
 0x21b   :  { %v1631_v33 = vpop.f32.mrb[154].mxu0  ;;  %v2127_v34 = vpop.f32.mrb[154].mxu1 }
 0x21c   :  { %2383 = vst.msk [vmem:[%s5608_s3 + $0x260] sm:$0xff] %vm2306_vm3, %v1629_v29  ;;  %v1632_v35 = vadd.f32 %v4699_v12, %v1631_v33  ;;  %v3101_v36 = vpop.f32.mrb[155].mxu0  ;;  %2507 = vst.msk [vmem:[%s5608_s3 + $0x640] sm:$0xff] %vm2306_vm3, %v2125_v31  ;;  %v2128_v37 = vadd.f32 %v4699_v12, %v2127_v34  ;;  %v3349_v38 = vpop.f32.mrb[155].mxu1 }
 0x21e   :  { %2384 = vst.msk [vmem:[%s5608_s3 + $0x268] sm:$0xff] %vm2306_vm3, %v1632_v35  ;;  %2508 = vst.msk [vmem:[%s5608_s3 + $0x648] sm:$0xff] %vm2306_vm3, %v2128_v37 }
 0x221   :  { %v1636_v39 = vpop.f32.mrb[156].mxu0  ;;  %v2132_v40 = vpop.f32.mrb[156].mxu1 }
 0x222   :  { %v1637_v41 = vadd.f32 %v4699_v12, %v1636_v39  ;;  %v3104_v42 = vpop.f32.mrb[157].mxu0  ;;  %v2133_v43 = vadd.f32 %v4699_v12, %v2132_v40  ;;  %v3352_v44 = vpop.f32.mrb[157].mxu1 }
 0x223   :  { %v1639_v45 = vpop.f32.mrb[158].mxu0  ;;  %v2135_v46 = vpop.f32.mrb[158].mxu1 }
 0x224   :  { %2385 = vst.msk [vmem:[%s5608_s3 + $0x270] sm:$0xff] %vm2306_vm3, %v1637_v41  ;;  %v1640_v47 = vadd.f32 %v4699_v12, %v1639_v45  ;;  %v3105_v48 = vpop.f32.mrb[159].mxu0  ;;  %2509 = vst.msk [vmem:[%s5608_s3 + $0x650] sm:$0xff] %vm2306_vm3, %v2133_v43  ;;  %v2136_v49 = vadd.f32 %v4699_v12, %v2135_v46  ;;  %v3353_v0 = vpop.f32.mrb[159].mxu1 }
 0x226   :  { %2386 = vst.msk [vmem:[%s5608_s3 + $0x278] sm:$0xff] %vm2306_vm3, %v1640_v47  ;;  %2510 = vst.msk [vmem:[%s5608_s3 + $0x658] sm:$0xff] %vm2306_vm3, %v2136_v49 }
 0x229   :  { %v1644_v50 = vpop.f32.mrb[160].mxu0  ;;  %v2140_v51 = vpop.f32.mrb[160].mxu1 }
 0x22a   :  { %v1645_v52 = vadd.f32 %v4699_v12, %v1644_v50  ;;  %v3108_v53 = vpop.f32.mrb[161].mxu0  ;;  %v2141_v54 = vadd.f32 %v4699_v12, %v2140_v51  ;;  %v3356_v55 = vpop.f32.mrb[161].mxu1 }
 0x22b   :  { %v1647_v56 = vpop.f32.mrb[162].mxu0  ;;  %v2143_v57 = vpop.f32.mrb[162].mxu1 }
 0x22c   :  { %2387 = vst.msk [vmem:[%s5608_s3 + $0x280] sm:$0xff] %vm2306_vm3, %v1645_v52  ;;  %v1648_v58 = vadd.f32 %v4699_v12, %v1647_v56  ;;  %v3109_v59 = vpop.f32.mrb[163].mxu0  ;;  %2511 = vst.msk [vmem:[%s5608_s3 + $0x660] sm:$0xff] %vm2306_vm3, %v2141_v54  ;;  %v2144_v60 = vadd.f32 %v4699_v12, %v2143_v57  ;;  %v3357_v62 = vpop.f32.mrb[163].mxu1 }
 0x22e   :  { %2388 = vst.msk [vmem:[%s5608_s3 + $0x288] sm:$0xff] %vm2306_vm3, %v1648_v58  ;;  %2512 = vst.msk [vmem:[%s5608_s3 + $0x668] sm:$0xff] %vm2306_vm3, %v2144_v60 }
 0x231   :  { %v1652_v63 = vpop.f32.mrb[164].mxu0  ;;  %v2148_v1 = vpop.f32.mrb[164].mxu1 }
 0x232   :  { %v1653_v2 = vadd.f32 %v4699_v12, %v1652_v63  ;;  %v3112_v3 = vpop.f32.mrb[165].mxu0  ;;  %v2149_v4 = vadd.f32 %v4699_v12, %v2148_v1  ;;  %v3360_v5 = vpop.f32.mrb[165].mxu1 }
 0x233   :  { %v1655_v6 = vpop.f32.mrb[166].mxu0  ;;  %v2151_v7 = vpop.f32.mrb[166].mxu1 }
 0x234   :  { %2389 = vst.msk [vmem:[%s5608_s3 + $0x290] sm:$0xff] %vm2306_vm3, %v1653_v2  ;;  %v1656_v8 = vadd.f32 %v4699_v12, %v1655_v6  ;;  %v3113_v9 = vpop.f32.mrb[167].mxu0  ;;  %2513 = vst.msk [vmem:[%s5608_s3 + $0x670] sm:$0xff] %vm2306_vm3, %v2149_v4  ;;  %v2152_v10 = vadd.f32 %v4699_v12, %v2151_v7  ;;  %v3361_v61 = vpop.f32.mrb[167].mxu1 }
 0x236   :  { %2390 = vst.msk [vmem:[%s5608_s3 + $0x298] sm:$0xff] %vm2306_vm3, %v1656_v8  ;;  %2514 = vst.msk [vmem:[%s5608_s3 + $0x678] sm:$0xff] %vm2306_vm3, %v2152_v10 }
 0x239   :  { %v1660_v11 = vpop.f32.mrb[168].mxu0  ;;  %v2156_v13 = vpop.f32.mrb[168].mxu1 }
 0x23a   :  { %v1661_v14 = vadd.f32 %v4699_v12, %v1660_v11  ;;  %v3116_v15 = vpop.f32.mrb[169].mxu0  ;;  %v2157_v16 = vadd.f32 %v4699_v12, %v2156_v13  ;;  %v3364_v17 = vpop.f32.mrb[169].mxu1 }
 0x23b   :  { %v1663_v18 = vpop.f32.mrb[170].mxu0  ;;  %v2159_v19 = vpop.f32.mrb[170].mxu1 }
 0x23c   :  { %2391 = vst.msk [vmem:[%s5608_s3 + $0x2a0] sm:$0xff] %vm2306_vm3, %v1661_v14  ;;  %v1664_v20 = vadd.f32 %v4699_v12, %v1663_v18  ;;  %v3117_v21 = vpop.f32.mrb[171].mxu0  ;;  %2515 = vst.msk [vmem:[%s5608_s3 + $0x680] sm:$0xff] %vm2306_vm3, %v2157_v16  ;;  %v2160_v22 = vadd.f32 %v4699_v12, %v2159_v19  ;;  %v3365_v23 = vpop.f32.mrb[171].mxu1 }
 0x23e   :  { %2392 = vst.msk [vmem:[%s5608_s3 + $0x2a8] sm:$0xff] %vm2306_vm3, %v1664_v20  ;;  %2516 = vst.msk [vmem:[%s5608_s3 + $0x688] sm:$0xff] %vm2306_vm3, %v2160_v22 }
 0x241   :  { %v1668_v24 = vpop.f32.mrb[172].mxu0  ;;  %v2164_v25 = vpop.f32.mrb[172].mxu1 }
 0x242   :  { %v1669_v26 = vadd.f32 %v4699_v12, %v1668_v24  ;;  %v3120_v27 = vpop.f32.mrb[173].mxu0  ;;  %v2165_v28 = vadd.f32 %v4699_v12, %v2164_v25  ;;  %v3368_v29 = vpop.f32.mrb[173].mxu1 }
 0x243   :  { %v1671_v30 = vpop.f32.mrb[174].mxu0  ;;  %v2167_v31 = vpop.f32.mrb[174].mxu1 }
 0x244   :  { %2393 = vst.msk [vmem:[%s5608_s3 + $0x2b0] sm:$0xff] %vm2306_vm3, %v1669_v26  ;;  %v1672_v32 = vadd.f32 %v4699_v12, %v1671_v30  ;;  %v3121_v33 = vpop.f32.mrb[175].mxu0  ;;  %2517 = vst.msk [vmem:[%s5608_s3 + $0x690] sm:$0xff] %vm2306_vm3, %v2165_v28  ;;  %v2168_v34 = vadd.f32 %v4699_v12, %v2167_v31  ;;  %v3369_v35 = vpop.f32.mrb[175].mxu1 }
 0x246   :  { %2394 = vst.msk [vmem:[%s5608_s3 + $0x2b8] sm:$0xff] %vm2306_vm3, %v1672_v32  ;;  %2518 = vst.msk [vmem:[%s5608_s3 + $0x698] sm:$0xff] %vm2306_vm3, %v2168_v34 }
 0x249   :  { %v1676_v36 = vpop.f32.mrb[176].mxu0  ;;  %v2172_v37 = vpop.f32.mrb[176].mxu1 }
 0x24a   :  { %v1677_v38 = vadd.f32 %v4699_v12, %v1676_v36  ;;  %v3124_v39 = vpop.f32.mrb[177].mxu0  ;;  %v2173_v40 = vadd.f32 %v4699_v12, %v2172_v37  ;;  %v3372_v41 = vpop.f32.mrb[177].mxu1 }
 0x24b   :  { %v1679_v42 = vpop.f32.mrb[178].mxu0  ;;  %v2175_v43 = vpop.f32.mrb[178].mxu1 }
 0x24c   :  { %2395 = vst.msk [vmem:[%s5608_s3 + $0x2c0] sm:$0xff] %vm2306_vm3, %v1677_v38  ;;  %v1680_v44 = vadd.f32 %v4699_v12, %v1679_v42  ;;  %v3125_v45 = vpop.f32.mrb[179].mxu0  ;;  %2519 = vst.msk [vmem:[%s5608_s3 + $0x6a0] sm:$0xff] %vm2306_vm3, %v2173_v40  ;;  %v2176_v46 = vadd.f32 %v4699_v12, %v2175_v43  ;;  %v3373_v47 = vpop.f32.mrb[179].mxu1 }
 0x24e   :  { %2396 = vst.msk [vmem:[%s5608_s3 + $0x2c8] sm:$0xff] %vm2306_vm3, %v1680_v44  ;;  %2520 = vst.msk [vmem:[%s5608_s3 + $0x6a8] sm:$0xff] %vm2306_vm3, %v2176_v46 }
 0x251   :  { %v1684_v48 = vpop.f32.mrb[180].mxu0  ;;  %v2180_v49 = vpop.f32.mrb[180].mxu1 }
 0x252   :  { %v1685_v0 = vadd.f32 %v4699_v12, %v1684_v48  ;;  %v3128_v50 = vpop.f32.mrb[181].mxu0  ;;  %v2181_v51 = vadd.f32 %v4699_v12, %v2180_v49  ;;  %v3376_v52 = vpop.f32.mrb[181].mxu1 }
 0x253   :  { %v1687_v53 = vpop.f32.mrb[182].mxu0  ;;  %v2183_v54 = vpop.f32.mrb[182].mxu1 }
 0x254   :  { %2397 = vst.msk [vmem:[%s5608_s3 + $0x2d0] sm:$0xff] %vm2306_vm3, %v1685_v0  ;;  %v1688_v55 = vadd.f32 %v4699_v12, %v1687_v53  ;;  %v3129_v56 = vpop.f32.mrb[183].mxu0  ;;  %2521 = vst.msk [vmem:[%s5608_s3 + $0x6b0] sm:$0xff] %vm2306_vm3, %v2181_v51  ;;  %v2184_v57 = vadd.f32 %v4699_v12, %v2183_v54  ;;  %v3377_v58 = vpop.f32.mrb[183].mxu1 }
 0x255   :  { %v5398_v58 = vld [vmem:[%s5607_s2] ss:$0 sm:$0xff] }
 0x256   :  { %2398 = vst.msk [vmem:[%s5608_s3 + $0x2d8] sm:$0xff] %vm2306_vm3, %v1688_v55  ;;  %2522 = vst.msk [vmem:[%s5608_s3 + $0x6b8] sm:$0xff] %vm2306_vm3, %v2184_v57 }
 0x259   :  { %v1692_v59 = vpop.f32.mrb[184].mxu0  ;;  %v2188_v60 = vpop.f32.mrb[184].mxu1 }
 0x25a   :  { %v1693_v62 = vadd.f32 %v4699_v12, %v1692_v59  ;;  %v3132_v63 = vpop.f32.mrb[185].mxu0  ;;  %v2189_v1 = vadd.f32 %v4699_v12, %v2188_v60  ;;  %v3380_v2 = vpop.f32.mrb[185].mxu1 }
 0x25b   :  { %v1695_v3 = vpop.f32.mrb[186].mxu0  ;;  %v2191_v4 = vpop.f32.mrb[186].mxu1 }
 0x25c   :  { %2399 = vst.msk [vmem:[%s5608_s3 + $0x2e0] sm:$0xff] %vm2306_vm3, %v1693_v62  ;;  %v1696_v5 = vadd.f32 %v4699_v12, %v1695_v3  ;;  %v3133_v6 = vpop.f32.mrb[187].mxu0  ;;  %2523 = vst.msk [vmem:[%s5608_s3 + $0x6c0] sm:$0xff] %vm2306_vm3, %v2189_v1  ;;  %v2192_v7 = vadd.f32 %v4699_v12, %v2191_v4  ;;  %v3381_v8 = vpop.f32.mrb[187].mxu1 }
 0x25e   :  { %2400 = vst.msk [vmem:[%s5608_s3 + $0x2e8] sm:$0xff] %vm2306_vm3, %v1696_v5  ;;  %2524 = vst.msk [vmem:[%s5608_s3 + $0x6c8] sm:$0xff] %vm2306_vm3, %v2192_v7 }
 0x261   :  { %v1700_v9 = vpop.f32.mrb[188].mxu0  ;;  %v2196_v10 = vpop.f32.mrb[188].mxu1 }
 0x262   :  { %v1701_v61 = vadd.f32 %v4699_v12, %v1700_v9  ;;  %v3136_v11 = vpop.f32.mrb[189].mxu0  ;;  %v2197_v13 = vadd.f32 %v4699_v12, %v2196_v10  ;;  %v3384_v14 = vpop.f32.mrb[189].mxu1 }
 0x263   :  { %v1703_v15 = vpop.f32.mrb[190].mxu0  ;;  %v2199_v16 = vpop.f32.mrb[190].mxu1 }
 0x264   :  { %2401 = vst.msk [vmem:[%s5608_s3 + $0x2f0] sm:$0xff] %vm2306_vm3, %v1701_v61  ;;  %v1704_v17 = vadd.f32 %v4699_v12, %v1703_v15  ;;  %v3137_v18 = vpop.f32.mrb[191].mxu0  ;;  %2525 = vst.msk [vmem:[%s5608_s3 + $0x6d0] sm:$0xff] %vm2306_vm3, %v2197_v13  ;;  %v2200_v19 = vadd.f32 %v4699_v12, %v2199_v16  ;;  %v3385_v20 = vpop.f32.mrb[191].mxu1 }
 0x266   :  { %2402 = vst.msk [vmem:[%s5608_s3 + $0x2f8] sm:$0xff] %vm2306_vm3, %v1704_v17  ;;  %2526 = vst.msk [vmem:[%s5608_s3 + $0x6d8] sm:$0xff] %vm2306_vm3, %v2200_v19 }
 0x269   :  { %v1708_v21 = vpop.f32.mrb[192].mxu0  ;;  %v2204_v22 = vpop.f32.mrb[192].mxu1 }
 0x26a   :  { %v1709_v23 = vadd.f32 %v4699_v12, %v1708_v21  ;;  %v3140_v24 = vpop.f32.mrb[193].mxu0  ;;  %v2205_v25 = vadd.f32 %v4699_v12, %v2204_v22  ;;  %v3388_v26 = vpop.f32.mrb[193].mxu1 }
 0x26b   :  { %v1711_v27 = vpop.f32.mrb[194].mxu0  ;;  %v2207_v28 = vpop.f32.mrb[194].mxu1 }
 0x26c   :  { %2403 = vst.msk [vmem:[%s5608_s3 + $0x300] sm:$0xff] %vm2306_vm3, %v1709_v23  ;;  %v1712_v29 = vadd.f32 %v4699_v12, %v1711_v27  ;;  %v3141_v30 = vpop.f32.mrb[195].mxu0  ;;  %2527 = vst.msk [vmem:[%s5608_s3 + $0x6e0] sm:$0xff] %vm2306_vm3, %v2205_v25  ;;  %v2208_v31 = vadd.f32 %v4699_v12, %v2207_v28  ;;  %v3389_v32 = vpop.f32.mrb[195].mxu1 }
 0x26e   :  { %2404 = vst.msk [vmem:[%s5608_s3 + $0x308] sm:$0xff] %vm2306_vm3, %v1712_v29  ;;  %2528 = vst.msk [vmem:[%s5608_s3 + $0x6e8] sm:$0xff] %vm2306_vm3, %v2208_v31 }
 0x271   :  { %v1716_v33 = vpop.f32.mrb[196].mxu0  ;;  %v2212_v34 = vpop.f32.mrb[196].mxu1 }
 0x272   :  { %v1717_v35 = vadd.f32 %v4699_v12, %v1716_v33  ;;  %v3144_v36 = vpop.f32.mrb[197].mxu0  ;;  %v2213_v37 = vadd.f32 %v4699_v12, %v2212_v34  ;;  %v3392_v38 = vpop.f32.mrb[197].mxu1 }
 0x273   :  { %v1719_v39 = vpop.f32.mrb[198].mxu0  ;;  %v2215_v40 = vpop.f32.mrb[198].mxu1 }
 0x274   :  { %2405 = vst.msk [vmem:[%s5608_s3 + $0x310] sm:$0xff] %vm2306_vm3, %v1717_v35  ;;  %v1720_v41 = vadd.f32 %v4699_v12, %v1719_v39  ;;  %v3145_v42 = vpop.f32.mrb[199].mxu0  ;;  %2529 = vst.msk [vmem:[%s5608_s3 + $0x6f0] sm:$0xff] %vm2306_vm3, %v2213_v37  ;;  %v2216_v43 = vadd.f32 %v4699_v12, %v2215_v40  ;;  %v3393_v44 = vpop.f32.mrb[199].mxu1 }
 0x276   :  { %2406 = vst.msk [vmem:[%s5608_s3 + $0x318] sm:$0xff] %vm2306_vm3, %v1720_v41  ;;  %2530 = vst.msk [vmem:[%s5608_s3 + $0x6f8] sm:$0xff] %vm2306_vm3, %v2216_v43 }
 0x279   :  { %v1724_v45 = vpop.f32.mrb[200].mxu0  ;;  %v2220_v46 = vpop.f32.mrb[200].mxu1 }
 0x27a   :  { %v1725_v47 = vadd.f32 %v4699_v12, %v1724_v45  ;;  %v3148_v48 = vpop.f32.mrb[201].mxu0  ;;  %v2221_v49 = vadd.f32 %v4699_v12, %v2220_v46  ;;  %v3396_v0 = vpop.f32.mrb[201].mxu1 }
 0x27b   :  { %v1727_v50 = vpop.f32.mrb[202].mxu0  ;;  %v2223_v51 = vpop.f32.mrb[202].mxu1 }
 0x27c   :  { %2407 = vst.msk [vmem:[%s5608_s3 + $0x320] sm:$0xff] %vm2306_vm3, %v1725_v47  ;;  %v1728_v52 = vadd.f32 %v4699_v12, %v1727_v50  ;;  %v3149_v53 = vpop.f32.mrb[203].mxu0  ;;  %2531 = vst.msk [vmem:[%s5608_s3 + $0x700] sm:$0xff] %vm2306_vm3, %v2221_v49  ;;  %v2224_v54 = vadd.f32 %v4699_v12, %v2223_v51  ;;  %v3397_v55 = vpop.f32.mrb[203].mxu1 }
 0x27e   :  { %2408 = vst.msk [vmem:[%s5608_s3 + $0x328] sm:$0xff] %vm2306_vm3, %v1728_v52  ;;  %2532 = vst.msk [vmem:[%s5608_s3 + $0x708] sm:$0xff] %vm2306_vm3, %v2224_v54 }
 0x281   :  { %v1732_v56 = vpop.f32.mrb[204].mxu0  ;;  %v2228_v57 = vpop.f32.mrb[204].mxu1 }
 0x282   :  { %v1733_v12 = vadd.f32 %v5398_v58, %v1732_v56  ;;  %v3152_v59 = vpop.f32.mrb[205].mxu0  ;;  %v2229_v60 = vadd.f32 %v5398_v58, %v2228_v57  ;;  %v3400_v62 = vpop.f32.mrb[205].mxu1 }
 0x283   :  { %v1735_v63 = vpop.f32.mrb[206].mxu0  ;;  %v2231_v1 = vpop.f32.mrb[206].mxu1 }
 0x284   :  { %2409 = vst.msk [vmem:[%s5608_s3 + $0x330] sm:$0xff] %vm2306_vm3, %v1733_v12  ;;  %v1736_v2 = vadd.f32 %v5398_v58, %v1735_v63  ;;  %v3153_v3 = vpop.f32.mrb[207].mxu0  ;;  %2533 = vst.msk [vmem:[%s5608_s3 + $0x710] sm:$0xff] %vm2306_vm3, %v2229_v60  ;;  %v2232_v4 = vadd.f32 %v5398_v58, %v2231_v1  ;;  %v3401_v5 = vpop.f32.mrb[207].mxu1 }
 0x286   :  { %2410 = vst.msk [vmem:[%s5608_s3 + $0x338] sm:$0xff] %vm2306_vm3, %v1736_v2  ;;  %2534 = vst.msk [vmem:[%s5608_s3 + $0x718] sm:$0xff] %vm2306_vm3, %v2232_v4 }
 0x289   :  { %v1740_v6 = vpop.f32.mrb[208].mxu0  ;;  %v2236_v7 = vpop.f32.mrb[208].mxu1 }
 0x28a   :  { %v1741_v8 = vadd.f32 %v5398_v58, %v1740_v6  ;;  %v3156_v9 = vpop.f32.mrb[209].mxu0  ;;  %v2237_v10 = vadd.f32 %v5398_v58, %v2236_v7  ;;  %v3404_v61 = vpop.f32.mrb[209].mxu1 }
 0x28b   :  { %v1743_v11 = vpop.f32.mrb[210].mxu0  ;;  %v2239_v13 = vpop.f32.mrb[210].mxu1 }
 0x28c   :  { %2411 = vst.msk [vmem:[%s5608_s3 + $0x340] sm:$0xff] %vm2306_vm3, %v1741_v8  ;;  %v1744_v14 = vadd.f32 %v5398_v58, %v1743_v11  ;;  %v3157_v15 = vpop.f32.mrb[211].mxu0  ;;  %2535 = vst.msk [vmem:[%s5608_s3 + $0x720] sm:$0xff] %vm2306_vm3, %v2237_v10  ;;  %v2240_v16 = vadd.f32 %v5398_v58, %v2239_v13  ;;  %v3405_v17 = vpop.f32.mrb[211].mxu1 }
 0x28e   :  { %2412 = vst.msk [vmem:[%s5608_s3 + $0x348] sm:$0xff] %vm2306_vm3, %v1744_v14  ;;  %2536 = vst.msk [vmem:[%s5608_s3 + $0x728] sm:$0xff] %vm2306_vm3, %v2240_v16 }
 0x291   :  { %v1748_v18 = vpop.f32.mrb[212].mxu0  ;;  %v2244_v19 = vpop.f32.mrb[212].mxu1 }
 0x292   :  { %v1749_v20 = vadd.f32 %v5398_v58, %v1748_v18  ;;  %v3160_v21 = vpop.f32.mrb[213].mxu0  ;;  %v2245_v22 = vadd.f32 %v5398_v58, %v2244_v19  ;;  %v3408_v23 = vpop.f32.mrb[213].mxu1 }
 0x293   :  { %v1751_v24 = vpop.f32.mrb[214].mxu0  ;;  %v2247_v25 = vpop.f32.mrb[214].mxu1 }
 0x294   :  { %2413 = vst.msk [vmem:[%s5608_s3 + $0x350] sm:$0xff] %vm2306_vm3, %v1749_v20  ;;  %v1752_v26 = vadd.f32 %v5398_v58, %v1751_v24  ;;  %v3161_v27 = vpop.f32.mrb[215].mxu0  ;;  %2537 = vst.msk [vmem:[%s5608_s3 + $0x730] sm:$0xff] %vm2306_vm3, %v2245_v22  ;;  %v2248_v28 = vadd.f32 %v5398_v58, %v2247_v25  ;;  %v3409_v29 = vpop.f32.mrb[215].mxu1 }
 0x296   :  { %2414 = vst.msk [vmem:[%s5608_s3 + $0x358] sm:$0xff] %vm2306_vm3, %v1752_v26  ;;  %2538 = vst.msk [vmem:[%s5608_s3 + $0x738] sm:$0xff] %vm2306_vm3, %v2248_v28 }
 0x299   :  { %v1756_v30 = vpop.f32.mrb[216].mxu0  ;;  %v2252_v31 = vpop.f32.mrb[216].mxu1 }
 0x29a   :  { %v1757_v32 = vadd.f32 %v5398_v58, %v1756_v30  ;;  %v3164_v33 = vpop.f32.mrb[217].mxu0  ;;  %v2253_v34 = vadd.f32 %v5398_v58, %v2252_v31  ;;  %v3412_v35 = vpop.f32.mrb[217].mxu1 }
 0x29b   :  { %v1759_v36 = vpop.f32.mrb[218].mxu0  ;;  %v2255_v37 = vpop.f32.mrb[218].mxu1 }
 0x29c   :  { %2415 = vst.msk [vmem:[%s5608_s3 + $0x360] sm:$0xff] %vm2306_vm3, %v1757_v32  ;;  %v1760_v38 = vadd.f32 %v5398_v58, %v1759_v36  ;;  %v3165_v39 = vpop.f32.mrb[219].mxu0  ;;  %2539 = vst.msk [vmem:[%s5608_s3 + $0x740] sm:$0xff] %vm2306_vm3, %v2253_v34  ;;  %v2256_v40 = vadd.f32 %v5398_v58, %v2255_v37  ;;  %v3413_v41 = vpop.f32.mrb[219].mxu1 }
 0x29e   :  { %2416 = vst.msk [vmem:[%s5608_s3 + $0x368] sm:$0xff] %vm2306_vm3, %v1760_v38  ;;  %2540 = vst.msk [vmem:[%s5608_s3 + $0x748] sm:$0xff] %vm2306_vm3, %v2256_v40 }
 0x2a1   :  { %v1764_v42 = vpop.f32.mrb[220].mxu0  ;;  %v2260_v43 = vpop.f32.mrb[220].mxu1 }
 0x2a2   :  { %v1765_v44 = vadd.f32 %v5398_v58, %v1764_v42  ;;  %v3168_v45 = vpop.f32.mrb[221].mxu0  ;;  %v2261_v46 = vadd.f32 %v5398_v58, %v2260_v43  ;;  %v3416_v47 = vpop.f32.mrb[221].mxu1 }
 0x2a3   :  { %v1767_v48 = vpop.f32.mrb[222].mxu0  ;;  %v2263_v49 = vpop.f32.mrb[222].mxu1 }
 0x2a4   :  { %2417 = vst.msk [vmem:[%s5608_s3 + $0x370] sm:$0xff] %vm2306_vm3, %v1765_v44  ;;  %v1768_v0 = vadd.f32 %v5398_v58, %v1767_v48  ;;  %v3169_v50 = vpop.f32.mrb[223].mxu0  ;;  %2541 = vst.msk [vmem:[%s5608_s3 + $0x750] sm:$0xff] %vm2306_vm3, %v2261_v46  ;;  %v2264_v51 = vadd.f32 %v5398_v58, %v2263_v49  ;;  %v3417_v52 = vpop.f32.mrb[223].mxu1 }
 0x2a6   :  { %2418 = vst.msk [vmem:[%s5608_s3 + $0x378] sm:$0xff] %vm2306_vm3, %v1768_v0  ;;  %2542 = vst.msk [vmem:[%s5608_s3 + $0x758] sm:$0xff] %vm2306_vm3, %v2264_v51 }
 0x2a9   :  { %v1772_v53 = vpop.f32.mrb[224].mxu0  ;;  %v2268_v54 = vpop.f32.mrb[224].mxu1 }
 0x2aa   :  { %v1773_v55 = vadd.f32 %v5398_v58, %v1772_v53  ;;  %v3172_v56 = vpop.f32.mrb[225].mxu0  ;;  %v2269_v57 = vadd.f32 %v5398_v58, %v2268_v54  ;;  %v3420_v12 = vpop.f32.mrb[225].mxu1 }
 0x2ab   :  { %v1775_v59 = vpop.f32.mrb[226].mxu0  ;;  %v2271_v60 = vpop.f32.mrb[226].mxu1 }
 0x2ac   :  { %2419 = vst.msk [vmem:[%s5608_s3 + $0x380] sm:$0xff] %vm2306_vm3, %v1773_v55  ;;  %v1776_v62 = vadd.f32 %v5398_v58, %v1775_v59  ;;  %v3173_v63 = vpop.f32.mrb[227].mxu0  ;;  %2543 = vst.msk [vmem:[%s5608_s3 + $0x760] sm:$0xff] %vm2306_vm3, %v2269_v57  ;;  %v2272_v1 = vadd.f32 %v5398_v58, %v2271_v60  ;;  %v3421_v2 = vpop.f32.mrb[227].mxu1 }
 0x2ae   :  { %2420 = vst.msk [vmem:[%s5608_s3 + $0x388] sm:$0xff] %vm2306_vm3, %v1776_v62  ;;  %2544 = vst.msk [vmem:[%s5608_s3 + $0x768] sm:$0xff] %vm2306_vm3, %v2272_v1 }
 0x2b1   :  { %v1780_v3 = vpop.f32.mrb[228].mxu0  ;;  %v2276_v4 = vpop.f32.mrb[228].mxu1 }
 0x2b2   :  { %v1781_v5 = vadd.f32 %v5398_v58, %v1780_v3  ;;  %v3176_v6 = vpop.f32.mrb[229].mxu0  ;;  %v2277_v7 = vadd.f32 %v5398_v58, %v2276_v4  ;;  %v3424_v8 = vpop.f32.mrb[229].mxu1 }
 0x2b3   :  { %v1783_v9 = vpop.f32.mrb[230].mxu0  ;;  %v2279_v10 = vpop.f32.mrb[230].mxu1 }
 0x2b4   :  { %2421 = vst.msk [vmem:[%s5608_s3 + $0x390] sm:$0xff] %vm2306_vm3, %v1781_v5  ;;  %v1784_v61 = vadd.f32 %v5398_v58, %v1783_v9  ;;  %v3177_v11 = vpop.f32.mrb[231].mxu0  ;;  %2545 = vst.msk [vmem:[%s5608_s3 + $0x770] sm:$0xff] %vm2306_vm3, %v2277_v7  ;;  %v2280_v13 = vadd.f32 %v5398_v58, %v2279_v10  ;;  %v3425_v14 = vpop.f32.mrb[231].mxu1 }
 0x2b6   :  { %2422 = vst.msk [vmem:[%s5608_s3 + $0x398] sm:$0xff] %vm2306_vm3, %v1784_v61  ;;  %2546 = vst.msk [vmem:[%s5608_s3 + $0x778] sm:$0xff] %vm2306_vm3, %v2280_v13 }
 0x2b9   :  { %v1788_v15 = vpop.f32.mrb[232].mxu0  ;;  %v2284_v16 = vpop.f32.mrb[232].mxu1 }
 0x2ba   :  { %v1789_v17 = vadd.f32 %v5398_v58, %v1788_v15  ;;  %v3180_v18 = vpop.f32.mrb[233].mxu0  ;;  %v2285_v19 = vadd.f32 %v5398_v58, %v2284_v16  ;;  %v3428_v20 = vpop.f32.mrb[233].mxu1 }
 0x2bb   :  { %v1791_v21 = vpop.f32.mrb[234].mxu0  ;;  %v2287_v22 = vpop.f32.mrb[234].mxu1 }
 0x2bc   :  { %2423 = vst.msk [vmem:[%s5608_s3 + $0x3a0] sm:$0xff] %vm2306_vm3, %v1789_v17  ;;  %v1792_v23 = vadd.f32 %v5398_v58, %v1791_v21  ;;  %v3181_v24 = vpop.f32.mrb[235].mxu0  ;;  %2547 = vst.msk [vmem:[%s5608_s3 + $0x780] sm:$0xff] %vm2306_vm3, %v2285_v19  ;;  %v2288_v25 = vadd.f32 %v5398_v58, %v2287_v22  ;;  %v3429_v26 = vpop.f32.mrb[235].mxu1 }
 0x2be   :  { %2424 = vst.msk [vmem:[%s5608_s3 + $0x3a8] sm:$0xff] %vm2306_vm3, %v1792_v23  ;;  %2548 = vst.msk [vmem:[%s5608_s3 + $0x788] sm:$0xff] %vm2306_vm3, %v2288_v25 }
 0x2c1   :  { %v1796_v27 = vpop.f32.mrb[236].mxu0  ;;  %v2292_v28 = vpop.f32.mrb[236].mxu1 }
 0x2c2   :  { %v1797_v29 = vadd.f32 %v5398_v58, %v1796_v27  ;;  %v3184_v30 = vpop.f32.mrb[237].mxu0  ;;  %v2293_v31 = vadd.f32 %v5398_v58, %v2292_v28  ;;  %v3432_v32 = vpop.f32.mrb[237].mxu1 }
 0x2c3   :  { %v1799_v33 = vpop.f32.mrb[238].mxu0  ;;  %v2295_v34 = vpop.f32.mrb[238].mxu1 }
 0x2c4   :  { %2425 = vst.msk [vmem:[%s5608_s3 + $0x3b0] sm:$0xff] %vm2306_vm3, %v1797_v29  ;;  %v1800_v35 = vadd.f32 %v5398_v58, %v1799_v33  ;;  %v3185_v36 = vpop.f32.mrb[239].mxu0  ;;  %2549 = vst.msk [vmem:[%s5608_s3 + $0x790] sm:$0xff] %vm2306_vm3, %v2293_v31  ;;  %v2296_v37 = vadd.f32 %v5398_v58, %v2295_v34  ;;  %v3433_v38 = vpop.f32.mrb[239].mxu1 }
 0x2c6   :  { %2426 = vst.msk [vmem:[%s5608_s3 + $0x3b8] sm:$0xff] %vm2306_vm3, %v1800_v35  ;;  %2550 = vst.msk [vmem:[%s5608_s3 + $0x798] sm:$0xff] %vm2306_vm3, %v2296_v37 }
 0x2c9   :  { %v1804_v39 = vpop.f32.mrb[240].mxu0  ;;  %v2300_v40 = vpop.f32.mrb[240].mxu1 }
 0x2ca   :  { %v1805_v41 = vadd.f32 %v5398_v58, %v1804_v39  ;;  %v3188_v42 = vpop.f32.mrb[241].mxu0  ;;  %v2301_v43 = vadd.f32 %v5398_v58, %v2300_v40  ;;  %v3436_v44 = vpop.f32.mrb[241].mxu1 }
 0x2cb   :  { %v1807_v45 = vpop.f32.mrb[242].mxu0  ;;  %v2303_v46 = vpop.f32.mrb[242].mxu1 }
 0x2cc   :  { %2427 = vst.msk [vmem:[%s5608_s3 + $0x3c0] sm:$0xff] %vm2306_vm3, %v1805_v41  ;;  %v1808_v47 = vadd.f32 %v5398_v58, %v1807_v45  ;;  %v3189_v48 = vpop.f32.mrb[243].mxu0  ;;  %2551 = vst.msk [vmem:[%s5608_s3 + $0x7a0] sm:$0xff] %vm2306_vm3, %v2301_v43  ;;  %v3437_v49 = vpop.f32.mrb[243].mxu1 }
 0x2ce   :  { %2428 = vst.msk [vmem:[%s5608_s3 + $0x3c8] sm:$0xff] %vm2306_vm3, %v1808_v47 }
 0x2d1   :  { %v1812_v0 = vpop.f32.mrb[244].mxu0 }
 0x2d2   :  { %v1813_v50 = vadd.f32 %v5398_v58, %v1812_v0  ;;  %v3192_v51 = vpop.f32.mrb[245].mxu0 }
 0x2d3   :  { %v1815_v52 = vpop.f32.mrb[246].mxu0 }
 0x2d4   :  { %2429 = vst.msk [vmem:[%s5608_s3 + $0x3d0] sm:$0xff] %vm2306_vm3, %v1813_v50  ;;  %v1816_v53 = vadd.f32 %v5398_v58, %v1815_v52  ;;  %v3193_v54 = vpop.f32.mrb[247].mxu0 }
 0x2d6   :  { %2430 = vst.msk [vmem:[%s5608_s3 + $0x3d8] sm:$0xff] %vm2306_vm3, %v1816_v53 }

// kernel: gcb_forward.9
= control target key start
LH: loop header
LB: loop body
LE: loop exit
PB: predicated region body
PF: predicated region fallthrough
CT: control target
= control target key end

     0   :  { %v2207_v0 = vmov 0   ;;  %vm910_vm0 = vcmask 1043456   ;;  %vm813_vm1 = vcmask 850944   ;;  %vm1684_vm2 = vcmask 64512   ;;  %s3297_s1 = inlined_call_operand.vmem [shape: bf16[360,8], index: 1, kind: input, shape index: {}]   ;;  %s3298_s0 = inlined_call_operand.vmem [shape: bf16[512,360], index: 0, kind: input, shape index: {}]   ;;  %s3299_s2 = inlined_call_operand.vmem [shape: f32[1,8], index: 2, kind: input, shape index: {}]   ;;  %s3300_s3 = inlined_call_operand.vmem [shape: f32[512,8], index: 3, kind: input, shape index: {}]   ;;  %s3301_s4 = inlined_call_operand.vmem [shape: f32[512,8], index: 4, kind: output, shape index: {}]  }
   0x1   :  { %914 = vmatprep.subr.bf16.mxu0 %v2207_v0  ;;  %2022 = vmatprep.subr.bf16.mxu1 %v2207_v0  ;;  %v2056_v1 = vld [vmem:[%s3297_s1] sm:$0xff]   ;;  %v2057_v2 = vld [vmem:[%s3297_s1 + $0x8] sm:$0xff]   ;;  %v2058_v3 = vld [vmem:[%s3297_s1 + $0x10] sm:$0xff]  }
   0x2   :  { %915 = vmatpush1.bf16.msra.mxu0 %v2056_v1  ;;  %2038 = vmatpush1.bf16.msra.mxu1 %v2056_v1  ;;  %v2059_v4 = vld [vmem:[%s3297_s1 + $0x18] sm:$0xff]   ;;  %v2060_v5 = vld [vmem:[%s3297_s1 + $0x20] sm:$0xff]   ;;  %v2061_v7 = vld [vmem:[%s3297_s1 + $0x28] sm:$0xff]  }
   0x3   :  { %916 = vmatprep.subr.bf16.mxu0 %v2207_v0  ;;  %2023 = vmatprep.subr.bf16.mxu1 %v2207_v0  ;;  %v2074_v6 = vld [vmem:[%s3298_s0 + $0x4] ss:$12 sps:$4 sm:$0xff]   ;;  %v2063_v10 = vld [vmem:[%s3297_s1 + $0x38] sm:$0xff]   ;;  %v2065_v12 = vld [vmem:[%s3297_s1 + $0x48] sm:$0xff]  }
   0x4   :  { %v2077_v8 = vld [vmem:[%s3298_s0 + $0x244] ss:$12 sps:$4 sm:$0xff]   ;;  %946 = vmatprep.mubr.bf16.mxu0 %v2074_v6  ;;  %v2067_v14 = vld [vmem:[%s3297_s1 + $0x58] sm:$0xff]   ;;  %v2069_v16 = vld [vmem:[%s3297_s1 + $0x68] sm:$0xff]  }
   0x5   :  { %1138 = vmatprep.mubr.bf16.mxu1 %v2077_v8  ;;  %v2062_v9 = vld [vmem:[%s3297_s1 + $0x30] sm:$0xff]   ;;  %v2064_v11 = vld [vmem:[%s3297_s1 + $0x40] sm:$0xff]   ;;  %v2071_v18 = vld [vmem:[%s3297_s1 + $0x78] sm:$0xff]  }
   0x6   :  { %917 = vmatpush1.bf16.msra.mxu0 %v2057_v2  ;;  %2039 = vmatpush1.bf16.msra.mxu1 %v2057_v2  ;;  %v2066_v13 = vld [vmem:[%s3297_s1 + $0x50] sm:$0xff]   ;;  %v2068_v15 = vld [vmem:[%s3297_s1 + $0x60] sm:$0xff]   ;;  %v2079_v22 = vld [vmem:[%s3298_s0 + $0x1c] ss:$12 sps:$4 sm:$0xff]  }
   0x7   :  { %918 = vmatprep.subr.bf16.mxu0 %v2207_v0  ;;  %2024 = vmatprep.subr.bf16.mxu1 %v2207_v0  ;;  %v2070_v17 = vld [vmem:[%s3297_s1 + $0x70] sm:$0xff]   ;;  %v2078_v19 = vld [vmem:[%s3297_s1 + $0x80] sm:$0xff]   ;;  %v2081_v23 = vld [vmem:[%s3298_s0 + $0x25c] ss:$12 sps:$4 sm:$0xff]  }
   0x8   :  { %v2072_v20 = vld [vmem:[%s3298_s0] ss:$12 sps:$4 sm:$0xff]   ;;  %v2092_v25 = vld [vmem:[%s3297_s1 + $0x90] sm:$0xff]   ;;  %v2083_v26 = vld [vmem:[%s3298_s0 + $0x18] ss:$12 sps:$4 sm:$0xff]  }
   0x9   :  { %v2075_v21 = vld [vmem:[%s3298_s0 + $0x240] ss:$12 sps:$4 sm:$0xff]   ;;  %v2084_v27 = vld [vmem:[%s3298_s0 + $0x258] ss:$12 sps:$4 sm:$0xff]   ;;  %v2090_v31 = vld [vmem:[%s3298_s0 + $0x30] ss:$12 sps:$4 sm:$0xff]  }
   0xa   :  { %919 = vmatpush1.bf16.msra.mxu0 %v2058_v3  ;;  %2040 = vmatpush1.bf16.msra.mxu1 %v2058_v3  ;;  %v2085_v24 = vld [vmem:[%s3297_s1 + $0x88] sm:$0xff]   ;;  %v2086_v28 = vld [vmem:[%s3298_s0 + $0x34] ss:$12 sps:$4 sm:$0xff]   ;;  %v2099_v30 = vld [vmem:[%s3297_s1 + $0x98] sm:$0xff]  }
   0xb   :  { %920 = vmatprep.subr.bf16.mxu0 %v2207_v0  ;;  %2025 = vmatprep.subr.bf16.mxu1 %v2207_v0  ;;  %v2088_v29 = vld [vmem:[%s3298_s0 + $0x274] ss:$12 sps:$4 sm:$0xff]   ;;  %v2091_v32 = vld [vmem:[%s3298_s0 + $0x270] ss:$12 sps:$4 sm:$0xff]   ;;  %v2093_v34 = vld [vmem:[%s3298_s0 + $0x4c] ss:$12 sps:$4 sm:$0xff]  }
   0xc   :  { %v2106_v33 = vld [vmem:[%s3297_s1 + $0xa0] sm:$0xff]   ;;  %v2095_v35 = vld [vmem:[%s3298_s0 + $0x28c] ss:$12 sps:$4 sm:$0xff]   ;;  %v2124_v37 = vld [vmem:[%s3297_s1 + $0xb0] ss:$0 sps:$4 sm:$0xff]  }
   0xd   :  { %v2113_v36 = vld [vmem:[%s3297_s1 + $0xa8] sm:$0xff]   ;;  %v2100_v40 = vld [vmem:[%s3298_s0 + $0x64] ss:$12 sps:$4 sm:$0xff]   ;;  %v912_v42 = vsel %vm910_vm0, %v2124_v37, 0  ;;  %v2114_v49 = vld [vmem:[%s3298_s0 + $0x94] ss:$12 sps:$4 sm:$0xff]  }
   0xe   :  { %921 = vmatpush1.bf16.msra.mxu0 %v2059_v4  ;;  %2041 = vmatpush1.bf16.msra.mxu1 %v2059_v4  ;;  %v2097_v38 = vld [vmem:[%s3298_s0 + $0x48] ss:$12 sps:$4 sm:$0xff]   ;;  %v2102_v41 = vld [vmem:[%s3298_s0 + $0x2a4] ss:$12 sps:$4 sm:$0xff]   ;;  %v2104_v43 = vld [vmem:[%s3298_s0 + $0x60] ss:$12 sps:$4 sm:$0xff]  }
   0xf   :  { %922 = vmatprep.subr.bf16.mxu0 %v2207_v0  ;;  %2026 = vmatprep.subr.bf16.mxu1 %v2207_v0  ;;  %v2098_v39 = vld [vmem:[%s3298_s0 + $0x288] ss:$12 sps:$4 sm:$0xff]   ;;  %v2105_v44 = vld [vmem:[%s3298_s0 + $0x2a0] ss:$12 sps:$4 sm:$0xff]   ;;  %v2111_v47 = vld [vmem:[%s3298_s0 + $0x78] ss:$12 sps:$4 sm:$0xff]  }
  0x10   :  { %v2107_v45 = vld [vmem:[%s3298_s0 + $0x7c] ss:$12 sps:$4 sm:$0xff]   ;;  %v2112_v48 = vld [vmem:[%s3298_s0 + $0x2b8] ss:$12 sps:$4 sm:$0xff]   ;;  %v2116_v50 = vld [vmem:[%s3298_s0 + $0x2d4] ss:$12 sps:$4 sm:$0xff]  }
  0x11   :  { %v2109_v46 = vld [vmem:[%s3298_s0 + $0x2bc] ss:$12 sps:$4 sm:$0xff]   ;;  %v2120_v53 = vld [vmem:[%s3298_s0 + $0xac] ss:$12 sps:$4 sm:$0xff]   ;;  %v2127_v57 = vld [vmem:[%s3298_s0 + $0xc4] ss:$12 sps:$4 sm:$0xff]  }
  0x12   :  { %923 = vmatpush1.bf16.msra.mxu0 %v2060_v5  ;;  %2042 = vmatpush1.bf16.msra.mxu1 %v2060_v5  ;;  %v2118_v51 = vld [vmem:[%s3298_s0 + $0x90] ss:$12 sps:$4 sm:$0xff]   ;;  %v2122_v54 = vld [vmem:[%s3298_s0 + $0x2ec] ss:$12 sps:$4 sm:$0xff]   ;;  %v2125_v55 = vld [vmem:[%s3298_s0 + $0xa8] ss:$12 sps:$4 sm:$0xff]  }
  0x13   :  { %924 = vmatprep.subr.bf16.mxu0 %v2207_v0  ;;  %2027 = vmatprep.subr.bf16.mxu1 %v2207_v0  ;;  %v2119_v52 = vld [vmem:[%s3298_s0 + $0x2d0] ss:$12 sps:$4 sm:$0xff]   ;;  %v2126_v56 = vld [vmem:[%s3298_s0 + $0x2e8] ss:$12 sps:$4 sm:$0xff]   ;;  %v2130_v59 = vld [vmem:[%s3298_s0 + $0xc0] ss:$12 sps:$4 sm:$0xff]  }
  0x14   :  { %v2129_v58 = vld [vmem:[%s3298_s0 + $0x8] ss:$12 sps:$4 sm:$0xff]   ;;  %v2131_v60 = vld [vmem:[%s3298_s0 + $0x20] ss:$12 sps:$4 sm:$0xff]   ;;  %v2134_v62 = vld [vmem:[%s3298_s0 + $0x38] ss:$12 sps:$4 sm:$0xff]  }
  0x15   :  { %v2132_v61 = vld [vmem:[%s3298_s0 + $0xdc] ss:$12 sps:$4 sm:$0xff]   ;;  %v2135_v63 = vld [vmem:[%s3298_s0 + $0xd8] ss:$12 sps:$4 sm:$0xff]   ;;  %v2137_v1 = vld [vmem:[%s3298_s0 + $0xf4] ss:$12 sps:$4 sm:$0xff]  }
  0x16   :  { %925 = vmatpush1.bf16.msra.mxu0 %v2061_v7  ;;  %2043 = vmatpush1.bf16.msra.mxu1 %v2061_v7  ;;  %v2139_v2 = vld [vmem:[%s3298_s0 + $0x68] ss:$12 sps:$4 sm:$0xff]   ;;  %v2140_v3 = vld [vmem:[%s3298_s0 + $0xf0] ss:$12 sps:$4 sm:$0xff]   ;;  %v2141_v4 = vld [vmem:[%s3298_s0 + $0x80] ss:$12 sps:$4 sm:$0xff]  }
  0x17   :  { %926 = vmatprep.subr.bf16.mxu0 %v2207_v0  ;;  %2028 = vmatprep.subr.bf16.mxu1 %v2207_v0  ;;  %v2142_v5 = vld [vmem:[%s3298_s0 + $0x10c] ss:$12 sps:$4 sm:$0xff]   ;;  %v2145_v7 = vld [vmem:[%s3298_s0 + $0x108] ss:$12 sps:$4 sm:$0xff]   ;;  %v2146_v8 = vld [vmem:[%s3298_s0 + $0xb0] ss:$12 sps:$4 sm:$0xff]  }
  0x18   :  { %v2144_v6 = vld [vmem:[%s3298_s0 + $0x98] ss:$12 sps:$4 sm:$0xff]  }
  0x1a   :  { %927 = vmatpush1.bf16.msra.mxu0 %v2062_v9  ;;  %2044 = vmatpush1.bf16.msra.mxu1 %v2062_v9  ;;  %v2147_v9 = vld [vmem:[%s3298_s0 + $0x124] ss:$12 sps:$4 sm:$0xff]  }
  0x1b   :  { %928 = vmatprep.subr.bf16.mxu0 %v2207_v0  ;;  %2029 = vmatprep.subr.bf16.mxu1 %v2207_v0 }
  0x1e   :  { %929 = vmatpush1.bf16.msra.mxu0 %v2063_v10  ;;  %2045 = vmatpush1.bf16.msra.mxu1 %v2063_v10  ;;  %v2149_v10 = vld [vmem:[%s3298_s0 + $0xc8] ss:$12 sps:$4 sm:$0xff]  }
  0x1f   :  { %930 = vmatprep.subr.bf16.mxu0 %v2207_v0  ;;  %2030 = vmatprep.subr.bf16.mxu1 %v2207_v0 }
  0x22   :  { %931 = vmatpush1.bf16.msra.mxu0 %v2064_v11  ;;  %2046 = vmatpush1.bf16.msra.mxu1 %v2064_v11  ;;  %v2150_v11 = vld [vmem:[%s3298_s0 + $0x120] ss:$12 sps:$4 sm:$0xff]  }
  0x23   :  { %932 = vmatprep.subr.bf16.mxu0 %v2207_v0  ;;  %2031 = vmatprep.subr.bf16.mxu1 %v2207_v0 }
  0x26   :  { %933 = vmatpush1.bf16.msra.mxu0 %v2065_v12  ;;  %2047 = vmatpush1.bf16.msra.mxu1 %v2065_v12  ;;  %v2151_v12 = vld [vmem:[%s3298_s0 + $0xe0] ss:$12 sps:$4 sm:$0xff]  }
  0x27   :  { %934 = vmatprep.subr.bf16.mxu0 %v2207_v0  ;;  %2032 = vmatprep.subr.bf16.mxu1 %v2207_v0 }
  0x2a   :  { %935 = vmatpush1.bf16.msra.mxu0 %v2066_v13  ;;  %2048 = vmatpush1.bf16.msra.mxu1 %v2066_v13  ;;  %v2152_v13 = vld [vmem:[%s3298_s0 + $0x13c] ss:$12 sps:$4 sm:$0xff]  }
  0x2b   :  { %936 = vmatprep.subr.bf16.mxu0 %v2207_v0  ;;  %2033 = vmatprep.subr.bf16.mxu1 %v2207_v0 }
  0x2e   :  { %937 = vmatpush1.bf16.msra.mxu0 %v2067_v14  ;;  %2049 = vmatpush1.bf16.msra.mxu1 %v2067_v14  ;;  %v2154_v14 = vld [vmem:[%s3298_s0 + $0xf8] ss:$12 sps:$4 sm:$0xff]  }
  0x2f   :  { %938 = vmatprep.subr.bf16.mxu0 %v2207_v0  ;;  %2034 = vmatprep.subr.bf16.mxu1 %v2207_v0 }
  0x32   :  { %939 = vmatpush1.bf16.msra.mxu0 %v2068_v15  ;;  %2050 = vmatpush1.bf16.msra.mxu1 %v2068_v15  ;;  %v2155_v15 = vld [vmem:[%s3298_s0 + $0x138] ss:$12 sps:$4 sm:$0xff]  }
  0x33   :  { %940 = vmatprep.subr.bf16.mxu0 %v2207_v0  ;;  %2035 = vmatprep.subr.bf16.mxu1 %v2207_v0 }
  0x36   :  { %941 = vmatpush1.bf16.msra.mxu0 %v2069_v16  ;;  %2051 = vmatpush1.bf16.msra.mxu1 %v2069_v16  ;;  %v2156_v16 = vld [vmem:[%s3298_s0 + $0x110] ss:$12 sps:$4 sm:$0xff]  }
  0x37   :  { %942 = vmatprep.subr.bf16.mxu0 %v2207_v0  ;;  %2036 = vmatprep.subr.bf16.mxu1 %v2207_v0 }
  0x3a   :  { %943 = vmatpush1.bf16.msra.mxu0 %v2070_v17  ;;  %2052 = vmatpush1.bf16.msra.mxu1 %v2070_v17  ;;  %v2157_v17 = vld [vmem:[%s3298_s0 + $0x154] ss:$12 sps:$4 sm:$0xff]  }
  0x3b   :  { %944 = vmatprep.subr.bf16.mxu0 %v2207_v0  ;;  %2037 = vmatprep.subr.bf16.mxu1 %v2207_v0  ;;  %v2136_v0 = vld [vmem:[%s3298_s0 + $0x50] ss:$12 sps:$4 sm:$0xff]  }
  0x3e   :  { %945 = vmatpush1.bf16.msra.mxu0 %v2071_v18  ;;  %2053 = vmatpush1.bf16.msra.mxu1 %v2071_v18  ;;  %v2159_v18 = vld [vmem:[%s3298_s0 + $0x128] ss:$12 sps:$4 sm:$0xff]  }
  0x3f   :  { %1944 = vmatprep.subr.bf16.mxu1 %v2078_v19 }
  0x41   :  { %947 = vmatmul.mubr.bf16.vlgmr.msra.gmra.mrb[0].mxu0 %v2072_v20  ;;  %1139 = vmatmul.mubr.bf16.vlgmr.msra.gmra.mrb[0].mxu1 %v2075_v21  ;;  %v2161_v20 = vld [vmem:[%s3298_s0 + $0x140] ss:$12 sps:$4 sm:$0xff]  }
  0x42   :  { %1945 = vmatpush3.bf16.msra.mxu1 %v2078_v19  ;;  %954 = vmatprep.mubr.bf16.mxu0 %v2079_v22  ;;  %v2160_v19 = vld [vmem:[%s3298_s0 + $0x150] ss:$12 sps:$4 sm:$0xff]   ;;  %v2162_v21 = vld [vmem:[%s3298_s0 + $0x16c] ss:$12 sps:$4 sm:$0xff]  }
  0x43   :  { %1146 = vmatprep.mubr.bf16.mxu1 %v2081_v23  ;;  %1946 = vmatprep.subr.bf16.mxu1 %v2085_v24  ;;  %v2164_v22 = vld [vmem:[%s3298_s0 + $0x158] ss:$12 sps:$4 sm:$0xff]   ;;  %v2165_v23 = vld [vmem:[%s3298_s0 + $0x168] ss:$12 sps:$4 sm:$0xff]  }
  0x46   :  { %1947 = vmatpush3.bf16.msra.mxu1 %v2085_v24  ;;  %v2166_v24 = vld [vmem:[%s3298_s0 + $0x170] ss:$12 sps:$4 sm:$0xff]  }
  0x47   :  { %1948 = vmatprep.subr.bf16.mxu1 %v2092_v25 }
  0x49   :  { %955 = vmatmul.mubr.bf16.gmra.mrb[4].mxu0 %v2083_v26  ;;  %1147 = vmatmul.mubr.bf16.gmra.mrb[4].mxu1 %v2084_v27  ;;  %v2169_v26 = vld [vmem:[%s3298_s0 + $0x188] ss:$12 sps:$4 sm:$0xff]   ;;  %v2170_v27 = vld [vmem:[%s3298_s0 + $0x180] ss:$12 sps:$4 sm:$0xff]  }
  0x4a   :  { %962 = vmatprep.mubr.bf16.mxu0 %v2086_v28  ;;  %1154 = vmatprep.mubr.bf16.mxu1 %v2088_v29  ;;  %v2171_v28 = vld [vmem:[%s3298_s0 + $0x1a0] ss:$12 sps:$4 sm:$0xff]   ;;  %v2172_v29 = vld [vmem:[%s3298_s0 + $0x19c] ss:$12 sps:$4 sm:$0xff]  }
  0x4b   :  { %1949 = vmatpush3.bf16.msra.mxu1 %v2092_v25  ;;  %v2167_v25 = vld [vmem:[%s3298_s0 + $0x184] ss:$12 sps:$4 sm:$0xff]  }
  0x4c   :  { %1950 = vmatprep.subr.bf16.mxu1 %v2099_v30 }
  0x4f   :  { %1951 = vmatpush3.bf16.msra.mxu1 %v2099_v30  ;;  %v2174_v30 = vld [vmem:[%s3298_s0 + $0x1b8] ss:$12 sps:$4 sm:$0xff]  }
  0x50   :  { %1952 = vmatprep.subr.bf16.mxu1 %v2106_v33 }
  0x51   :  { %963 = vmatmul.mubr.bf16.gmra.mrb[8].mxu0 %v2090_v31  ;;  %1155 = vmatmul.mubr.bf16.gmra.mrb[8].mxu1 %v2091_v32  ;;  %v2175_v31 = vld [vmem:[%s3298_s0 + $0x198] ss:$12 sps:$4 sm:$0xff]   ;;  %v2176_v32 = vld [vmem:[%s3298_s0 + $0x1d0] ss:$12 sps:$4 sm:$0xff]  }
  0x52   :  { %970 = vmatprep.mubr.bf16.mxu0 %v2093_v34  ;;  %1162 = vmatprep.mubr.bf16.mxu1 %v2095_v35  ;;  %v2179_v34 = vld [vmem:[%s3298_s0 + $0x1e8] ss:$12 sps:$4 sm:$0xff]   ;;  %v2180_v35 = vld [vmem:[%s3298_s0 + $0x1b0] ss:$12 sps:$4 sm:$0xff]  }
  0x53   :  { %1953 = vmatpush3.bf16.msra.mxu1 %v2106_v33  ;;  %v2177_v33 = vld [vmem:[%s3298_s0 + $0x1b4] ss:$12 sps:$4 sm:$0xff]  }
  0x54   :  { %1954 = vmatprep.subr.bf16.mxu1 %v2113_v36 }
  0x57   :  { %1955 = vmatpush3.bf16.msra.mxu1 %v2113_v36  ;;  %v2181_v36 = vld [vmem:[%s3298_s0 + $0x200] ss:$12 sps:$4 sm:$0xff]  }
  0x58   :  { %2054 = vmatprep.subr.msk.bf16.mxu1 %vm910_vm0, %v2124_v37  ;;  %v2182_v37 = vld [vmem:[%s3298_s0 + $0x1cc] ss:$12 sps:$4 sm:$0xff]  }
  0x59   :  { %971 = vmatmul.mubr.bf16.gmra.mrb[12].mxu0 %v2097_v38  ;;  %1163 = vmatmul.mubr.bf16.gmra.mrb[12].mxu1 %v2098_v39  ;;  %v2184_v38 = vld [vmem:[%s3298_s0 + $0x218] ss:$12 sps:$4 sm:$0xff]   ;;  %v2185_v39 = vld [vmem:[%s3298_s0 + $0x1c8] ss:$12 sps:$4 sm:$0xff]  }
  0x5a   :  { %978 = vmatprep.mubr.bf16.mxu0 %v2100_v40  ;;  %1170 = vmatprep.mubr.bf16.mxu1 %v2102_v41  ;;  %v2186_v40 = vld [vmem:[%s3298_s0 + $0x230] ss:$12 sps:$4 sm:$0xff]  }
  0x5b   :  { %1957 = vmatpush3.bf16.msra.mxu1 %v912_v42  ;;  %v2187_v41 = vld [vmem:[%s3298_s0 + $0x1e4] ss:$12 sps:$4 sm:$0xff]   ;;  %v2189_v42 = vld [vmem:[%s3298_s0 + $0x248] ss:$12 sps:$4 sm:$0xff]  }
  0x61   :  { %979 = vmatmul.mubr.bf16.gmra.mrb[16].mxu0 %v2104_v43  ;;  %1171 = vmatmul.mubr.bf16.gmra.mrb[16].mxu1 %v2105_v44  ;;  %v2190_v43 = vld [vmem:[%s3298_s0 + $0x1e0] ss:$12 sps:$4 sm:$0xff]  }
  0x62   :  { %986 = vmatprep.mubr.bf16.mxu0 %v2107_v45  ;;  %1178 = vmatprep.mubr.bf16.mxu1 %v2109_v46  ;;  %v2191_v44 = vld [vmem:[%s3298_s0 + $0x260] ss:$12 sps:$4 sm:$0xff]   ;;  %v2192_v45 = vld [vmem:[%s3298_s0 + $0x1fc] ss:$12 sps:$4 sm:$0xff]   ;;  %v2194_v46 = vld [vmem:[%s3298_s0 + $0x278] ss:$12 sps:$4 sm:$0xff]  }
  0x69   :  { %987 = vmatmul.mubr.bf16.gmra.mrb[20].mxu0 %v2111_v47  ;;  %1179 = vmatmul.mubr.bf16.gmra.mrb[20].mxu1 %v2112_v48  ;;  %v2195_v47 = vld [vmem:[%s3298_s0 + $0x1f8] ss:$12 sps:$4 sm:$0xff]   ;;  %v2196_v48 = vld [vmem:[%s3298_s0 + $0x290] ss:$12 sps:$4 sm:$0xff]  }
  0x6a   :  { %994 = vmatprep.mubr.bf16.mxu0 %v2114_v49  ;;  %1186 = vmatprep.mubr.bf16.mxu1 %v2116_v50  ;;  %v2197_v49 = vld [vmem:[%s3298_s0 + $0x214] ss:$12 sps:$4 sm:$0xff]  }
  0x6b   :  { %v2199_v50 = vld [vmem:[%s3298_s0 + $0x2a8] ss:$12 sps:$4 sm:$0xff]  }
  0x71   :  { %995 = vmatmul.mubr.bf16.gmra.mrb[24].mxu0 %v2118_v51  ;;  %1187 = vmatmul.mubr.bf16.gmra.mrb[24].mxu1 %v2119_v52  ;;  %v2200_v51 = vld [vmem:[%s3298_s0 + $0x210] ss:$12 sps:$4 sm:$0xff]   ;;  %v2201_v52 = vld [vmem:[%s3298_s0 + $0x2c0] ss:$12 sps:$4 sm:$0xff]  }
  0x72   :  { %1002 = vmatprep.mubr.bf16.mxu0 %v2120_v53  ;;  %1194 = vmatprep.mubr.bf16.mxu1 %v2122_v54  ;;  %v2202_v53 = vld [vmem:[%s3298_s0 + $0x22c] ss:$12 sps:$4 sm:$0xff]  }
  0x73   :  { %v2204_v54 = vld [vmem:[%s3298_s0 + $0x2d8] ss:$12 sps:$4 sm:$0xff]  }
  0x79   :  { %1003 = vmatmul.mubr.bf16.gmra.mrb[28].mxu0 %v2125_v55  ;;  %1195 = vmatmul.mubr.bf16.gmra.mrb[28].mxu1 %v2126_v56  ;;  %v2205_v55 = vld [vmem:[%s3298_s0 + $0x228] ss:$12 sps:$4 sm:$0xff]   ;;  %v2206_v56 = vld [vmem:[%s3298_s0 + $0x2f0] ss:$12 sps:$4 sm:$0xff]  }
  0x7a   :  { %1010 = vmatprep.mubr.bf16.mxu0 %v2127_v57  ;;  %1958 = vmatprep.mubr.msk.bf16.mxu1 %vm813_vm1, %v2129_v58 }
  0x81   :  { %1011 = vmatmul.mubr.bf16.gmra.mrb[32].mxu0 %v2130_v59  ;;  %1959 = vmatmul.mubr.msk.bf16.vlgmr.msra.gmra.mrb[32].mxu1 %vm813_vm1, %v2131_v60 }
  0x82   :  { %1018 = vmatprep.mubr.bf16.mxu0 %v2132_v61  ;;  %1962 = vmatprep.mubr.msk.bf16.mxu1 %vm813_vm1, %v2134_v62 }
  0x89   :  { %1019 = vmatmul.mubr.bf16.gmra.mrb[36].mxu0 %v2135_v63  ;;  %1963 = vmatmul.mubr.msk.bf16.gmra.mrb[36].mxu1 %vm813_vm1, %v2136_v0 }
  0x8a   :  { %1026 = vmatprep.mubr.bf16.mxu0 %v2137_v1  ;;  %1966 = vmatprep.mubr.msk.bf16.mxu1 %vm813_vm1, %v2139_v2 }
  0x91   :  { %1027 = vmatmul.mubr.bf16.gmra.mrb[40].mxu0 %v2140_v3  ;;  %1967 = vmatmul.mubr.msk.bf16.gmra.mrb[40].mxu1 %vm813_vm1, %v2141_v4 }
  0x92   :  { %1034 = vmatprep.mubr.bf16.mxu0 %v2142_v5  ;;  %1970 = vmatprep.mubr.msk.bf16.mxu1 %vm813_vm1, %v2144_v6 }
  0x99   :  { %1035 = vmatmul.mubr.bf16.gmra.mrb[44].mxu0 %v2145_v7  ;;  %1971 = vmatmul.mubr.msk.bf16.gmra.mrb[44].mxu1 %vm813_vm1, %v2146_v8 }
  0x9a   :  { %1042 = vmatprep.mubr.bf16.mxu0 %v2147_v9  ;;  %1974 = vmatprep.mubr.msk.bf16.mxu1 %vm813_vm1, %v2149_v10 }
  0xa1   :  { %1043 = vmatmul.mubr.bf16.gmra.mrb[48].mxu0 %v2150_v11  ;;  %1975 = vmatmul.mubr.msk.bf16.gmra.mrb[48].mxu1 %vm813_vm1, %v2151_v12 }
  0xa2   :  { %1050 = vmatprep.mubr.bf16.mxu0 %v2152_v13  ;;  %1978 = vmatprep.mubr.msk.bf16.mxu1 %vm813_vm1, %v2154_v14 }
  0xa9   :  { %1051 = vmatmul.mubr.bf16.gmra.mrb[52].mxu0 %v2155_v15  ;;  %1979 = vmatmul.mubr.msk.bf16.gmra.mrb[52].mxu1 %vm813_vm1, %v2156_v16 }
  0xaa   :  { %1058 = vmatprep.mubr.bf16.mxu0 %v2157_v17  ;;  %1982 = vmatprep.mubr.msk.bf16.mxu1 %vm813_vm1, %v2159_v18 }
  0xb1   :  { %1059 = vmatmul.mubr.bf16.gmra.mrb[56].mxu0 %v2160_v19  ;;  %1983 = vmatmul.mubr.msk.bf16.gmra.mrb[56].mxu1 %vm813_vm1, %v2161_v20 }
  0xb2   :  { %1066 = vmatprep.mubr.bf16.mxu0 %v2162_v21  ;;  %1986 = vmatprep.mubr.msk.bf16.mxu1 %vm813_vm1, %v2164_v22 }
  0xb9   :  { %1067 = vmatmul.mubr.bf16.gmra.mrb[60].mxu0 %v2165_v23  ;;  %1987 = vmatmul.mubr.msk.bf16.gmra.mrb[60].mxu1 %vm813_vm1, %v2166_v24 }
  0xba   :  { %1074 = vmatprep.mubr.bf16.mxu0 %v2167_v25  ;;  %1990 = vmatprep.mubr.msk.bf16.mxu1 %vm813_vm1, %v2169_v26 }
  0xc1   :  { %1075 = vmatmul.mubr.bf16.gmra.mrb[64].mxu0 %v2170_v27  ;;  %1991 = vmatmul.mubr.msk.bf16.gmra.mrb[64].mxu1 %vm813_vm1, %v2171_v28 }
  0xc2   :  { %1082 = vmatprep.mubr.bf16.mxu0 %v2172_v29  ;;  %1994 = vmatprep.mubr.msk.bf16.mxu1 %vm813_vm1, %v2174_v30 }
  0xc9   :  { %1083 = vmatmul.mubr.bf16.gmra.mrb[68].mxu0 %v2175_v31  ;;  %1995 = vmatmul.mubr.msk.bf16.gmra.mrb[68].mxu1 %vm813_vm1, %v2176_v32 }
  0xca   :  { %1090 = vmatprep.mubr.bf16.mxu0 %v2177_v33  ;;  %1998 = vmatprep.mubr.msk.bf16.mxu1 %vm813_vm1, %v2179_v34 }
  0xd1   :  { %1091 = vmatmul.mubr.bf16.gmra.mrb[72].mxu0 %v2180_v35  ;;  %1999 = vmatmul.mubr.msk.bf16.gmra.mrb[72].mxu1 %vm813_vm1, %v2181_v36 }
  0xd2   :  { %1098 = vmatprep.mubr.bf16.mxu0 %v2182_v37  ;;  %2002 = vmatprep.mubr.msk.bf16.mxu1 %vm813_vm1, %v2184_v38 }
  0xd9   :  { %1099 = vmatmul.mubr.bf16.gmra.mrb[76].mxu0 %v2185_v39  ;;  %2003 = vmatmul.mubr.msk.bf16.gmra.mrb[76].mxu1 %vm813_vm1, %v2186_v40 }
  0xda   :  { %1106 = vmatprep.mubr.bf16.mxu0 %v2187_v41  ;;  %2006 = vmatprep.mubr.msk.bf16.mxu1 %vm813_vm1, %v2189_v42 }
  0xe1   :  { %1107 = vmatmul.mubr.bf16.gmra.mrb[80].mxu0 %v2190_v43  ;;  %2007 = vmatmul.mubr.msk.bf16.gmra.mrb[80].mxu1 %vm813_vm1, %v2191_v44 }
  0xe2   :  { %1114 = vmatprep.mubr.bf16.mxu0 %v2192_v45  ;;  %2010 = vmatprep.mubr.msk.bf16.mxu1 %vm813_vm1, %v2194_v46 }
  0xe9   :  { %1115 = vmatmul.mubr.bf16.gmra.mrb[84].mxu0 %v2195_v47  ;;  %2011 = vmatmul.mubr.msk.bf16.gmra.mrb[84].mxu1 %vm813_vm1, %v2196_v48 }
  0xea   :  { %1122 = vmatprep.mubr.bf16.mxu0 %v2197_v49  ;;  %2014 = vmatprep.mubr.msk.bf16.mxu1 %vm813_vm1, %v2199_v50 }
  0xf1   :  { %1123 = vmatmul.mubr.bf16.gmra.mrb[88].mxu0 %v2200_v51  ;;  %2015 = vmatmul.mubr.msk.bf16.gmra.mrb[88].mxu1 %vm813_vm1, %v2201_v52 }
  0xf2   :  { %1130 = vmatprep.mubr.bf16.mxu0 %v2202_v53  ;;  %2018 = vmatprep.mubr.msk.bf16.mxu1 %vm813_vm1, %v2204_v54 }
  0xf9   :  { %1131 = vmatmul.mubr.bf16.gmra.mrb[92].mxu0 %v2205_v55  ;;  %2019 = vmatmul.mubr.msk.bf16.gmra.mrb[92].mxu1 %vm813_vm1, %v2206_v56 }
 0x114   :  { %v2654_v57 = vpop.f32.mrb[0].mxu0  ;;  %v2656_v58 = vpop.f32.mrb[0].mxu1 }
 0x115   :  { %v950_v59 = vpop.f32.mrb[1].mxu0  ;;  %v1142_v60 = vpop.f32.mrb[1].mxu1 }
 0x116   :  { %v2658_v61 = vpop.f32.mrb[2].mxu0  ;;  %v2660_v62 = vpop.f32.mrb[2].mxu1  ;;  %v2717_v59 = vld [vmem:[%s3299_s2] ss:$0 sm:$0xff] }
 0x117   :  { %v953_v63 = vpop.f32.mrb[3].mxu0  ;;  %v1145_v0 = vpop.f32.mrb[3].mxu1 }
 0x118   :  { %v949_v63 = vadd.f32 %v2717_v59, %v2654_v57 }
 0x11c   :  { %v956_v1 = vpop.f32.mrb[4].mxu0  ;;  %v2662_v2 = vpop.f32.mrb[4].mxu1 }
 0x11d   :  { %v958_v3 = vpop.f32.mrb[5].mxu0  ;;  %v1150_v4 = vpop.f32.mrb[5].mxu1  ;;  %v957_v60 = vadd.f32 %v2717_v59, %v956_v1  ;;  %v952_v1 = vadd.f32 %v2717_v59, %v2658_v61 }
 0x11e   :  { %v959_v5 = vpop.f32.mrb[6].mxu0  ;;  %v2664_v6 = vpop.f32.mrb[6].mxu1  ;;  %v1494_v4 = vld [vmem:[%s3300_s3 + $0x10] sm:$0xff] }
 0x11f   :  { %v961_v7 = vpop.f32.mrb[7].mxu0  ;;  %v1153_v8 = vpop.f32.mrb[7].mxu1 }
 0x120   :  { %v960_v7 = vadd.f32 %v2717_v59, %v959_v5 }
 0x124   :  { %v2666_v9 = vpop.f32.mrb[8].mxu0  ;;  %v2668_v10 = vpop.f32.mrb[8].mxu1 }
 0x125   :  { %v966_v11 = vpop.f32.mrb[9].mxu0  ;;  %v1158_v12 = vpop.f32.mrb[9].mxu1 }
 0x126   :  { %v2670_v13 = vpop.f32.mrb[10].mxu0  ;;  %v2672_v14 = vpop.f32.mrb[10].mxu1 }
 0x127   :  { %v969_v15 = vpop.f32.mrb[11].mxu0  ;;  %v1161_v16 = vpop.f32.mrb[11].mxu1 }
 0x128   :  { %v1492_v15 = vld [vmem:[%s3300_s3] sm:$0xff] }
 0x12c   :  { %v2674_v17 = vpop.f32.mrb[12].mxu0  ;;  %v2676_v18 = vpop.f32.mrb[12].mxu1 }
 0x12d   :  { %v974_v19 = vpop.f32.mrb[13].mxu0  ;;  %v1166_v20 = vpop.f32.mrb[13].mxu1 }
 0x12e   :  { %v2678_v21 = vpop.f32.mrb[14].mxu0  ;;  %v2680_v22 = vpop.f32.mrb[14].mxu1  ;;  %v1495_v20 = vld [vmem:[%s3300_s3 + $0x18] sm:$0xff] }
 0x12f   :  { %v977_v23 = vpop.f32.mrb[15].mxu0  ;;  %v1169_v24 = vpop.f32.mrb[15].mxu1 }
 0x134   :  { %v2682_v25 = vpop.f32.mrb[16].mxu0  ;;  %v2684_v26 = vpop.f32.mrb[16].mxu1 }
 0x135   :  { %v982_v27 = vpop.f32.mrb[17].mxu0  ;;  %v1174_v28 = vpop.f32.mrb[17].mxu1 }
 0x136   :  { %v2686_v29 = vpop.f32.mrb[18].mxu0  ;;  %v2688_v30 = vpop.f32.mrb[18].mxu1  ;;  %v1493_v28 = vld [vmem:[%s3300_s3 + $0x8] sm:$0xff] }
 0x137   :  { %v985_v31 = vpop.f32.mrb[19].mxu0  ;;  %v1177_v32 = vpop.f32.mrb[19].mxu1 }
 0x13c   :  { %v2690_v33 = vpop.f32.mrb[20].mxu0  ;;  %v2692_v34 = vpop.f32.mrb[20].mxu1 }
 0x13d   :  { %v990_v35 = vpop.f32.mrb[21].mxu0  ;;  %v1182_v36 = vpop.f32.mrb[21].mxu1 }
 0x13e   :  { %v2694_v37 = vpop.f32.mrb[22].mxu0  ;;  %v2696_v38 = vpop.f32.mrb[22].mxu1 }
 0x13f   :  { %v993_v39 = vpop.f32.mrb[23].mxu0  ;;  %v1185_v40 = vpop.f32.mrb[23].mxu1 }
 0x140   :  { %v973_v40 = vadd.f32 %v2717_v59, %v2674_v17  ;;  %v1498_v17 = vld [vmem:[%s3300_s3 + $0x30] sm:$0xff] }
 0x144   :  { %v2698_v41 = vpop.f32.mrb[24].mxu0  ;;  %v2700_v42 = vpop.f32.mrb[24].mxu1 }
 0x145   :  { %v998_v43 = vpop.f32.mrb[25].mxu0  ;;  %v1190_v44 = vpop.f32.mrb[25].mxu1 }
 0x146   :  { %v2702_v45 = vpop.f32.mrb[26].mxu0  ;;  %v2704_v46 = vpop.f32.mrb[26].mxu1  ;;  %v965_v44 = vadd.f32 %v2717_v59, %v2666_v9 }
 0x147   :  { %v1001_v47 = vpop.f32.mrb[27].mxu0  ;;  %v1193_v48 = vpop.f32.mrb[27].mxu1 }
 0x14c   :  { %v2706_v49 = vpop.f32.mrb[28].mxu0  ;;  %v2708_v50 = vpop.f32.mrb[28].mxu1 }
 0x14d   :  { %v1006_v51 = vpop.f32.mrb[29].mxu0  ;;  %v1198_v52 = vpop.f32.mrb[29].mxu1 }
 0x14e   :  { %v2710_v53 = vpop.f32.mrb[30].mxu0  ;;  %v2712_v54 = vpop.f32.mrb[30].mxu1  ;;  %v976_v52 = vadd.f32 %v2717_v59, %v2678_v21 }
 0x14f   :  { %v1009_v55 = vpop.f32.mrb[31].mxu0  ;;  %v1201_v56 = vpop.f32.mrb[31].mxu1 }
 0x154   :  { %v2722_v0 = vpop.f32.mrb[32].mxu0  ;;  %v1960_v3 = vpop.f32.mrb[32].mxu1 }
 0x155   :  { %v1246_v8 = vadd.f32 %v1960_v3, %v957_v60  ;;  %v1014_v11 = vpop.f32.mrb[33].mxu0  ;;  %v1237_v12 = vpop.f32.mrb[33].mxu1  ;;  %v1496_v60 = vld [vmem:[%s3300_s3 + $0x20] sm:$0xff] }
 0x156   :  { %v1238_v57 = vadd.f32 %v1237_v12, %v949_v63  ;;  %v2733_v16 = vpop.f32.mrb[34].mxu0  ;;  %v1961_v19 = vpop.f32.mrb[34].mxu1  ;;  %v968_v63 = vadd.f32 %v2717_v59, %v2670_v13  ;;  %v1497_v13 = vld [vmem:[%s3300_s3 + $0x28] sm:$0xff] }
 0x157   :  { %v1558_v23 = vadd.f32 %v1494_v4, %v1246_v8  ;;  %v1249_v5 = vadd.f32 %v1961_v19, %v960_v7  ;;  %v1017_v24 = vpop.f32.mrb[35].mxu0  ;;  %v1240_v27 = vpop.f32.mrb[35].mxu1  ;;  %v1499_v7 = vld [vmem:[%s3300_s3 + $0x38] sm:$0xff] }
 0x158   :  { %v1556_v31 = vadd.f32 %v1492_v15, %v1238_v57  ;;  %v1241_v32 = vadd.f32 %v1240_v27, %v952_v1  ;;  %v989_v24 = vadd.f32 %v2717_v59, %v2690_v33  ;;  %v1502_v33 = vld [vmem:[%s3300_s3 + $0x50] sm:$0xff] }
 0x159   :  { %v1622_v61 = vmax.f32 %v1558_v23, 0.0  ;;  %v1559_v35 = vadd.f32 %v1495_v20, %v1249_v5 }
 0x15a   :  { %v1620_v36 = vmax.f32 %v1556_v31, 0.0  ;;  %v1557_v39 = vadd.f32 %v1493_v28, %v1241_v32  ;;  %v981_v28 = vadd.f32 %v2717_v59, %v2682_v25 }
 0x15b   :  { %1687 = vst.msk [vmem:[%s3301_s4 + $0x10] sm:$0xff] %vm1684_vm2, %v1622_v61  ;;  %v1623_v43 = vmax.f32 %v1559_v35, 0.0  ;;  %v992_v35 = vadd.f32 %v2717_v59, %v2694_v37 }
 0x15c   :  { %1685 = vst.msk [vmem:[%s3301_s4] sm:$0xff] %vm1684_vm2, %v1620_v36  ;;  %v1621_v47 = vmax.f32 %v1557_v39, 0.0  ;;  %v2753_v48 = vpop.f32.mrb[36].mxu0  ;;  %v1964_v51 = vpop.f32.mrb[36].mxu1 }
 0x15d   :  { %1688 = vst.msk [vmem:[%s3301_s4 + $0x18] sm:$0xff] %vm1684_vm2, %v1623_v43  ;;  %v1262_v9 = vadd.f32 %v1964_v51, %v973_v40  ;;  %v1022_v55 = vpop.f32.mrb[37].mxu0  ;;  %v1253_v56 = vpop.f32.mrb[37].mxu1  ;;  %v1500_v40 = vld [vmem:[%s3300_s3 + $0x40] sm:$0xff]  ;;  %v984_v43 = vadd.f32 %v2717_v59, %v2686_v29  ;;  %v1503_v51 = vld [vmem:[%s3300_s3 + $0x58] sm:$0xff]  ;;  %v1501_v29 = vld [vmem:[%s3300_s3 + $0x48] sm:$0xff] }
 0x15e   :  { %1686 = vst.msk [vmem:[%s3301_s4 + $0x8] sm:$0xff] %vm1684_vm2, %v1621_v47  ;;  %v1254_v21 = vadd.f32 %v1253_v56, %v965_v44  ;;  %v2773_v3 = vpop.f32.mrb[38].mxu0  ;;  %v1965_v4 = vpop.f32.mrb[38].mxu1 }
 0x15f   :  { %v1562_v8 = vadd.f32 %v1498_v17, %v1262_v9  ;;  %v1265_v11 = vadd.f32 %v1965_v4, %v976_v52  ;;  %v1025_v12 = vpop.f32.mrb[39].mxu0  ;;  %v1256_v15 = vpop.f32.mrb[39].mxu1 }
 0x160   :  { %v1560_v1 = vadd.f32 %v1496_v60, %v1254_v21  ;;  %v1257_v57 = vadd.f32 %v1256_v15, %v968_v63  ;;  %v997_v12 = vadd.f32 %v2717_v59, %v2698_v41 }
 0x161   :  { %v1626_v19 = vmax.f32 %v1562_v8, 0.0  ;;  %v1563_v20 = vadd.f32 %v1499_v7, %v1265_v11  ;;  %v1005_v8 = vadd.f32 %v2717_v59, %v2706_v49  ;;  %v1506_v49 = vld [vmem:[%s3300_s3 + $0x70] sm:$0xff] }
 0x162   :  { %v1624_v23 = vmax.f32 %v1560_v1, 0.0  ;;  %v1561_v5 = vadd.f32 %v1497_v13, %v1257_v57  ;;  %v1008_v57 = vadd.f32 %v2717_v59, %v2710_v53 }
 0x163   :  { %1691 = vst.msk [vmem:[%s3301_s4 + $0x30] sm:$0xff] %vm1684_vm2, %v1626_v19  ;;  %v1627_v27 = vmax.f32 %v1563_v20, 0.0 }
 0x164   :  { %1689 = vst.msk [vmem:[%s3301_s4 + $0x20] sm:$0xff] %vm1684_vm2, %v1624_v23  ;;  %v1625_v31 = vmax.f32 %v1561_v5, 0.0  ;;  %v2793_v32 = vpop.f32.mrb[40].mxu0  ;;  %v1968_v61 = vpop.f32.mrb[40].mxu1  ;;  %v1504_v23 = vld [vmem:[%s3300_s3 + $0x60] sm:$0xff]  ;;  %v1000_v5 = vadd.f32 %v2717_v59, %v2702_v45  ;;  %v1505_v45 = vld [vmem:[%s3300_s3 + $0x68] sm:$0xff] }
 0x165   :  { %1692 = vst.msk [vmem:[%s3301_s4 + $0x38] sm:$0xff] %vm1684_vm2, %v1627_v27  ;;  %v1278_v25 = vadd.f32 %v1968_v61, %v989_v24  ;;  %v1030_v36 = vpop.f32.mrb[41].mxu0  ;;  %v1269_v39 = vpop.f32.mrb[41].mxu1 }
 0x166   :  { %1690 = vst.msk [vmem:[%s3301_s4 + $0x28] sm:$0xff] %vm1684_vm2, %v1625_v31  ;;  %v1270_v37 = vadd.f32 %v1269_v39, %v981_v28  ;;  %v2813_v44 = vpop.f32.mrb[42].mxu0  ;;  %v1969_v47 = vpop.f32.mrb[42].mxu1  ;;  %v1507_v28 = vld [vmem:[%s3300_s3 + $0x78] sm:$0xff] }
 0x167   :  { %v1566_v17 = vadd.f32 %v1502_v33, %v1278_v25  ;;  %v1281_v52 = vadd.f32 %v1969_v47, %v992_v35  ;;  %v1033_v9 = vpop.f32.mrb[43].mxu0  ;;  %v1272_v55 = vpop.f32.mrb[43].mxu1  ;;  %v1021_v47 = vadd.f32 %v2717_v59, %v2753_v48  ;;  %v1510_v48 = vld [vmem:[%s3300_s3 + $0x90] sm:$0xff] }
 0x168   :  { %v1564_v56 = vadd.f32 %v1500_v40, %v1270_v37  ;;  %v1273_v60 = vadd.f32 %v1272_v55, %v984_v43 }
 0x169   :  { %v1630_v63 = vmax.f32 %v1566_v17, 0.0  ;;  %v1567_v21 = vadd.f32 %v1503_v51, %v1281_v52  ;;  %v1013_v17 = vadd.f32 %v2717_v59, %v2722_v0 }
 0x16a   :  { %v1628_v4 = vmax.f32 %v1564_v56, 0.0  ;;  %v1565_v7 = vadd.f32 %v1501_v29, %v1273_v60  ;;  %v1024_v29 = vadd.f32 %v2717_v59, %v2773_v3 }
 0x16b   :  { %1695 = vst.msk [vmem:[%s3301_s4 + $0x50] sm:$0xff] %vm1684_vm2, %v1630_v63  ;;  %v1631_v11 = vmax.f32 %v1567_v21, 0.0  ;;  %v1508_v63 = vld [vmem:[%s3300_s3 + $0x80] sm:$0xff]  ;;  %v1016_v21 = vadd.f32 %v2717_v59, %v2733_v16  ;;  %v1509_v16 = vld [vmem:[%s3300_s3 + $0x88] sm:$0xff] }
 0x16c   :  { %1693 = vst.msk [vmem:[%s3301_s4 + $0x40] sm:$0xff] %vm1684_vm2, %v1628_v4  ;;  %v1629_v15 = vmax.f32 %v1565_v7, 0.0  ;;  %v1036_v13 = vpop.f32.mrb[44].mxu0  ;;  %v1972_v1 = vpop.f32.mrb[44].mxu1 }
 0x16d   :  { %1696 = vst.msk [vmem:[%s3301_s4 + $0x58] sm:$0xff] %vm1684_vm2, %v1631_v11  ;;  %v1294_v41 = vadd.f32 %v1972_v1, %v1005_v8  ;;  %v1038_v19 = vpop.f32.mrb[45].mxu0  ;;  %v1285_v20 = vpop.f32.mrb[45].mxu1  ;;  %v1511_v8 = vld [vmem:[%s3300_s3 + $0x98] sm:$0xff] }
 0x16e   :  { %1694 = vst.msk [vmem:[%s3301_s4 + $0x48] sm:$0xff] %vm1684_vm2, %v1629_v15  ;;  %v1286_v53 = vadd.f32 %v1285_v20, %v997_v12  ;;  %v1039_v24 = vpop.f32.mrb[46].mxu0  ;;  %v1973_v27 = vpop.f32.mrb[46].mxu1 }
 0x16f   :  { %v1570_v31 = vadd.f32 %v1506_v49, %v1294_v41  ;;  %v1297_v61 = vadd.f32 %v1973_v27, %v1008_v57  ;;  %v1041_v33 = vpop.f32.mrb[47].mxu0  ;;  %v1288_v35 = vpop.f32.mrb[47].mxu1  ;;  %v1029_v27 = vadd.f32 %v2717_v59, %v2793_v32 }
 0x170   :  { %v1568_v25 = vadd.f32 %v1504_v23, %v1286_v53  ;;  %v1289_v36 = vadd.f32 %v1288_v35, %v1000_v5  ;;  %v1037_v5 = vadd.f32 %v2717_v59, %v1036_v13  ;;  %v1514_v13 = vld [vmem:[%s3300_s3 + $0xb0] sm:$0xff]  ;;  %v1040_v33 = vadd.f32 %v2717_v59, %v1039_v24 }
 0x171   :  { %v1634_v39 = vmax.f32 %v1570_v31, 0.0  ;;  %v1571_v40 = vadd.f32 %v1507_v28, %v1297_v61 }
 0x172   :  { %v1632_v43 = vmax.f32 %v1568_v25, 0.0  ;;  %v1569_v37 = vadd.f32 %v1505_v45, %v1289_v36  ;;  %v1512_v25 = vld [vmem:[%s3300_s3 + $0xa0] sm:$0xff]  ;;  %v1032_v36 = vadd.f32 %v2717_v59, %v2813_v44  ;;  %v1513_v44 = vld [vmem:[%s3300_s3 + $0xa8] sm:$0xff] }
 0x173   :  { %1699 = vst.msk [vmem:[%s3301_s4 + $0x70] sm:$0xff] %vm1684_vm2, %v1634_v39  ;;  %v1635_v51 = vmax.f32 %v1571_v40, 0.0 }
 0x174   :  { %1697 = vst.msk [vmem:[%s3301_s4 + $0x60] sm:$0xff] %vm1684_vm2, %v1632_v43  ;;  %v1633_v52 = vmax.f32 %v1569_v37, 0.0  ;;  %v1044_v9 = vpop.f32.mrb[48].mxu0  ;;  %v1976_v55 = vpop.f32.mrb[48].mxu1  ;;  %v1515_v43 = vld [vmem:[%s3300_s3 + $0xb8] sm:$0xff] }
 0x175   :  { %1700 = vst.msk [vmem:[%s3301_s4 + $0x78] sm:$0xff] %vm1684_vm2, %v1635_v51  ;;  %v1310_v0 = vadd.f32 %v1976_v55, %v1021_v47  ;;  %v1046_v56 = vpop.f32.mrb[49].mxu0  ;;  %v1301_v60 = vpop.f32.mrb[49].mxu1 }
 0x176   :  { %1698 = vst.msk [vmem:[%s3301_s4 + $0x68] sm:$0xff] %vm1684_vm2, %v1633_v52  ;;  %v1302_v3 = vadd.f32 %v1301_v60, %v1013_v17  ;;  %v1047_v4 = vpop.f32.mrb[50].mxu0  ;;  %v1977_v7 = vpop.f32.mrb[50].mxu1 }
 0x177   :  { %v1574_v11 = vadd.f32 %v1510_v48, %v1310_v0  ;;  %v1313_v12 = vadd.f32 %v1977_v7, %v1024_v29  ;;  %v1049_v15 = vpop.f32.mrb[51].mxu0  ;;  %v1304_v1 = vpop.f32.mrb[51].mxu1 }
 0x178   :  { %v1572_v49 = vadd.f32 %v1508_v63, %v1302_v3  ;;  %v1305_v57 = vadd.f32 %v1304_v1, %v1016_v21  ;;  %v1045_v21 = vadd.f32 %v2717_v59, %v1044_v9 }
 0x179   :  { %v1638_v41 = vmax.f32 %v1574_v11, 0.0  ;;  %v1575_v19 = vadd.f32 %v1511_v8, %v1313_v12  ;;  %v1518_v11 = vld [vmem:[%s3300_s3 + $0xd0] sm:$0xff] }
 0x17a   :  { %v1636_v20 = vmax.f32 %v1572_v49, 0.0  ;;  %v1573_v23 = vadd.f32 %v1509_v16, %v1305_v57  ;;  %v1516_v16 = vld [vmem:[%s3300_s3 + $0xc0] sm:$0xff]  ;;  %v1048_v49 = vadd.f32 %v2717_v59, %v1047_v4  ;;  %v1517_v4 = vld [vmem:[%s3300_s3 + $0xc8] sm:$0xff] }
 0x17b   :  { %1703 = vst.msk [vmem:[%s3301_s4 + $0x90] sm:$0xff] %vm1684_vm2, %v1638_v41  ;;  %v1639_v53 = vmax.f32 %v1575_v19, 0.0 }
 0x17c   :  { %1701 = vst.msk [vmem:[%s3301_s4 + $0x80] sm:$0xff] %vm1684_vm2, %v1636_v20  ;;  %v1637_v28 = vmax.f32 %v1573_v23, 0.0  ;;  %v1052_v31 = vpop.f32.mrb[52].mxu0  ;;  %v1980_v61 = vpop.f32.mrb[52].mxu1  ;;  %v1519_v20 = vld [vmem:[%s3300_s3 + $0xd8] sm:$0xff] }
 0x17d   :  { %1704 = vst.msk [vmem:[%s3301_s4 + $0x98] sm:$0xff] %vm1684_vm2, %v1639_v53  ;;  %v1326_v32 = vadd.f32 %v1980_v61, %v1037_v5  ;;  %v1054_v35 = vpop.f32.mrb[53].mxu0  ;;  %v1317_v45 = vpop.f32.mrb[53].mxu1  ;;  %v1053_v60 = vadd.f32 %v2717_v59, %v1052_v31 }
 0x17e   :  { %1702 = vst.msk [vmem:[%s3301_s4 + $0x88] sm:$0xff] %vm1684_vm2, %v1637_v28  ;;  %v1318_v24 = vadd.f32 %v1317_v45, %v1029_v27  ;;  %v1055_v39 = vpop.f32.mrb[54].mxu0  ;;  %v1981_v40 = vpop.f32.mrb[54].mxu1 }
 0x17f   :  { %v1578_v37 = vadd.f32 %v1514_v13, %v1326_v32  ;;  %v1329_v47 = vadd.f32 %v1981_v40, %v1040_v33  ;;  %v1057_v51 = vpop.f32.mrb[55].mxu0  ;;  %v1320_v17 = vpop.f32.mrb[55].mxu1  ;;  %v1056_v12 = vadd.f32 %v2717_v59, %v1055_v39 }
 0x180   :  { %v1576_v52 = vadd.f32 %v1512_v25, %v1318_v24  ;;  %v1321_v55 = vadd.f32 %v1320_v17, %v1032_v36  ;;  %v1522_v51 = vld [vmem:[%s3300_s3 + $0xf0] sm:$0xff] }
 0x181   :  { %v1642_v48 = vmax.f32 %v1578_v37, 0.0  ;;  %v1579_v29 = vadd.f32 %v1515_v43, %v1329_v47  ;;  %v1520_v37 = vld [vmem:[%s3300_s3 + $0xe0] sm:$0xff] }
 0x182   :  { %v1640_v0 = vmax.f32 %v1576_v52, 0.0  ;;  %v1577_v56 = vadd.f32 %v1513_v44, %v1321_v55 }
 0x183   :  { %1707 = vst.msk [vmem:[%s3301_s4 + $0xb0] sm:$0xff] %vm1684_vm2, %v1642_v48  ;;  %v1643_v63 = vmax.f32 %v1579_v29, 0.0 }
 0x184   :  { %1705 = vst.msk [vmem:[%s3301_s4 + $0xa0] sm:$0xff] %vm1684_vm2, %v1640_v0  ;;  %v1641_v3 = vmax.f32 %v1577_v56, 0.0  ;;  %v1060_v7 = vpop.f32.mrb[56].mxu0  ;;  %v1984_v8 = vpop.f32.mrb[56].mxu1  ;;  %v1521_v56 = vld [vmem:[%s3300_s3 + $0xe8] sm:$0xff] }
 0x185   :  { %1708 = vst.msk [vmem:[%s3301_s4 + $0xb8] sm:$0xff] %vm1684_vm2, %v1643_v63  ;;  %v1342_v9 = vadd.f32 %v1984_v8, %v1053_v60  ;;  %v1062_v15 = vpop.f32.mrb[57].mxu0  ;;  %v1333_v1 = vpop.f32.mrb[57].mxu1  ;;  %v1061_v45 = vadd.f32 %v2717_v59, %v1060_v7  ;;  %v1523_v63 = vld [vmem:[%s3300_s3 + $0xf8] sm:$0xff] }
 0x186   :  { %1706 = vst.msk [vmem:[%s3301_s4 + $0xa8] sm:$0xff] %vm1684_vm2, %v1641_v3  ;;  %v1334_v57 = vadd.f32 %v1333_v1, %v1045_v21  ;;  %v1063_v41 = vpop.f32.mrb[58].mxu0  ;;  %v1985_v19 = vpop.f32.mrb[58].mxu1 }
 0x187   :  { %v1582_v23 = vadd.f32 %v1518_v11, %v1342_v9  ;;  %v1345_v5 = vadd.f32 %v1985_v19, %v1056_v12  ;;  %v1065_v53 = vpop.f32.mrb[59].mxu0  ;;  %v1336_v27 = vpop.f32.mrb[59].mxu1  ;;  %v1064_v47 = vadd.f32 %v2717_v59, %v1063_v41 }
 0x188   :  { %v1580_v28 = vadd.f32 %v1516_v16, %v1334_v57  ;;  %v1337_v31 = vadd.f32 %v1336_v27, %v1048_v49 }
 0x189   :  { %v1646_v61 = vmax.f32 %v1582_v23, 0.0  ;;  %v1583_v13 = vadd.f32 %v1519_v20, %v1345_v5  ;;  %v1524_v20 = vld [vmem:[%s3300_s3 + $0x100] sm:$0xff] }
 0x18a   :  { %v1644_v33 = vmax.f32 %v1580_v28, 0.0  ;;  %v1581_v32 = vadd.f32 %v1517_v4, %v1337_v31  ;;  %v1525_v31 = vld [vmem:[%s3300_s3 + $0x108] sm:$0xff] }
 0x18b   :  { %1711 = vst.msk [vmem:[%s3301_s4 + $0xd0] sm:$0xff] %vm1684_vm2, %v1646_v61  ;;  %v1647_v35 = vmax.f32 %v1583_v13, 0.0 }
 0x18c   :  { %1709 = vst.msk [vmem:[%s3301_s4 + $0xc0] sm:$0xff] %vm1684_vm2, %v1644_v33  ;;  %v1645_v25 = vmax.f32 %v1581_v32, 0.0  ;;  %v1068_v36 = vpop.f32.mrb[60].mxu0  ;;  %v1988_v24 = vpop.f32.mrb[60].mxu1 }
 0x18d   :  { %1712 = vst.msk [vmem:[%s3301_s4 + $0xd8] sm:$0xff] %vm1684_vm2, %v1647_v35  ;;  %v1069_v39 = vadd.f32 %v2717_v59, %v1068_v36  ;;  %v1070_v40 = vpop.f32.mrb[61].mxu0  ;;  %v1349_v43 = vpop.f32.mrb[61].mxu1 }
 0x18e   :  { %1710 = vst.msk [vmem:[%s3301_s4 + $0xc8] sm:$0xff] %vm1684_vm2, %v1645_v25  ;;  %v1350_v17 = vadd.f32 %v1349_v43, %v1061_v45  ;;  %v1071_v44 = vpop.f32.mrb[62].mxu0  ;;  %v1989_v52 = vpop.f32.mrb[62].mxu1  ;;  %v1526_v40 = vld [vmem:[%s3300_s3 + $0x110] sm:$0xff] }
 0x18f   :  { %v1358_v55 = vadd.f32 %v1988_v24, %v1069_v39  ;;  %v1072_v48 = vadd.f32 %v2717_v59, %v1071_v44  ;;  %v1073_v29 = vpop.f32.mrb[63].mxu0  ;;  %v1352_v0 = vpop.f32.mrb[63].mxu1 }
 0x190   :  { %v1584_v60 = vadd.f32 %v1520_v37, %v1350_v17  ;;  %v1353_v21 = vadd.f32 %v1352_v0, %v1064_v47 }
 0x191   :  { %v1586_v3 = vadd.f32 %v1522_v51, %v1358_v55  ;;  %v1361_v7 = vadd.f32 %v1989_v52, %v1072_v48  ;;  %v1527_v52 = vld [vmem:[%s3300_s3 + $0x118] sm:$0xff] }
 0x192   :  { %v1648_v8 = vmax.f32 %v1584_v60, 0.0  ;;  %v1585_v11 = vadd.f32 %v1521_v56, %v1353_v21 }
 0x193   :  { %v1650_v12 = vmax.f32 %v1586_v3, 0.0  ;;  %v1587_v9 = vadd.f32 %v1523_v63, %v1361_v7 }
 0x194   :  { %1713 = vst.msk [vmem:[%s3301_s4 + $0xe0] sm:$0xff] %vm1684_vm2, %v1648_v8  ;;  %v1649_v15 = vmax.f32 %v1585_v11, 0.0  ;;  %v1076_v1 = vpop.f32.mrb[64].mxu0  ;;  %v1992_v16 = vpop.f32.mrb[64].mxu1  ;;  %v1528_v8 = vld [vmem:[%s3300_s3 + $0x120] sm:$0xff] }
 0x195   :  { %1715 = vst.msk [vmem:[%s3301_s4 + $0xf0] sm:$0xff] %vm1684_vm2, %v1650_v12  ;;  %v1651_v49 = vmax.f32 %v1587_v9, 0.0  ;;  %v1077_v57 = vadd.f32 %v2717_v59, %v1076_v1  ;;  %v1078_v41 = vpop.f32.mrb[65].mxu0  ;;  %v1365_v19 = vpop.f32.mrb[65].mxu1 }
 0x196   :  { %1714 = vst.msk [vmem:[%s3301_s4 + $0xe8] sm:$0xff] %vm1684_vm2, %v1649_v15  ;;  %v1079_v23 = vpop.f32.mrb[66].mxu0  ;;  %v1993_v5 = vpop.f32.mrb[66].mxu1 }
 0x197   :  { %1716 = vst.msk [vmem:[%s3301_s4 + $0xf8] sm:$0xff] %vm1684_vm2, %v1651_v49  ;;  %v1366_v53 = vadd.f32 %v1365_v19, %v1077_v57  ;;  %v1080_v27 = vadd.f32 %v2717_v59, %v1079_v23  ;;  %v1081_v4 = vpop.f32.mrb[67].mxu0  ;;  %v1368_v28 = vpop.f32.mrb[67].mxu1  ;;  %v1529_v49 = vld [vmem:[%s3300_s3 + $0x128] sm:$0xff] }
 0x199   :  { %v1588_v61 = vadd.f32 %v1524_v20, %v1366_v53  ;;  %v1369_v13 = vadd.f32 %v1368_v28, %v1080_v27 }
 0x19b   :  { %v1652_v33 = vmax.f32 %v1588_v61, 0.0  ;;  %v1589_v32 = vadd.f32 %v1525_v31, %v1369_v13  ;;  %v1530_v31 = vld [vmem:[%s3300_s3 + $0x130] sm:$0xff] }
 0x19c   :  { %v1084_v35 = vpop.f32.mrb[68].mxu0  ;;  %v1996_v45 = vpop.f32.mrb[68].mxu1 }
 0x19d   :  { %1717 = vst.msk [vmem:[%s3301_s4 + $0x100] sm:$0xff] %vm1684_vm2, %v1652_v33  ;;  %v1653_v25 = vmax.f32 %v1589_v32, 0.0  ;;  %v1085_v36 = vadd.f32 %v2717_v59, %v1084_v35  ;;  %v1086_v24 = vpop.f32.mrb[69].mxu0  ;;  %v1381_v39 = vpop.f32.mrb[69].mxu1 }
 0x19e   :  { %v1087_v43 = vpop.f32.mrb[70].mxu0  ;;  %v1997_v37 = vpop.f32.mrb[70].mxu1 }
 0x19f   :  { %1718 = vst.msk [vmem:[%s3301_s4 + $0x108] sm:$0xff] %vm1684_vm2, %v1653_v25  ;;  %v1374_v47 = vadd.f32 %v1992_v16, %v1085_v36  ;;  %v1088_v51 = vadd.f32 %v2717_v59, %v1087_v43  ;;  %v1089_v17 = vpop.f32.mrb[71].mxu0  ;;  %v1384_v44 = vpop.f32.mrb[71].mxu1  ;;  %v1531_v36 = vld [vmem:[%s3300_s3 + $0x138] sm:$0xff] }
 0x1a1   :  { %v1590_v55 = vadd.f32 %v1526_v40, %v1374_v47  ;;  %v1377_v48 = vadd.f32 %v1993_v5, %v1088_v51  ;;  %v1149_v40 = vadd.f32 %v2717_v59, %v2662_v2  ;;  %v1141_v51 = vadd.f32 %v2717_v59, %v2656_v58 }
 0x1a3   :  { %v1654_v29 = vmax.f32 %v1590_v55, 0.0  ;;  %v1591_v0 = vadd.f32 %v1527_v52, %v1377_v48  ;;  %v1152_v52 = vadd.f32 %v2717_v59, %v2664_v6  ;;  %v1532_v6 = vld [vmem:[%s3300_s3 + $0x140] sm:$0xff] }
 0x1a4   :  { %v1092_v56 = vpop.f32.mrb[72].mxu0  ;;  %v3031_v60 = vpop.f32.mrb[72].mxu1 }
 0x1a5   :  { %1719 = vst.msk [vmem:[%s3301_s4 + $0x110] sm:$0xff] %vm1684_vm2, %v1654_v29  ;;  %v1655_v63 = vmax.f32 %v1591_v0, 0.0  ;;  %v1093_v21 = vadd.f32 %v2717_v59, %v1092_v56  ;;  %v1094_v3 = vpop.f32.mrb[73].mxu0  ;;  %v1397_v7 = vpop.f32.mrb[73].mxu1  ;;  %v1540_v29 = vld [vmem:[%s3300_s3 + $0x180] sm:$0xff]  ;;  %v1144_v0 = vadd.f32 %v2717_v59, %v2660_v62 }
 0x1a6   :  { %v1095_v11 = vpop.f32.mrb[74].mxu0  ;;  %v3041_v12 = vpop.f32.mrb[74].mxu1  ;;  %v1543_v3 = vld [vmem:[%s3300_s3 + $0x198] sm:$0xff] }
 0x1a7   :  { %1720 = vst.msk [vmem:[%s3301_s4 + $0x118] sm:$0xff] %vm1684_vm2, %v1655_v63  ;;  %v1382_v9 = vadd.f32 %v1381_v39, %v1093_v21  ;;  %v1096_v15 = vadd.f32 %v2717_v59, %v1095_v11  ;;  %v1097_v1 = vpop.f32.mrb[75].mxu0  ;;  %v1400_v16 = vpop.f32.mrb[75].mxu1 }
 0x1a9   :  { %v1592_v57 = vadd.f32 %v1528_v8, %v1382_v9  ;;  %v1385_v41 = vadd.f32 %v1384_v44, %v1096_v15  ;;  %v1542_v44 = vld [vmem:[%s3300_s3 + $0x190] sm:$0xff] }
 0x1ab   :  { %v1656_v19 = vmax.f32 %v1592_v57, 0.0  ;;  %v1593_v20 = vadd.f32 %v1529_v49, %v1385_v41  ;;  %v1541_v49 = vld [vmem:[%s3300_s3 + $0x188] sm:$0xff] }
 0x1ac   :  { %v1100_v23 = vpop.f32.mrb[76].mxu0  ;;  %v3051_v5 = vpop.f32.mrb[76].mxu1  ;;  %v1533_v41 = vld [vmem:[%s3300_s3 + $0x148] sm:$0xff] }
 0x1ad   :  { %1721 = vst.msk [vmem:[%s3301_s4 + $0x120] sm:$0xff] %vm1684_vm2, %v1656_v19  ;;  %v1657_v53 = vmax.f32 %v1593_v20, 0.0  ;;  %v1101_v27 = vadd.f32 %v2717_v59, %v1100_v23  ;;  %v1102_v4 = vpop.f32.mrb[77].mxu0  ;;  %v3058_v28 = vpop.f32.mrb[77].mxu1 }
 0x1ae   :  { %v1103_v61 = vpop.f32.mrb[78].mxu0  ;;  %v3063_v13 = vpop.f32.mrb[78].mxu1 }
 0x1af   :  { %1722 = vst.msk [vmem:[%s3301_s4 + $0x128] sm:$0xff] %vm1684_vm2, %v1657_v53  ;;  %v1390_v33 = vadd.f32 %v1996_v45, %v1101_v27  ;;  %v1104_v32 = vadd.f32 %v2717_v59, %v1103_v61  ;;  %v1105_v35 = vpop.f32.mrb[79].mxu0  ;;  %v3070_v25 = vpop.f32.mrb[79].mxu1 }
 0x1b0   :  { %v1157_v35 = vadd.f32 %v2717_v59, %v2668_v10 }
 0x1b1   :  { %v1594_v24 = vadd.f32 %v1530_v31, %v1390_v33  ;;  %v1393_v39 = vadd.f32 %v1997_v37, %v1104_v32  ;;  %v1165_v31 = vadd.f32 %v2717_v59, %v2676_v18  ;;  %v1546_v18 = vld [vmem:[%s3300_s3 + $0x1b0] sm:$0xff] }
 0x1b3   :  { %v1658_v43 = vmax.f32 %v1594_v24, 0.0  ;;  %v1595_v47 = vadd.f32 %v1531_v36, %v1393_v39  ;;  %v1168_v39 = vadd.f32 %v2717_v59, %v2680_v22  ;;  %v1544_v22 = vld [vmem:[%s3300_s3 + $0x1a0] sm:$0xff] }
 0x1b4   :  { %v1108_v45 = vpop.f32.mrb[80].mxu0  ;;  %v2008_v17 = vpop.f32.mrb[80].mxu1 }
 0x1b5   :  { %1723 = vst.msk [vmem:[%s3301_s4 + $0x130] sm:$0xff] %vm1684_vm2, %v1658_v43  ;;  %v1659_v2 = vmax.f32 %v1595_v47, 0.0  ;;  %v1109_v37 = vadd.f32 %v2717_v59, %v1108_v45  ;;  %v1438_v55 = vadd.f32 %v2008_v17, %v1149_v40  ;;  %v1110_v48 = vpop.f32.mrb[81].mxu0  ;;  %v1429_v58 = vpop.f32.mrb[81].mxu1  ;;  %v1160_v45 = vadd.f32 %v2717_v59, %v2672_v14  ;;  %v1534_v17 = vld [vmem:[%s3300_s3 + $0x150] sm:$0xff] }
 0x1b6   :  { %v1430_v56 = vadd.f32 %v1429_v58, %v1141_v51  ;;  %v1111_v63 = vpop.f32.mrb[82].mxu0  ;;  %v2009_v21 = vpop.f32.mrb[82].mxu1 }
 0x1b7   :  { %1724 = vst.msk [vmem:[%s3301_s4 + $0x138] sm:$0xff] %vm1684_vm2, %v1659_v2  ;;  %v1398_v8 = vadd.f32 %v1397_v7, %v1109_v37  ;;  %v1606_v11 = vadd.f32 %v1542_v44, %v1438_v55  ;;  %v1112_v62 = vadd.f32 %v2717_v59, %v1111_v63  ;;  %v1441_v9 = vadd.f32 %v2009_v21, %v1152_v52  ;;  %v1113_v15 = vpop.f32.mrb[83].mxu0  ;;  %v1432_v1 = vpop.f32.mrb[83].mxu1  ;;  %v1547_v37 = vld [vmem:[%s3300_s3 + $0x1b8] sm:$0xff] }
 0x1b8   :  { %v1604_v57 = vadd.f32 %v1540_v29, %v1430_v56  ;;  %v1433_v19 = vadd.f32 %v1432_v1, %v1144_v0  ;;  %v1535_v63 = vld [vmem:[%s3300_s3 + $0x158] sm:$0xff]  ;;  %v1181_v15 = vadd.f32 %v2717_v59, %v2692_v34  ;;  %v1550_v34 = vld [vmem:[%s3300_s3 + $0x1d0] sm:$0xff] }
 0x1b9   :  { %v1596_v20 = vadd.f32 %v1532_v6, %v1398_v8  ;;  %v1670_v23 = vmax.f32 %v1606_v11, 0.0  ;;  %v1401_v53 = vadd.f32 %v1400_v16, %v1112_v62  ;;  %v1607_v7 = vadd.f32 %v1543_v3, %v1441_v9  ;;  %v1545_v6 = vld [vmem:[%s3300_s3 + $0x1a8] sm:$0xff] }
 0x1ba   :  { %v1668_v27 = vmax.f32 %v1604_v57, 0.0  ;;  %v1605_v4 = vadd.f32 %v1541_v49, %v1433_v19 }
 0x1bb   :  { %v1660_v61 = vmax.f32 %v1596_v20, 0.0  ;;  %1735 = vst.msk [vmem:[%s3301_s4 + $0x190] sm:$0xff] %vm1684_vm2, %v1670_v23  ;;  %v1597_v33 = vadd.f32 %v1533_v41, %v1401_v53  ;;  %v1671_v32 = vmax.f32 %v1607_v7, 0.0  ;;  %v1173_v41 = vadd.f32 %v2717_v59, %v2684_v26 }
 0x1bc   :  { %1733 = vst.msk [vmem:[%s3301_s4 + $0x180] sm:$0xff] %vm1684_vm2, %v1668_v27  ;;  %v1669_v16 = vmax.f32 %v1605_v4, 0.0  ;;  %v1116_v36 = vpop.f32.mrb[84].mxu0  ;;  %v2012_v24 = vpop.f32.mrb[84].mxu1  ;;  %v1184_v23 = vadd.f32 %v2717_v59, %v2696_v38  ;;  %v1548_v38 = vld [vmem:[%s3300_s3 + $0x1c0] sm:$0xff] }
 0x1bd   :  { %1725 = vst.msk [vmem:[%s3301_s4 + $0x140] sm:$0xff] %vm1684_vm2, %v1660_v61  ;;  %v1661_v10 = vmax.f32 %v1597_v33, 0.0  ;;  %1736 = vst.msk [vmem:[%s3301_s4 + $0x198] sm:$0xff] %vm1684_vm2, %v1671_v32  ;;  %v1117_v40 = vadd.f32 %v2717_v59, %v1116_v36  ;;  %v1454_v43 = vadd.f32 %v2012_v24, %v1165_v31  ;;  %v1118_v47 = vpop.f32.mrb[85].mxu0  ;;  %v1445_v51 = vpop.f32.mrb[85].mxu1  ;;  %v1176_v31 = vadd.f32 %v2717_v59, %v2688_v30  ;;  %v1536_v61 = vld [vmem:[%s3300_s3 + $0x160] sm:$0xff] }
 0x1be   :  { %1734 = vst.msk [vmem:[%s3301_s4 + $0x188] sm:$0xff] %vm1684_vm2, %v1669_v16  ;;  %v1446_v44 = vadd.f32 %v1445_v51, %v1157_v35  ;;  %v1119_v52 = vpop.f32.mrb[86].mxu0  ;;  %v2013_v2 = vpop.f32.mrb[86].mxu1  ;;  %v1551_v16 = vld [vmem:[%s3300_s3 + $0x1d8] sm:$0xff]  ;;  %v1537_v47 = vld [vmem:[%s3300_s3 + $0x168] sm:$0xff] }
 0x1bf   :  { %1726 = vst.msk [vmem:[%s3301_s4 + $0x148] sm:$0xff] %vm1684_vm2, %v1661_v10  ;;  %v1406_v14 = vadd.f32 %v3031_v60, %v1117_v40  ;;  %v1610_v55 = vadd.f32 %v1546_v18, %v1454_v43  ;;  %v1120_v48 = vadd.f32 %v2717_v59, %v1119_v52  ;;  %v1457_v58 = vadd.f32 %v2013_v2, %v1168_v39  ;;  %v1121_v29 = vpop.f32.mrb[87].mxu0  ;;  %v1448_v0 = vpop.f32.mrb[87].mxu1  ;;  %v1549_v40 = vld [vmem:[%s3300_s3 + $0x1c8] sm:$0xff] }
 0x1c0   :  { %v1608_v56 = vadd.f32 %v1544_v22, %v1446_v44  ;;  %v1449_v21 = vadd.f32 %v1448_v0, %v1160_v45  ;;  %v1197_v2 = vadd.f32 %v2717_v59, %v2708_v50  ;;  %v1554_v50 = vld [vmem:[%s3300_s3 + $0x1f0] sm:$0xff]  ;;  %v1200_v0 = vadd.f32 %v2717_v59, %v2712_v54  ;;  %v1552_v54 = vld [vmem:[%s3300_s3 + $0x1e0] sm:$0xff] }
 0x1c1   :  { %v1598_v3 = vadd.f32 %v1534_v17, %v1406_v14  ;;  %v1674_v8 = vmax.f32 %v1610_v55, 0.0  ;;  %v1409_v60 = vadd.f32 %v3041_v12, %v1120_v48  ;;  %v1611_v11 = vadd.f32 %v1547_v37, %v1457_v58 }
 0x1c2   :  { %v1672_v62 = vmax.f32 %v1608_v56, 0.0  ;;  %v1609_v9 = vadd.f32 %v1545_v6, %v1449_v21  ;;  %v1189_v48 = vadd.f32 %v2717_v59, %v2700_v42 }
 0x1c3   :  { %v1662_v1 = vmax.f32 %v1598_v3, 0.0  ;;  %1739 = vst.msk [vmem:[%s3301_s4 + $0x1b0] sm:$0xff] %vm1684_vm2, %v1674_v8  ;;  %v1599_v49 = vadd.f32 %v1535_v63, %v1409_v60  ;;  %v1675_v57 = vmax.f32 %v1611_v11, 0.0  ;;  %v1192_v3 = vadd.f32 %v2717_v59, %v2704_v46  ;;  %v1538_v8 = vld [vmem:[%s3300_s3 + $0x170] sm:$0xff] }
 0x1c4   :  { %1737 = vst.msk [vmem:[%s3301_s4 + $0x1a0] sm:$0xff] %vm1684_vm2, %v1672_v62  ;;  %v1673_v12 = vmax.f32 %v1609_v9, 0.0  ;;  %v1124_v19 = vpop.f32.mrb[88].mxu0  ;;  %v2016_v20 = vpop.f32.mrb[88].mxu1  ;;  %v1555_v9 = vld [vmem:[%s3300_s3 + $0x1f8] sm:$0xff] }
 0x1c5   :  { %1727 = vst.msk [vmem:[%s3301_s4 + $0x150] sm:$0xff] %vm1684_vm2, %v1662_v1  ;;  %v1663_v26 = vmax.f32 %v1599_v49, 0.0  ;;  %1740 = vst.msk [vmem:[%s3301_s4 + $0x1b8] sm:$0xff] %vm1684_vm2, %v1675_v57  ;;  %v1125_v53 = vadd.f32 %v2717_v59, %v1124_v19  ;;  %v1470_v7 = vadd.f32 %v2016_v20, %v1181_v15  ;;  %v1126_v27 = vpop.f32.mrb[89].mxu0  ;;  %v1461_v4 = vpop.f32.mrb[89].mxu1  ;;  %v1539_v20 = vld [vmem:[%s3300_s3 + $0x178] sm:$0xff] }
 0x1c6   :  { %1738 = vst.msk [vmem:[%s3301_s4 + $0x1a8] sm:$0xff] %vm1684_vm2, %v1673_v12  ;;  %v1462_v33 = vadd.f32 %v1461_v4, %v1173_v41  ;;  %v1127_v32 = vpop.f32.mrb[90].mxu0  ;;  %v2017_v35 = vpop.f32.mrb[90].mxu1  ;;  %v1553_v12 = vld [vmem:[%s3300_s3 + $0x1e8] sm:$0xff] }
 0x1c7   :  { %1728 = vst.msk [vmem:[%s3301_s4 + $0x158] sm:$0xff] %vm1684_vm2, %v1663_v26  ;;  %v1414_v30 = vadd.f32 %v3058_v28, %v1125_v53  ;;  %v1614_v36 = vadd.f32 %v1550_v34, %v1470_v7  ;;  %v1128_v24 = vadd.f32 %v2717_v59, %v1127_v32  ;;  %v1473_v18 = vadd.f32 %v2017_v35, %v1184_v23  ;;  %v1129_v39 = vpop.f32.mrb[91].mxu0  ;;  %v1464_v10 = vpop.f32.mrb[91].mxu1 }
 0x1c8   :  { %v1612_v43 = vadd.f32 %v1548_v38, %v1462_v33  ;;  %v1465_v51 = vadd.f32 %v1464_v10, %v1176_v31 }
 0x1c9   :  { %v1600_v22 = vadd.f32 %v1536_v61, %v1414_v30  ;;  %v1678_v45 = vmax.f32 %v1614_v36, 0.0  ;;  %v1417_v28 = vadd.f32 %v3070_v25, %v1128_v24  ;;  %v1615_v17 = vadd.f32 %v1551_v16, %v1473_v18 }
 0x1ca   :  { %v1676_v44 = vmax.f32 %v1612_v43, 0.0  ;;  %v1613_v52 = vadd.f32 %v1549_v40, %v1465_v51 }
 0x1cb   :  { %v1664_v37 = vmax.f32 %v1600_v22, 0.0  ;;  %1743 = vst.msk [vmem:[%s3301_s4 + $0x1d0] sm:$0xff] %vm1684_vm2, %v1678_v45  ;;  %v1601_v14 = vadd.f32 %v1537_v47, %v1417_v28  ;;  %v1679_v55 = vmax.f32 %v1615_v17, 0.0 }
 0x1cc   :  { %1741 = vst.msk [vmem:[%s3301_s4 + $0x1c0] sm:$0xff] %vm1684_vm2, %v1676_v44  ;;  %v1677_v25 = vmax.f32 %v1613_v52, 0.0  ;;  %v1132_v58 = vpop.f32.mrb[92].mxu0  ;;  %v2020_v29 = vpop.f32.mrb[92].mxu1 }
 0x1cd   :  { %1729 = vst.msk [vmem:[%s3301_s4 + $0x160] sm:$0xff] %vm1684_vm2, %v1664_v37  ;;  %v1665_v42 = vmax.f32 %v1601_v14, 0.0  ;;  %1744 = vst.msk [vmem:[%s3301_s4 + $0x1d8] sm:$0xff] %vm1684_vm2, %v1679_v55  ;;  %v1133_v6 = vadd.f32 %v2717_v59, %v1132_v58  ;;  %v1486_v56 = vadd.f32 %v2020_v29, %v1197_v2  ;;  %v1134_v63 = vpop.f32.mrb[93].mxu0  ;;  %v1477_v21 = vpop.f32.mrb[93].mxu1 }
 0x1ce   :  { %1742 = vst.msk [vmem:[%s3301_s4 + $0x1c8] sm:$0xff] %vm1684_vm2, %v1677_v25  ;;  %v1478_v60 = vadd.f32 %v1477_v21, %v1189_v48  ;;  %v1135_v11 = vpop.f32.mrb[94].mxu0  ;;  %v2021_v62 = vpop.f32.mrb[94].mxu1 }
 0x1cf   :  { %1730 = vst.msk [vmem:[%s3301_s4 + $0x168] sm:$0xff] %vm1684_vm2, %v1665_v42  ;;  %v1422_v46 = vadd.f32 %v3051_v5, %v1133_v6  ;;  %v1618_v15 = vadd.f32 %v1554_v50, %v1486_v56  ;;  %v1136_v1 = vadd.f32 %v2717_v59, %v1135_v11  ;;  %v1489_v49 = vadd.f32 %v2021_v62, %v1200_v0  ;;  %v1137_v57 = vpop.f32.mrb[95].mxu0  ;;  %v1480_v41 = vpop.f32.mrb[95].mxu1 }
 0x1d0   :  { %v1616_v19 = vadd.f32 %v1552_v54, %v1478_v60  ;;  %v1481_v34 = vadd.f32 %v1480_v41, %v1192_v3 }
 0x1d1   :  { %v1602_v23 = vadd.f32 %v1538_v8, %v1422_v46  ;;  %v1682_v26 = vmax.f32 %v1618_v15, 0.0  ;;  %v1425_v5 = vadd.f32 %v3063_v13, %v1136_v1  ;;  %v1619_v53 = vadd.f32 %v1555_v9, %v1489_v49 }
 0x1d2   :  { %v1680_v7 = vmax.f32 %v1616_v19, 0.0  ;;  %v1617_v59 = vadd.f32 %v1553_v12, %v1481_v34 }
 0x1d3   :  { %v1666_v27 = vmax.f32 %v1602_v23, 0.0  ;;  %1747 = vst.msk [vmem:[%s3301_s4 + $0x1f0] sm:$0xff] %vm1684_vm2, %v1682_v26  ;;  %v1603_v4 = vadd.f32 %v1539_v20, %v1425_v5  ;;  %v1683_v38 = vmax.f32 %v1619_v53, 0.0 }
 0x1d4   :  { %1745 = vst.msk [vmem:[%s3301_s4 + $0x1e0] sm:$0xff] %vm1684_vm2, %v1680_v7  ;;  %v1681_v31 = vmax.f32 %v1617_v59, 0.0 }
 0x1d5   :  { %1731 = vst.msk [vmem:[%s3301_s4 + $0x170] sm:$0xff] %vm1684_vm2, %v1666_v27  ;;  %v1667_v13 = vmax.f32 %v1603_v4, 0.0  ;;  %1748 = vst.msk [vmem:[%s3301_s4 + $0x1f8] sm:$0xff] %vm1684_vm2, %v1683_v38 }
 0x1d6   :  { %1746 = vst.msk [vmem:[%s3301_s4 + $0x1e8] sm:$0xff] %vm1684_vm2, %v1681_v31 }
 0x1d7   :  { %1732 = vst.msk [vmem:[%s3301_s4 + $0x178] sm:$0xff] %vm1684_vm2, %v1667_v13 }

</bundles_post_ra>
